<compile_context>
chip_gen: v6e
topology: v6e:2x2x1
jax: 0.10.0
libtpu: 0.0.40
codegen_flags: <defaults>
</compile_context>

<pallas_src>
import functools

import jax
import jax.numpy as jnp
import numpy as np
from jax import lax
from jax.experimental import pallas as pl
from jax.experimental.pallas import tpu as pltpu


VMEM_LIMIT = 32 * 1024 * 1024


def _round_up(x, m):
    return (x + m - 1) // m * m


# ----------------------------------------------------------------------------
# Kernel 1: fused conv stack (conv1 8x8/4 -> conv2 4x4/2 -> conv3 3x3/1, ReLU).
# One image per grid step; patches are built in VMEM, never in HBM.
# ----------------------------------------------------------------------------
def _conv_stack_kernel(x_ref, w1_ref, b1_ref, w2_ref, b2_ref, w3_ref, b3_ref,
                       o_ref):
    # x: space-to-depth-8 image, (11, 11, 256) bf16,
    # channel order (qh, qw, dh4, dw4, c): h = 8p + 4qh + dh4, w = 8r + 4qw + dw4
    x = x_ref[0]

    # ---- conv1 (8x8 stride 4) == 2x2 stride-1 conv over the s2d-4 view.
    # Output is produced directly in space-to-depth-2 layout (10,10,128) so
    # conv2 only needs contiguous slices.
    y1_blocks = []
    for di in range(2):
        for dj in range(2):
            cols = []
            for a in range(2):
                for b in range(2):
                    ph, qh = divmod(di + a, 2)
                    pw, qw = divmod(dj + b, 2)
                    c0 = (qh * 2 + qw) * 64
                    cols.append(x[ph:ph + 10, pw:pw + 10, c0:c0 + 64])
            p = jnp.concatenate(cols, axis=-1).reshape(100, 256)   # (i2,j2) rows
            h = jnp.dot(p, w1_ref[...], preferred_element_type=jnp.float32)
            h = jnp.maximum(h + b1_ref[...], 0.0).astype(jnp.bfloat16)
            y1_blocks.append(h.reshape(10, 10, 32))
    # channels ordered (di, dj, c): y1[i2, j2, (di,dj,c)] = conv1[2*i2+di, 2*j2+dj, c]
    y1 = jnp.concatenate(y1_blocks, axis=-1)                       # (10, 10, 128)

    # ---- conv2 (4x4 stride 2) == 2x2 stride-1 conv over the s2d-2 view.
    cols = [y1[a:a + 9, b:b + 9, :] for a in range(2) for b in range(2)]
    p2 = jnp.concatenate(cols, axis=-1).reshape(81, 512)
    h2 = jnp.dot(p2, w2_ref[...], preferred_element_type=jnp.float32)
    h2 = jnp.maximum(h2 + b2_ref[...], 0.0).astype(jnp.bfloat16)
    y2 = h2.reshape(9, 9, 64)

    # ---- conv3 (3x3 stride 1): plain stride-1 patch build.
    cols = [y2[dh:dh + 7, dw:dw + 7, :] for dh in range(3) for dw in range(3)]
    p3 = jnp.concatenate(cols, axis=-1).reshape(49, 576)
    h3 = jnp.dot(p3, w3_ref[...], preferred_element_type=jnp.float32)
    h3 = jnp.maximum(h3 + b3_ref[...], 0.0).astype(jnp.bfloat16)

    o_ref[0] = h3                                                  # (49, 64), (h,w,c)


def conv_stack(x_prep, cw1, cb1, cw2, cb2, cw3, cb3):
    B = x_prep.shape[0]
    return pl.pallas_call(
        _conv_stack_kernel,
        out_shape=jax.ShapeDtypeStruct((B, 49, 64), jnp.bfloat16),
        grid=(B,),
        in_specs=[
            pl.BlockSpec((1, 11, 11, 256), lambda b: (b, 0, 0, 0)),
            pl.BlockSpec((256, 32), lambda b: (0, 0)),
            pl.BlockSpec((1, 32), lambda b: (0, 0)),
            pl.BlockSpec((512, 64), lambda b: (0, 0)),
            pl.BlockSpec((1, 64), lambda b: (0, 0)),
            pl.BlockSpec((576, 64), lambda b: (0, 0)),
            pl.BlockSpec((1, 64), lambda b: (0, 0)),
        ],
        out_specs=pl.BlockSpec((1, 49, 64), lambda b: (b, 0, 0)),
        compiler_params=pltpu.CompilerParams(
            dimension_semantics=("parallel",),          # both v7x TCs when B>=2
            vmem_limit_bytes=VMEM_LIMIT),
    )(x_prep, cw1, cb1, cw2, cb2, cw3, cb3)


# ----------------------------------------------------------------------------
# Kernel 2: fc1 + fused dueling head, batched over all images, lane-dense store.
# ----------------------------------------------------------------------------
def _dueling_head_kernel(s_ref, w1_ref, b1_ref, wav_ref, bav_ref, q_ref, *,
                         n_actions):
    h = jnp.dot(s_ref[...], w1_ref[...], preferred_element_type=jnp.float32)
    h = jnp.maximum(h + b1_ref[...], 0.0).astype(w1_ref.dtype)
    y = jnp.dot(h, wav_ref[...], preferred_element_type=jnp.float32) + bav_ref[...]
    adv = y[:, :n_actions]
    v = y[:, n_actions:n_actions + 1]
    # Lane-dense (tb, 128) store; columns >= n_actions are meaningless and get
    # sliced off outside the kernel (wAV/bAV are zero-padded there).
    q_ref[...] = v + (y - jnp.mean(adv, axis=-1, keepdims=True))


def dueling_head(s, w1, b1, wav, bav, n_actions, *, tile_b=256):
    B, K = s.shape
    H = w1.shape[1]
    NP = wav.shape[1]          # 128 (padded)
    align = 16                 # bf16 sublane packing (covers f32 output's 8)
    Bp = _round_up(B, align)
    tb = Bp if Bp <= tile_b else tile_b
    Bp = _round_up(Bp, tb)
    if Bp != B:
        s = jnp.pad(s, ((0, Bp - B), (0, 0)))

    kern = functools.partial(_dueling_head_kernel, n_actions=n_actions)
    q = pl.pallas_call(
        kern,
        out_shape=jax.ShapeDtypeStruct((Bp, NP), jnp.float32),
        grid=(Bp // tb,),
        in_specs=[
            pl.BlockSpec((tb, K), lambda i: (i, 0)),
            pl.BlockSpec((K, H), lambda i: (0, 0)),
            pl.BlockSpec((1, H), lambda i: (0, 0)),
            pl.BlockSpec((H, NP), lambda i: (0, 0)),
            pl.BlockSpec((1, NP), lambda i: (0, 0)),
        ],
        out_specs=pl.BlockSpec((tb, NP), lambda i: (i, 0)),
        compiler_params=pltpu.CompilerParams(
            dimension_semantics=("parallel",),
            vmem_limit_bytes=VMEM_LIMIT),
    )(s, w1, b1, wav, bav)
    return q[:B, :n_actions]


# ----------------------------------------------------------------------------
# JAX-side glue: one space-to-depth-8 relayout of the uint8 obs (no expansion).
# ----------------------------------------------------------------------------
def prep_obs(obs):
    """(B, 4, 84, 84) uint8 NCHW -> (B, 11, 11, 256) bf16 (space-to-depth by 8).
    Channel order (qh, qw, dh4, dw4, c); padded rows/cols 84..87 are never read."""
    B = obs.shape[0]
    x = jnp.pad(obs, ((0, 0), (0, 0), (0, 4), (0, 4)))       # 84 -> 88
    x = x.reshape(B, 4, 11, 2, 4, 11, 2, 4)                  # (B,c,p,qh,dh4,r,qw,dw4)
    x = x.transpose(0, 2, 5, 3, 6, 4, 7, 1)                  # (B,p,r,qh,qw,dh4,dw4,c)
    return x.reshape(B, 11, 11, 256).astype(jnp.bfloat16)    # 0..255 exact in bf16


def duel_q_net_pallas(obs, kp, n_actions):
    x = prep_obs(obs)
    feats = conv_stack(x, kp["cw1"], kp["cb1"], kp["cw2"], kp["cb2"],
                       kp["cw3"], kp["cb3"])                  # (B, 49, 64) bf16
    s = feats.reshape(feats.shape[0], -1)                     # (B, 3136), (h,w,c) order
    return dueling_head(s, kp["w1"], kp["b1"], kp["wAV"], kp["bAV"], n_actions)


# ----------------------------------------------------------------------------
# Pure-JAX f32 reference (PyTorch semantics) for validation.
# ----------------------------------------------------------------------------
def duel_q_net_ref(obs, params):
    dn = ("NCHW", "OIHW", "NCHW")
    x = obs.astype(jnp.float32) / 255.0
    x = jax.nn.relu(
        lax.conv_general_dilated(x, params["cw1"], (4, 4), "VALID",
                                 dimension_numbers=dn)
        + params["cb1"][None, :, None, None])
    x = jax.nn.relu(
        lax.conv_general_dilated(x, params["cw2"], (2, 2), "VALID",
                                 dimension_numbers=dn)
        + params["cb2"][None, :, None, None])
    x = jax.nn.relu(
        lax.conv_general_dilated(x, params["cw3"], (1, 1), "VALID",
                                 dimension_numbers=dn)
        + params["cb3"][None, :, None, None])
    s = x.reshape(x.shape[0], -1)
    h = jax.nn.relu(s @ params["w1"] + params["b1"])
    adv = h @ params["wA"] + params["bA"]
    v = h @ params["wV"] + params["bV"]
    return v + (adv - jnp.mean(adv, axis=-1, keepdims=True))


# ----------------------------------------------------------------------------
# Parameters: PyTorch-layout init + one-time kernel-layout preprocessing.
# ----------------------------------------------------------------------------
def make_params(key, fc_width, action_dim):
    def uni(k, shape, fan_in):
        bound = 1.0 / np.sqrt(fan_in)
        return jax.random.uniform(k, shape, jnp.float32, -bound, bound)

    ks = jax.random.split(key, 12)
    flat = 64 * 7 * 7
    return {
        "cw1": uni(ks[0], (32, 4, 8, 8), 4 * 8 * 8),
        "cb1": uni(ks[1], (32,), 4 * 8 * 8),
        "cw2": uni(ks[2], (64, 32, 4, 4), 32 * 4 * 4),
        "cb2": uni(ks[3], (64,), 32 * 4 * 4),
        "cw3": uni(ks[4], (64, 64, 3, 3), 64 * 3 * 3),
        "cb3": uni(ks[5], (64,), 64 * 3 * 3),
        "w1": uni(ks[6], (flat, fc_width), flat),
        "b1": uni(ks[7], (fc_width,), flat),
        "wA": uni(ks[8], (fc_width, action_dim), fc_width),
        "bA": uni(ks[9], (action_dim,), fc_width),
        "wV": uni(ks[10], (fc_width, 1), fc_width),
        "bV": uni(ks[11], (1,), fc_width),
    }


def prepare_params(p):
    """One-time re-layout: s2d-ordered GEMM conv weights (1/255 folded into cw1),
    (h,w,c)-ordered fc1 rows, fused & 128-padded A|V head, bf16 MXU operands."""
    def s2d2_conv_w(w):
        # (Cout, Cin, K, K) -> rows (a, b, dh, dw, Cin), kh = (K//2)*a + dh
        cout, cin, K, _ = w.shape
        half = K // 2
        w = w.reshape(cout, cin, 2, half, 2, half)    # (cout, cin, a, dh, b, dw)
        w = w.transpose(2, 4, 3, 5, 1, 0)             # (a, b, dh, dw, cin, cout)
        return w.reshape(K * K * cin, cout)

    def plain_conv_w(w):
        cout, cin, K, _ = w.shape
        return w.transpose(2, 3, 1, 0).reshape(K * K * cin, cout)

    c3, hc, wc = 64, 7, 7
    fcw = p["w1"].shape[1]
    A = p["wA"].shape[1]
    assert A + 1 <= 128, "head assumes action_dim + 1 <= 128"
    # fc1 rows: PyTorch flatten order (c,h,w) -> kernel flatten order (h,w,c)
    w1 = (p["w1"].reshape(c3, hc, wc, fcw).transpose(1, 2, 0, 3)
                 .reshape(c3 * hc * wc, fcw))
    wav = jnp.concatenate([p["wA"], p["wV"]], axis=1)             # (fcw, A+1)
    wav = jnp.pad(wav, ((0, 0), (0, 128 - (A + 1))))              # lane-dense head
    bav = jnp.pad(jnp.concatenate([p["bA"], p["bV"]], axis=0), (0, 128 - (A + 1)))
    return {
        "cw1": (s2d2_conv_w(p["cw1"]) / 255.0).astype(jnp.bfloat16),  # dequant folded
        "cb1": p["cb1"].reshape(1, -1),
        "cw2": s2d2_conv_w(p["cw2"]).astype(jnp.bfloat16),
        "cb2": p["cb2"].reshape(1, -1),
        "cw3": plain_conv_w(p["cw3"]).astype(jnp.bfloat16),
        "cb3": p["cb3"].reshape(1, -1),
        "w1": w1.astype(jnp.bfloat16),
        "b1": p["b1"].reshape(1, -1),
        "wAV": wav.astype(jnp.bfloat16),
        "bAV": bav.reshape(1, -1),
    }


if __name__ == "__main__":
    # The conv stack requires 84x84 spatial input (fc1 expects 64*7*7 features).
    B, C, H, W = 2, 4, 84, 84
    fc_width, action_dim = 128, 6

    key = jax.random.PRNGKey(0)
    k_obs, k_par = jax.random.split(key)
    obs = jax.random.randint(k_obs, (B, C, H, W), 0, 256, dtype=jnp.int32)
    obs = obs.astype(jnp.uint8)
    params = make_params(k_par, fc_width, action_dim)
    kparams = prepare_params(params)

    fwd = jax.jit(duel_q_net_pallas, static_argnums=(2,))
    q = jax.block_until_ready(fwd(obs, kparams, action_dim))

    q_ref = duel_q_net_ref(obs, params)
    # bf16 operands with f32 MXU accumulation -> relaxed tolerance vs f32 reference.
    np.testing.assert_allclose(np.asarray(q), np.asarray(q_ref),
                               rtol=2e-2, atol=2e-2)

    assert q.shape == (B, action_dim)
    print("KERNEL_OK")
</pallas_src>

<mosaic_0001>
module attributes {stable_mosaic.version = 11 : i64} {
  func.func @_conv_stack_kernel(%arg0: i32, %arg1: memref<1x11x11x256xbf16, #tpu.memory_space<vmem>>, %arg2: memref<256x32xbf16, #tpu.memory_space<vmem>>, %arg3: memref<1x32xf32, #tpu.memory_space<vmem>>, %arg4: memref<512x64xbf16, #tpu.memory_space<vmem>>, %arg5: memref<1x64xf32, #tpu.memory_space<vmem>>, %arg6: memref<576x64xbf16, #tpu.memory_space<vmem>>, %arg7: memref<1x64xf32, #tpu.memory_space<vmem>>, %arg8: memref<1x49x64xbf16, #tpu.memory_space<vmem>>) attributes {dimension_semantics = [#tpu.dimension_semantics<parallel>], iteration_bounds = array<i64: 2>, scalar_prefetch = 0 : i64, scratch_operands = 0 : i64, tpu.core_type = #tpu.core_type<tc>, window_params = [{transform_indices = @transform_0, window_bounds = array<i64: 1, 11, 11, 256>}, {pipeline_mode = #tpu.pipeline_mode<synchronous>, transform_indices = @transform_1, window_bounds = array<i64: 256, 32>}, {pipeline_mode = #tpu.pipeline_mode<synchronous>, transform_indices = @transform_2, window_bounds = array<i64: 1, 32>}, {pipeline_mode = #tpu.pipeline_mode<synchronous>, transform_indices = @transform_3, window_bounds = array<i64: 512, 64>}, {pipeline_mode = #tpu.pipeline_mode<synchronous>, transform_indices = @transform_4, window_bounds = array<i64: 1, 64>}, {pipeline_mode = #tpu.pipeline_mode<synchronous>, transform_indices = @transform_5, window_bounds = array<i64: 576, 64>}, {pipeline_mode = #tpu.pipeline_mode<synchronous>, transform_indices = @transform_6, window_bounds = array<i64: 1, 64>}, {transform_indices = @transform_7, window_bounds = array<i64: 1, 49, 64>}]} {
    %c0 = arith.constant 0 : index
    %c0_0 = arith.constant 0 : index
    %c0_1 = arith.constant 0 : index
    %c0_2 = arith.constant 0 : index
    %0 = vector.load %arg1[%c0, %c0_0, %c0_1, %c0_2] : memref<1x11x11x256xbf16, #tpu.memory_space<vmem>>, vector<1x11x11x256xbf16>
    %1 = vector.shape_cast %0 : vector<1x11x11x256xbf16> to vector<11x11x256xbf16>
    %2 = vector.extract_strided_slice %1 {offsets = [0, 0, 0], sizes = [10, 10, 64], strides = [1, 1, 1]} : vector<11x11x256xbf16> to vector<10x10x64xbf16>
    %3 = vector.extract_strided_slice %1 {offsets = [0, 0, 64], sizes = [10, 10, 64], strides = [1, 1, 1]} : vector<11x11x256xbf16> to vector<10x10x64xbf16>
    %4 = vector.extract_strided_slice %1 {offsets = [0, 0, 128], sizes = [10, 10, 64], strides = [1, 1, 1]} : vector<11x11x256xbf16> to vector<10x10x64xbf16>
    %5 = vector.extract_strided_slice %1 {offsets = [0, 0, 192], sizes = [10, 10, 64], strides = [1, 1, 1]} : vector<11x11x256xbf16> to vector<10x10x64xbf16>
    %6 = tpu.concatenate %2, %3, %4, %5 in 2 : vector<10x10x64xbf16>, vector<10x10x64xbf16>, vector<10x10x64xbf16>, vector<10x10x64xbf16> -> vector<10x10x256xbf16>
    %7 = vector.shape_cast %6 : vector<10x10x256xbf16> to vector<100x256xbf16>
    %c0_3 = arith.constant 0 : index
    %c0_4 = arith.constant 0 : index
    %8 = vector.load %arg2[%c0_3, %c0_4] : memref<256x32xbf16, #tpu.memory_space<vmem>>, vector<256x32xbf16>
    %cst = arith.constant dense<0.000000e+00> : vector<100x32xf32>
    %9 = tpu.matmul %7, %8, %cst {dimension_numbers = #tpu.dot_dimension_numbers<[1], [0], [0], [1], [0, 0, 1, 1], [], []>} : vector<100x256xbf16>, vector<256x32xbf16>, vector<100x32xf32> -> vector<100x32xf32>
    %c0_5 = arith.constant 0 : index
    %c0_6 = arith.constant 0 : index
    %10 = vector.load %arg3[%c0_5, %c0_6] : memref<1x32xf32, #tpu.memory_space<vmem>>, vector<1x32xf32>
    %11 = vector.broadcast %10 : vector<1x32xf32> to vector<100x32xf32>
    %12 = arith.addf %9, %11 : vector<100x32xf32>
    %cst_7 = arith.constant 0.000000e+00 : f32
    %13 = vector.broadcast %cst_7 : f32 to vector<100x32xf32>
    %14 = arith.maximumf %12, %13 : vector<100x32xf32>
    %15 = arith.truncf %14 : vector<100x32xf32> to vector<100x32xbf16>
    %16 = vector.shape_cast %15 : vector<100x32xbf16> to vector<10x10x32xbf16>
    %17 = vector.extract_strided_slice %1 {offsets = [0, 0, 64], sizes = [10, 10, 64], strides = [1, 1, 1]} : vector<11x11x256xbf16> to vector<10x10x64xbf16>
    %18 = vector.extract_strided_slice %1 {offsets = [0, 1, 0], sizes = [10, 10, 64], strides = [1, 1, 1]} : vector<11x11x256xbf16> to vector<10x10x64xbf16>
    %19 = vector.extract_strided_slice %1 {offsets = [0, 0, 192], sizes = [10, 10, 64], strides = [1, 1, 1]} : vector<11x11x256xbf16> to vector<10x10x64xbf16>
    %20 = vector.extract_strided_slice %1 {offsets = [0, 1, 128], sizes = [10, 10, 64], strides = [1, 1, 1]} : vector<11x11x256xbf16> to vector<10x10x64xbf16>
    %21 = tpu.concatenate %17, %18, %19, %20 in 2 : vector<10x10x64xbf16>, vector<10x10x64xbf16>, vector<10x10x64xbf16>, vector<10x10x64xbf16> -> vector<10x10x256xbf16>
    %22 = vector.shape_cast %21 : vector<10x10x256xbf16> to vector<100x256xbf16>
    %c0_8 = arith.constant 0 : index
    %c0_9 = arith.constant 0 : index
    %23 = vector.load %arg2[%c0_8, %c0_9] : memref<256x32xbf16, #tpu.memory_space<vmem>>, vector<256x32xbf16>
    %cst_10 = arith.constant dense<0.000000e+00> : vector<100x32xf32>
    %24 = tpu.matmul %22, %23, %cst_10 {dimension_numbers = #tpu.dot_dimension_numbers<[1], [0], [0], [1], [0, 0, 1, 1], [], []>} : vector<100x256xbf16>, vector<256x32xbf16>, vector<100x32xf32> -> vector<100x32xf32>
    %c0_11 = arith.constant 0 : index
    %c0_12 = arith.constant 0 : index
    %25 = vector.load %arg3[%c0_11, %c0_12] : memref<1x32xf32, #tpu.memory_space<vmem>>, vector<1x32xf32>
    %26 = vector.broadcast %25 : vector<1x32xf32> to vector<100x32xf32>
    %27 = arith.addf %24, %26 : vector<100x32xf32>
    %cst_13 = arith.constant 0.000000e+00 : f32
    %28 = vector.broadcast %cst_13 : f32 to vector<100x32xf32>
    %29 = arith.maximumf %27, %28 : vector<100x32xf32>
    %30 = arith.truncf %29 : vector<100x32xf32> to vector<100x32xbf16>
    %31 = vector.shape_cast %30 : vector<100x32xbf16> to vector<10x10x32xbf16>
    %32 = vector.extract_strided_slice %1 {offsets = [0, 0, 128], sizes = [10, 10, 64], strides = [1, 1, 1]} : vector<11x11x256xbf16> to vector<10x10x64xbf16>
    %33 = vector.extract_strided_slice %1 {offsets = [0, 0, 192], sizes = [10, 10, 64], strides = [1, 1, 1]} : vector<11x11x256xbf16> to vector<10x10x64xbf16>
    %34 = vector.extract_strided_slice %1 {offsets = [1, 0, 0], sizes = [10, 10, 64], strides = [1, 1, 1]} : vector<11x11x256xbf16> to vector<10x10x64xbf16>
    %35 = vector.extract_strided_slice %1 {offsets = [1, 0, 64], sizes = [10, 10, 64], strides = [1, 1, 1]} : vector<11x11x256xbf16> to vector<10x10x64xbf16>
    %36 = tpu.concatenate %32, %33, %34, %35 in 2 : vector<10x10x64xbf16>, vector<10x10x64xbf16>, vector<10x10x64xbf16>, vector<10x10x64xbf16> -> vector<10x10x256xbf16>
    %37 = vector.shape_cast %36 : vector<10x10x256xbf16> to vector<100x256xbf16>
    %c0_14 = arith.constant 0 : index
    %c0_15 = arith.constant 0 : index
    %38 = vector.load %arg2[%c0_14, %c0_15] : memref<256x32xbf16, #tpu.memory_space<vmem>>, vector<256x32xbf16>
    %cst_16 = arith.constant dense<0.000000e+00> : vector<100x32xf32>
    %39 = tpu.matmul %37, %38, %cst_16 {dimension_numbers = #tpu.dot_dimension_numbers<[1], [0], [0], [1], [0, 0, 1, 1], [], []>} : vector<100x256xbf16>, vector<256x32xbf16>, vector<100x32xf32> -> vector<100x32xf32>
    %c0_17 = arith.constant 0 : index
    %c0_18 = arith.constant 0 : index
    %40 = vector.load %arg3[%c0_17, %c0_18] : memref<1x32xf32, #tpu.memory_space<vmem>>, vector<1x32xf32>
    %41 = vector.broadcast %40 : vector<1x32xf32> to vector<100x32xf32>
    %42 = arith.addf %39, %41 : vector<100x32xf32>
    %cst_19 = arith.constant 0.000000e+00 : f32
    %43 = vector.broadcast %cst_19 : f32 to vector<100x32xf32>
    %44 = arith.maximumf %42, %43 : vector<100x32xf32>
    %45 = arith.truncf %44 : vector<100x32xf32> to vector<100x32xbf16>
    %46 = vector.shape_cast %45 : vector<100x32xbf16> to vector<10x10x32xbf16>
    %47 = vector.extract_strided_slice %1 {offsets = [0, 0, 192], sizes = [10, 10, 64], strides = [1, 1, 1]} : vector<11x11x256xbf16> to vector<10x10x64xbf16>
    %48 = vector.extract_strided_slice %1 {offsets = [0, 1, 128], sizes = [10, 10, 64], strides = [1, 1, 1]} : vector<11x11x256xbf16> to vector<10x10x64xbf16>
    %49 = vector.extract_strided_slice %1 {offsets = [1, 0, 64], sizes = [10, 10, 64], strides = [1, 1, 1]} : vector<11x11x256xbf16> to vector<10x10x64xbf16>
    %50 = vector.extract_strided_slice %1 {offsets = [1, 1, 0], sizes = [10, 10, 64], strides = [1, 1, 1]} : vector<11x11x256xbf16> to vector<10x10x64xbf16>
    %51 = tpu.concatenate %47, %48, %49, %50 in 2 : vector<10x10x64xbf16>, vector<10x10x64xbf16>, vector<10x10x64xbf16>, vector<10x10x64xbf16> -> vector<10x10x256xbf16>
    %52 = vector.shape_cast %51 : vector<10x10x256xbf16> to vector<100x256xbf16>
    %c0_20 = arith.constant 0 : index
    %c0_21 = arith.constant 0 : index
    %53 = vector.load %arg2[%c0_20, %c0_21] : memref<256x32xbf16, #tpu.memory_space<vmem>>, vector<256x32xbf16>
    %cst_22 = arith.constant dense<0.000000e+00> : vector<100x32xf32>
    %54 = tpu.matmul %52, %53, %cst_22 {dimension_numbers = #tpu.dot_dimension_numbers<[1], [0], [0], [1], [0, 0, 1, 1], [], []>} : vector<100x256xbf16>, vector<256x32xbf16>, vector<100x32xf32> -> vector<100x32xf32>
    %c0_23 = arith.constant 0 : index
    %c0_24 = arith.constant 0 : index
    %55 = vector.load %arg3[%c0_23, %c0_24] : memref<1x32xf32, #tpu.memory_space<vmem>>, vector<1x32xf32>
    %56 = vector.broadcast %55 : vector<1x32xf32> to vector<100x32xf32>
    %57 = arith.addf %54, %56 : vector<100x32xf32>
    %cst_25 = arith.constant 0.000000e+00 : f32
    %58 = vector.broadcast %cst_25 : f32 to vector<100x32xf32>
    %59 = arith.maximumf %57, %58 : vector<100x32xf32>
    %60 = arith.truncf %59 : vector<100x32xf32> to vector<100x32xbf16>
    %61 = vector.shape_cast %60 : vector<100x32xbf16> to vector<10x10x32xbf16>
    %62 = tpu.concatenate %16, %31, %46, %61 in 2 : vector<10x10x32xbf16>, vector<10x10x32xbf16>, vector<10x10x32xbf16>, vector<10x10x32xbf16> -> vector<10x10x128xbf16>
    %63 = vector.extract_strided_slice %62 {offsets = [0, 0, 0], sizes = [9, 9, 128], strides = [1, 1, 1]} : vector<10x10x128xbf16> to vector<9x9x128xbf16>
    %64 = vector.extract_strided_slice %62 {offsets = [0, 1, 0], sizes = [9, 9, 128], strides = [1, 1, 1]} : vector<10x10x128xbf16> to vector<9x9x128xbf16>
    %65 = vector.extract_strided_slice %62 {offsets = [1, 0, 0], sizes = [9, 9, 128], strides = [1, 1, 1]} : vector<10x10x128xbf16> to vector<9x9x128xbf16>
    %66 = vector.extract_strided_slice %62 {offsets = [1, 1, 0], sizes = [9, 9, 128], strides = [1, 1, 1]} : vector<10x10x128xbf16> to vector<9x9x128xbf16>
    %67 = tpu.concatenate %63, %64, %65, %66 in 2 : vector<9x9x128xbf16>, vector<9x9x128xbf16>, vector<9x9x128xbf16>, vector<9x9x128xbf16> -> vector<9x9x512xbf16>
    %68 = vector.shape_cast %67 : vector<9x9x512xbf16> to vector<81x512xbf16>
    %c0_26 = arith.constant 0 : index
    %c0_27 = arith.constant 0 : index
    %69 = vector.load %arg4[%c0_26, %c0_27] : memref<512x64xbf16, #tpu.memory_space<vmem>>, vector<512x64xbf16>
    %cst_28 = arith.constant dense<0.000000e+00> : vector<81x64xf32>
    %70 = tpu.matmul %68, %69, %cst_28 {dimension_numbers = #tpu.dot_dimension_numbers<[1], [0], [0], [1], [0, 0, 1, 1], [], []>} : vector<81x512xbf16>, vector<512x64xbf16>, vector<81x64xf32> -> vector<81x64xf32>
    %c0_29 = arith.constant 0 : index
    %c0_30 = arith.constant 0 : index
    %71 = vector.load %arg5[%c0_29, %c0_30] : memref<1x64xf32, #tpu.memory_space<vmem>>, vector<1x64xf32>
    %72 = vector.broadcast %71 : vector<1x64xf32> to vector<81x64xf32>
    %73 = arith.addf %70, %72 : vector<81x64xf32>
    %cst_31 = arith.constant 0.000000e+00 : f32
    %74 = vector.broadcast %cst_31 : f32 to vector<81x64xf32>
    %75 = arith.maximumf %73, %74 : vector<81x64xf32>
    %76 = arith.truncf %75 : vector<81x64xf32> to vector<81x64xbf16>
    %77 = vector.shape_cast %76 : vector<81x64xbf16> to vector<9x9x64xbf16>
    %78 = vector.extract_strided_slice %77 {offsets = [0, 0, 0], sizes = [7, 7, 64], strides = [1, 1, 1]} : vector<9x9x64xbf16> to vector<7x7x64xbf16>
    %79 = vector.extract_strided_slice %77 {offsets = [0, 1, 0], sizes = [7, 7, 64], strides = [1, 1, 1]} : vector<9x9x64xbf16> to vector<7x7x64xbf16>
    %80 = vector.extract_strided_slice %77 {offsets = [0, 2, 0], sizes = [7, 7, 64], strides = [1, 1, 1]} : vector<9x9x64xbf16> to vector<7x7x64xbf16>
    %81 = vector.extract_strided_slice %77 {offsets = [1, 0, 0], sizes = [7, 7, 64], strides = [1, 1, 1]} : vector<9x9x64xbf16> to vector<7x7x64xbf16>
    %82 = vector.extract_strided_slice %77 {offsets = [1, 1, 0], sizes = [7, 7, 64], strides = [1, 1, 1]} : vector<9x9x64xbf16> to vector<7x7x64xbf16>
    %83 = vector.extract_strided_slice %77 {offsets = [1, 2, 0], sizes = [7, 7, 64], strides = [1, 1, 1]} : vector<9x9x64xbf16> to vector<7x7x64xbf16>
    %84 = vector.extract_strided_slice %77 {offsets = [2, 0, 0], sizes = [7, 7, 64], strides = [1, 1, 1]} : vector<9x9x64xbf16> to vector<7x7x64xbf16>
    %85 = vector.extract_strided_slice %77 {offsets = [2, 1, 0], sizes = [7, 7, 64], strides = [1, 1, 1]} : vector<9x9x64xbf16> to vector<7x7x64xbf16>
    %86 = vector.extract_strided_slice %77 {offsets = [2, 2, 0], sizes = [7, 7, 64], strides = [1, 1, 1]} : vector<9x9x64xbf16> to vector<7x7x64xbf16>
    %87 = tpu.concatenate %78, %79, %80, %81, %82, %83, %84, %85, %86 in 2 : vector<7x7x64xbf16>, vector<7x7x64xbf16>, vector<7x7x64xbf16>, vector<7x7x64xbf16>, vector<7x7x64xbf16>, vector<7x7x64xbf16>, vector<7x7x64xbf16>, vector<7x7x64xbf16>, vector<7x7x64xbf16> -> vector<7x7x576xbf16>
    %88 = vector.shape_cast %87 : vector<7x7x576xbf16> to vector<49x576xbf16>
    %c0_32 = arith.constant 0 : index
    %c0_33 = arith.constant 0 : index
    %89 = vector.load %arg6[%c0_32, %c0_33] : memref<576x64xbf16, #tpu.memory_space<vmem>>, vector<576x64xbf16>
    %cst_34 = arith.constant dense<0.000000e+00> : vector<49x64xf32>
    %90 = tpu.matmul %88, %89, %cst_34 {dimension_numbers = #tpu.dot_dimension_numbers<[1], [0], [0], [1], [0, 0, 1, 1], [], []>} : vector<49x576xbf16>, vector<576x64xbf16>, vector<49x64xf32> -> vector<49x64xf32>
    %c0_35 = arith.constant 0 : index
    %c0_36 = arith.constant 0 : index
    %91 = vector.load %arg7[%c0_35, %c0_36] : memref<1x64xf32, #tpu.memory_space<vmem>>, vector<1x64xf32>
    %92 = vector.broadcast %91 : vector<1x64xf32> to vector<49x64xf32>
    %93 = arith.addf %90, %92 : vector<49x64xf32>
    %cst_37 = arith.constant 0.000000e+00 : f32
    %94 = vector.broadcast %cst_37 : f32 to vector<49x64xf32>
    %95 = arith.maximumf %93, %94 : vector<49x64xf32>
    %96 = arith.truncf %95 : vector<49x64xf32> to vector<49x64xbf16>
    %c0_38 = arith.constant 0 : index
    %c0_39 = arith.constant 0 : index
    %c0_40 = arith.constant 0 : index
    %97 = vector.load %arg8[%c0_38, %c0_39, %c0_40] : memref<1x49x64xbf16, #tpu.memory_space<vmem>>, vector<1x49x64xbf16>
    %98 = vector.shape_cast %97 : vector<1x49x64xbf16> to vector<49x64xbf16>
    %99 = vector.shape_cast %96 : vector<49x64xbf16> to vector<1x49x64xbf16>
    tpu.vector_store %arg8[%c0_38, %c0_39, %c0_40], %99 {strides = array<i32>} : memref<1x49x64xbf16, #tpu.memory_space<vmem>>, vector<1x49x64xbf16>,
    return
  }
  func.func @transform_0(%arg0: i32) -> (i32, i32, i32, i32) {
    %c0_i32 = arith.constant 0 : i32
    %c0_i32_0 = arith.constant 0 : i32
    %c0_i32_1 = arith.constant 0 : i32
    %c0_i32_2 = arith.constant 0 : i32
    return %arg0, %c0_i32, %c0_i32_0, %c0_i32_1 : i32, i32, i32, i32
  }
  func.func @transform_1(%arg0: i32) -> (i32, i32) {
    %c0_i32 = arith.constant 0 : i32
    %c0_i32_0 = arith.constant 0 : i32
    %c0_i32_1 = arith.constant 0 : i32
    return %c0_i32, %c0_i32_0 : i32, i32
  }
  func.func @transform_2(%arg0: i32) -> (i32, i32) {
    %c0_i32 = arith.constant 0 : i32
    %c0_i32_0 = arith.constant 0 : i32
    %c0_i32_1 = arith.constant 0 : i32
    return %c0_i32, %c0_i32_0 : i32, i32
  }
  func.func @transform_3(%arg0: i32) -> (i32, i32) {
    %c0_i32 = arith.constant 0 : i32
    %c0_i32_0 = arith.constant 0 : i32
    %c0_i32_1 = arith.constant 0 : i32
    return %c0_i32, %c0_i32_0 : i32, i32
  }
  func.func @transform_4(%arg0: i32) -> (i32, i32) {
    %c0_i32 = arith.constant 0 : i32
    %c0_i32_0 = arith.constant 0 : i32
    %c0_i32_1 = arith.constant 0 : i32
    return %c0_i32, %c0_i32_0 : i32, i32
  }
  func.func @transform_5(%arg0: i32) -> (i32, i32) {
    %c0_i32 = arith.constant 0 : i32
    %c0_i32_0 = arith.constant 0 : i32
    %c0_i32_1 = arith.constant 0 : i32
    return %c0_i32, %c0_i32_0 : i32, i32
  }
  func.func @transform_6(%arg0: i32) -> (i32, i32) {
    %c0_i32 = arith.constant 0 : i32
    %c0_i32_0 = arith.constant 0 : i32
    %c0_i32_1 = arith.constant 0 : i32
    return %c0_i32, %c0_i32_0 : i32, i32
  }
  func.func @transform_7(%arg0: i32) -> (i32, i32, i32) {
    %c0_i32 = arith.constant 0 : i32
    %c0_i32_0 = arith.constant 0 : i32
    %c0_i32_1 = arith.constant 0 : i32
    return %arg0, %c0_i32, %c0_i32_0 : i32, i32, i32
  }
}

module attributes {stable_mosaic.version = 11 : i64} {
  func.func @_dueling_head_kernel(%arg0: i32, %arg1: memref<16x3136xbf16, #tpu.memory_space<vmem>>, %arg2: memref<3136x128xbf16, #tpu.memory_space<vmem>>, %arg3: memref<1x128xf32, #tpu.memory_space<vmem>>, %arg4: memref<128x128xbf16, #tpu.memory_space<vmem>>, %arg5: memref<1x128xf32, #tpu.memory_space<vmem>>, %arg6: memref<16x128xf32, #tpu.memory_space<vmem>>) attributes {dimension_semantics = [#tpu.dimension_semantics<parallel>], iteration_bounds = array<i64: 1>, scalar_prefetch = 0 : i64, scratch_operands = 0 : i64, tpu.core_type = #tpu.core_type<tc>, window_params = [{transform_indices = @transform_0, window_bounds = array<i64: 16, 3136>}, {pipeline_mode = #tpu.pipeline_mode<synchronous>, transform_indices = @transform_1, window_bounds = array<i64: 3136, 128>}, {pipeline_mode = #tpu.pipeline_mode<synchronous>, transform_indices = @transform_2, window_bounds = array<i64: 1, 128>}, {pipeline_mode = #tpu.pipeline_mode<synchronous>, transform_indices = @transform_3, window_bounds = array<i64: 128, 128>}, {pipeline_mode = #tpu.pipeline_mode<synchronous>, transform_indices = @transform_4, window_bounds = array<i64: 1, 128>}, {transform_indices = @transform_5, window_bounds = array<i64: 16, 128>}]} {
    %c0 = arith.constant 0 : index
    %c0_0 = arith.constant 0 : index
    %0 = vector.load %arg1[%c0, %c0_0] : memref<16x3136xbf16, #tpu.memory_space<vmem>>, vector<16x3136xbf16>
    %c0_1 = arith.constant 0 : index
    %c0_2 = arith.constant 0 : index
    %1 = vector.load %arg2[%c0_1, %c0_2] : memref<3136x128xbf16, #tpu.memory_space<vmem>>, vector<3136x128xbf16>
    %cst = arith.constant dense<0.000000e+00> : vector<16x128xf32>
    %2 = tpu.matmul %0, %1, %cst {dimension_numbers = #tpu.dot_dimension_numbers<[1], [0], [0], [1], [0, 0, 1, 1], [], []>} : vector<16x3136xbf16>, vector<3136x128xbf16>, vector<16x128xf32> -> vector<16x128xf32>
    %c0_3 = arith.constant 0 : index
    %c0_4 = arith.constant 0 : index
    %3 = vector.load %arg3[%c0_3, %c0_4] : memref<1x128xf32, #tpu.memory_space<vmem>>, vector<1x128xf32>
    %4 = vector.broadcast %3 : vector<1x128xf32> to vector<16x128xf32>
    %5 = arith.addf %2, %4 : vector<16x128xf32>
    %cst_5 = arith.constant 0.000000e+00 : f32
    %6 = vector.broadcast %cst_5 : f32 to vector<16x128xf32>
    %7 = arith.maximumf %5, %6 : vector<16x128xf32>
    %8 = arith.truncf %7 : vector<16x128xf32> to vector<16x128xbf16>
    %c0_6 = arith.constant 0 : index
    %c0_7 = arith.constant 0 : index
    %9 = vector.load %arg4[%c0_6, %c0_7] : memref<128x128xbf16, #tpu.memory_space<vmem>>, vector<128x128xbf16>
    %cst_8 = arith.constant dense<0.000000e+00> : vector<16x128xf32>
    %10 = tpu.matmul %8, %9, %cst_8 {dimension_numbers = #tpu.dot_dimension_numbers<[1], [0], [0], [1], [0, 0, 1, 1], [], []>} : vector<16x128xbf16>, vector<128x128xbf16>, vector<16x128xf32> -> vector<16x128xf32>
    %c0_9 = arith.constant 0 : index
    %c0_10 = arith.constant 0 : index
    %11 = vector.load %arg5[%c0_9, %c0_10] : memref<1x128xf32, #tpu.memory_space<vmem>>, vector<1x128xf32>
    %12 = vector.broadcast %11 : vector<1x128xf32> to vector<16x128xf32>
    %13 = arith.addf %10, %12 : vector<16x128xf32>
    %14 = vector.extract_strided_slice %13 {offsets = [0, 0], sizes = [16, 6], strides = [1, 1]} : vector<16x128xf32> to vector<16x6xf32>
    %15 = vector.extract_strided_slice %13 {offsets = [0, 6], sizes = [16, 1], strides = [1, 1]} : vector<16x128xf32> to vector<16x1xf32>
    %cst_11 = arith.constant dense<0.000000e+00> : vector<16xf32>
    %16 = vector.multi_reduction <add>, %14, %cst_11 [1] : vector<16x6xf32> to vector<16xf32>
    %17 = vector.shape_cast %16 : vector<16xf32> to vector<16x1xf32>
    %cst_12 = arith.constant 6.000000e+00 : f32
    %18 = vector.broadcast %cst_12 : f32 to vector<16x1xf32>
    %19 = arith.divf %17, %18 : vector<16x1xf32>
    %20 = vector.broadcast %19 : vector<16x1xf32> to vector<16x128xf32>
    %21 = arith.subf %13, %20 : vector<16x128xf32>
    %22 = vector.broadcast %15 : vector<16x1xf32> to vector<16x128xf32>
    %23 = arith.addf %22, %21 : vector<16x128xf32>
    %c0_13 = arith.constant 0 : index
    %c0_14 = arith.constant 0 : index
    %24 = vector.load %arg6[%c0_13, %c0_14] : memref<16x128xf32, #tpu.memory_space<vmem>>, vector<16x128xf32>
    tpu.vector_store %arg6[%c0_13, %c0_14], %23 {strides = array<i32>} : memref<16x128xf32, #tpu.memory_space<vmem>>, vector<16x128xf32>,
    return
  }
  func.func @transform_0(%arg0: i32) -> (i32, i32) {
    %c0_i32 = arith.constant 0 : i32
    %c0_i32_0 = arith.constant 0 : i32
    return %arg0, %c0_i32 : i32, i32
  }
  func.func @transform_1(%arg0: i32) -> (i32, i32) {
    %c0_i32 = arith.constant 0 : i32
    %c0_i32_0 = arith.constant 0 : i32
    %c0_i32_1 = arith.constant 0 : i32
    return %c0_i32, %c0_i32_0 : i32, i32
  }
  func.func @transform_2(%arg0: i32) -> (i32, i32) {
    %c0_i32 = arith.constant 0 : i32
    %c0_i32_0 = arith.constant 0 : i32
    %c0_i32_1 = arith.constant 0 : i32
    return %c0_i32, %c0_i32_0 : i32, i32
  }
  func.func @transform_3(%arg0: i32) -> (i32, i32) {
    %c0_i32 = arith.constant 0 : i32
    %c0_i32_0 = arith.constant 0 : i32
    %c0_i32_1 = arith.constant 0 : i32
    return %c0_i32, %c0_i32_0 : i32, i32
  }
  func.func @transform_4(%arg0: i32) -> (i32, i32) {
    %c0_i32 = arith.constant 0 : i32
    %c0_i32_0 = arith.constant 0 : i32
    %c0_i32_1 = arith.constant 0 : i32
    return %c0_i32, %c0_i32_0 : i32, i32
  }
  func.func @transform_5(%arg0: i32) -> (i32, i32) {
    %c0_i32 = arith.constant 0 : i32
    %c0_i32_0 = arith.constant 0 : i32
    return %arg0, %c0_i32 : i32, i32
  }
}

</mosaic_0001>

<bundles_post_ra>
// kernel: duel_q_net_pallas.3
= control target key start
LH: loop header
LB: loop body
LE: loop exit
PB: predicated region body
PF: predicated region fallthrough
CT: control target
= control target key end

     0   :  { %vm3218_vm0 = vmmov 0   ;;  %vm1747_vm1 = vcmask 523264   ;;  %vm2399_vm2 = vcmask 48128   ;;  %s3949_s1 = inlined_call_operand.vmem [shape: bf16[3136,128], index: 1, kind: input, shape index: {}]   ;;  %s3950_s0 = inlined_call_operand.vmem [shape: bf16[16,3136], index: 0, kind: input, shape index: {}]   ;;  %s3951_s3 = inlined_call_operand.vmem [shape: bf16[128,128], index: 3, kind: input, shape index: {}]   ;;  %s3952_s2 = inlined_call_operand.vmem [shape: f32[1,128], index: 2, kind: input, shape index: {}]   ;;  %s3953_s4 = inlined_call_operand.vmem [shape: f32[1,128], index: 4, kind: input, shape index: {}]   ;;  %s3954_s5 = inlined_call_operand.vmem [shape: f32[16,128], index: 5, kind: output, shape index: {}]  }
   0x1   :  { %v2976_v0 = vld [vmem:[%s3949_s1 + $0x78] sm:$0xff]   ;;  %v2980_v4 = vld [vmem:[%s3949_s1 + $0x70] sm:$0xff]   ;;  %v2984_v8 = vld [vmem:[%s3949_s1 + $0x68] sm:$0xff]  }
   0x2   :  { %v2977_v1 = vld [vmem:[%s3949_s1 + $0x38] sm:$0xff]   ;;  %2661 = vmatprep.subr.bf16.mxu0 %v2976_v0  ;;  %v2981_v5 = vld [vmem:[%s3949_s1 + $0x30] sm:$0xff]   ;;  %v2985_v9 = vld [vmem:[%s3949_s1 + $0x28] sm:$0xff]  }
   0x3   :  { %v2978_v2 = vld [vmem:[%s3949_s1 + $0xf8] sm:$0xff]   ;;  %2662 = vmatpush3.bf16.msra.mxu0 %v2977_v1  ;;  %v2982_v6 = vld [vmem:[%s3949_s1 + $0xf0] sm:$0xff]   ;;  %v2986_v10 = vld [vmem:[%s3949_s1 + $0xe8] sm:$0xff]  }
   0x4   :  { %v2979_v3 = vld [vmem:[%s3949_s1 + $0xb8] sm:$0xff]   ;;  %2683 = vmatprep.subr.bf16.mxu1 %v2978_v2  ;;  %2663 = vmatprep.subr.bf16.mxu0 %v2980_v4  ;;  %v2983_v7 = vld [vmem:[%s3949_s1 + $0xb0] sm:$0xff]   ;;  %v2987_v11 = vld [vmem:[%s3949_s1 + $0xa8] sm:$0xff]  }
   0x5   :  { %2684 = vmatpush3.bf16.msra.mxu1 %v2979_v3  ;;  %v2988_v12 = vld [vmem:[%s3949_s1 + $0x60] sm:$0xff]   ;;  %v2992_v16 = vld [vmem:[%s3949_s1 + $0x58] sm:$0xff]   ;;  %v2996_v20 = vld [vmem:[%s3949_s1 + $0x50] sm:$0xff]  }
   0x6   :  { %2685 = vmatprep.subr.bf16.mxu1 %v2982_v6  ;;  %v2989_v13 = vld [vmem:[%s3949_s1 + $0x20] sm:$0xff]   ;;  %v2993_v17 = vld [vmem:[%s3949_s1 + $0x18] sm:$0xff]   ;;  %v2997_v21 = vld [vmem:[%s3949_s1 + $0x10] sm:$0xff]  }
   0x7   :  { %2664 = vmatpush3.bf16.msra.mxu0 %v2981_v5  ;;  %v2990_v14 = vld [vmem:[%s3949_s1 + $0xe0] sm:$0xff]   ;;  %v2994_v18 = vld [vmem:[%s3949_s1 + $0xd8] sm:$0xff]   ;;  %v2998_v22 = vld [vmem:[%s3949_s1 + $0xd0] sm:$0xff]  }
   0x8   :  { %2665 = vmatprep.subr.bf16.mxu0 %v2984_v8  ;;  %v2991_v15 = vld [vmem:[%s3949_s1 + $0xa0] sm:$0xff]   ;;  %v2995_v19 = vld [vmem:[%s3949_s1 + $0x98] sm:$0xff]   ;;  %v2999_v23 = vld [vmem:[%s3949_s1 + $0x90] sm:$0xff]  }
   0x9   :  { %2686 = vmatpush3.bf16.msra.mxu1 %v2983_v7  ;;  %v3000_v24 = vld [vmem:[%s3949_s1 + $0x48] sm:$0xff]   ;;  %v3004_v28 = vld [vmem:[%s3949_s1 + $0x40] sm:$0xff]   ;;  %v3011_v34 = vld [vmem:[%s3949_s1 + $0x178] sm:$0xff]  }
   0xa   :  { %2687 = vmatprep.subr.bf16.mxu1 %v2986_v10  ;;  %v3001_v25 = vld [vmem:[%s3949_s1 + $0x8] sm:$0xff]   ;;  %v3005_v29 = vld [vmem:[%s3949_s1] sm:$0xff]   ;;  %v3015_v37 = vld [vmem:[%s3949_s1 + $0x138] sm:$0xff]  }
   0xb   :  { %2666 = vmatpush3.bf16.msra.mxu0 %v2985_v9  ;;  %v3002_v26 = vld [vmem:[%s3949_s1 + $0xc8] sm:$0xff]   ;;  %v3006_v30 = vld [vmem:[%s3949_s1 + $0xc0] sm:$0xff]   ;;  %v3016_v38 = vld [vmem:[%s3949_s1 + $0x1f8] sm:$0xff]  }
   0xc   :  { %2667 = vmatprep.subr.bf16.mxu0 %v2988_v12  ;;  %v3003_v27 = vld [vmem:[%s3949_s1 + $0x88] sm:$0xff]   ;;  %v3007_v31 = vld [vmem:[%s3950_s0] ss:$100 sps:$4 sm:$0xff]   ;;  %v3017_v39 = vld [vmem:[%s3949_s1 + $0x1b8] sm:$0xff]  }
   0xd   :  { %2688 = vmatpush3.bf16.msra.mxu1 %v2987_v11  ;;  %v3009_v32 = vld [vmem:[%s3950_s0 + $0x4] ss:$100 sps:$4 sm:$0xff]   ;;  %v3014_v36 = vld [vmem:[%s3950_s0 + $0xc] ss:$100 sps:$4 sm:$0xff]   ;;  %v3030_v52 = vld [vmem:[%s3949_s1 + $0x158] sm:$0xff]  }
   0xe   :  { %2689 = vmatprep.subr.bf16.mxu1 %v2990_v14  ;;  %v3010_v33 = vld [vmem:[%s3949_s1 + $0x80] sm:$0xff]   ;;  %1783 = vmatprep.mubr.bf16.mxu0 %v3009_v32  ;;  %v3012_v35 = vld [vmem:[%s3950_s0 + $0x8] ss:$100 sps:$4 sm:$0xff]   ;;  %v3018_v40 = vld [vmem:[%s3949_s1 + $0x170] sm:$0xff]  }
   0xf   :  { %2668 = vmatpush3.bf16.msra.mxu0 %v2989_v13  ;;  %1824 = vmatprep.mubr.bf16.mxu1 %v3014_v36  ;;  %v3019_v41 = vld [vmem:[%s3949_s1 + $0x130] sm:$0xff]   ;;  %v3022_v44 = vld [vmem:[%s3949_s1 + $0x168] sm:$0xff]   ;;  %v3026_v48 = vld [vmem:[%s3949_s1 + $0x160] sm:$0xff]  }
  0x10   :  { %2669 = vmatprep.subr.bf16.mxu0 %v2992_v16  ;;  %v3020_v42 = vld [vmem:[%s3949_s1 + $0x1f0] sm:$0xff]   ;;  %v3023_v45 = vld [vmem:[%s3949_s1 + $0x128] sm:$0xff]   ;;  %v3027_v49 = vld [vmem:[%s3949_s1 + $0x120] sm:$0xff]  }
  0x11   :  { %2690 = vmatpush3.bf16.msra.mxu1 %v2991_v15  ;;  %v3021_v43 = vld [vmem:[%s3949_s1 + $0x1b0] sm:$0xff]   ;;  %v3024_v46 = vld [vmem:[%s3949_s1 + $0x1e8] sm:$0xff]   ;;  %v3028_v50 = vld [vmem:[%s3949_s1 + $0x1e0] sm:$0xff]  }
  0x12   :  { %2691 = vmatprep.subr.bf16.mxu1 %v2994_v18  ;;  %v3025_v47 = vld [vmem:[%s3949_s1 + $0x1a8] sm:$0xff]   ;;  %v3029_v51 = vld [vmem:[%s3949_s1 + $0x1a0] sm:$0xff]   ;;  %v3031_v53 = vld [vmem:[%s3949_s1 + $0x118] sm:$0xff]  }
  0x13   :  { %2670 = vmatpush3.bf16.msra.mxu0 %v2993_v17  ;;  %v3032_v54 = vld [vmem:[%s3949_s1 + $0x1d8] sm:$0xff]   ;;  %v3034_v56 = vld [vmem:[%s3949_s1 + $0x150] sm:$0xff]   ;;  %v3038_v60 = vld [vmem:[%s3949_s1 + $0x148] sm:$0xff]  }
  0x14   :  { %2671 = vmatprep.subr.bf16.mxu0 %v2996_v20  ;;  %v3033_v55 = vld [vmem:[%s3949_s1 + $0x198] sm:$0xff]   ;;  %v3035_v57 = vld [vmem:[%s3949_s1 + $0x110] sm:$0xff]   ;;  %v3039_v61 = vld [vmem:[%s3949_s1 + $0x108] sm:$0xff]  }
  0x15   :  { %2692 = vmatpush3.bf16.msra.mxu1 %v2995_v19  ;;  %v3036_v58 = vld [vmem:[%s3949_s1 + $0x1d0] sm:$0xff]   ;;  %v3040_v62 = vld [vmem:[%s3949_s1 + $0x1c8] sm:$0xff]   ;;  %v3042_v0 = vld [vmem:[%s3949_s1 + $0x140] sm:$0xff]  }
  0x16   :  { %2693 = vmatprep.subr.bf16.mxu1 %v2998_v22  ;;  %v3037_v59 = vld [vmem:[%s3949_s1 + $0x190] sm:$0xff]   ;;  %v3041_v63 = vld [vmem:[%s3949_s1 + $0x188] sm:$0xff]   ;;  %v3043_v1 = vld [vmem:[%s3949_s1 + $0x100] sm:$0xff]  }
  0x17   :  { %2672 = vmatpush3.bf16.msra.mxu0 %v2997_v21  ;;  %v3044_v2 = vld [vmem:[%s3949_s1 + $0x1c0] sm:$0xff]   ;;  %v3045_v3 = vld [vmem:[%s3950_s0 + $0x10] ss:$100 sps:$4 sm:$0xff]   ;;  %v3049_v6 = vld [vmem:[%s3949_s1 + $0x278] sm:$0xff]  }
  0x18   :  { %2673 = vmatprep.subr.bf16.mxu0 %v3000_v24  ;;  %v3047_v4 = vld [vmem:[%s3950_s0 + $0x14] ss:$100 sps:$4 sm:$0xff]   ;;  %v3048_v5 = vld [vmem:[%s3949_s1 + $0x180] sm:$0xff]   ;;  %v3060_v16 = vld [vmem:[%s3949_s1 + $0x268] sm:$0xff]  }
  0x19   :  { %2694 = vmatpush3.bf16.msra.mxu1 %v2999_v23  ;;  %v3050_v7 = vld [vmem:[%s3950_s0 + $0x18] ss:$100 sps:$4 sm:$0xff]   ;;  %v3056_v12 = vld [vmem:[%s3949_s1 + $0x270] sm:$0xff]   ;;  %v3061_v17 = vld [vmem:[%s3949_s1 + $0x228] sm:$0xff]  }
  0x1a   :  { %2695 = vmatprep.subr.bf16.mxu1 %v3002_v26  ;;  %v3052_v8 = vld [vmem:[%s3950_s0 + $0x1c] ss:$100 sps:$4 sm:$0xff]   ;;  %v3057_v13 = vld [vmem:[%s3949_s1 + $0x230] sm:$0xff]   ;;  %v3062_v18 = vld [vmem:[%s3949_s1 + $0x2e8] sm:$0xff]  }
  0x1b   :  { %2674 = vmatpush3.bf16.msra.mxu0 %v3001_v25  ;;  %v3053_v9 = vld [vmem:[%s3949_s1 + $0x238] sm:$0xff]   ;;  %v3058_v14 = vld [vmem:[%s3949_s1 + $0x2f0] sm:$0xff]   ;;  %v3063_v19 = vld [vmem:[%s3949_s1 + $0x2a8] sm:$0xff]  }
  0x1c   :  { %2675 = vmatprep.subr.bf16.mxu0 %v3004_v28  ;;  %v3054_v10 = vld [vmem:[%s3949_s1 + $0x2f8] sm:$0xff]   ;;  %v3059_v15 = vld [vmem:[%s3949_s1 + $0x2b0] sm:$0xff]   ;;  %v3064_v20 = vld [vmem:[%s3949_s1 + $0x260] sm:$0xff]  }
  0x1d   :  { %2696 = vmatpush3.bf16.msra.mxu1 %v3003_v27  ;;  %v3055_v11 = vld [vmem:[%s3949_s1 + $0x2b8] sm:$0xff]   ;;  %v3065_v21 = vld [vmem:[%s3949_s1 + $0x220] sm:$0xff]   ;;  %v3072_v28 = vld [vmem:[%s3949_s1 + $0x250] sm:$0xff]  }
  0x1e   :  { %2697 = vmatprep.subr.bf16.mxu1 %v3006_v30  ;;  %v3066_v22 = vld [vmem:[%s3949_s1 + $0x2e0] sm:$0xff]   ;;  %v3068_v24 = vld [vmem:[%s3949_s1 + $0x258] sm:$0xff]   ;;  %v3074_v30 = vld [vmem:[%s3949_s1 + $0x2d0] sm:$0xff]  }
  0x1f   :  { %2676 = vmatpush3.bf16.msra.mxu0 %v3005_v29  ;;  %v3067_v23 = vld [vmem:[%s3949_s1 + $0x2a0] sm:$0xff]   ;;  %v3069_v25 = vld [vmem:[%s3949_s1 + $0x218] sm:$0xff]   ;;  %v3073_v29 = vld [vmem:[%s3949_s1 + $0x210] sm:$0xff]  }
  0x20   :  { %2705 = vmatprep.subr.bf16.mxu0 %v3011_v34  ;;  %v3070_v26 = vld [vmem:[%s3949_s1 + $0x2d8] sm:$0xff]   ;;  %v3076_v32 = vld [vmem:[%s3949_s1 + $0x248] sm:$0xff]   ;;  %v3080_v36 = vld [vmem:[%s3949_s1 + $0x240] sm:$0xff]  }
  0x21   :  { %2698 = vmatpush3.bf16.msra.mxu1 %v3010_v33  ;;  %v3071_v27 = vld [vmem:[%s3949_s1 + $0x298] sm:$0xff]   ;;  %v3077_v33 = vld [vmem:[%s3949_s1 + $0x208] sm:$0xff]  }
  0x22   :  { %1784 = vmatmul.mubr.bf16.vlgmr.msra.gmra.mxu0 %v3007_v31  ;;  %2727 = vmatprep.subr.bf16.mxu1 %v3016_v38  ;;  %v3075_v31 = vld [vmem:[%s3949_s1 + $0x290] sm:$0xff]   ;;  %v3078_v34 = vld [vmem:[%s3949_s1 + $0x2c8] sm:$0xff]   ;;  %v3082_v38 = vld [vmem:[%s3949_s1 + $0x2c0] sm:$0xff]  }
  0x23   :  { %2706 = vmatpush3.bf16.msra.mxu0 %v3015_v37  ;;  %1865 = vmatprep.mubr.bf16.mxu0 %v3047_v4  ;;  %v3081_v37 = vld [vmem:[%s3949_s1 + $0x200] sm:$0xff]   ;;  %v3114_v4 = vld [vmem:[%s3949_s1 + $0x348] sm:$0xff]  }
  0x24   :  { %1825 = vmatmul.mubr.bf16.vlgmr.msra.gmra.mxu1 %v3012_v35  ;;  %2707 = vmatprep.subr.bf16.mxu0 %v3018_v40  ;;  %v3079_v35 = vld [vmem:[%s3949_s1 + $0x288] sm:$0xff]  }
  0x25   :  { %2728 = vmatpush3.bf16.msra.mxu1 %v3017_v39  ;;  %1906 = vmatprep.mubr.bf16.mxu1 %v3052_v8  ;;  %v3083_v39 = vld [vmem:[%s3950_s0 + $0x20] ss:$100 sps:$4 sm:$0xff]  }
  0x26   :  { %2729 = vmatprep.subr.bf16.mxu1 %v3020_v42  ;;  %v3085_v40 = vld [vmem:[%s3950_s0 + $0x24] ss:$100 sps:$4 sm:$0xff]   ;;  %v3087_v42 = vld [vmem:[%s3949_s1 + $0x378] sm:$0xff]  }
  0x27   :  { %2708 = vmatpush3.bf16.msra.mxu0 %v3019_v41  ;;  %v3086_v41 = vld [vmem:[%s3949_s1 + $0x280] sm:$0xff]  }
  0x28   :  { %2709 = vmatprep.subr.bf16.mxu0 %v3022_v44  ;;  %v3090_v44 = vld [vmem:[%s3950_s0 + $0x2c] ss:$100 sps:$4 sm:$0xff]   ;;  %v3118_v8 = vld [vmem:[%s3949_s1 + $0x340] sm:$0xff]  }
  0x29   :  { %2730 = vmatpush3.bf16.msra.mxu1 %v3021_v43  ;;  %v3088_v43 = vld [vmem:[%s3950_s0 + $0x28] ss:$100 sps:$4 sm:$0xff]  }
  0x2a   :  { %2731 = vmatprep.subr.bf16.mxu1 %v3024_v46  ;;  %v3092_v46 = vld [vmem:[%s3949_s1 + $0x3f8] sm:$0xff]  }
  0x2b   :  { %2710 = vmatpush3.bf16.msra.mxu0 %v3023_v45  ;;  %v3091_v45 = vld [vmem:[%s3949_s1 + $0x338] sm:$0xff]  }
  0x2c   :  { %2711 = vmatprep.subr.bf16.mxu0 %v3026_v48  ;;  %v3094_v48 = vld [vmem:[%s3949_s1 + $0x370] sm:$0xff]  }
  0x2d   :  { %2732 = vmatpush3.bf16.msra.mxu1 %v3025_v47  ;;  %v3093_v47 = vld [vmem:[%s3949_s1 + $0x3b8] sm:$0xff]  }
  0x2e   :  { %2733 = vmatprep.subr.bf16.mxu1 %v3028_v50  ;;  %v3096_v50 = vld [vmem:[%s3949_s1 + $0x3f0] sm:$0xff]  }
  0x2f   :  { %2712 = vmatpush3.bf16.msra.mxu0 %v3027_v49  ;;  %v3095_v49 = vld [vmem:[%s3949_s1 + $0x330] sm:$0xff]  }
  0x30   :  { %2713 = vmatprep.subr.bf16.mxu0 %v3030_v52  ;;  %v3098_v52 = vld [vmem:[%s3949_s1 + $0x368] sm:$0xff]  }
  0x31   :  { %2734 = vmatpush3.bf16.msra.mxu1 %v3029_v51  ;;  %v3097_v51 = vld [vmem:[%s3949_s1 + $0x3b0] sm:$0xff]  }
  0x32   :  { %2735 = vmatprep.subr.bf16.mxu1 %v3032_v54  ;;  %v3100_v54 = vld [vmem:[%s3949_s1 + $0x3e8] sm:$0xff]  }
  0x33   :  { %2714 = vmatpush3.bf16.msra.mxu0 %v3031_v53  ;;  %v3099_v53 = vld [vmem:[%s3949_s1 + $0x328] sm:$0xff]  }
  0x34   :  { %2715 = vmatprep.subr.bf16.mxu0 %v3034_v56  ;;  %v3102_v56 = vld [vmem:[%s3949_s1 + $0x360] sm:$0xff]  }
  0x35   :  { %2736 = vmatpush3.bf16.msra.mxu1 %v3033_v55  ;;  %v3101_v55 = vld [vmem:[%s3949_s1 + $0x3a8] sm:$0xff]  }
  0x36   :  { %2737 = vmatprep.subr.bf16.mxu1 %v3036_v58  ;;  %v3104_v58 = vld [vmem:[%s3949_s1 + $0x3e0] sm:$0xff]  }
  0x37   :  { %2716 = vmatpush3.bf16.msra.mxu0 %v3035_v57  ;;  %v3103_v57 = vld [vmem:[%s3949_s1 + $0x320] sm:$0xff]  }
  0x38   :  { %2717 = vmatprep.subr.bf16.mxu0 %v3038_v60  ;;  %v3106_v60 = vld [vmem:[%s3949_s1 + $0x358] sm:$0xff]  }
  0x39   :  { %2738 = vmatpush3.bf16.msra.mxu1 %v3037_v59  ;;  %v3105_v59 = vld [vmem:[%s3949_s1 + $0x3a0] sm:$0xff]  }
  0x3a   :  { %2739 = vmatprep.subr.bf16.mxu1 %v3040_v62  ;;  %v3108_v62 = vld [vmem:[%s3949_s1 + $0x3d8] sm:$0xff]  }
  0x3b   :  { %2718 = vmatpush3.bf16.msra.mxu0 %v3039_v61  ;;  %v3107_v61 = vld [vmem:[%s3949_s1 + $0x318] sm:$0xff]  }
  0x3c   :  { %2719 = vmatprep.subr.bf16.mxu0 %v3042_v0  ;;  %v3110_v0 = vld [vmem:[%s3949_s1 + $0x350] sm:$0xff]  }
  0x3d   :  { %2740 = vmatpush3.bf16.msra.mxu1 %v3041_v63  ;;  %v3109_v63 = vld [vmem:[%s3949_s1 + $0x398] sm:$0xff]  }
  0x3e   :  { %2741 = vmatprep.subr.bf16.mxu1 %v3044_v2  ;;  %v3112_v2 = vld [vmem:[%s3949_s1 + $0x3d0] sm:$0xff]  }
  0x3f   :  { %2720 = vmatpush3.bf16.msra.mxu0 %v3043_v1  ;;  %v3111_v1 = vld [vmem:[%s3949_s1 + $0x310] sm:$0xff]  }
  0x40   :  { %2749 = vmatprep.subr.bf16.mxu0 %v3049_v6  ;;  %v3116_v6 = vld [vmem:[%s3949_s1 + $0x3c8] sm:$0xff]  }
  0x41   :  { %2742 = vmatpush3.bf16.msra.mxu1 %v3048_v5  ;;  %v3115_v5 = vld [vmem:[%s3949_s1 + $0x308] sm:$0xff]  }
  0x42   :  { %1866 = vmatmul.mubr.bf16.vlgmr.msra.gmra.mxu0 %v3045_v3  ;;  %2771 = vmatprep.subr.bf16.mxu1 %v3054_v10  ;;  %v3113_v3 = vld [vmem:[%s3949_s1 + $0x390] sm:$0xff]   ;;  %v3120_v10 = vld [vmem:[%s3949_s1 + $0x3c0] sm:$0xff]  }
  0x43   :  { %2750 = vmatpush3.bf16.msra.mxu0 %v3053_v9  ;;  %1947 = vmatprep.mubr.bf16.mxu0 %v3085_v40  ;;  %v3119_v9 = vld [vmem:[%s3949_s1 + $0x300] sm:$0xff]   ;;  %v3152_v40 = vld [vmem:[%s3949_s1 + $0x448] sm:$0xff]  }
  0x44   :  { %1907 = vmatmul.mubr.bf16.vlgmr.msra.gmra.mxu1 %v3050_v7  ;;  %2751 = vmatprep.subr.bf16.mxu0 %v3056_v12  ;;  %v3117_v7 = vld [vmem:[%s3949_s1 + $0x388] sm:$0xff]   ;;  %v3123_v12 = vld [vmem:[%s3950_s0 + $0x34] ss:$100 sps:$4 sm:$0xff]  }
  0x45   :  { %2772 = vmatpush3.bf16.msra.mxu1 %v3055_v11  ;;  %1988 = vmatprep.mubr.bf16.mxu1 %v3090_v44  ;;  %v3121_v11 = vld [vmem:[%s3950_s0 + $0x30] ss:$100 sps:$4 sm:$0xff]   ;;  %v3156_v44 = vld [vmem:[%s3949_s1 + $0x440] sm:$0xff]  }
  0x46   :  { %2773 = vmatprep.subr.bf16.mxu1 %v3058_v14  ;;  %v3125_v14 = vld [vmem:[%s3949_s1 + $0x478] sm:$0xff]  }
  0x47   :  { %2752 = vmatpush3.bf16.msra.mxu0 %v3057_v13  ;;  %v3124_v13 = vld [vmem:[%s3949_s1 + $0x380] sm:$0xff]  }
  0x48   :  { %2753 = vmatprep.subr.bf16.mxu0 %v3060_v16  ;;  %v3128_v16 = vld [vmem:[%s3950_s0 + $0x3c] ss:$100 sps:$4 sm:$0xff]  }
  0x49   :  { %2774 = vmatpush3.bf16.msra.mxu1 %v3059_v15  ;;  %v3126_v15 = vld [vmem:[%s3950_s0 + $0x38] ss:$100 sps:$4 sm:$0xff]  }
  0x4a   :  { %2775 = vmatprep.subr.bf16.mxu1 %v3062_v18  ;;  %v3130_v18 = vld [vmem:[%s3949_s1 + $0x4f8] sm:$0xff]  }
  0x4b   :  { %2754 = vmatpush3.bf16.msra.mxu0 %v3061_v17  ;;  %v3129_v17 = vld [vmem:[%s3949_s1 + $0x438] sm:$0xff]  }
  0x4c   :  { %2755 = vmatprep.subr.bf16.mxu0 %v3064_v20  ;;  %v3132_v20 = vld [vmem:[%s3949_s1 + $0x470] sm:$0xff]  }
  0x4d   :  { %2776 = vmatpush3.bf16.msra.mxu1 %v3063_v19  ;;  %v3131_v19 = vld [vmem:[%s3949_s1 + $0x4b8] sm:$0xff]  }
  0x4e   :  { %2777 = vmatprep.subr.bf16.mxu1 %v3066_v22  ;;  %v3134_v22 = vld [vmem:[%s3949_s1 + $0x4f0] sm:$0xff]  }
  0x4f   :  { %2756 = vmatpush3.bf16.msra.mxu0 %v3065_v21  ;;  %v3133_v21 = vld [vmem:[%s3949_s1 + $0x430] sm:$0xff]  }
  0x50   :  { %2757 = vmatprep.subr.bf16.mxu0 %v3068_v24  ;;  %v3136_v24 = vld [vmem:[%s3949_s1 + $0x468] sm:$0xff]  }
  0x51   :  { %2778 = vmatpush3.bf16.msra.mxu1 %v3067_v23  ;;  %v3135_v23 = vld [vmem:[%s3949_s1 + $0x4b0] sm:$0xff]  }
  0x52   :  { %2779 = vmatprep.subr.bf16.mxu1 %v3070_v26  ;;  %v3138_v26 = vld [vmem:[%s3949_s1 + $0x4e8] sm:$0xff]  }
  0x53   :  { %2758 = vmatpush3.bf16.msra.mxu0 %v3069_v25  ;;  %v3137_v25 = vld [vmem:[%s3949_s1 + $0x428] sm:$0xff]  }
  0x54   :  { %2759 = vmatprep.subr.bf16.mxu0 %v3072_v28  ;;  %v3140_v28 = vld [vmem:[%s3949_s1 + $0x460] sm:$0xff]  }
  0x55   :  { %2780 = vmatpush3.bf16.msra.mxu1 %v3071_v27  ;;  %v3139_v27 = vld [vmem:[%s3949_s1 + $0x4a8] sm:$0xff]  }
  0x56   :  { %2781 = vmatprep.subr.bf16.mxu1 %v3074_v30  ;;  %v3142_v30 = vld [vmem:[%s3949_s1 + $0x4e0] sm:$0xff]  }
  0x57   :  { %2760 = vmatpush3.bf16.msra.mxu0 %v3073_v29  ;;  %v3141_v29 = vld [vmem:[%s3949_s1 + $0x420] sm:$0xff]  }
  0x58   :  { %2761 = vmatprep.subr.bf16.mxu0 %v3076_v32  ;;  %v3144_v32 = vld [vmem:[%s3949_s1 + $0x458] sm:$0xff]  }
  0x59   :  { %2782 = vmatpush3.bf16.msra.mxu1 %v3075_v31  ;;  %v3143_v31 = vld [vmem:[%s3949_s1 + $0x4a0] sm:$0xff]  }
  0x5a   :  { %2783 = vmatprep.subr.bf16.mxu1 %v3078_v34  ;;  %v3146_v34 = vld [vmem:[%s3949_s1 + $0x4d8] sm:$0xff]  }
  0x5b   :  { %2762 = vmatpush3.bf16.msra.mxu0 %v3077_v33  ;;  %v3145_v33 = vld [vmem:[%s3949_s1 + $0x418] sm:$0xff]  }
  0x5c   :  { %2763 = vmatprep.subr.bf16.mxu0 %v3080_v36  ;;  %v3148_v36 = vld [vmem:[%s3949_s1 + $0x450] sm:$0xff]  }
  0x5d   :  { %2784 = vmatpush3.bf16.msra.mxu1 %v3079_v35  ;;  %v3147_v35 = vld [vmem:[%s3949_s1 + $0x498] sm:$0xff]  }
  0x5e   :  { %2785 = vmatprep.subr.bf16.mxu1 %v3082_v38  ;;  %v3150_v38 = vld [vmem:[%s3949_s1 + $0x4d0] sm:$0xff]  }
  0x5f   :  { %2764 = vmatpush3.bf16.msra.mxu0 %v3081_v37  ;;  %v3149_v37 = vld [vmem:[%s3949_s1 + $0x410] sm:$0xff]  }
  0x60   :  { %2793 = vmatprep.subr.bf16.mxu0 %v3087_v42  ;;  %v3154_v42 = vld [vmem:[%s3949_s1 + $0x4c8] sm:$0xff]  }
  0x61   :  { %2786 = vmatpush3.bf16.msra.mxu1 %v3086_v41  ;;  %v3153_v41 = vld [vmem:[%s3949_s1 + $0x408] sm:$0xff]  }
  0x62   :  { %1948 = vmatmul.mubr.bf16.vlgmr.msra.gmra.mxu0 %v3083_v39  ;;  %2815 = vmatprep.subr.bf16.mxu1 %v3092_v46  ;;  %v3151_v39 = vld [vmem:[%s3949_s1 + $0x490] sm:$0xff]   ;;  %v3158_v46 = vld [vmem:[%s3949_s1 + $0x4c0] sm:$0xff]  }
  0x63   :  { %2794 = vmatpush3.bf16.msra.mxu0 %v3091_v45  ;;  %2029 = vmatprep.mubr.bf16.mxu0 %v3123_v12  ;;  %v3157_v45 = vld [vmem:[%s3949_s1 + $0x400] sm:$0xff]   ;;  %v3190_v12 = vld [vmem:[%s3949_s1 + $0x548] sm:$0xff]  }
  0x64   :  { %1989 = vmatmul.mubr.bf16.vlgmr.msra.gmra.mxu1 %v3088_v43  ;;  %2795 = vmatprep.subr.bf16.mxu0 %v3094_v48  ;;  %v3155_v43 = vld [vmem:[%s3949_s1 + $0x488] sm:$0xff]  }
  0x65   :  { %2816 = vmatpush3.bf16.msra.mxu1 %v3093_v47  ;;  %2070 = vmatprep.mubr.bf16.mxu1 %v3128_v16  ;;  %v3159_v47 = vld [vmem:[%s3950_s0 + $0x40] ss:$100 sps:$4 sm:$0xff]  }
  0x66   :  { %2817 = vmatprep.subr.bf16.mxu1 %v3096_v50  ;;  %v3161_v48 = vld [vmem:[%s3950_s0 + $0x44] ss:$100 sps:$4 sm:$0xff]   ;;  %v3163_v50 = vld [vmem:[%s3949_s1 + $0x578] sm:$0xff]  }
  0x67   :  { %2796 = vmatpush3.bf16.msra.mxu0 %v3095_v49  ;;  %v3162_v49 = vld [vmem:[%s3949_s1 + $0x480] sm:$0xff]  }
  0x68   :  { %2797 = vmatprep.subr.bf16.mxu0 %v3098_v52  ;;  %v3166_v52 = vld [vmem:[%s3950_s0 + $0x4c] ss:$100 sps:$4 sm:$0xff]   ;;  %v3194_v16 = vld [vmem:[%s3949_s1 + $0x540] sm:$0xff]  }
  0x69   :  { %2818 = vmatpush3.bf16.msra.mxu1 %v3097_v51  ;;  %v3164_v51 = vld [vmem:[%s3950_s0 + $0x48] ss:$100 sps:$4 sm:$0xff]  }
  0x6a   :  { %2819 = vmatprep.subr.bf16.mxu1 %v3100_v54  ;;  %v3168_v54 = vld [vmem:[%s3949_s1 + $0x5f8] sm:$0xff]  }
  0x6b   :  { %2798 = vmatpush3.bf16.msra.mxu0 %v3099_v53  ;;  %v3167_v53 = vld [vmem:[%s3949_s1 + $0x538] sm:$0xff]  }
  0x6c   :  { %2799 = vmatprep.subr.bf16.mxu0 %v3102_v56  ;;  %v3170_v56 = vld [vmem:[%s3949_s1 + $0x570] sm:$0xff]  }
  0x6d   :  { %2820 = vmatpush3.bf16.msra.mxu1 %v3101_v55  ;;  %v3169_v55 = vld [vmem:[%s3949_s1 + $0x5b8] sm:$0xff]  }
  0x6e   :  { %2821 = vmatprep.subr.bf16.mxu1 %v3104_v58  ;;  %v3172_v58 = vld [vmem:[%s3949_s1 + $0x5f0] sm:$0xff]  }
  0x6f   :  { %2800 = vmatpush3.bf16.msra.mxu0 %v3103_v57  ;;  %v3171_v57 = vld [vmem:[%s3949_s1 + $0x530] sm:$0xff]  }
  0x70   :  { %2801 = vmatprep.subr.bf16.mxu0 %v3106_v60  ;;  %v3174_v60 = vld [vmem:[%s3949_s1 + $0x568] sm:$0xff]  }
  0x71   :  { %2822 = vmatpush3.bf16.msra.mxu1 %v3105_v59  ;;  %v3173_v59 = vld [vmem:[%s3949_s1 + $0x5b0] sm:$0xff]  }
  0x72   :  { %2823 = vmatprep.subr.bf16.mxu1 %v3108_v62  ;;  %v3176_v62 = vld [vmem:[%s3949_s1 + $0x5e8] sm:$0xff]  }
  0x73   :  { %2802 = vmatpush3.bf16.msra.mxu0 %v3107_v61  ;;  %v3175_v61 = vld [vmem:[%s3949_s1 + $0x528] sm:$0xff]  }
  0x74   :  { %2803 = vmatprep.subr.bf16.mxu0 %v3110_v0  ;;  %v3178_v0 = vld [vmem:[%s3949_s1 + $0x560] sm:$0xff]  }
  0x75   :  { %2824 = vmatpush3.bf16.msra.mxu1 %v3109_v63  ;;  %v3177_v63 = vld [vmem:[%s3949_s1 + $0x5a8] sm:$0xff]  }
  0x76   :  { %2825 = vmatprep.subr.bf16.mxu1 %v3112_v2  ;;  %v3180_v2 = vld [vmem:[%s3949_s1 + $0x5e0] sm:$0xff]  }
  0x77   :  { %2804 = vmatpush3.bf16.msra.mxu0 %v3111_v1  ;;  %v3179_v1 = vld [vmem:[%s3949_s1 + $0x520] sm:$0xff]  }
  0x78   :  { %2805 = vmatprep.subr.bf16.mxu0 %v3114_v4  ;;  %v3182_v4 = vld [vmem:[%s3949_s1 + $0x558] sm:$0xff]  }
  0x79   :  { %2826 = vmatpush3.bf16.msra.mxu1 %v3113_v3  ;;  %v3181_v3 = vld [vmem:[%s3949_s1 + $0x5a0] sm:$0xff]  }
  0x7a   :  { %2827 = vmatprep.subr.bf16.mxu1 %v3116_v6  ;;  %v3184_v6 = vld [vmem:[%s3949_s1 + $0x5d8] sm:$0xff]  }
  0x7b   :  { %2806 = vmatpush3.bf16.msra.mxu0 %v3115_v5  ;;  %v3183_v5 = vld [vmem:[%s3949_s1 + $0x518] sm:$0xff]  }
  0x7c   :  { %2807 = vmatprep.subr.bf16.mxu0 %v3118_v8  ;;  %v3186_v8 = vld [vmem:[%s3949_s1 + $0x550] sm:$0xff]  }
  0x7d   :  { %2828 = vmatpush3.bf16.msra.mxu1 %v3117_v7  ;;  %v3185_v7 = vld [vmem:[%s3949_s1 + $0x598] sm:$0xff]  }
  0x7e   :  { %2829 = vmatprep.subr.bf16.mxu1 %v3120_v10  ;;  %v3188_v10 = vld [vmem:[%s3949_s1 + $0x5d0] sm:$0xff]  }
  0x7f   :  { %2808 = vmatpush3.bf16.msra.mxu0 %v3119_v9  ;;  %v3187_v9 = vld [vmem:[%s3949_s1 + $0x510] sm:$0xff]  }
  0x80   :  { %2837 = vmatprep.subr.bf16.mxu0 %v3125_v14  ;;  %v3192_v14 = vld [vmem:[%s3949_s1 + $0x5c8] sm:$0xff]  }
  0x81   :  { %2830 = vmatpush3.bf16.msra.mxu1 %v3124_v13  ;;  %v3191_v13 = vld [vmem:[%s3949_s1 + $0x508] sm:$0xff]  }
  0x82   :  { %2030 = vmatmul.mubr.bf16.vlgmr.msra.gmra.mxu0 %v3121_v11  ;;  %2859 = vmatprep.subr.bf16.mxu1 %v3130_v18  ;;  %v3189_v11 = vld [vmem:[%s3949_s1 + $0x590] sm:$0xff]   ;;  %v3196_v18 = vld [vmem:[%s3949_s1 + $0x5c0] sm:$0xff]  }
  0x83   :  { %2838 = vmatpush3.bf16.msra.mxu0 %v3129_v17  ;;  %2111 = vmatprep.mubr.bf16.mxu0 %v3161_v48  ;;  %v3195_v17 = vld [vmem:[%s3949_s1 + $0x500] sm:$0xff]  }
  0x84   :  { %2071 = vmatmul.mubr.bf16.vlgmr.msra.gmra.mxu1 %v3126_v15  ;;  %2839 = vmatprep.subr.bf16.mxu0 %v3132_v20  ;;  %v3193_v15 = vld [vmem:[%s3949_s1 + $0x588] sm:$0xff]   ;;  %v3199_v20 = vld [vmem:[%s3950_s0 + $0x54] ss:$100 sps:$4 sm:$0xff]  }
  0x85   :  { %2860 = vmatpush3.bf16.msra.mxu1 %v3131_v19  ;;  %2152 = vmatprep.mubr.bf16.mxu1 %v3166_v52  ;;  %v3197_v19 = vld [vmem:[%s3950_s0 + $0x50] ss:$100 sps:$4 sm:$0xff]  }
  0x86   :  { %2861 = vmatprep.subr.bf16.mxu1 %v3134_v22  ;;  %v3217_v22 = vmov 0.0  }
  0x87   :  { %2840 = vmatpush3.bf16.msra.mxu0 %v3133_v21  ;;  %v3200_v21 = vld [vmem:[%s3949_s1 + $0x580] sm:$0xff]  }
  0x88   :  { %2841 = vmatprep.subr.bf16.mxu0 %v3136_v24  ;;  %v3203_v24 = vld [vmem:[%s3950_s0 + $0x5c] ss:$100 sps:$4 sm:$0xff]  }
  0x89   :  { %2862 = vmatpush3.bf16.msra.mxu1 %v3135_v23  ;;  %v3201_v23 = vld [vmem:[%s3950_s0 + $0x58] ss:$100 sps:$4 sm:$0xff]  }
  0x8a   :  { %2863 = vmatprep.subr.bf16.mxu1 %v3138_v26  ;;  %v3205_v26 = vld [vmem:[%s3949_s1 + $0x610] sm:$0xff]  }
  0x8b   :  { %2842 = vmatpush3.bf16.msra.mxu0 %v3137_v25  ;;  %v3204_v25 = vld [vmem:[%s3949_s1 + $0x618] sm:$0xff]  }
  0x8c   :  { %2843 = vmatprep.subr.bf16.mxu0 %v3140_v28  ;;  %v3207_v28 = vld [vmem:[%s3949_s1 + $0x600] sm:$0xff]  }
  0x8d   :  { %2864 = vmatpush3.bf16.msra.mxu1 %v3139_v27  ;;  %v3206_v27 = vld [vmem:[%s3949_s1 + $0x608] sm:$0xff]  }
  0x8e   :  { %2865 = vmatprep.subr.bf16.mxu1 %v3142_v30  ;;  %v3209_v30 = vld [vmem:[%s3951_s3 + $0x38] sm:$0xff]  }
  0x8f   :  { %2844 = vmatpush3.bf16.msra.mxu0 %v3141_v29  ;;  %v3208_v29 = vld [vmem:[%s3950_s0 + $0x60] ss:$100 sps:$4 sm:$0xff]  }
  0x90   :  { %2845 = vmatprep.subr.bf16.mxu0 %v3144_v32  ;;  %v3211_v32 = vld [vmem:[%s3951_s3 + $0x28] sm:$0xff]  }
  0x91   :  { %2866 = vmatpush3.bf16.msra.mxu1 %v3143_v31  ;;  %v3210_v31 = vld [vmem:[%s3951_s3 + $0x30] sm:$0xff]  }
  0x92   :  { %2867 = vmatprep.subr.bf16.mxu1 %v3146_v34  ;;  %v3213_v34 = vld [vmem:[%s3951_s3 + $0x18] sm:$0xff]  }
  0x93   :  { %2846 = vmatpush3.bf16.msra.mxu0 %v3145_v33  ;;  %v3212_v33 = vld [vmem:[%s3951_s3 + $0x20] sm:$0xff]  }
  0x94   :  { %2847 = vmatprep.subr.bf16.mxu0 %v3148_v36  ;;  %v3215_v36 = vld [vmem:[%s3951_s3 + $0x8] sm:$0xff]  }
  0x95   :  { %2868 = vmatpush3.bf16.msra.mxu1 %v3147_v35  ;;  %v3214_v35 = vld [vmem:[%s3951_s3 + $0x10] sm:$0xff]  }
  0x96   :  { %2869 = vmatprep.subr.bf16.mxu1 %v3150_v38 }
  0x97   :  { %2848 = vmatpush3.bf16.msra.mxu0 %v3149_v37  ;;  %v3216_v37 = vld [vmem:[%s3951_s3] sm:$0xff]  }
  0x98   :  { %2849 = vmatprep.subr.bf16.mxu0 %v3152_v40 }
  0x99   :  { %2870 = vmatpush3.bf16.msra.mxu1 %v3151_v39 }
  0x9a   :  { %2871 = vmatprep.subr.bf16.mxu1 %v3154_v42 }
  0x9b   :  { %2850 = vmatpush3.bf16.msra.mxu0 %v3153_v41 }
  0x9c   :  { %2851 = vmatprep.subr.bf16.mxu0 %v3156_v44 }
  0x9d   :  { %2872 = vmatpush3.bf16.msra.mxu1 %v3155_v43 }
  0x9e   :  { %2873 = vmatprep.subr.bf16.mxu1 %v3158_v46 }
  0x9f   :  { %2852 = vmatpush3.bf16.msra.mxu0 %v3157_v45 }
  0xa0   :  { %2881 = vmatprep.subr.bf16.mxu0 %v3163_v50 }
  0xa1   :  { %2874 = vmatpush3.bf16.msra.mxu1 %v3162_v49 }
  0xa2   :  { %2112 = vmatmul.mubr.bf16.vlgmr.msra.gmra.mxu0 %v3159_v47  ;;  %2903 = vmatprep.subr.bf16.mxu1 %v3168_v54 }
  0xa3   :  { %2882 = vmatpush3.bf16.msra.mxu0 %v3167_v53  ;;  %2193 = vmatprep.mubr.bf16.mxu0 %v3199_v20 }
  0xa4   :  { %2153 = vmatmul.mubr.bf16.vlgmr.msra.gmra.mxu1 %v3164_v51  ;;  %2883 = vmatprep.subr.bf16.mxu0 %v3170_v56 }
  0xa5   :  { %2904 = vmatpush3.bf16.msra.mxu1 %v3169_v55  ;;  %2234 = vmatprep.mubr.bf16.mxu1 %v3203_v24 }
  0xa6   :  { %2905 = vmatprep.subr.bf16.mxu1 %v3172_v58 }
  0xa7   :  { %2884 = vmatpush3.bf16.msra.mxu0 %v3171_v57 }
  0xa8   :  { %2885 = vmatprep.subr.bf16.mxu0 %v3174_v60 }
  0xa9   :  { %2906 = vmatpush3.bf16.msra.mxu1 %v3173_v59 }
  0xaa   :  { %2907 = vmatprep.subr.bf16.mxu1 %v3176_v62 }
  0xab   :  { %2886 = vmatpush3.bf16.msra.mxu0 %v3175_v61 }
  0xac   :  { %2887 = vmatprep.subr.bf16.mxu0 %v3178_v0 }
  0xad   :  { %2908 = vmatpush3.bf16.msra.mxu1 %v3177_v63 }
  0xae   :  { %2909 = vmatprep.subr.bf16.mxu1 %v3180_v2 }
  0xaf   :  { %2888 = vmatpush3.bf16.msra.mxu0 %v3179_v1 }
  0xb0   :  { %2889 = vmatprep.subr.bf16.mxu0 %v3182_v4  ;;  %v2429_v4 = vld [vmem:[%s3952_s2] ss:$0 sm:$0xff] }
  0xb1   :  { %2910 = vmatpush3.bf16.msra.mxu1 %v3181_v3 }
  0xb2   :  { %2911 = vmatprep.subr.bf16.mxu1 %v3184_v6 }
  0xb3   :  { %2890 = vmatpush3.bf16.msra.mxu0 %v3183_v5 }
  0xb4   :  { %2891 = vmatprep.subr.bf16.mxu0 %v3186_v8 }
  0xb5   :  { %2912 = vmatpush3.bf16.msra.mxu1 %v3185_v7 }
  0xb6   :  { %2913 = vmatprep.subr.bf16.mxu1 %v3188_v10 }
  0xb7   :  { %2892 = vmatpush3.bf16.msra.mxu0 %v3187_v9 }
  0xb8   :  { %2893 = vmatprep.subr.bf16.mxu0 %v3190_v12 }
  0xb9   :  { %2914 = vmatpush3.bf16.msra.mxu1 %v3189_v11 }
  0xba   :  { %2915 = vmatprep.subr.bf16.mxu1 %v3192_v14 }
  0xbb   :  { %2894 = vmatpush3.bf16.msra.mxu0 %v3191_v13 }
  0xbc   :  { %2895 = vmatprep.subr.bf16.mxu0 %v3194_v16 }
  0xbd   :  { %2916 = vmatpush3.bf16.msra.mxu1 %v3193_v15 }
  0xbe   :  { %2917 = vmatprep.subr.bf16.mxu1 %v3196_v18 }
  0xbf   :  { %2896 = vmatpush3.bf16.msra.mxu0 %v3195_v17 }
  0xc0   :  { %2939 = vmatprep.subr.bf16.mxu0 %v3217_v22 }
  0xc1   :  { %2918 = vmatpush3.bf16.msra.mxu1 %v3200_v21 }
  0xc2   :  { %2194 = vmatmul.mubr.bf16.vlgmr.msra.gmra.mxu0 %v3197_v19  ;;  %2951 = vmatprep.subr.bf16.mxu1 %v3217_v22 }
  0xc3   :  { %2947 = vmatprep.mubr.msk.bf16.mxu0 %vm3218_vm0, %v3217_v22  ;;  %2940 = vmatpush3.bf16.msra.mxu0 %v3204_v25 }
  0xc4   :  { %2235 = vmatmul.mubr.bf16.vlgmr.msra.gmra.mxu1 %v3201_v23  ;;  %2941 = vmatprep.subr.bf16.mxu0 %v3217_v22 }
  0xc5   :  { %2967 = vmatprep.mubr.msk.bf16.mxu1 %vm3218_vm0, %v3217_v22  ;;  %2952 = vmatpush3.bf16.msra.mxu1 %v3209_v30 }
  0xc6   :  { %2953 = vmatprep.subr.bf16.mxu1 %v3217_v22 }
  0xc7   :  { %2942 = vmatpush3.bf16.msra.mxu0 %v3205_v26 }
  0xc8   :  { %2943 = vmatprep.subr.bf16.mxu0 %v3217_v22 }
  0xc9   :  { %2954 = vmatpush3.bf16.msra.mxu1 %v3210_v31 }
  0xca   :  { %2955 = vmatprep.subr.bf16.mxu1 %v3217_v22 }
  0xcb   :  { %2944 = vmatpush3.bf16.msra.mxu0 %v3206_v27 }
  0xcc   :  { %2945 = vmatprep.subr.bf16.mxu0 %v3217_v22 }
  0xcd   :  { %2956 = vmatpush3.bf16.msra.mxu1 %v3211_v32 }
  0xce   :  { %2957 = vmatprep.subr.bf16.mxu1 %v3217_v22 }
  0xcf   :  { %2946 = vmatpush3.bf16.msra.mxu0 %v3207_v28 }
  0xd1   :  { %2958 = vmatpush3.bf16.msra.mxu1 %v3212_v33 }
  0xd2   :  { %2948 = vmatmul.mubr.msk.bf16.vlgmr.msra.gmra.mxu0 %vm1747_vm1, %v3208_v29  ;;  %2959 = vmatprep.subr.bf16.mxu1 %v3217_v22 }
  0xd5   :  { %2960 = vmatpush3.bf16.msra.mxu1 %v3213_v34 }
  0xd6   :  { %2961 = vmatprep.subr.bf16.mxu1 %v3217_v22 }
  0xd9   :  { %2962 = vmatpush3.bf16.msra.mxu1 %v3214_v35 }
  0xda   :  { %2963 = vmatprep.subr.bf16.mxu1 %v3217_v22 }
  0xdd   :  { %2964 = vmatpush3.bf16.msra.mxu1 %v3215_v36 }
  0xde   :  { %2965 = vmatprep.subr.bf16.mxu1 %v3217_v22 }
  0xe1   :  { %2966 = vmatpush3.bf16.msra.mxu1 %v3216_v37 }
  0xe2   :  { %v2677_v38 = vpop.f32.mrf.mxu0 }
  0xe4   :  { %v2699_v39 = vpop.f32.mrf.mxu1  ;;  %v2678_v40 = vpop.f32.mrf.mxu0 }
  0xe5   :  { %v2679_v2 = vadd.f32 %v2678_v40, %v2677_v38 }
  0xe6   :  { %v2700_v41 = vpop.f32.mrf.mxu1  ;;  %v2680_v42 = vpop.f32.mrf.mxu0 }
  0xe7   :  { %v1786_v7 = vadd.f32 %v2679_v2, %v2429_v4  ;;  %v2701_v8 = vadd.f32 %v2700_v41, %v2699_v39 }
  0xe8   :  { %v2702_v43 = vpop.f32.mrf.mxu1  ;;  %v2681_v44 = vpop.f32.mrf.mxu0 }
  0xe9   :  { %v2682_v5 = vadd.f32 %v2681_v44, %v2680_v42  ;;  %v1827_v15 = vadd.f32 %v2701_v8, %v1786_v7 }
  0xea   :  { %v2703_v46 = vpop.f32.mrf.mxu1 }
  0xeb   :  { %v1789_v10 = vadd.f32 %v2682_v5, %v2429_v4  ;;  %v2704_v11 = vadd.f32 %v2703_v46, %v2702_v43 }
  0xed   :  { %v1830_v18 = vadd.f32 %v2704_v11, %v1789_v10 }
 0x102   :  { %v2721_v45 = vpop.f32.mrf.mxu0 }
 0x104   :  { %v2743_v47 = vpop.f32.mrf.mxu1  ;;  %v2722_v48 = vpop.f32.mrf.mxu0 }
 0x105   :  { %v2723_v12 = vadd.f32 %v2722_v48, %v2721_v45 }
 0x106   :  { %v2744_v49 = vpop.f32.mrf.mxu1  ;;  %v2724_v50 = vpop.f32.mrf.mxu0 }
 0x107   :  { %v1868_v19 = vadd.f32 %v2723_v12, %v1827_v15  ;;  %v2745_v20 = vadd.f32 %v2744_v49, %v2743_v47 }
 0x108   :  { %v2746_v51 = vpop.f32.mrf.mxu1  ;;  %v2725_v52 = vpop.f32.mrf.mxu0 }
 0x109   :  { %v2726_v16 = vadd.f32 %v2725_v52, %v2724_v50  ;;  %v1909_v26 = vadd.f32 %v2745_v20, %v1868_v19 }
 0x10a   :  { %v2747_v54 = vpop.f32.mrf.mxu1 }
 0x10b   :  { %v1871_v22 = vadd.f32 %v2726_v16, %v1830_v18  ;;  %v2748_v23 = vadd.f32 %v2747_v54, %v2746_v51  ;;  %v3219_v16 = vmov 6  }
 0x10c   :  { %2974 = vset.pattern.permute.xlu1 %v3219_v16  ;;  %2975 = vset.pattern.permute.xlu0 %v3219_v16 }
 0x10d   :  { %v1912_v29 = vadd.f32 %v2748_v23, %v1871_v22 }
 0x122   :  { %v2765_v53 = vpop.f32.mrf.mxu0 }
 0x124   :  { %v2787_v55 = vpop.f32.mrf.mxu1  ;;  %v2766_v56 = vpop.f32.mrf.mxu0 }
 0x125   :  { %v2767_v24 = vadd.f32 %v2766_v56, %v2765_v53 }
 0x126   :  { %v2788_v57 = vpop.f32.mrf.mxu1  ;;  %v2768_v58 = vpop.f32.mrf.mxu0 }
 0x127   :  { %v1950_v30 = vadd.f32 %v2767_v24, %v1909_v26  ;;  %v2789_v31 = vadd.f32 %v2788_v57, %v2787_v55 }
 0x128   :  { %v2790_v59 = vpop.f32.mrf.mxu1  ;;  %v2769_v60 = vpop.f32.mrf.mxu0 }
 0x129   :  { %v2770_v27 = vadd.f32 %v2769_v60, %v2768_v58  ;;  %v1991_v37 = vadd.f32 %v2789_v31, %v1950_v30 }
 0x12a   :  { %v2791_v62 = vpop.f32.mrf.mxu1 }
 0x12b   :  { %v1953_v33 = vadd.f32 %v2770_v27, %v1912_v29  ;;  %v2792_v34 = vadd.f32 %v2791_v62, %v2790_v59 }
 0x12d   :  { %v1994_v41 = vadd.f32 %v2792_v34, %v1953_v33 }
 0x142   :  { %v2809_v61 = vpop.f32.mrf.mxu0 }
 0x144   :  { %v2831_v63 = vpop.f32.mrf.mxu1  ;;  %v2810_v0 = vpop.f32.mrf.mxu0 }
 0x145   :  { %v2811_v35 = vadd.f32 %v2810_v0, %v2809_v61 }
 0x146   :  { %v2832_v1 = vpop.f32.mrf.mxu1  ;;  %v2812_v3 = vpop.f32.mrf.mxu0 }
 0x147   :  { %v2032_v42 = vadd.f32 %v2811_v35, %v1991_v37  ;;  %v2833_v43 = vadd.f32 %v2832_v1, %v2831_v63 }
 0x148   :  { %v2834_v6 = vpop.f32.mrf.mxu1  ;;  %v2813_v9 = vpop.f32.mrf.mxu0 }
 0x149   :  { %v2814_v38 = vadd.f32 %v2813_v9, %v2812_v3  ;;  %v2073_v51 = vadd.f32 %v2833_v43, %v2032_v42 }
 0x14a   :  { %v2835_v14 = vpop.f32.mrf.mxu1 }
 0x14b   :  { %v2035_v46 = vadd.f32 %v2814_v38, %v1994_v41  ;;  %v2836_v47 = vadd.f32 %v2835_v14, %v2834_v6 }
 0x14d   :  { %v2076_v53 = vadd.f32 %v2836_v47, %v2035_v46 }
 0x162   :  { %v2853_v13 = vpop.f32.mrf.mxu0 }
 0x164   :  { %v2875_v17 = vpop.f32.mrf.mxu1  ;;  %v2854_v21 = vpop.f32.mrf.mxu0 }
 0x165   :  { %v2855_v48 = vadd.f32 %v2854_v21, %v2853_v13 }
 0x166   :  { %v2876_v25 = vpop.f32.mrf.mxu1  ;;  %v2856_v28 = vpop.f32.mrf.mxu0 }
 0x167   :  { %v2114_v54 = vadd.f32 %v2855_v48, %v2073_v51  ;;  %v2877_v55 = vadd.f32 %v2876_v25, %v2875_v17  ;;  %v2652_v17 = vld [vmem:[%s3953_s4] ss:$0 sm:$0xff] }
 0x168   :  { %v2878_v32 = vpop.f32.mrf.mxu1  ;;  %v2857_v36 = vpop.f32.mrf.mxu0 }
 0x169   :  { %v2858_v52 = vadd.f32 %v2857_v36, %v2856_v28  ;;  %v2155_v61 = vadd.f32 %v2877_v55, %v2114_v54 }
 0x16a   :  { %v2879_v40 = vpop.f32.mrf.mxu1 }
 0x16b   :  { %v2117_v58 = vadd.f32 %v2858_v52, %v2076_v53  ;;  %v2880_v59 = vadd.f32 %v2879_v40, %v2878_v32 }
 0x16d   :  { %v2158_v0 = vadd.f32 %v2880_v59, %v2117_v58 }
 0x182   :  { %v2897_v39 = vpop.f32.mrf.mxu0 }
 0x184   :  { %v2898_v44 = vpop.f32.mrf.mxu0  ;;  %v2919_v45 = vpop.f32.mrf.mxu1 }
 0x185   :  { %v2899_v60 = vadd.f32 %v2898_v44, %v2897_v39 }
 0x186   :  { %v2900_v49 = vpop.f32.mrf.mxu0  ;;  %v2920_v50 = vpop.f32.mrf.mxu1 }
 0x187   :  { %v2196_v1 = vadd.f32 %v2899_v60, %v2155_v61  ;;  %v2921_v2 = vadd.f32 %v2920_v50, %v2919_v45 }
 0x188   :  { %v2901_v56 = vpop.f32.mrf.mxu0  ;;  %v2922_v57 = vpop.f32.mrf.mxu1 }
 0x189   :  { %v2902_v62 = vadd.f32 %v2901_v56, %v2900_v49  ;;  %v2237_v6 = vadd.f32 %v2921_v2, %v2196_v1 }
 0x18a   :  { %v2923_v63 = vpop.f32.mrf.mxu1 }
 0x18b   :  { %v2199_v3 = vadd.f32 %v2902_v62, %v2158_v0  ;;  %v2924_v4 = vadd.f32 %v2923_v63, %v2922_v57 }
 0x18d   :  { %v2240_v9 = vadd.f32 %v2924_v4, %v2199_v3 }
 0x192   :  { %v2277_v5 = vpop.f32.mrf.mxu0 }
 0x193   :  { %v2278_v8 = vadd.f32 %v2277_v5, %v2237_v6 }
 0x194   :  { %v2949_v7 = vpop.f32.mrf.mxu0 }
 0x195   :  { %v2284_v13 = vmax.f32 %v2278_v8, 0.0 }
 0x196   :  { %v2280_v10 = vpop.f32.mrf.mxu0 }
 0x197   :  { %v2281_v11 = vadd.f32 %v2280_v10, %v2240_v9 }
 0x198   :  { %v2950_v12 = vpop.f32.mrf.mxu0 }
 0x199   :  { %v2285_v14 = vmax.f32 %v2281_v11, 0.0 }
 0x19b   :  { %v2286_v15 = vpack.c.bf16 %v2285_v14, %v2284_v13 }
 0x19d   :  { %2968 = vmatmul.mubr.bf16.vlgmr.msra.gmra.mxu1 %v2286_v15 }
 0x25d   :  { %v2392_v18 = vpop.f32.mrf.mxu1 }
 0x25e   :  { %v2393_v19 = vadd.f32 %v2652_v17, %v2392_v18 }
 0x25f   :  { %v2969_v20 = vpop.f32.mrf.mxu1 }
 0x260   :  { %2413 = vperm.xlu1 %2974, %v2393_v19   ;;  %v2400_v21 = vsel %vm2399_vm2, %v2393_v19, 0.0 }
 0x261   :  { %2401 = vadd.xlane.f32.xlu0 %v2400_v21  ;;  %v2395_v22 = vpop.f32.mrf.mxu1 }
 0x262   :  { %v2396_v23 = vadd.f32 %v2652_v17, %v2395_v22 }
 0x263   :  { %v2970_v24 = vpop.f32.mrf.mxu1 }
 0x264   :  { %2418 = vperm.xlu1 %2974, %v2396_v23   ;;  %v2403_v25 = vsel %vm2399_vm2, %v2396_v23, 0.0 }
 0x265   :  { %2404 = vadd.xlane.f32.xlu0 %v2403_v25 }
 0x2db   :  { %v2414_v28 = vpop.permute.xlu1 %2413 }
 0x2df   :  { %v2419_v34 = vpop.permute.xlu1 %2418 }
 0x2ea   :  { %v2402_v26 = vpop.xlane.xlu0 %2401 }
 0x2eb   :  { %v2407_v27 = vmul.f32 0.16666667, %v2402_v26 }
 0x2ed   :  { %v2409_v29 = vsub.f32 %v2393_v19, %v2407_v27 }
 0x2ee   :  { %v2405_v30 = vpop.xlane.xlu0 %2404 }
 0x2ef   :  { %v2421_v31 = vadd.f32 %v2414_v28, %v2409_v29  ;;  %v2408_v32 = vmul.f32 0.16666667, %v2405_v30 }
 0x2f1   :  { %2423 = vst [vmem:[%s3954_s5] sm:$0xff] %v2421_v31  ;;  %v2410_v33 = vsub.f32 %v2396_v23, %v2408_v32 }
 0x2f3   :  { %v2422_v35 = vadd.f32 %v2419_v34, %v2410_v33 }
 0x2f5   :  { %2424 = vst [vmem:[%s3954_s5 + $0x8] sm:$0xff] %v2422_v35 }

// kernel: duel_q_net_pallas.2
= control target key start
LH: loop header
LB: loop body
LE: loop exit
PB: predicated region body
PF: predicated region fallthrough
CT: control target
= control target key end

     0   :  { %s12673_s24 = smov 0   ;;  %s16195_s0 = inlined_call_operand.vmem [shape: bf16[2,11,11,256], index: 0, kind: input, shape index: {}]   ;;  %s16196_s1 = inlined_call_operand.vmem [shape: bf16[256,32], index: 1, kind: input, shape index: {}]   ;;  %s16197_s2 = inlined_call_operand.vmem [shape: f32[1,32], index: 2, kind: input, shape index: {}]   ;;  %s16198_s3 = inlined_call_operand.vmem [shape: bf16[512,64], index: 3, kind: input, shape index: {}]   ;;  %s16199_s4 = inlined_call_operand.vmem [shape: f32[1,64], index: 4, kind: input, shape index: {}]   ;;  %s16200_s5 = inlined_call_operand.vmem [shape: bf16[576,64], index: 5, kind: input, shape index: {}]   ;;  %s16201_s6 = inlined_call_operand.vmem [shape: f32[1,64], index: 6, kind: input, shape index: {}]   ;;  %s16202_s7 = inlined_call_operand.vmem [shape: bf16[2,49,64], index: 7, kind: output, shape index: {}]  }
   0x1 LB: > { %s11732_s25 = sadd.s32 4294967295, %s12627_s24   ;;  %p11736_p0 = scmp.ge.s32.totalorder %s12627_s24, 1  ;;  %s12627_s24 = sphi %s12673_s24, %s17_s24  }
   0x2   : > { %p237_p1 = scmp.lt.s32.totalorder %s12627_s24, 3 }
   0x4   : > { %p238_p2 = pnand %p11736_p0, %p237_p1 }
   0x6   : > { %241 = sbr.rel (%p238_p2) target bundleno = 1316 (0x524), region = 48 }
   0xb   : > { %p269_p3 = scmp.lt.s32.totalorder %s11732_s25, 1  ;;  %v428_v0 = vlaneseq  ;;  %v12629_v1 = vmov 1966171168   ;;  %v12684_v3 = vld [vmem:[%s16196_s1 + $0x78] sm:$0xff]   ;;  %v12696_v6 = vld [vmem:[%s16196_s1 + $0x70] sm:$0xff]   ;;  %v12712_v9 = vld [vmem:[%s16196_s1 + $0x68] sm:$0xff]  }
   0xc   : > { %v426_v2 = vunpack.c.l.s4 %v12629_v1  ;;  %v12691_v5 = vld [vmem:[%s16196_s1 + $0x38] sm:$0xff]   ;;  %12037 = vmatprep.subr.bf16.mxu0 %v12684_v3  ;;  %12095 = vmatprep.subr.bf16.mxu1 %v12684_v3  ;;  %v12705_v8 = vld [vmem:[%s16196_s1 + $0x30] sm:$0xff]   ;;  %v12723_v10 = vld [vmem:[%s16196_s1 + $0x28] sm:$0xff]   ;;  %s12630_s19 = smov 64   ;;  %vm382_vm0 = vcmask 523264   ;;  %s12631_s13 = smov 32  }
   0xd   : > { %s16335_s25 = smov (!%p269_p3, %s11732_s25), 1  ;;  %v429_v4 = vshrl.u32 %v428_v0, 7  ;;  %12038 = vmatpush3.bf16.msra.mxu0 %v12691_v5  ;;  %12096 = vmatpush3.bf16.msra.mxu1 %v12691_v5  ;;  %v12789_v35 = vld [vmem:[%s16196_s1 + $0x60] sm:$0xff]   ;;  %v12814_v47 = vld [vmem:[%s16196_s1 + $0x58] sm:$0xff]   ;;  %vm7535_vm1 = vcmask 261120   ;;  %vm7586_vm2 = vcmask 785408  }
   0xe   : > { %v427_v7 = vunpack.c.0.s8 %v426_v2  ;;  %s12485_s9 = smul.u32 176, %s16335_s25  ;;  %12039 = vmatprep.subr.bf16.mxu0 %v12696_v6  ;;  %12097 = vmatprep.subr.bf16.mxu1 %v12696_v6  ;;  %v12809_v46 = vld [vmem:[%s16196_s1 + $0x20] sm:$0xff]   ;;  %v12849_v62 = vld [vmem:[%s16196_s1 + $0x18] sm:$0xff]   ;;  %vm11671_vm3 = vcmask 516096   ;;  %vm11672_vm4 = vsmask.f32 256 }
   0xf   : > { %16248 = vst [vmem:[#allocation14_spill] sm:$0xff] %v12849_v62  ;;  %s12486_s20 = smul.u32 28, %s16335_s25  ;;  %vm11664_vm5 = vcmask 519168   ;;  %vm16172_vm6 = vmand %vm11671_vm3, %vm11672_vm4 }
  0x10   : > { %s12718_s16 = scalar_lea.vmem %s16195_s0, %s12485_s9  ;;  %v12729_v13 = vsub.s32 %v427_v7, %v429_v4  ;;  %v12865_v4 = vld [vmem:[%s16196_s1 + $0x50] sm:$0xff]  }
  0x11   : > { %v280_v11 = vld [vmem:[%s12718_s16] sm:$0xff]  ;;  %v12727_v12 = vld [vmem:[%s12718_s16 + $0x8] sm:$0x33]  ;;  %v12732_v14 = vld [vmem:[%s12718_s16 + $0x10] sm:$0xff]  ;;  %12040 = vmatpush3.bf16.msra.mxu0 %v12705_v8  ;;  %12098 = vmatpush3.bf16.msra.mxu1 %v12705_v8  ;;  %16249 = vst [vmem:[#allocation15_spill] sm:$0xff] %v12865_v4  ;;  %s16168_s23 = scalar_lea.vmem %s16202_s7, %s12486_s20 }
  0x12   : > { %16236 = vst [vmem:[#allocation2_spill] sm:$0xff] %v12727_v12  ;;  %16237 = vst [vmem:[#allocation3_spill] sm:$0xff] %v12732_v14  ;;  %v11739_v15 = vcombine.low %v280_v11, %v12727_v12  ;;  %v12736_v16 = vld [vmem:[%s12718_s16 + $0x18] sm:$0x33]  ;;  %v12739_v17 = vcombine.high %v280_v11, %v12727_v12  ;;  %v12742_v18 = vld [vmem:[%s12718_s16 + $0x20] sm:$0xff]  ;;  %12041 = vmatprep.subr.bf16.mxu0 %v12712_v9  ;;  %v12766_v26 = vrot.slane %v280_v11, %v12729_v13 }
  0x13   : > { %16239 = vst [vmem:[#allocation5_spill] sm:$0xff] %v12742_v18  ;;  %v12745_v19 = vld [vmem:[%s12718_s16 + $0x28] sm:$0x33]  ;;  %v12750_v20 = vcombine.high %v12732_v14, %v12736_v16  ;;  %v12754_v21 = vcombine.low %v12732_v14, %v12736_v16  ;;  %v12775_v30 = vld [vmem:[%s12718_s16 + $0x30] sm:$0xff]  ;;  %v12778_v31 = vld [vmem:[%s12718_s16 + $0x38] sm:$0x33]  ;;  %12099 = vmatprep.subr.bf16.mxu1 %v12712_v9  ;;  %v12835_v57 = vrot.slane %v12742_v18, %v12729_v13 }
  0x14   : > { %16238 = vst [vmem:[#allocation4_spill] sm:$0xff] %v12739_v17  ;;  %1822 = vrot.lane.b32.xlu0 %v11739_v15, %s12630_s19  ;;  %v1842_v22 = vshrl.u32 %v11739_v15, 16  ;;  %v1844_v23 = vshll.u32 %v11739_v15, 16  ;;  %v12762_v25 = vcombine.low %v12742_v18, %v12745_v19  ;;  %16243 = vst [vmem:[#allocation9_spill] sm:$0xff] %v12775_v30  ;;  %v1942_v42 = vshrl.u32 %v12739_v17, 16  ;;  %v12803_v45 = vld [vmem:[%s12718_s16 + $0x40] sm:$0xff] }
  0x15   : > { %16240 = vst [vmem:[#allocation6_spill] sm:$0xff] %v12750_v20  ;;  %16241 = vst [vmem:[#allocation7_spill] sm:$0xff] %v12754_v21  ;;  %1924 = vrot.lane.b32.xlu1 %v12750_v20, %s12630_s19  ;;  %v1848_v28 = vshrl.u32 %v12754_v21, 16  ;;  %v1850_v29 = vshll.u32 %v12754_v21, 16  ;;  %12042 = vmatpush3.bf16.msra.mxu0 %v12723_v10  ;;  %v1948_v39 = vshrl.u32 %v12750_v20, 16  ;;  %v1950_v40 = vshll.u32 %v12750_v20, 16 }
  0x16   : > { %16242 = vst [vmem:[#allocation8_spill] sm:$0xff] %v12762_v25  ;;  %v1846_v32 = vrot.slane %v1844_v23, 1  ;;  %v1944_v43 = vshll.u32 %v12739_v17, 16  ;;  %v1856_v44 = vshll.u32 %v12762_v25, 16  ;;  %16244 = vst [vmem:[#allocation10_spill] sm:$0xff] %v12803_v45  ;;  %12043 = vmatprep.subr.bf16.mxu0 %v12789_v35  ;;  %v1854_v49 = vshrl.u32 %v12762_v25, 16  ;;  %12100 = vmatpush3.bf16.msra.mxu1 %v12723_v10 }
  0x17   : > { %v1852_v38 = vrot.slane %v1850_v29, 1  ;;  %v1952_v48 = vrot.slane %v1950_v40, 1  ;;  %v12819_v50 = vcombine.high %v12742_v18, %v12745_v19  ;;  %v12823_v51 = vcombine.low %v12775_v30, %v12778_v31  ;;  %v12826_v52 = vld [vmem:[%s12718_s16 + $0x48] sm:$0x33]  ;;  %v12843_v61 = vld [vmem:[%s12718_s16 + $0x50] sm:$0xff]  ;;  %12101 = vmatprep.subr.bf16.mxu1 %v12789_v35 }
  0x18   : > { %1824 = vrot.lane.b32.xlu0 %v12754_v21, %s12630_s19  ;;  %v1847_v41 = vor.u32 %v1846_v32, %v1842_v22  ;;  %v1946_v55 = vrot.slane %v1944_v43, 1  ;;  %v1858_v56 = vrot.slane %v1856_v44, 1  ;;  %16247 = vst [vmem:[#allocation13_spill] sm:$0xff] %v12843_v61  ;;  %v12856_v0 = vrot.slane %v12775_v30, %v12729_v13  ;;  %v12878_v23 = vld [vmem:[%s12718_s16 + $0x58] sm:$0x33] }
  0x19   : > { %16245 = vst [vmem:[#allocation11_spill] sm:$0xff] %v12819_v50  ;;  %16246 = vst [vmem:[#allocation12_spill] sm:$0xff] %v12823_v51  ;;  %v1853_v54 = vor.u32 %v1852_v38, %v1848_v28  ;;  %12044 = vmatpush3.bf16.msra.mxu0 %v12809_v46  ;;  %v1956_v59 = vshll.u32 %v12819_v50, 16  ;;  %v1953_v63 = vor.u32 %v1952_v48, %v1948_v39  ;;  %v1954_v7 = vshrl.u32 %v12819_v50, 16  ;;  %v12923_v60 = vld [vmem:[%s12718_s16 + $0x68] sm:$0x33] }
  0x1a   : > { %1902 = vrot.lane.b32.xlu1 %v1847_v41, %s12630_s19  ;;  %12045 = vmatprep.subr.bf16.mxu0 %v12814_v47  ;;  %v1862_v11 = vshll.u32 %v12823_v51, 16  ;;  %v12871_v15 = vcombine.high %v12775_v30, %v12778_v31  ;;  %v12875_v22 = vcombine.low %v12803_v45, %v12826_v52  ;;  %v1947_v28 = vor.u32 %v1946_v55, %v1942_v42  ;;  %v12896_v42 = vld [vmem:[%s16196_s1 + $0x10] sm:$0xff]   ;;  %v12911_v55 = vld [vmem:[%s12718_s16 + $0x60] sm:$0xff] }
  0x1b   : > { %12102 = vmatpush3.bf16.msra.mxu1 %v12809_v46  ;;  %v1859_v29 = vor.u32 %v1858_v56, %v1854_v49  ;;  %v1958_v32 = vrot.slane %v1956_v59, 1  ;;  %v12884_v38 = vcombine.high %v12803_v45, %v12826_v52  ;;  %v1860_v39 = vshrl.u32 %v12823_v51, 16  ;;  %16253 = vst [vmem:[#allocation19_spill] sm:$0xff] %v12896_v42  ;;  %16254 = vst [vmem:[#allocation20_spill] sm:$0xff] %v12911_v55  ;;  %v12917_v56 = vld [vmem:[%s16196_s1 + $0x48] sm:$0xff]  }
  0x1c   : > { %1922 = vrot.lane.b32.xlu0 %v12739_v17, %s12630_s19  ;;  %16250 = vst [vmem:[#allocation16_spill] sm:$0xff] %v12871_v15  ;;  %16251 = vst [vmem:[#allocation17_spill] sm:$0xff] %v12875_v22  ;;  %v1864_v40 = vrot.slane %v1862_v11, 1  ;;  %v1962_v41 = vshll.u32 %v12871_v15, 16  ;;  %v12890_v43 = vrot.slane %v12803_v45, %v12729_v13  ;;  %12103 = vmatprep.subr.bf16.mxu1 %v12814_v47  ;;  %v1868_v49 = vshll.u32 %v12875_v22, 16 }
  0x1d   : > { %16252 = vst [vmem:[#allocation18_spill] sm:$0xff] %v12884_v38  ;;  %12046 = vmatpush3.bf16.msra.mxu0 %v12849_v62  ;;  %16255 = vst [vmem:[#allocation21_spill] sm:$0xff] %v12917_v56  ;;  %v1960_v59 = vshrl.u32 %v12871_v15, 16  ;;  %v1866_v48 = vshrl.u32 %v12875_v22, 16  ;;  %v1968_v2 = vshll.u32 %v12884_v38, 16  ;;  %v1959_v34 = vor.u32 %v1958_v32, %v1954_v7  ;;  %v12946_v32 = vld [vmem:[%s16196_s1 + $0x8] sm:$0xff]  }
  0x1e   : > { %1904 = vrot.lane.b32.xlu1 %v1853_v54, %s12630_s19  ;;  %v12908_v54 = vcombine.low %v12843_v61, %v12878_v23  ;;  %12047 = vmatprep.subr.bf16.mxu0 %v12865_v4  ;;  %v1964_v11 = vrot.slane %v1962_v41, 1  ;;  %v1870_v27 = vrot.slane %v1868_v49, 1  ;;  %v1966_v24 = vshrl.u32 %v12884_v38, 16  ;;  %v12940_v7 = vld [vmem:[%s12718_s16 + $0x78] sm:$0x33]  ;;  %16256 = vst [vmem:[#allocation22_spill] sm:$0xff] %v12946_v32 }
  0x1f   : > { %12104 = vmatpush3.bf16.msra.mxu1 %v12849_v62  ;;  %v12931_v41 = vor.u32 %v1864_v40, %v1860_v39  ;;  %v1970_v44 = vrot.slane %v1968_v2, 1  ;;  %v12935_v1 = vrot.slane %v12843_v61, %v12729_v13  ;;  %v12953_v40 = vcombine.high %v12843_v61, %v12878_v23 }
  0x20   : > { %1826 = vrot.lane.b32.xlu0 %v12762_v25, %s12630_s19  ;;  %12105 = vmatprep.subr.bf16.mxu1 %v12865_v4  ;;  %v1872_v2 = vshrl.u32 %v12908_v54, 16  ;;  %v1874_v39 = vshll.u32 %v12908_v54, 16  ;;  %v12957_v49 = vcombine.low %v12911_v55, %v12923_v60  ;;  %v12968_v33 = vor.u32 %v1964_v11, %v1960_v59 }
  0x21   : > { %12048 = vmatpush3.bf16.msra.mxu0 %v12896_v42  ;;  %v12976_v36 = vcombine.high %v12911_v55, %v12923_v60  ;;  %v12980_v53 = vor.u32 %v1870_v27, %v1866_v48  ;;  %v12982_v59 = vor.u32 %v1970_v44, %v1966_v24  ;;  %v1974_v58 = vshll.u32 %v12953_v40, 16  ;;  %v12997_v27 = vld [vmem:[%s12718_s16 + $0x88] sm:$0x33]  ;;  %v13001_v24 = vld [vmem:[%s12718_s16 + $0x90] sm:$0xff]  ;;  %v13004_v44 = vld [vmem:[%s12718_s16 + $0x98] sm:$0x33] }
  0x22   : > { %2004 = vrot.lane.b32.xlu1 %v1953_v63, %s12630_s19  ;;  %v12960_v63 = vld [vmem:[%s12718_s16 + $0x70] sm:$0xff]  ;;  %12049 = vmatprep.subr.bf16.mxu0 %v12917_v56  ;;  %v1876_v11 = vrot.slane %v1874_v39, 1  ;;  %v1972_v37 = vshrl.u32 %v12953_v40, 16  ;;  %v12989_v61 = vrot.slane %v12911_v55, %v12729_v13  ;;  %v1878_v45 = vshrl.u32 %v12957_v49, 16  ;;  %16260 = vst [vmem:[#allocation26_spill] sm:$0xff] %v12997_v27  ;;  %16261 = vst [vmem:[#allocation27_spill] sm:$0xff] %v13001_v24 }
  0x23   : > { %16257 = vst [vmem:[#allocation23_spill] sm:$0xff] %v12960_v63  ;;  %12106 = vmatpush3.bf16.msra.mxu1 %v12896_v42  ;;  %v1880_v30 = vshll.u32 %v12957_v49, 16  ;;  %v13009_v48 = vld [vmem:[%s16196_s1] sm:$0xff]   ;;  %v1976_v39 = vrot.slane %v1974_v58, 1  ;;  %v1980_v18 = vshll.u32 %v12976_v36, 16  ;;  %v13018_v20 = vcombine.low %v12960_v63, %v12940_v7 }
  0x24   : > { %2002 = vrot.lane.b32.xlu0 %v1947_v28, %s12630_s19  ;;  %v12966_v28 = vld [vmem:[%s16196_s1 + $0x40] sm:$0xff]   ;;  %12107 = vmatprep.subr.bf16.mxu1 %v12917_v56  ;;  %16262 = vst [vmem:[#allocation28_spill] sm:$0xff] %v13009_v48  ;;  %v1978_v58 = vshrl.u32 %v12976_v36, 16  ;;  %v13028_v25 = vor.u32 %v1876_v11, %v1872_v2  ;;  %v13032_v42 = vrot.slane %v12960_v63, %v12729_v13 }
  0x25   : > { %16258 = vst [vmem:[#allocation24_spill] sm:$0xff] %v12966_v28  ;;  %12050 = vmatpush3.bf16.msra.mxu0 %v12946_v32  ;;  %v1882_v56 = vrot.slane %v1880_v30, 1  ;;  %v1884_v17 = vshrl.u32 %v13018_v20, 16  ;;  %v1886_v55 = vshll.u32 %v13018_v20, 16  ;;  %v13058_v30 = vcombine.low %v13001_v24, %v13004_v44 }
  0x26   : > { %1906 = vrot.lane.b32.xlu1 %v1859_v29, %s12630_s19  ;;  %v12994_v29 = vld [vmem:[%s12718_s16 + $0x80] sm:$0xff]  ;;  %12051 = vmatprep.subr.bf16.mxu0 %v12966_v28 }
  0x27   : > { %16259 = vst [vmem:[#allocation25_spill] sm:$0xff] %v12994_v29  ;;  %12108 = vmatpush3.bf16.msra.mxu1 %v12946_v32  ;;  %v13054_v11 = vcombine.low %v12994_v29, %v12997_v27  ;;  %16263 = vst [vmem:[#allocation29_spill] sm:$0xff] %v13058_v30  ;;  %v13060_v21 = vor.u32 %v1882_v56, %v1878_v45  ;;  %v1898_v2 = vshll.u32 %v13058_v30, 16 }
  0x28   : > { %1926 = vrot.lane.b32.xlu0 %v12819_v50, %s12630_s19  ;;  %v1982_v50 = vrot.slane %v1980_v18, 1  ;;  %12109 = vmatprep.subr.bf16.mxu1 %v12966_v28  ;;  %v13048_v18 = vor.u32 %v1976_v39, %v1972_v37  ;;  %v1888_v28 = vrot.slane %v1886_v55, 1  ;;  %v13071_v37 = vrot.slane %v12994_v29, %v12729_v13 }
  0x29   : > { %12052 = vmatpush3.bf16.msra.mxu0 %v13009_v48  ;;  %v13081_v39 = vrot.slane %v13001_v24, %v12729_v13  ;;  %v13104_v4 = vcombine.high %v12994_v29, %v12997_v27  ;;  %v526_v27 = vrot.slane %v12835_v57, %v12729_v13 }
  0x2a   : > { %2006 = vrot.lane.b32.xlu1 %v1959_v34, %s12630_s19  ;;  %v13043_v34 = vcombine.high %v12960_v63, %v12940_v7  ;;  %v13062_v63 = vor.u32 %v1982_v50, %v1978_v58  ;;  %12153 = vmatprep.subr.bf16.mxu0 %v12684_v3  ;;  %v1892_v58 = vshll.u32 %v13054_v11, 16  ;;  %v446_v50 = vrot.slane %v12766_v26, %v12729_v13 }
  0x2b   : > { %12110 = vmatpush3.bf16.msra.mxu1 %v13009_v48  ;;  %16264 = vst [vmem:[#allocation30_spill] sm:$0xff] %v13081_v39  ;;  %v13094_v45 = vor.u32 %v1888_v28, %v1884_v17  ;;  %v16266_v48 = vrot.slane %v12727_v12, %v12729_v13  ;;  %16267 = vst [vmem:[#allocation31_spill] sm:$0xff] %v13104_v4  ;;  %v13111_v28 = vcombine.high %v13001_v24, %v13004_v44 }
  0x2c   : > { %1828 = vrot.lane.b32.xlu0 %v12823_v51, %s12630_s19  ;;  %v1986_v51 = vshll.u32 %v13043_v34, 16  ;;  %12211 = vmatprep.subr.bf16.mxu1 %v12684_v3  ;;  %v1984_v55 = vshrl.u32 %v13043_v34, 16  ;;  %v16265_v3 = vcombine.high %v12766_v26, %v12766_v26  ;;  %v1896_v26 = vshrl.u32 %v13058_v30, 16 }
  0x2d   : > { %v453_v32 = vrot.slane %v16266_v48, %v12729_v13  ;;  %v1900_v39 = vrot.slane %v1898_v2, 1  ;;  %v1998_v2 = vshll.u32 %v13111_v28, 16 }
  0x2e   : > { %1908 = vrot.lane.b32.xlu1 %v12931_v41, %s12630_s19  ;;  %v1988_v56 = vrot.slane %v1986_v51, 1  ;;  %v1890_v41 = vshrl.u32 %v13054_v11, 16  ;;  %v460_v51 = vrot.slane %v16265_v3, %v12729_v13 }
  0x30   : > { %1928 = vrot.lane.b32.xlu0 %v12871_v15, %s12630_s19  ;;  %v471_v15 = vrot.slane %v12732_v14, %v12729_v13  ;;  %v862_v3 = vcombine.low %v446_v50, %v460_v51  ;;  %v11760_v17 = vcombine.high %v446_v50, %v460_v51  ;;  %v13113_v12 = vor.u32 %v1988_v56, %v1984_v55 }
  0x32   : > { %2008 = vrot.lane.b32.xlu1 %v12968_v33, %s12630_s19  ;;  %v479_v48 = vcombine.high %v471_v15, %v471_v15  ;;  %v486_v14 = vrot.slane %v471_v15, %v12729_v13  ;;  %v1894_v33 = vrot.slane %v1892_v58, 1  ;;  %v872_v50 = vrot.slane %v862_v3, %v12729_v13 }
  0x33   : > { %v879_v51 = vrot.slane %v11760_v17, %v12729_v13  ;;  %v1992_v15 = vshll.u32 %v13104_v4, 16  ;;  %v1990_v58 = vshrl.u32 %v13104_v4, 16  ;;  %v1996_v17 = vshrl.u32 %v13111_v28, 16 }
  0x34   : > { %1830 = vrot.lane.b32.xlu0 %v12875_v22, %s12630_s19  ;;  %v500_v55 = vrot.slane %v479_v48, %v12729_v13  ;;  %v501_v56 = vcombine.high %v486_v14, %v486_v14  ;;  %v864_v30 = vcombine.low %v453_v32, %v486_v14  ;;  %v13131_v48 = vld [vmem:[%s12718_s16 + $0xa0] sm:$0xff]  ;;  %v301_v14 = vld [vmem:[%s12718_s16 + $0xa8] sm:$0x33]  ;;  %v13136_v32 = vor.u32 %v1894_v33, %v1890_v41 }
  0x35   : > { %v895_v29 = vcombine.high %v872_v50, %v879_v51  ;;  %v894_v24 = vcombine.low %v872_v50, %v879_v51  ;;  %v2000_v50 = vrot.slane %v1998_v2, 1  ;;  %v16268_v51 = vrot.slane %v12736_v16, %v12729_v13 }
  0x36   : > { %1910 = vrot.lane.b32.xlu1 %v12980_v53, %s12630_s19  ;;  %v502_v22 = vcombine.high %v500_v55, %v500_v55  ;;  %v865_v3 = vcombine.low %v500_v55, %v501_v56  ;;  %v886_v62 = vrot.slane %v864_v30, %v12729_v13  ;;  %v1994_v53 = vrot.slane %v1992_v15, 1 }
  0x37   : > { %v493_v4 = vrot.slane %v16268_v51, %v12729_v13  ;;  %v13142_v55 = vor.u32 %v1900_v39, %v1896_v26  ;;  %v519_v56 = vcombine.high %v12835_v57, %v12835_v57  ;;  %v911_v41 = vrot.slane %v895_v29, %v12729_v13 }
  0x38   : > { %1930 = vrot.lane.b32.xlu0 %v12884_v38, %s12630_s19  ;;  %v893_v30 = vrot.slane %v865_v3, %v12729_v13  ;;  %v16269_v33 = vrot.slane %v12745_v19, %v12729_v13  ;;  %v566_v39 = vrot.slane %v12856_v0, %v12729_v13  ;;  %v904_v51 = vrot.slane %v894_v24, %v12729_v13 }
  0x39   : > { %v928_v26 = vcombine.low %v502_v22, %v493_v4  ;;  %v540_v57 = vrot.slane %v519_v56, %v12729_v13  ;;  %v13164_v38 = vcombine.low %v13131_v48, %v301_v14 }
  0x3a   : > { %2010 = vrot.lane.b32.xlu1 %v12982_v59, %s12630_s19  ;;  %v533_v15 = vrot.slane %v16269_v33, %v12729_v13  ;;  %v897_v2 = vcombine.high %v886_v62, %v893_v30  ;;  %v896_v3 = vcombine.low %v886_v62, %v893_v30  ;;  %v13172_v30 = vor.u32 %v1994_v53, %v1990_v58 }
  0x3b   : > { %v938_v29 = vrot.slane %v928_v26, %v12729_v13  ;;  %v929_v22 = vcombine.low %v526_v27, %v540_v57  ;;  %v11761_v24 = vcombine.high %v526_v27, %v540_v57  ;;  %v4639_v27 = vshrl.u32 %v13164_v38, 16 }
  0x3c   : > { %1832 = vrot.lane.b32.xlu0 %v12908_v54, %s12630_s19  ;;  %v931_v59 = vcombine.low %v533_v15, %v566_v39  ;;  %v925_v4 = vrot.slane %v897_v2, %v12729_v13  ;;  %v918_v62 = vrot.slane %v896_v3, %v12729_v13  ;;  %v559_v15 = vcombine.high %v12856_v0, %v12856_v0 }
  0x3d   : > { %v945_v2 = vrot.slane %v929_v22, %v12729_v13  ;;  %v952_v3 = vrot.slane %v11761_v24, %v12729_v13  ;;  %v4641_v58 = vshll.u32 %v13164_v38, 16  ;;  %v16270_v53 = vrot.slane %v12778_v31, %v12729_v13 }
  0x3e   : > { %1912 = vrot.lane.b32.xlu1 %v13028_v25, %s12630_s19  ;;  %v959_v56 = vrot.slane %v931_v59, %v12729_v13  ;;  %v927_v26 = vcombine.low %v911_v41, %v925_v4  ;;  %v926_v33 = vcombine.low %v904_v51, %v918_v62  ;;  %v13183_v25 = vor.u32 %v2000_v50, %v1996_v17 }
  0x3f   : > { %v573_v0 = vrot.slane %v16270_v53, %v12729_v13  ;;  %v961_v41 = vcombine.high %v938_v29, %v945_v2  ;;  %v960_v57 = vcombine.low %v938_v29, %v945_v2  ;;  %v4643_v17 = vrot.slane %v4641_v58, 1 }
  0x40   : > { %1932 = vrot.lane.b32.xlu0 %v12953_v40, %s12630_s19  ;;  %1423 = vmatprep.mubr.bf16.mxu0 %v927_v26  ;;  %v963_v51 = vcombine.high %v952_v3, %v959_v56  ;;  %v962_v59 = vcombine.low %v952_v3, %v959_v56  ;;  %v580_v50 = vrot.slane %v559_v15, %v12729_v13 }
  0x41   : > { %1424 = vmatmul.mubr.bf16.vlgmr.msra.gmra.mxu0 %v926_v33  ;;  %v581_v4 = vcombine.high %v566_v39, %v566_v39  ;;  %v599_v62 = vcombine.high %v12890_v43, %v12890_v43  ;;  %v977_v22 = vrot.slane %v961_v41, %v12729_v13  ;;  %v970_v26 = vrot.slane %v960_v57, %v12729_v13 }
  0x42   : > { %2012 = vrot.lane.b32.xlu1 %v13048_v18, %s12630_s19  ;;  %v991_v24 = vrot.slane %v963_v51, %v12729_v13  ;;  %v984_v29 = vrot.slane %v962_v59, %v12729_v13  ;;  %12154 = vmatpush3.bf16.msra.mxu0 %v12691_v5  ;;  %v13203_v18 = vor.u32 %v4643_v17, %v4639_v27 }
  0x43   : > { %v582_v33 = vcombine.high %v580_v50, %v580_v50  ;;  %v606_v39 = vrot.slane %v12890_v43, %v12729_v13  ;;  %v620_v56 = vrot.slane %v599_v62, %v12729_v13  ;;  %v994_v3 = vcombine.low %v580_v50, %v581_v4  ;;  %12155 = vmatprep.subr.bf16.mxu0 %v12696_v6 }
  0x44   : > { %1834 = vrot.lane.b32.xlu0 %v12957_v49, %s12630_s19  ;;  %v993_v15 = vcombine.low %v977_v22, %v991_v24  ;;  %v992_v2 = vcombine.low %v970_v26, %v984_v29  ;;  %v16271_v58 = vrot.slane %v12826_v52, %v12729_v13  ;;  %v639_v43 = vcombine.high %v12935_v1, %v12935_v1 }
  0x45   : > { %v995_v5 = vcombine.low %v582_v33, %v573_v0  ;;  %v996_v27 = vcombine.low %v606_v39, %v620_v56  ;;  %v11762_v41 = vcombine.high %v606_v39, %v620_v56  ;;  %v1004_v51 = vrot.slane %v994_v3, %v12729_v13 }
  0x46   : > { %v613_v53 = vrot.slane %v16271_v58, %v12729_v13  ;;  %1914 = vrot.lane.b32.xlu1 %v13060_v21, %s12630_s19  ;;  %1431 = vmatprep.mubr.bf16.mxu0 %v993_v15  ;;  %v646_v57 = vrot.slane %v12935_v1, %v12729_v13  ;;  %v16272_v59 = vrot.slane %v12878_v23, %v12729_v13 }
  0x47   : > { %v679_v21 = vcombine.high %v12989_v61, %v12989_v61  ;;  %v1011_v0 = vrot.slane %v995_v5, %v12729_v13  ;;  %v1018_v17 = vrot.slane %v996_v27, %v12729_v13  ;;  %v1025_v50 = vrot.slane %v11762_v41, %v12729_v13  ;;  %12156 = vmatpush3.bf16.msra.mxu0 %v12705_v8 }
  0x48   : > { %v653_v6 = vrot.slane %v16272_v59, %v12729_v13  ;;  %1934 = vrot.lane.b32.xlu0 %v12976_v36, %s12630_s19  ;;  %v660_v4 = vrot.slane %v639_v43, %v12729_v13  ;;  %v661_v1 = vcombine.high %v646_v57, %v646_v57  ;;  %v686_v62 = vrot.slane %v12989_v61, %v12729_v13 }
  0x49   : > { %v700_v22 = vrot.slane %v679_v21, %v12729_v13  ;;  %v1060_v24 = vcombine.low %v613_v53, %v646_v57  ;;  %1432 = vmatmul.mubr.bf16.gmra.mxu0 %v992_v2  ;;  %v1027_v26 = vcombine.high %v1004_v51, %v1011_v0  ;;  %v1029_v29 = vcombine.high %v1018_v17, %v1025_v50 }
  0x4a   : > { %2014 = vrot.lane.b32.xlu1 %v13062_v63, %s12630_s19  ;;  %v1026_v33 = vcombine.low %v1004_v51, %v1011_v0  ;;  %v1028_v39 = vcombine.low %v1018_v17, %v1025_v50  ;;  %v662_v56 = vcombine.high %v660_v4, %v660_v4  ;;  %v1061_v15 = vcombine.low %v660_v4, %v661_v1 }
  0x4b   : > { %v1063_v3 = vcombine.low %v686_v62, %v700_v22  ;;  %12157 = vmatprep.subr.bf16.mxu0 %v12712_v9  ;;  %v1043_v61 = vrot.slane %v1027_v26, %v12729_v13  ;;  %v1057_v8 = vrot.slane %v1029_v29, %v12729_v13  ;;  %v1070_v63 = vrot.slane %v1060_v24, %v12729_v13 }
  0x4c   : > { %1836 = vrot.lane.b32.xlu0 %v13018_v20, %s12630_s19  ;;  %v1036_v58 = vrot.slane %v1026_v33, %v12729_v13  ;;  %v1050_v2 = vrot.slane %v1028_v39, %v12729_v13  ;;  %v1062_v53 = vcombine.low %v662_v56, %v653_v6  ;;  %v1077_v5 = vrot.slane %v1061_v15, %v12729_v13 }
  0x4d   : > { %v1091_v27 = vrot.slane %v1063_v3, %v12729_v13  ;;  %12158 = vmatpush3.bf16.msra.mxu0 %v12723_v10  ;;  %v1059_v9 = vcombine.low %v1043_v61, %v1057_v8  ;;  %v16273_v41 = vrot.slane %v12923_v60, %v12729_v13  ;;  %v719_v51 = vcombine.high %v13032_v42, %v13032_v42  ;;  %v16275_v8 = vld [vmem:[#allocation26_spill] sm:$0xff] }
  0x4e   : > { %1916 = vrot.lane.b32.xlu1 %v13094_v45, %s12630_s19  ;;  %v726_v57 = vrot.slane %v13032_v42, %v12729_v13  ;;  %v1058_v59 = vcombine.low %v1036_v58, %v1050_v2  ;;  %v1084_v6 = vrot.slane %v1062_v53, %v12729_v13  ;;  %v1093_v21 = vcombine.high %v1070_v63, %v1077_v5  ;;  %v16278_v2 = vld [vmem:[#allocation29_spill] sm:$0xff] }
  0x4f   : > { %v693_v43 = vrot.slane %v16273_v41, %v12729_v13  ;;  %v1092_v10 = vcombine.low %v1070_v63, %v1077_v5  ;;  %12159 = vmatprep.subr.bf16.mxu0 %v12789_v35  ;;  %1439 = vmatprep.mubr.bf16.mxu0 %v1059_v9  ;;  %v16274_v45 = vrot.slane %v12940_v7, %v12729_v13  ;;  %v16277_v63 = vld [vmem:[#allocation14_spill] sm:$0xff] }
  0x50   : > { %1936 = vrot.lane.b32.xlu0 %v13043_v34, %s12630_s19  ;;  %v740_v17 = vrot.slane %v719_v51, %v12729_v13  ;;  %v741_v50 = vcombine.high %v726_v57, %v726_v57  ;;  %v1095_v42 = vcombine.high %v1084_v6, %v1091_v27  ;;  %v1109_v4 = vrot.slane %v1093_v21, %v12729_v13  ;;  %v16279_v9 = vld [vmem:[#allocation30_spill] sm:$0xff]  ;;  %v16280_v51 = vld [vmem:[#allocation15_spill] sm:$0xff] }
  0x51   : > { %v733_v0 = vrot.slane %v16274_v45, %v12729_v13  ;;  %v1094_v1 = vcombine.low %v1084_v6, %v1091_v27  ;;  %v1102_v24 = vrot.slane %v1092_v10, %v12729_v13  ;;  %12160 = vmatpush3.bf16.msra.mxu0 %v12809_v46  ;;  %v11763_v26 = vcombine.high %v686_v62, %v700_v22 }
  0x52   : > { %2016 = vrot.lane.b32.xlu1 %v13113_v12, %s12630_s19  ;;  %1440 = vmatmul.mubr.bf16.gmra.mxu0 %v1058_v59  ;;  %v742_v35 = vcombine.high %v740_v17, %v740_v17  ;;  %v1127_v29 = vcombine.low %v693_v43, %v726_v57  ;;  %v1123_v7 = vrot.slane %v1095_v42, %v12729_v13  ;;  %v16281_v42 = vld [vmem:[#allocation19_spill] sm:$0xff] }
  0x53   : > { %v1116_v33 = vrot.slane %v1094_v1, %v12729_v13  ;;  %v1128_v39 = vcombine.low %v740_v17, %v741_v50  ;;  %v759_v56 = vcombine.high %v13071_v37, %v13071_v37  ;;  %12161 = vmatprep.subr.bf16.mxu0 %v12814_v47  ;;  %v1136_v12 = vrot.slane %v11763_v26, %v12729_v13 }
  0x54   : > { %1838 = vrot.lane.b32.xlu0 %v13054_v11, %s12630_s19  ;;  %v1129_v46 = vcombine.low %v742_v35, %v733_v0  ;;  %v1143_v15 = vrot.slane %v1127_v29, %v12729_v13  ;;  %v766_v62 = vrot.slane %v13071_v37, %v12729_v13  ;;  %v1125_v22 = vcombine.low %v1109_v4, %v1123_v7  ;;  %v16282_v7 = vld [vmem:[#allocation21_spill] sm:$0xff] }
  0x55   : > { %v1124_v3 = vcombine.low %v1102_v24, %v1116_v33  ;;  %v1150_v61 = vrot.slane %v1128_v39, %v12729_v13  ;;  %v16276_v58 = vrot.slane %v16275_v8, %v12729_v13  ;;  %12162 = vmatpush3.bf16.msra.mxu0 %v16277_v63  ;;  %v780_v37 = vrot.slane %v759_v56, %v12729_v13  ;;  %v16283_v33 = vld [vmem:[#allocation31_spill] sm:$0xff] }
  0x56   : > { %1840 = vrot.lane.b32.xlu1 %v16278_v2, %s12630_s19  ;;  %v1157_v53 = vrot.slane %v1129_v46, %v12729_v13  ;;  %v1159_v5 = vcombine.high %v1136_v12, %v1143_v15  ;;  %v1158_v27 = vcombine.low %v1136_v12, %v1143_v15  ;;  %1447 = vmatprep.mubr.bf16.mxu0 %v1125_v22  ;;  %v16284_v22 = vld [vmem:[#allocation22_spill] sm:$0xff] }
  0x57   : > { %v773_v47 = vrot.slane %v16276_v58, %v12729_v13  ;;  %v799_v41 = vcombine.high %v16279_v9, %v16279_v9  ;;  %v806_v43 = vrot.slane %v16279_v9, %v12729_v13  ;;  %12163 = vmatprep.subr.bf16.mxu0 %v16280_v51  ;;  %v798_v57 = vrot.slane %v13004_v44, %v12729_v13  ;;  %v16291_v9 = vld [vmem:[#allocation6_spill] sm:$0xff] }
  0x58   : > { %1918 = vrot.lane.b32.xlu0 %v13136_v32, %s12630_s19  ;;  %v1161_v59 = vcombine.high %v1150_v61, %v1157_v53  ;;  %v1175_v6 = vrot.slane %v1159_v5, %v12729_v13  ;;  %v1160_v21 = vcombine.low %v1150_v61, %v1157_v53  ;;  %v1168_v10 = vrot.slane %v1158_v27, %v12729_v13  ;;  %v16286_v61 = vld [vmem:[#allocation3_spill] sm:$0xff]  ;;  %v16288_v53 = vld [vmem:[#allocation2_spill] sm:$0xff] }
  0x59   : > { %v820_v45 = vrot.slane %v799_v41, %v12729_v13  ;;  %v821_v0 = vcombine.high %v806_v43, %v806_v43  ;;  %v1192_v17 = vcombine.low %v766_v62, %v780_v37  ;;  %v11764_v50 = vcombine.high %v766_v62, %v780_v37  ;;  %12164 = vmatpush3.bf16.msra.mxu0 %v16281_v42  ;;  %v16289_v5 = vld [vmem:[#allocation7_spill] sm:$0xff]  ;;  %v16292_v41 = vld [vmem:[#allocation5_spill] sm:$0xff] }
  0x5a   : > { %1920 = vrot.lane.b32.xlu1 %v13142_v55, %s12630_s19  ;;  %1448 = vmatmul.mubr.bf16.gmra.mxu0 %v1124_v3  ;;  %v1189_v4 = vrot.slane %v1161_v59, %v12729_v13  ;;  %v1182_v32 = vrot.slane %v1160_v21, %v12729_v13  ;;  %v1194_v1 = vcombine.low %v773_v47, %v806_v43  ;;  %v16285_v3 = vld [vmem:[#allocation4_spill] sm:$0xff] }
  0x5b   : > { %v1195_v24 = vcombine.low %v820_v45, %v821_v0  ;;  %v1202_v35 = vrot.slane %v1192_v17, %v12729_v13  ;;  %v1209_v26 = vrot.slane %v11764_v50, %v12729_v13  ;;  %v813_v29 = vrot.slane %v798_v57, %v12729_v13  ;;  %12165 = vmatprep.subr.bf16.mxu0 %v16282_v7 }
  0x5c   : > { %1938 = vrot.lane.b32.xlu0 %v16283_v33, %s12630_s19  ;;  %v1191_v39 = vcombine.low %v1175_v6, %v1189_v4  ;;  %v1190_v55 = vcombine.low %v1168_v10, %v1182_v32  ;;  %v1216_v56 = vrot.slane %v1194_v1, %v12729_v13  ;;  %v822_v46 = vcombine.high %v820_v45, %v820_v45  ;;  %v16294_v10 = vld [vmem:[#allocation24_spill] sm:$0xff] }
  0x5d   : > { %v1223_v12 = vrot.slane %v1195_v24, %v12729_v13  ;;  %v1225_v15 = vcombine.high %v1202_v35, %v1209_v26  ;;  %v1224_v62 = vcombine.low %v1202_v35, %v1209_v26  ;;  %12166 = vmatpush3.bf16.msra.mxu0 %v16284_v22  ;;  %v16287_v58 = vcombine.low %v16285_v3, %v16286_v61  ;;  %v16295_v32 = vld [vmem:[#allocation28_spill] sm:$0xff] }
  0x5e   : > { %1940 = vrot.lane.b32.xlu1 %v13111_v28, %s12630_s19  ;;  %1455 = vmatprep.mubr.bf16.mxu0 %v1191_v39  ;;  %v1258_v63 = vcombine.low %v822_v46, %v813_v29  ;;  %v16290_v27 = vcombine.high %v16288_v53, %v16289_v5  ;;  %v16293_v43 = vcombine.low %v16291_v9, %v16292_v41  ;;  %v16301_v9 = vld [vmem:[#allocation12_spill] sm:$0xff] }
  0x5f   : > { %v3381_v47 = vrot.slane %v16287_v58, %v12729_v13  ;;  %v1227_v57 = vcombine.high %v1216_v56, %v1223_v12  ;;  %v1241_v59 = vrot.slane %v1225_v15, %v12729_v13  ;;  %v1226_v6 = vcombine.low %v1216_v56, %v1223_v12  ;;  %12167 = vmatprep.subr.bf16.mxu0 %v16294_v10  ;;  %v16298_v58 = vld [vmem:[#allocation11_spill] sm:$0xff]  ;;  %v16303_v10 = vld [vmem:[#allocation16_spill] sm:$0xff] }
  0x60   : > { %v3388_v37 = vrot.slane %v16290_v27, %v12729_v13  ;;  %v3421_v51 = vrot.slane %v16293_v43, %v12729_v13  ;;  %v1234_v21 = vrot.slane %v1224_v62, %v12729_v13  ;;  %2018 = vrot.lane.b32.xlu0 %v13172_v30, %s12630_s19  ;;  %v13340_v45 = vrot.slane %v1258_v63, %v12729_v13  ;;  %v16296_v62 = vld [vmem:[#allocation8_spill] sm:$0xff] }
  0x61   : > { %v3389_v0 = vcombine.high %v3381_v47, %v3381_v47  ;;  %v3396_v17 = vrot.slane %v3381_v47, %v12729_v13  ;;  %v1255_v42 = vrot.slane %v1227_v57, %v12729_v13  ;;  %v1248_v4 = vrot.slane %v1226_v6, %v12729_v13  ;;  %12168 = vmatpush3.bf16.msra.mxu0 %v16295_v32  ;;  %v16299_v47 = vld [vmem:[#allocation9_spill] sm:$0xff] }
  0x62   : > { %v3403_v50 = vrot.slane %v3388_v37, %v12729_v13  ;;  %v3429_v1 = vcombine.high %v3421_v51, %v3421_v51  ;;  %v3436_v24 = vrot.slane %v3421_v51, %v12729_v13  ;;  %2020 = vrot.lane.b32.xlu1 %v13183_v25, %s12630_s19  ;;  %1456 = vmatmul.mubr.bf16.gmra.mxu0 %v1190_v55 }
  0x63   : > { %v1266_v30 = vcombine.high %v13340_v45, %v13340_v45  ;;  %v1273_v35 = vrot.slane %v13340_v45, %v12729_v13  ;;  %v3410_v26 = vrot.slane %v3389_v0, %v12729_v13  ;;  %v1257_v29 = vcombine.low %v1241_v59, %v1255_v42  ;;  %v16304_v0 = vld [vmem:[#allocation10_spill] sm:$0xff] }
  0x64   : > { %v1256_v7 = vcombine.low %v1234_v21, %v1248_v4  ;;  %v3450_v39 = vrot.slane %v3429_v1, %v12729_v13  ;;  %v3451_v56 = vcombine.high %v3436_v24, %v3436_v24  ;;  %4637 = vrot.lane.b32.xlu0 %v13164_v38, %s12630_s19  ;;  %v3775_v12 = vcombine.low %v3403_v50, %v3436_v24 }
  0x65   : > { %v1280_v46 = vrot.slane %v1266_v30, %v12729_v13  ;;  %v3773_v25 = vcombine.low %v3396_v17, %v3410_v26  ;;  %v11819_v55 = vcombine.high %v3396_v17, %v3410_v26  ;;  %1463 = vmatprep.mubr.bf16.mxu0 %v1257_v29  ;;  %v16297_v22 = vcombine.high %v12736_v16, %v16296_v62  ;;  %v16306_v26 = vld [vmem:[#allocation17_spill] sm:$0xff] }
  0x66   : > { %v3776_v15 = vcombine.low %v3450_v39, %v3451_v56  ;;  %v3452_v61 = vcombine.high %v3450_v39, %v3450_v39  ;;  %v16300_v63 = vcombine.low %v16298_v58, %v16299_v47  ;;  %4645 = vrot.lane.b32.xlu1 %v13203_v18, %s12630_s19  ;;  %v3797_v37 = vrot.slane %v3775_v12, %v12729_v13 }
  0x67   : > { %v3428_v3 = vrot.slane %v16297_v22, %v12729_v13  ;;  %v3783_v5 = vrot.slane %v3773_v25, %v12729_v13  ;;  %v3790_v27 = vrot.slane %v11819_v55, %v12729_v13  ;;  %v16302_v16 = vcombine.high %v12745_v19, %v16301_v9 }
  0x68   : > { %v3461_v53 = vrot.slane %v16300_v63, %v12729_v13  ;;  %v3804_v43 = vrot.slane %v3776_v15, %v12729_v13  ;;  %v16305_v17 = vcombine.low %v16303_v10, %v16304_v0  ;;  %v16307_v29 = vcombine.high %v12778_v31, %v16306_v26 }
  0x69   : > { %v3468_v41 = vrot.slane %v16302_v16, %v12729_v13  ;;  %v3443_v51 = vrot.slane %v3428_v3, %v12729_v13  ;;  %v3805_v6 = vcombine.low %v3783_v5, %v3790_v27  ;;  %v3806_v18 = vcombine.high %v3783_v5, %v3790_v27  ;;  %v16309_v5 = vld [vmem:[#allocation13_spill] sm:$0xff] }
  0x6a   : > { %v3469_v57 = vcombine.high %v3461_v53, %v3461_v53  ;;  %v3476_v59 = vrot.slane %v3461_v53, %v12729_v13  ;;  %v3501_v50 = vrot.slane %v16305_v17, %v12729_v13  ;;  %v3807_v42 = vcombine.low %v3797_v37, %v3804_v43  ;;  %1464 = vmatmul.mubr.bf16.gmra.mxu0 %v1256_v7  ;;  %v16308_v53 = vld [vmem:[#allocation18_spill] sm:$0xff] }
  0x6b   : > { %v3483_v21 = vrot.slane %v3468_v41, %v12729_v13  ;;  %v3808_v4 = vcombine.high %v3797_v37, %v3804_v43  ;;  %v3839_v32 = vcombine.low %v3452_v61, %v3443_v51  ;;  %v3822_v1 = vrot.slane %v3806_v18, %v12729_v13  ;;  %1471 = vmatprep.mubr.bf16.mxu0 %v1280_v46  ;;  %v16312_v51 = vld [vmem:[#allocation20_spill] sm:$0xff] }
  0x6c   : > { %v3490_v19 = vrot.slane %v3469_v57, %v12729_v13  ;;  %v13387_v24 = vrot.slane %v3805_v6, %v12729_v13  ;;  %v3516_v30 = vrot.slane %v3501_v50, %v12729_v13  ;;  %v3508_v39 = vrot.slane %v16307_v29, %v12729_v13 }
  0x6d   : > { %v3836_v56 = vrot.slane %v3808_v4, %v12729_v13  ;;  %v3829_v25 = vrot.slane %v3807_v42, %v12729_v13  ;;  %v3849_v15 = vrot.slane %v3839_v32, %v12729_v13  ;;  %v3509_v62 = vcombine.high %v3501_v50, %v3501_v50 }
  0x6e   : > { %v3840_v55 = vcombine.low %v3476_v59, %v3490_v19  ;;  %v11820_v12 = vcombine.high %v3476_v59, %v3490_v19  ;;  %v3842_v7 = vcombine.low %v3483_v21, %v3516_v30  ;;  %v3523_v22 = vrot.slane %v3508_v39, %v12729_v13  ;;  %v16314_v19 = vld [vmem:[#allocation25_spill] sm:$0xff] }
  0x6f   : > { %v3838_v3 = vcombine.low %v3822_v1, %v3836_v56  ;;  %v3837_v61 = vcombine.low %v13387_v24, %v3829_v25  ;;  %v3530_v47 = vrot.slane %v3509_v62, %v12729_v13  ;;  %v3531_v63 = vcombine.high %v3516_v30, %v3516_v30 }
  0x70   : > { %v3856_v58 = vrot.slane %v3840_v55, %v12729_v13  ;;  %v3863_v31 = vrot.slane %v11820_v12, %v12729_v13  ;;  %v3870_v46 = vrot.slane %v3842_v7, %v12729_v13  ;;  %v16310_v27 = vcombine.low %v16308_v53, %v16309_v5  ;;  %v16316_v7 = vld [vmem:[#allocation23_spill] sm:$0xff] }
  0x71   : > { %v16311_v41 = vcombine.high %v12826_v52, %v12908_v54  ;;  %v16313_v57 = vcombine.low %v12953_v40, %v16312_v51  ;;  %v3532_v21 = vcombine.high %v3530_v47, %v3530_v47  ;;  %v3905_v42 = vcombine.low %v3530_v47, %v3531_v63 }
  0x72   : > { %v3541_v37 = vrot.slane %v16310_v27, %v12729_v13  ;;  %v3872_v9 = vcombine.high %v3849_v15, %v3856_v58  ;;  %v3871_v16 = vcombine.low %v3849_v15, %v3856_v58  ;;  %v3874_v6 = vcombine.high %v3863_v31, %v3870_v46  ;;  %1472 = vmatmul.mubr.bf16.gmra.mxu0 %v1273_v35  ;;  %v12604_v27 = vld [vmem:[%s12718_s16 + $0x78] sm:$0x33]  ;;  %s12632_s16 = smov 96  }
  0x73   : > { %v3548_v43 = vrot.slane %v16311_v41, %v12729_v13  ;;  %v3581_v59 = vrot.slane %v16313_v57, %v12729_v13  ;;  %v3873_v18 = vcombine.low %v3863_v31, %v3870_v46  ;;  %v3906_v4 = vcombine.low %v3532_v21, %v3523_v22  ;;  %4238 = vmatprep.mubr.bf16.mxu0 %v3838_v3 }
  0x74   : > { %v3549_v10 = vcombine.high %v3541_v37, %v3541_v37  ;;  %v3888_v0 = vrot.slane %v3872_v9, %v12729_v13  ;;  %v13417_v17 = vrot.slane %v3871_v16, %v12729_v13  ;;  %v3556_v50 = vrot.slane %v3541_v37, %v12729_v13 }
  0x75   : > { %v3902_v52 = vrot.slane %v3874_v6, %v12729_v13  ;;  %v13425_v54 = vrot.slane %v3873_v18, %v12729_v13  ;;  %v11813_v32 = vcombine.low %v13043_v34, %v16314_v19  ;;  %v3915_v1 = vrot.slane %v3905_v42, %v12729_v13 }
  0x76   : > { %v3570_v40 = vrot.slane %v3549_v10, %v12729_v13  ;;  %v16315_v24 = vcombine.high %v12878_v23, %v12957_v49  ;;  %v3589_v35 = vcombine.high %v3581_v59, %v3581_v59  ;;  %v3922_v56 = vrot.slane %v3906_v4, %v12729_v13 }
  0x77   : > { %v3904_v30 = vcombine.low %v3888_v0, %v3902_v52  ;;  %v3903_v26 = vcombine.low %v13417_v17, %v13425_v54  ;;  %v3563_v34 = vrot.slane %v3548_v43, %v12729_v13  ;;  %v3596_v25 = vrot.slane %v3581_v59, %v12729_v13 }
  0x78   : > { %v3588_v45 = vrot.slane %v16315_v24, %v12729_v13  ;;  %v3907_v29 = vcombine.low %v3556_v50, %v3570_v40  ;;  %v11821_v39 = vcombine.high %v3556_v50, %v3570_v40  ;;  %v3610_v55 = vrot.slane %v3589_v35, %v12729_v13 }
  0x79   : > { %v16317_v15 = vcombine.low %v12976_v36, %v16316_v7  ;;  %v3938_v22 = vcombine.high %v3915_v1, %v3922_v56  ;;  %v3937_v3 = vcombine.low %v3915_v1, %v3922_v56  ;;  %v3611_v58 = vcombine.high %v3596_v25, %v3596_v25 }
  0x7a   : > { %v3929_v12 = vrot.slane %v3907_v29, %v12729_v13  ;;  %v3936_v23 = vrot.slane %v11821_v39, %v12729_v13  ;;  %v3603_v49 = vrot.slane %v3588_v45, %v12729_v13  ;;  %v3612_v31 = vcombine.high %v3610_v55, %v3610_v55  ;;  %4239 = vmatmul.mubr.bf16.vlgmr.msra.gmra.mxu0 %v3837_v61 }
  0x7b   : > { %v3621_v62 = vrot.slane %v16317_v15, %v12729_v13  ;;  %v16318_v53 = vcombine.high %v12923_v60, %v13018_v20  ;;  %v11814_v37 = vcombine.high %v12604_v27, %v13054_v11  ;;  %v3971_v9 = vcombine.low %v3563_v34, %v3596_v25  ;;  %4246 = vmatprep.mubr.bf16.mxu0 %v3904_v30 }
  0x7c   : > { %v3940_v46 = vcombine.high %v3929_v12, %v3936_v23  ;;  %v3972_v16 = vcombine.low %v3610_v55, %v3611_v58  ;;  %v3954_v36 = vrot.slane %v3938_v22, %v12729_v13  ;;  %v3973_v51 = vcombine.low %v3612_v31, %v3603_v49 }
  0x7d   : > { %v3629_v47 = vcombine.high %v3621_v62, %v3621_v62  ;;  %v3636_v63 = vrot.slane %v3621_v62, %v12729_v13  ;;  %v3628_v5 = vrot.slane %v16318_v53, %v12729_v13  ;;  %v3981_v57 = vrot.slane %v3971_v9, %v12729_v13 }
  0x7e   : > { %v3968_v41 = vrot.slane %v3940_v46, %v12729_v13  ;;  %v3988_v59 = vrot.slane %v3972_v16, %v12729_v13  ;;  %v3661_v20 = vrot.slane %v11813_v32, %v12729_v13  ;;  %v3939_v60 = vcombine.low %v3929_v12, %v3936_v23 }
  0x7f   : > { %v3650_v43 = vrot.slane %v3629_v47, %v12729_v13  ;;  %v3995_v11 = vrot.slane %v3973_v51, %v12729_v13  ;;  %v3643_v61 = vrot.slane %v3628_v5, %v12729_v13  ;;  %v3668_v10 = vrot.slane %v11814_v37, %v12729_v13 }
  0x80   : > { %v4004_v18 = vcombine.high %v3981_v57, %v3988_v59  ;;  %v4003_v21 = vcombine.low %v3981_v57, %v3988_v59  ;;  %v3669_v0 = vcombine.high %v3661_v20, %v3661_v20  ;;  %v3970_v17 = vcombine.low %v3954_v36, %v3968_v41 }
  0x81   : > { %v3974_v6 = vcombine.low %v3636_v63, %v3650_v43  ;;  %v3676_v42 = vrot.slane %v3661_v20, %v12729_v13  ;;  %v11822_v52 = vcombine.high %v3636_v63, %v3650_v43  ;;  %v3683_v4 = vrot.slane %v3668_v10, %v12729_v13 }
  0x82   : > { %v4020_v54 = vrot.slane %v4004_v18, %v12729_v13  ;;  %v4013_v40 = vrot.slane %v4003_v21, %v12729_v13  ;;  %v3690_v19 = vrot.slane %v3669_v0, %v12729_v13  ;;  %v3947_v35 = vrot.slane %v3937_v3, %v12729_v13  ;;  %4247 = vmatmul.mubr.bf16.gmra.mxu0 %v3903_v26 }
  0x83   : > { %v4002_v50 = vrot.slane %v3974_v6, %v12729_v13  ;;  %v3691_v24 = vcombine.high %v3676_v42, %v3676_v42  ;;  %v4038_v45 = vcombine.low %v3643_v61, %v3676_v42  ;;  %v3961_v29 = vrot.slane %v3939_v60, %v12729_v13  ;;  %4254 = vmatprep.mubr.bf16.mxu0 %v3970_v17 }
  0x84   : > { %v3692_v30 = vcombine.high %v3690_v19, %v3690_v19  ;;  %v4047_v55 = vrot.slane %v11822_v52, %v12729_v13 }
  0x85   : > { %v4006_v32 = vcombine.high %v3995_v11, %v4002_v50  ;;  %v4005_v1 = vcombine.low %v3995_v11, %v4002_v50  ;;  %v4039_v34 = vcombine.low %v3690_v19, %v3691_v24  ;;  %v4054_v12 = vrot.slane %v4038_v45, %v12729_v13 }
  0x86   : > { %v4040_v25 = vcombine.low %v3692_v30, %v3683_v4  ;;  %v1823_v26 = vpop.permute.xlu0 %1822  ;;  %v3969_v62 = vcombine.low %v3947_v35, %v3961_v29 }
  0x87   : > { %v4034_v39 = vrot.slane %v4006_v32, %v12729_v13  ;;  %v4027_v56 = vrot.slane %v4005_v1, %v12729_v13  ;;  %v4061_v7 = vrot.slane %v4039_v34, %v12729_v13  ;;  %v1925_v22 = vpop.permute.xlu1 %1924  ;;  %v4070_v3 = vcombine.high %v4047_v55, %v4054_v12 }
  0x88   : > { %v4068_v15 = vrot.slane %v4040_v25, %v12729_v13  ;;  %v4069_v5 = vcombine.low %v4047_v55, %v4054_v12 }
  0x89   : > { %v4036_v23 = vcombine.low %v4020_v54, %v4034_v39  ;;  %v4035_v49 = vcombine.low %v4013_v40, %v4027_v56  ;;  %v4086_v46 = vrot.slane %v4070_v3, %v12729_v13 }
  0x8a   : > { %v4072_v58 = vcombine.high %v4061_v7, %v4068_v15  ;;  %v1825_v31 = vpop.permute.xlu0 %1824  ;;  %4255 = vmatmul.mubr.bf16.gmra.mxu0 %v3969_v62  ;;  %v4071_v27 = vcombine.low %v4061_v7, %v4068_v15  ;;  %v4079_v36 = vrot.slane %v4069_v5, %v12729_v13 }
  0x8b   : > { %4262 = vmatprep.mubr.bf16.mxu0 %v4036_v23 }
  0x8c   : > { %v4100_v47 = vrot.slane %v4072_v58, %v12729_v13  ;;  %v1903_v63 = vpop.permute.xlu1 %1902  ;;  %v4093_v41 = vrot.slane %v4071_v27, %v12729_v13 }
  0x8d   : > { %v2024_v60 = vsel %vm382_vm0, %v1823_v26, %v1903_v63 }
  0x8e   : > { %v1923_v53 = vpop.permute.xlu0 %1922  ;;  %v4102_v37 = vcombine.low %v4086_v46, %v4100_v47  ;;  %v4101_v20 = vcombine.low %v4079_v36, %v4093_v41 }
  0x90   : > { %v1905_v9 = vpop.permute.xlu1 %1904 }
  0x91   : > { %v13484_v57 = vsel %vm382_vm0, %v1825_v31, %v1905_v9 }
  0x92   : > { %v1827_v16 = vpop.permute.xlu0 %1826  ;;  %4263 = vmatmul.mubr.bf16.gmra.mxu0 %v4035_v49 }
  0x93   : > { %4270 = vmatprep.mubr.bf16.mxu0 %v4102_v37 }
  0x94   : > { %v2005_v43 = vpop.permute.xlu1 %2004 }
  0x95   : > { %v2057_v51 = vsel %vm382_vm0, %v1925_v22, %v2005_v43 }
  0x96   : > { %v2003_v59 = vpop.permute.xlu0 %2002  ;;  %v2142_v6 = vcombine.low %v13484_v57, %v2057_v51  ;;  %v2143_v23 = vcombine.high %v13484_v57, %v2057_v51 }
  0x97   : > { %v13489_v11 = vsel %vm382_vm0, %v1923_v53, %v2003_v59 }
  0x98   : > { %v2102_v61 = vcombine.low %v2024_v60, %v13489_v11  ;;  %v1907_v18 = vpop.permute.xlu1 %1906  ;;  %v4651_v21 = vcombine.low %v13489_v11, %v13484_v57  ;;  %v4652_v10 = vcombine.high %v13489_v11, %v13484_v57  ;;  %v2150_v42 = vrot.slane %v2142_v6, %v12729_v13 }
  0x99   : > { %v2030_v0 = vsel %vm382_vm0, %v1827_v16, %v1907_v18  ;;  %v2103_v52 = vcombine.high %v2024_v60, %v13489_v11  ;;  %v2157_v9 = vrot.slane %v2143_v23, %v12729_v13  ;;  %v12611_v11 = vld [vmem:[%s16196_s1 + $0x20] sm:$0xff]  }
  0x9a   : > { %v2110_v17 = vrot.slane %v2102_v61, %v12729_v13  ;;  %v1927_v50 = vpop.permute.xlu0 %1926  ;;  %4271 = vmatmul.mubr.bf16.gmra.mxu0 %v4101_v20  ;;  %v4666_v54 = vrot.slane %v4652_v10, %v12729_v13  ;;  %v4691_v40 = vcombine.low %v2057_v51, %v2030_v0  ;;  %v4692_v4 = vcombine.high %v2057_v51, %v2030_v0 }
  0x9b   : > { %v2158_v45 = vcombine.high %v2150_v42, %v2150_v42  ;;  %v2117_v35 = vrot.slane %v2103_v52, %v12729_v13  ;;  %v2165_v55 = vrot.slane %v2150_v42, %v12729_v13 }
  0x9c   : > { %v2007_v19 = vpop.permute.xlu1 %2006  ;;  %v2118_v32 = vcombine.high %v2110_v17, %v2110_v17  ;;  %v4699_v1 = vrot.slane %v4691_v40, %v12729_v13  ;;  %v4681_v30 = vrot.slane %v4666_v54, %v12729_v13  ;;  %v4706_v29 = vrot.slane %v4692_v4, %v12729_v13 }
  0x9d   : > { %v13509_v34 = vsel %vm382_vm0, %v1927_v50, %v2007_v19  ;;  %v2125_v62 = vrot.slane %v2110_v17, %v12729_v13  ;;  %v2132_v22 = vrot.slane %v2117_v35, %v12729_v13  ;;  %v13532_v63 = vrot.slane %v2158_v45, %v12729_v13 }
  0x9e   : > { %v1829_v24 = vpop.permute.xlu0 %1828  ;;  %v4707_v39 = vcombine.high %v4699_v1, %v4699_v1  ;;  %v13506_v56 = vrot.slane %v4699_v1, %v12729_v13  ;;  %v2139_v12 = vrot.slane %v2118_v32, %v12729_v13  ;;  %v2182_v3 = vcombine.low %v2030_v0, %v13509_v34 }
  0x9f   : > { %v4721_v58 = vrot.slane %v4706_v29, %v12729_v13  ;;  %v2180_v5 = vcombine.high %v2165_v55, %v2165_v55  ;;  %v2504_v43 = vcombine.low %v2132_v22, %v2165_v55  ;;  %v2183_v51 = vcombine.high %v2030_v0, %v13509_v34 }
  0xa0   : > { %v1909_v25 = vpop.permute.xlu1 %1908  ;;  %v13515_v49 = vrot.slane %v4707_v39, %v12729_v13  ;;  %v13518_v7 = vcombine.low %v4681_v30, %v13506_v56  ;;  %v2502_v27 = vcombine.low %v2125_v62, %v2139_v12  ;;  %v11787_v37 = vcombine.high %v2125_v62, %v2139_v12 }
  0xa1   : > { %v13521_v15 = vsel %vm382_vm0, %v1829_v24, %v1909_v25  ;;  %v2190_v41 = vrot.slane %v2182_v3, %v12729_v13  ;;  %v2505_v61 = vcombine.low %v13532_v63, %v2180_v5  ;;  %v2172_v17 = vrot.slane %v2157_v9, %v12729_v13 }
  0xa2   : > { %v1929_v26 = vpop.permute.xlu0 %1928  ;;  %v4730_v31 = vcombine.high %v13515_v49, %v13515_v49  ;;  %v4732_v46 = vcombine.high %v13509_v34, %v13521_v15  ;;  %v2512_v18 = vrot.slane %v2502_v27, %v12729_v13  ;;  %v2519_v10 = vrot.slane %v11787_v37, %v12729_v13 }
  0xa3   : > { %v2198_v42 = vcombine.high %v2190_v41, %v2190_v41  ;;  %v2181_v54 = vcombine.high %v13532_v63, %v13532_v63  ;;  %v2526_v40 = vrot.slane %v2504_v43, %v12729_v13  ;;  %v2197_v4 = vrot.slane %v2183_v51, %v12729_v13 }
  0xa4   : > { %v2009_v47 = vpop.permute.xlu1 %2008  ;;  %v13538_v16 = vcombine.low %v4730_v31, %v4721_v58  ;;  %v4746_v59 = vrot.slane %v4732_v46, %v12729_v13  ;;  %v2205_v19 = vrot.slane %v2190_v41, %v12729_v13  ;;  %v2533_v35 = vrot.slane %v2505_v61, %v12729_v13 }
  0xa5   : > { %v13535_v53 = vsel %vm382_vm0, %v1929_v26, %v2009_v47  ;;  %v2535_v30 = vcombine.high %v2512_v18, %v2519_v10  ;;  %v2534_v29 = vcombine.low %v2512_v18, %v2519_v10  ;;  %v2219_v26 = vrot.slane %v2198_v42, %v12729_v13 }
  0xa6   : > { %v1831_v36 = vpop.permute.xlu0 %1830  ;;  %v2222_v20 = vcombine.low %v13521_v15, %v13535_v53  ;;  %v4761_v45 = vrot.slane %v4746_v59, %v12729_v13  ;;  %v2537_v62 = vcombine.high %v2526_v40, %v2533_v35  ;;  %v2536_v3 = vcombine.low %v2526_v40, %v2533_v35 }
  0xa7   : > { %v2551_v22 = vrot.slane %v2535_v30, %v12729_v13  ;;  %v2544_v27 = vrot.slane %v2534_v29, %v12729_v13  ;;  %v2223_v41 = vcombine.high %v13521_v15, %v13535_v53  ;;  %v11788_v42 = vcombine.high %v2205_v19, %v2219_v26  ;;  %v12606_v30 = vld [vmem:[%s16196_s1 + $0x70] sm:$0xff]  }
  0xa8   : > { %v1911_v60 = vpop.permute.xlu1 %1910  ;;  %v2230_v32 = vrot.slane %v2222_v20, %v12729_v13  ;;  %v2565_v5 = vrot.slane %v2537_v62, %v12729_v13  ;;  %v2558_v37 = vrot.slane %v2536_v3, %v12729_v13  ;;  %v2569_v20 = vcombine.low %v2205_v19, %v2219_v26 }
  0xa9   : > { %v13546_v6 = vsel %vm382_vm0, %v1831_v36, %v1911_v60  ;;  %v2212_v36 = vrot.slane %v2197_v4, %v12729_v13 }
  0xaa   : > { %v4771_v0 = vcombine.low %v13535_v53, %v13546_v6  ;;  %v1931_v50 = vpop.permute.xlu0 %1930  ;;  %v4772_v52 = vcombine.high %v13535_v53, %v13546_v6  ;;  %v2238_v58 = vcombine.high %v2230_v32, %v2230_v32  ;;  %v13575_v31 = vrot.slane %v2230_v32, %v12729_v13 }
  0xab   : > { %v2567_v60 = vcombine.low %v2551_v22, %v2565_v5  ;;  %v2566_v61 = vcombine.low %v2544_v27, %v2558_v37  ;;  %v4731_v5 = vcombine.low %v13509_v34, %v13521_v15 }
  0xac   : > { %v4779_v1 = vrot.slane %v4771_v0, %v12729_v13  ;;  %v2011_v24 = vpop.permute.xlu1 %2010  ;;  %v4786_v39 = vrot.slane %v4772_v52, %v12729_v13  ;;  %v2259_v52 = vrot.slane %v2238_v58, %v12729_v13  ;;  %v2571_v53 = vcombine.low %v2212_v36, %v13575_v31 }
  0xad   : > { %v13570_v12 = vsel %vm382_vm0, %v1931_v50, %v2011_v24  ;;  %v2568_v50 = vcombine.low %v2181_v54, %v2172_v17  ;;  %2967 = vmatprep.mubr.bf16.mxu1 %v2567_v60  ;;  %v12605_v17 = vld [vmem:[%s16196_s1 + $0x38] sm:$0xff]   ;;  %v2260_v27 = vcombine.high %v13575_v31, %v13575_v31 }
  0xae   : > { %v4787_v25 = vcombine.high %v4779_v1, %v4779_v1  ;;  %v13567_v55 = vrot.slane %v4779_v1, %v12729_v13  ;;  %v1833_v23 = vpop.permute.xlu0 %1832  ;;  %v2262_v9 = vcombine.low %v13546_v6, %v13570_v12  ;;  %v4801_v43 = vrot.slane %v4786_v39, %v12729_v13  ;;  %2968 = vmatmul.mubr.bf16.vlgmr.msra.gmra.mxu1 %v2566_v61 }
  0xaf   : > { %v2237_v1 = vrot.slane %v2223_v41, %v12729_v13  ;;  %12212 = vmatpush3.bf16.msra.mxu1 %v12605_v17  ;;  %v2578_v19 = vrot.slane %v2568_v50, %v12729_v13  ;;  %v2261_v29 = vcombine.high %v2259_v52, %v2259_v52  ;;  %v2592_v39 = vrot.slane %v11788_v42, %v12729_v13  ;;  %v12608_v41 = vld [vmem:[%s16196_s1 + $0x68] sm:$0xff]  }
  0xb0   : > { %v13578_v46 = vrot.slane %v4787_v25, %v12729_v13  ;;  %v13581_v47 = vcombine.low %v4761_v45, %v13567_v55  ;;  %v1913_v63 = vpop.permute.xlu1 %1912  ;;  %v2270_v18 = vrot.slane %v2262_v9, %v12729_v13  ;;  %v2585_v45 = vrot.slane %v2569_v20, %v12729_v13  ;;  %12213 = vmatprep.subr.bf16.mxu1 %v12606_v30 }
  0xb1   : > { %v13604_v24 = vsel %vm382_vm0, %v1833_v23, %v1913_v63  ;;  %v2599_v25 = vrot.slane %v2571_v53, %v12729_v13  ;;  %v2252_v22 = vrot.slane %v2237_v1, %v12729_v13  ;;  %v12607_v63 = vld [vmem:[%s16196_s1 + $0x30] sm:$0xff]   ;;  %v2263_v34 = vcombine.high %v13546_v6, %v13570_v12  ;;  %v12609_v6 = vld [vmem:[%s16196_s1 + $0x28] sm:$0xff]  }
  0xb2   : > { %v4810_v51 = vcombine.high %v13578_v46, %v13578_v46  ;;  %v1933_v59 = vpop.permute.xlu0 %1932  ;;  %v2278_v4 = vcombine.high %v2270_v18, %v2270_v18  ;;  %v2601_v26 = vcombine.high %v2578_v19, %v2585_v45  ;;  %v2600_v58 = vcombine.low %v2578_v19, %v2585_v45  ;;  %v12610_v45 = vld [vmem:[%s16196_s1 + $0x60] sm:$0xff]  }
  0xb3   : > { %v2603_v3 = vcombine.high %v2592_v39, %v2599_v25  ;;  %12214 = vmatpush3.bf16.msra.mxu1 %v12607_v63  ;;  %v2285_v37 = vrot.slane %v2270_v18, %v12729_v13  ;;  %v2602_v20 = vcombine.low %v2592_v39, %v2599_v25  ;;  %v4659_v30 = vrot.slane %v4651_v21, %v12729_v13 }
  0xb4   : > { %v13595_v10 = vcombine.low %v4810_v51, %v4801_v43  ;;  %v2013_v0 = vpop.permute.xlu1 %2012  ;;  %v2299_v23 = vrot.slane %v2278_v4, %v12729_v13  ;;  %12215 = vmatprep.subr.bf16.mxu1 %v12608_v41  ;;  %v2635_v43 = vcombine.low %v2261_v29, %v2252_v22  ;;  %v2617_v51 = vrot.slane %v2601_v26, %v12729_v13 }
  0xb5   : > { %v13600_v40 = vsel %vm382_vm0, %v1933_v59, %v2013_v0  ;;  %v2631_v59 = vrot.slane %v2603_v3, %v12729_v13  ;;  %v2610_v0 = vrot.slane %v2600_v58, %v12729_v13  ;;  %v2624_v50 = vrot.slane %v2602_v20, %v12729_v13 }
  0xb6   : > { %v1835_v32 = vpop.permute.xlu0 %1834  ;;  %v2302_v54 = vcombine.low %v13604_v24, %v13600_v40  ;;  %v2636_v15 = vcombine.low %v2285_v37, %v2299_v23  ;;  %v11789_v53 = vcombine.high %v2285_v37, %v2299_v23  ;;  %v4739_v39 = vrot.slane %v4731_v5, %v12729_v13  ;;  %v12612_v5 = vld [vmem:[%s16196_s1 + $0x58] sm:$0xff]  }
  0xb7   : > { %v2633_v18 = vcombine.low %v2617_v51, %v2631_v59  ;;  %12216 = vmatpush3.bf16.msra.mxu1 %v12609_v6  ;;  %v2277_v25 = vrot.slane %v2263_v34, %v12729_v13 }
  0xb8   : > { %v1915_v35 = vpop.permute.xlu1 %1914  ;;  %v2310_v9 = vrot.slane %v2302_v54, %v12729_v13  ;;  %12217 = vmatprep.subr.bf16.mxu1 %v12610_v45  ;;  %v2632_v54 = vcombine.low %v2610_v0, %v2624_v50  ;;  %v2658_v26 = vrot.slane %v2636_v15, %v12729_v13  ;;  %v2665_v3 = vrot.slane %v11789_v53, %v12729_v13  ;;  %v12613_v0 = vld [vmem:[%s16196_s1 + $0x18] sm:$0xff]  }
  0xb9   : > { %v13637_v31 = vsel %vm382_vm0, %v1835_v32, %v1915_v35  ;;  %v2634_v32 = vcombine.low %v2259_v52, %v2260_v27  ;;  %2975 = vmatprep.mubr.bf16.mxu1 %v2633_v18  ;;  %v2651_v35 = vrot.slane %v2635_v43, %v12729_v13  ;;  %v2303_v52 = vcombine.high %v13604_v24, %v13600_v40 }
  0xba   : > { %v1935_v62 = vpop.permute.xlu0 %1934  ;;  %v2318_v4 = vcombine.high %v2310_v9, %v2310_v9  ;;  %v2325_v17 = vrot.slane %v2310_v9, %v12729_v13  ;;  %2976 = vmatmul.mubr.bf16.gmra.mxu1 %v2632_v54  ;;  %v2669_v37 = vcombine.high %v2658_v26, %v2665_v3  ;;  %v4747_v41 = vcombine.high %v4739_v39, %v4739_v39 }
  0xbb   : > { %v2644_v23 = vrot.slane %v2634_v32, %v12729_v13  ;;  %12218 = vmatpush3.bf16.msra.mxu1 %v12611_v11  ;;  %v2317_v27 = vrot.slane %v2303_v52, %v12729_v13  ;;  %v2292_v43 = vrot.slane %v2277_v25, %v12729_v13  ;;  %v2668_v51 = vcombine.low %v2658_v26, %v2665_v3 }
  0xbc   : > { %v2015_v36 = vpop.permute.xlu1 %2014  ;;  %v2340_v21 = vcombine.high %v2325_v17, %v2325_v17  ;;  %12219 = vmatprep.subr.bf16.mxu1 %v12612_v5  ;;  %v2697_v15 = vrot.slane %v2669_v37, %v12729_v13  ;;  %v13710_v3 = vrot.slane %v4659_v30, %v12729_v13  ;;  %v13731_v5 = vrot.slane %v4739_v39, %v12729_v13  ;;  %v12616_v37 = vld [vmem:[%s16196_s1 + $0x48] sm:$0xff]  }
  0xbd   : > { %v13640_v60 = vsel %vm382_vm0, %v1935_v62, %v2015_v36  ;;  %v2339_v62 = vrot.slane %v2318_v4, %v12729_v13  ;;  %v2667_v58 = vcombine.high %v2644_v23, %v2651_v35  ;;  %v2666_v63 = vcombine.low %v2644_v23, %v2651_v35  ;;  %v12614_v4 = vld [vmem:[%s16196_s1 + $0x50] sm:$0xff]  }
  0xbe   : > { %v1837_v61 = vpop.permute.xlu0 %1836  ;;  %v2342_v42 = vcombine.low %v13637_v31, %v13640_v60  ;;  %v4667_v36 = vcombine.high %v4659_v30, %v4659_v30  ;;  %v2332_v32 = vrot.slane %v2317_v27, %v12729_v13  ;;  %v16319_v30 = vcombine.low %v13111_v28, %v13131_v48 }
  0xbf   : > { %v2341_v59 = vcombine.high %v2339_v62, %v2339_v62  ;;  %v2683_v34 = vrot.slane %v2667_v58, %v12729_v13  ;;  %12220 = vmatpush3.bf16.msra.mxu1 %v12613_v0  ;;  %v2676_v50 = vrot.slane %v2666_v63, %v12729_v13  ;;  %v2701_v53 = vcombine.low %v2339_v62, %v2340_v21  ;;  %v12615_v21 = vld [vmem:[%s16196_s1 + $0x10] sm:$0xff]  }
  0xc0   : > { %v1917_v1 = vpop.permute.xlu1 %1916  ;;  %v2350_v19 = vrot.slane %v2342_v42, %v12729_v13  ;;  %v2690_v42 = vrot.slane %v2668_v51, %v12729_v13  ;;  %12221 = vmatprep.subr.bf16.mxu1 %v12614_v4  ;;  %v13703_v25 = vrot.slane %v4667_v36, %v12729_v13  ;;  %v13726_v58 = vrot.slane %v16319_v30, %v12729_v13  ;;  %v12617_v4 = vld [vmem:[%s16196_s1 + $0x8] sm:$0xff]  }
  0xc1   : > { %v2699_v54 = vcombine.low %v2683_v34, %v2697_v15  ;;  %v13700_v35 = vsel %vm382_vm0, %v1837_v61, %v1917_v1  ;;  %v2702_v62 = vcombine.low %v2341_v59, %v2332_v32  ;;  %v13713_v61 = vrot.slane %v4747_v41, %v12729_v13 }
  0xc2   : > { %v1937_v29 = vpop.permute.xlu0 %1936  ;;  %v2358_v22 = vcombine.high %v2350_v19, %v2350_v19  ;;  %v13697_v45 = vrot.slane %v2350_v19, %v12729_v13  ;;  %v2698_v23 = vcombine.low %v2676_v50, %v2690_v42  ;;  %v5051_v63 = vcombine.low %v13710_v3, %v13703_v25 }
  0xc3   : > { %2983 = vmatprep.mubr.bf16.mxu1 %v2699_v54  ;;  %12222 = vmatpush3.bf16.msra.mxu1 %v12615_v21  ;;  %v11830_v36 = vcombine.high %v13710_v3, %v13703_v25  ;;  %v2724_v28 = vrot.slane %v2702_v62, %v12729_v13  ;;  %v4729_v39 = vcombine.high %v13506_v56, %v13506_v56 }
  0xc4   : > { %v2017_v57 = vpop.permute.xlu1 %2016  ;;  %v13678_v20 = vrot.slane %v2358_v22, %v12729_v13  ;;  %2984 = vmatmul.mubr.bf16.gmra.mxu1 %v2698_v23  ;;  %12223 = vmatprep.subr.bf16.mxu1 %v12616_v37  ;;  %v5118_v51 = vcombine.low %v13731_v5, %v13713_v61  ;;  %v2343_v59 = vcombine.high %v13637_v31, %v13640_v60 }
  0xc5   : > { %v13690_v6 = vsel %vm382_vm0, %v1937_v29, %v2017_v57  ;;  %v2700_v29 = vcombine.low %v2292_v43, %v2325_v17  ;;  %v2717_v17 = vrot.slane %v2701_v53, %v12729_v13  ;;  %v4811_v57 = vcombine.low %v13570_v12, %v13604_v24 }
  0xc6   : > { %v13674_v9 = vpop.permute.xlu0 %1838  ;;  %v2382_v26 = vcombine.low %v13700_v35, %v13690_v6  ;;  %v2703_v22 = vcombine.low %v13697_v45, %v13678_v20  ;;  %v4851_v0 = vcombine.low %v13600_v40, %v13637_v31  ;;  %v2383_v50 = vcombine.high %v13700_v35, %v13690_v6 }
  0xc7   : > { %v2710_v27 = vrot.slane %v2700_v29, %v12729_v13  ;;  %v13748_v15 = vrot.slane %v4811_v57, %v12729_v13  ;;  %12224 = vmatpush3.bf16.msra.mxu1 %v12617_v4  ;;  %v5075_v56 = vrot.slane %v13518_v7, %v12729_v13 }
  0xc8   : > { %v13682_v18 = vpop.permute.xlu1 %1840  ;;  %v2390_v1 = vrot.slane %v2382_v26, %v12729_v13  ;;  %v2731_v48 = vrot.slane %v2703_v22, %v12729_v13  ;;  %v12618_v26 = vld [vmem:[%s16196_s1 + $0x40] sm:$0xff]   ;;  %v2397_v37 = vrot.slane %v2383_v50, %v12729_v13  ;;  %v11831_v50 = vcombine.high %v13731_v5, %v13713_v61 }
  0xc9   : > { %v2733_v34 = vcombine.high %v2710_v27, %v2717_v17  ;;  %v2732_v29 = vcombine.low %v2710_v27, %v2717_v17  ;;  %12225 = vmatprep.subr.bf16.mxu1 %v12618_v26  ;;  %v13777_v27 = vrot.slane %v4851_v0, %v12729_v13  ;;  %v4827_v4 = vcombine.high %v13748_v15, %v13748_v15 }
  0xca   : > { %v1919_v52 = vpop.permute.xlu0 %1918  ;;  %v2398_v41 = vcombine.high %v2390_v1, %v2390_v1  ;;  %v2735_v42 = vcombine.high %v2724_v28, %v2731_v48  ;;  %v2405_v32 = vrot.slane %v2390_v1, %v12729_v13  ;;  %v2734_v23 = vcombine.low %v2724_v28, %v2731_v48  ;;  %v12619_v28 = vld [vmem:[%s16196_s1] sm:$0xff]  }
  0xcb   : > { %v13760_v54 = vsel %vm382_vm0, %v13674_v9, %v1919_v52  ;;  %v2749_v22 = vrot.slane %v2733_v34, %v12729_v13  ;;  %v2357_v9 = vrot.slane %v2343_v59, %v12729_v13  ;;  %v2742_v52 = vrot.slane %v2732_v29, %v12729_v13  ;;  %12226 = vmatpush3.bf16.msra.mxu1 %v12619_v28 }
  0xcc   : > { %v1921_v19 = vpop.permute.xlu1 %1920  ;;  %v2419_v62 = vrot.slane %v2398_v41, %v12729_v13  ;;  %v2763_v57 = vrot.slane %v2735_v42, %v12729_v13  ;;  %v2756_v17 = vrot.slane %v2734_v23, %v12729_v13  ;;  %v4867_v23 = vcombine.high %v13777_v27, %v13777_v27 }
  0xcd   : > { %v13782_v41 = vsel %vm382_vm0, %v13682_v18, %v1921_v19  ;;  %v2420_v18 = vcombine.high %v2405_v32, %v2405_v32  ;;  %v2372_v29 = vrot.slane %v2357_v9, %v12729_v13  ;;  %v4891_v26 = vcombine.low %v13640_v60, %v13700_v35 }
  0xce   : > { %v1939_v11 = vpop.permute.xlu0 %1938  ;;  %v2764_v48 = vcombine.low %v2742_v52, %v2756_v17  ;;  %v2421_v19 = vcombine.high %v2419_v62, %v2419_v62 }
  0xd0   : > { %v1941_v43 = vpop.permute.xlu1 %1940 }
  0xd2   : > { %v2019_v53 = vpop.permute.xlu0 %2018 }
  0xd3   : > { %v13769_v21 = vsel %vm382_vm0, %v1939_v11, %v2019_v53  ;;  %v2765_v11 = vcombine.low %v2749_v22, %v2763_v57  ;;  %v4812_v53 = vcombine.high %v13570_v12, %v13604_v24  ;;  %v2412_v22 = vrot.slane %v2397_v37, %v12729_v13 }
  0xd4   : > { %v2021_v1 = vpop.permute.xlu1 %2020  ;;  %v2422_v30 = vcombine.low %v13760_v54, %v13769_v21  ;;  %v2423_v59 = vcombine.high %v13760_v54, %v13769_v21  ;;  %v11790_v12 = vcombine.high %v13697_v45, %v13678_v20  ;;  %v2767_v24 = vcombine.low %v2372_v29, %v2405_v32 }
  0xd5   : > { %v13791_v0 = vsel %vm382_vm0, %v1941_v43, %v2021_v1  ;;  %2991 = vmatprep.mubr.bf16.mxu1 %v2765_v11  ;;  %v2769_v52 = vcombine.low %v2421_v19, %v2412_v22  ;;  %v2768_v11 = vcombine.low %v2419_v62, %v2420_v18  ;;  %v13816_v37 = vrot.slane %v4812_v53, %v12729_v13 }
  0xd6   : > { %v2430_v34 = vrot.slane %v2422_v30, %v12729_v13  ;;  %v2462_v42 = vcombine.low %v13782_v41, %v13791_v0  ;;  %2992 = vmatmul.mubr.bf16.gmra.mxu1 %v2764_v48  ;;  %v2437_v1 = vrot.slane %v2423_v59, %v12729_v13  ;;  %v2463_v20 = vcombine.high %v13782_v41, %v13791_v0 }
  0xd7   : > { %v13822_v45 = vrot.slane %v4827_v4, %v12729_v13  ;;  %v13827_v59 = vrot.slane %v4867_v23, %v12729_v13  ;;  %v13830_v62 = vrot.slane %v4891_v26, %v12729_v13  ;;  %v2776_v53 = vrot.slane %v11790_v12, %v12729_v13 }
  0xd8   : > { %v2438_v43 = vcombine.high %v2430_v34, %v2430_v34  ;;  %v2470_v57 = vrot.slane %v2462_v42, %v12729_v13  ;;  %v2445_v48 = vrot.slane %v2430_v34, %v12729_v13  ;;  %v2452_v18 = vrot.slane %v2437_v1, %v12729_v13 }
  0xd9   : > { %v2783_v4 = vrot.slane %v2767_v24, %v12729_v13  ;;  %v2790_v29 = vrot.slane %v2768_v11, %v12729_v13  ;;  %v4892_v23 = vcombine.high %v13640_v60, %v13700_v35  ;;  %v2477_v26 = vrot.slane %v2463_v20, %v12729_v13 }
  0xda   : > { %v2459_v9 = vrot.slane %v2438_v43, %v12729_v13  ;;  %v2478_v17 = vcombine.high %v2470_v57, %v2470_v57  ;;  %v2485_v30 = vrot.slane %v2470_v57, %v12729_v13  ;;  %v2797_v43 = vrot.slane %v2769_v52, %v12729_v13 }
  0xdb   : > { %v2799_v1 = vcombine.high %v2776_v53, %v2783_v4  ;;  %v2798_v32 = vcombine.low %v2776_v53, %v2783_v4  ;;  %v4907_v12 = vcombine.high %v13830_v62, %v13830_v62  ;;  %v4931_v24 = vcombine.low %v13690_v6, %v13760_v54 }
  0xdc   : > { %v2832_v19 = vcombine.low %v2445_v48, %v2459_v9  ;;  %v2499_v34 = vrot.slane %v2478_v17, %v12729_v13  ;;  %v2500_v42 = vcombine.high %v2485_v30, %v2485_v30  ;;  %v11791_v22 = vcombine.high %v2445_v48, %v2459_v9 }
  0xdd   : > { %v2834_v57 = vcombine.low %v2452_v18, %v2485_v30  ;;  %v2801_v14 = vcombine.high %v2790_v29, %v2797_v43  ;;  %v2800_v17 = vcombine.low %v2790_v29, %v2797_v43  ;;  %v2815_v28 = vrot.slane %v2799_v1, %v12729_v13 }
  0xde   : > { %v2835_v11 = vcombine.low %v2499_v34, %v2500_v42  ;;  %v2842_v52 = vrot.slane %v2832_v19, %v12729_v13  ;;  %v2808_v48 = vrot.slane %v2798_v32, %v12729_v13  ;;  %v2492_v20 = vrot.slane %v2477_v26, %v12729_v13 }
  0xdf   : > { %v2829_v9 = vrot.slane %v2801_v14, %v12729_v13  ;;  %v2822_v30 = vrot.slane %v2800_v17, %v12729_v13  ;;  %v2849_v18 = vrot.slane %v11791_v22, %v12729_v13  ;;  %v2856_v53 = vrot.slane %v2834_v57, %v12729_v13 }
  0xe0   : > { %v2863_v4 = vrot.slane %v2835_v11, %v12729_v13  ;;  %v2501_v43 = vcombine.high %v2499_v34, %v2499_v34  ;;  %v5054_v14 = vcombine.low %v13515_v49, %v4729_v39  ;;  %v5061_v22 = vrot.slane %v5051_v63, %v12729_v13 }
  0xe1   : > { %v2831_v29 = vcombine.low %v2815_v28, %v2829_v9  ;;  %v2830_v42 = vcombine.low %v2808_v48, %v2822_v30  ;;  %v2865_v19 = vcombine.high %v2842_v52, %v2849_v18  ;;  %v2864_v1 = vcombine.low %v2842_v52, %v2849_v18 }
  0xe2   : > { %v2867_v32 = vcombine.high %v2856_v53, %v2863_v4  ;;  %v2866_v17 = vcombine.low %v2856_v53, %v2863_v4  ;;  %v2898_v26 = vcombine.low %v2501_v43, %v2492_v20  ;;  %v5068_v28 = vrot.slane %v11830_v36, %v12729_v13 }
  0xe3   : > { %2999 = vmatprep.mubr.bf16.mxu1 %v2831_v29  ;;  %v2881_v49 = vrot.slane %v2865_v19, %v12729_v13  ;;  %v2874_v34 = vrot.slane %v2864_v1, %v12729_v13  ;;  %v5082_v63 = vrot.slane %v5054_v14, %v12729_v13  ;;  %v4939_v3 = vrot.slane %v4931_v24, %v12729_v13 }
  0xe4   : > { %3000 = vmatmul.mubr.bf16.gmra.mxu1 %v2830_v42  ;;  %v2895_v39 = vrot.slane %v2867_v32, %v12729_v13  ;;  %v2888_v57 = vrot.slane %v2866_v17, %v12729_v13  ;;  %v13873_v11 = vrot.slane %v2898_v26, %v12729_v13  ;;  %v5083_v52 = vcombine.low %v5061_v22, %v5068_v28 }
  0xe5   : > { %v5084_v25 = vcombine.high %v5061_v22, %v5068_v28  ;;  %v5134_v9 = vrot.slane %v5118_v51, %v12729_v13  ;;  %v5085_v30 = vcombine.low %v5075_v56, %v5082_v63  ;;  %v5086_v20 = vcombine.high %v5075_v56, %v5082_v63 }
  0xe6   : > { %v2897_v36 = vcombine.low %v2881_v49, %v2895_v39  ;;  %v2896_v7 = vcombine.low %v2874_v34, %v2888_v57  ;;  %v2906_v48 = vcombine.high %v13873_v11, %v13873_v11  ;;  %v5127_v18 = vrot.slane %v13538_v16, %v12729_v13  ;;  %v4638_v34 = vpop.permute.xlu0 %4637  ;;  %v4646_v57 = vpop.permute.xlu1 %4645 }
  0xe7   : > { %v5100_v53 = vrot.slane %v5084_v25, %v12729_v13  ;;  %v13887_v24 = vrot.slane %v5083_v52, %v12729_v13  ;;  %v5141_v4 = vrot.slane %v11831_v50, %v12729_v13  ;;  %v5148_v51 = vrot.slane %v13581_v47, %v12729_v13 }
  0xe8   : > { %3007 = vmatprep.mubr.bf16.mxu1 %v2897_v36  ;;  %v2920_v29 = vrot.slane %v2906_v48, %v12729_v13  ;;  %v5114_v42 = vrot.slane %v5086_v20, %v12729_v13  ;;  %v13898_v16 = vrot.slane %v5085_v30, %v12729_v13  ;;  %v5150_v43 = vcombine.high %v5127_v18, %v5134_v9 }
  0xe9   : > { %v5152_v14 = vcombine.high %v5141_v4, %v5148_v51  ;;  %v5149_v19 = vcombine.low %v5127_v18, %v5134_v9  ;;  %v5151_v32 = vcombine.low %v5141_v4, %v5148_v51  ;;  %v16320_v1 = vcombine.high %v13567_v55, %v13567_v55 }
  0xea   : > { %v5116_v5 = vcombine.low %v5100_v53, %v5114_v42  ;;  %v5115_v47 = vcombine.low %v13887_v24, %v13898_v16  ;;  %v13907_v50 = vrot.slane %v5150_v43, %v12729_v13  ;;  %v13911_v17 = vrot.slane %v13595_v10, %v12729_v13  ;;  %v16322_v42 = vld [vmem:[#allocation27_spill] sm:$0xff] }
  0xeb   : > { %v5183_v61 = vcombine.low %v13578_v46, %v16320_v1  ;;  %v13914_v26 = vrot.slane %v5152_v14, %v12729_v13  ;;  %v13917_v22 = vrot.slane %v5149_v19, %v12729_v13  ;;  %v13920_v55 = vrot.slane %v5151_v32, %v12729_v13 }
  0xec   : > { %3008 = vmatmul.mubr.bf16.gmra.mxu1 %v2896_v7  ;;  %v4834_v28 = vrot.slane %v13748_v15, %v12729_v13  ;;  %v16321_v10 = vcombine.high %v13600_v40, %v13637_v31  ;;  %v13933_v49 = vrot.slane %v13777_v27, %v12729_v13  ;;  %v4947_v39 = vcombine.high %v4939_v3, %v4939_v3 }
  0xed   : > { %v13923_v46 = vrot.slane %v5183_v61, %v12729_v13  ;;  %3015 = vmatprep.mubr.bf16.mxu1 %v2920_v29  ;;  %v5182_v63 = vcombine.low %v13907_v50, %v13914_v26  ;;  %v5181_v52 = vcombine.low %v13917_v22, %v13920_v55  ;;  %v3749_v31 = vcombine.high %v13726_v58, %v13726_v58 }
  0xee   : > { %v4866_v56 = vrot.slane %v16321_v10, %v12729_v13  ;;  %v4890_v27 = vcombine.high %v13827_v59, %v13827_v59  ;;  %v4906_v25 = vrot.slane %v4892_v23, %v12729_v13  ;;  %v13955_v36 = vrot.slane %v4907_v12, %v12729_v13 }
  0xef   : > { %v5216_v15 = vcombine.high %v13923_v46, %v13911_v17  ;;  %v5215_v40 = vcombine.low %v13923_v46, %v13911_v17  ;;  %v3756_v7 = vrot.slane %v13726_v58, %v12729_v13  ;;  %v4841_v9 = vrot.slane %v13816_v37, %v12729_v13 }
  0xf0   : > { %v5185_v48 = vcombine.low %v4834_v28, %v13822_v45  ;;  %v4932_v30 = vcombine.high %v13690_v6, %v13760_v54  ;;  %v4881_v60 = vrot.slane %v4866_v56, %v12729_v13  ;;  %v13967_v35 = vrot.slane %v13830_v62, %v12729_v13 }
  0xf1   : > { %v13970_v23 = vrot.slane %v4947_v39, %v12729_v13  ;;  %v13973_v12 = vsel %vm382_vm0, %v4638_v34, %v4646_v57  ;;  %v11832_v58 = vcombine.high %v4834_v28, %v13822_v45  ;;  %v4889_v37 = vcombine.high %v13933_v49, %v13933_v49 }
  0xf2   : > { %v4971_v6 = vcombine.low %v13769_v21, %v13782_v41  ;;  %v2913_v54 = vrot.slane %v13873_v11, %v12729_v13  ;;  %v13983_v62 = vcombine.low %v4841_v9, %v13933_v49  ;;  %v13985_v20 = vcombine.low %v4890_v27, %v4881_v60 }
  0xf3   : > { %v4921_v18 = vrot.slane %v4906_v25, %v12729_v13  ;;  %v5252_v53 = vcombine.low %v13967_v35, %v13955_v36  ;;  %v4946_v45 = vrot.slane %v4932_v30, %v12729_v13  ;;  %v13992_v4 = vrot.slane %v4939_v3, %v12729_v13 }
  0xf4   : > { %v4972_v51 = vcombine.high %v13769_v21, %v13782_v41  ;;  %v5011_v11 = vcombine.low %v13791_v0, %v13973_v12  ;;  %3016 = vmatmul.mubr.bf16.gmra.mxu1 %v2913_v54  ;;  %v4970_v29 = vcombine.high %v13970_v23, %v13970_v23  ;;  %v16323_v43 = vcombine.low %v16283_v33, %v16322_v42 }
  0xf5   : > { %5516 = vmatprep.mubr.bf16.mxu1 %v5116_v5  ;;  %v16324_v3 = vcombine.high %v16275_v8, %v16278_v2  ;;  %v3770_v21 = vrot.slane %v3749_v31, %v12729_v13  ;;  %v14010_v41 = vrot.slane %v4971_v6, %v12729_v13  ;;  %v14013_v32 = vrot.slane %v5185_v48, %v12729_v13 }
  0xf6   : > { %v3701_v14 = vrot.slane %v16323_v43, %v12729_v13  ;;  %v14016_v1 = vrot.slane %v11832_v58, %v12729_v13  ;;  %v3771_v61 = vcombine.high %v3756_v7, %v3756_v7  ;;  %v11833_v33 = vcombine.high %v13967_v35, %v13955_v36 }
  0xf7   : > { %v3708_v19 = vrot.slane %v16324_v3, %v12729_v13  ;;  %v4961_v2 = vrot.slane %v4946_v45, %v12729_v13  ;;  %v14024_v10 = vrot.slane %v4972_v51, %v12729_v13  ;;  %v14027_v56 = vrot.slane %v5011_v11, %v12729_v13 }
  0xf8   : > { %v3709_v5 = vcombine.high %v3701_v14, %v3701_v14  ;;  %v3716_v28 = vrot.slane %v3701_v14, %v12729_v13  ;;  %v4106_v49 = vcombine.low %v3770_v21, %v3771_v61  ;;  %v4969_v39 = vcombine.high %v13992_v4, %v13992_v4 }
  0xf9   : > { %v3723_v8 = vrot.slane %v3708_v19, %v12729_v13  ;;  %v14032_v34 = vcombine.low %v4921_v18, %v13992_v4  ;;  %v5318_v27 = vcombine.low %v4970_v29, %v4961_v2  ;;  %v4987_v25 = vcombine.high %v14010_v41, %v14010_v41 }
  0xfa   : > { %v3730_v57 = vrot.slane %v3709_v5, %v12729_v13  ;;  %v5218_v9 = vcombine.high %v14013_v32, %v14016_v1  ;;  %v4134_v48 = vrot.slane %v4106_v49, %v12729_v13  ;;  %v14042_v30 = vrot.slane %v14010_v41, %v12729_v13 }
  0xfb   : > { %v4105_v31 = vcombine.low %v3723_v8, %v3756_v7  ;;  %v5001_v7 = vrot.slane %v14024_v10, %v12729_v13  ;;  %v5027_v54 = vcombine.high %v14027_v56, %v14027_v56  ;;  %v5250_v18 = vcombine.low %v13827_v59, %v4889_v37 }
  0xfc   : > { %v4103_v60 = vcombine.low %v3716_v28, %v3730_v57  ;;  %v11823_v58 = vcombine.high %v3716_v28, %v3730_v57  ;;  %5517 = vmatmul.mubr.bf16.vlgmr.msra.gmra.mxu1 %v5115_v47  ;;  %v16325_v45 = vcombine.high %v13004_v44, %v13164_v38  ;;  %v5246_v24 = vrot.slane %v5218_v9, %v12729_v13 }
  0xfd   : > { %v4127_v6 = vrot.slane %v4105_v31, %v12729_v13  ;;  %5524 = vmatprep.mubr.bf16.mxu1 %v5182_v63  ;;  %v14064_v59 = vrot.slane %v5252_v53, %v12729_v13  ;;  %v3772_v38 = vcombine.high %v3770_v21, %v3770_v21  ;;  %v14072_v63 = vld [vmem:[%s16197_s2] ss:$0 sm:$0xff]  ;;  %v5217_v14 = vcombine.low %v14013_v32, %v14016_v1 }
  0xfe   : > { %v3748_v4 = vrot.slane %v16325_v45, %v12729_v13  ;;  %v4113_v51 = vrot.slane %v4103_v60, %v12729_v13  ;;  %v4120_v11 = vrot.slane %v11823_v58, %v12729_v13  ;;  %v14077_v53 = vrot.slane %v5250_v18, %v12729_v13 }
  0xff   : > { %v4138_v29 = vcombine.high %v4127_v6, %v4134_v48  ;;  %v4137_v42 = vcombine.low %v4127_v6, %v4134_v48  ;;  %v5232_v21 = vrot.slane %v5216_v15, %v12729_v13  ;;  %v14085_v41 = vrot.slane %v13985_v20, %v12729_v13 }
 0x100   : > { %v3763_v16 = vrot.slane %v3748_v4, %v12729_v13  ;;  %v4136_v44 = vcombine.high %v4113_v51, %v4120_v11  ;;  %v4135_v50 = vcombine.low %v4113_v51, %v4120_v11  ;;  %v5034_v32 = vrot.slane %v14027_v56, %v12729_v13 }
 0x101   : > { %v12053_v43 = vpop.f32.mrf.mxu0  ;;  %v4166_v47 = vrot.slane %v4138_v29, %v12729_v13  ;;  %v4159_v26 = vrot.slane %v4137_v42, %v12729_v13  ;;  %v14093_v1 = vrot.slane %v13983_v62, %v12729_v13  ;;  %v5248_v2 = vcombine.low %v5232_v21, %v5246_v24 }
 0x102   : > { %v4169_v19 = vcombine.low %v3772_v38, %v3763_v16  ;;  %v4152_v61 = vrot.slane %v4136_v44, %v12729_v13  ;;  %v4145_v5 = vrot.slane %v4135_v50, %v12729_v13  ;;  %v5284_v20 = vcombine.high %v14085_v41, %v14064_v59 }
 0x103   : > { %v12054_v37 = vpop.f32.mrf.mxu0  ;;  %v14100_v9 = vrot.slane %v4987_v25, %v12729_v13  ;;  %v5317_v62 = vcombine.low %v13970_v23, %v4969_v39  ;;  %v5012_v60 = vcombine.high %v13791_v0, %v13973_v12  ;;  %v5239_v58 = vrot.slane %v5217_v14, %v12729_v13 }
 0x104   : > { %v12055_v3 = vadd.f32 %v12054_v37, %v12053_v43  ;;  %v4176_v15 = vrot.slane %v4169_v19, %v12729_v13  ;;  %v4168_v49 = vcombine.low %v4152_v61, %v4166_v47  ;;  %v4167_v57 = vcombine.low %v4145_v5, %v4159_v26  ;;  %5525 = vmatmul.mubr.bf16.gmra.mxu1 %v5181_v52 }
 0x105   : > { %v12056_v28 = vpop.f32.mrf.mxu0  ;;  %5532 = vmatprep.mubr.bf16.mxu1 %v5248_v2  ;;  %v5282_v6 = vcombine.high %v14093_v1, %v14077_v53  ;;  %v14112_v18 = vrot.slane %v5318_v27, %v12729_v13  ;;  %v14117_v23 = vrot.slane %v5027_v54, %v12729_v13  ;;  %v5049_v0 = vcombine.high %v5034_v32, %v5034_v32 }
 0x106   : > { %v1426_v8 = vadd.f32 %v12055_v3, %v14072_v63  ;;  %v4177_v56 = vcombine.high %v4176_v15, %v4176_v15  ;;  %4278 = vmatprep.mubr.bf16.mxu0 %v4168_v49  ;;  %v5225_v12 = vrot.slane %v5215_v40, %v12729_v13  ;;  %v5312_v39 = vrot.slane %v5284_v20, %v12729_v13 }
 0x107   : > { %v12057_v31 = vpop.f32.mrf.mxu0  ;;  %4279 = vmatmul.mubr.bf16.gmra.mxu0 %v4167_v57  ;;  %v14126_v27 = vrot.slane %v14032_v34, %v12729_v13  ;;  %v14129_v4 = vrot.slane %v5317_v62, %v12729_v13  ;;  %v5298_v29 = vrot.slane %v5282_v6, %v12729_v13  ;;  %v5283_v17 = vcombine.low %v14085_v41, %v14064_v59 }
 0x108   : > { %v12058_v48 = vadd.f32 %v12057_v31, %v12056_v28  ;;  %v1479_v22 = vmax.f32 %v1426_v8, 0.0  ;;  %v4191_v55 = vrot.slane %v4177_v56, %v12729_v13  ;;  %v5247_v11 = vcombine.low %v5225_v12, %v5239_v58 }
 0x109   : > { %v12059_v25 = vpop.f32.mrf.mxu0  ;;  %v14138_v46 = vrot.slane %v11833_v33, %v12729_v13  ;;  %v5350_v34 = vcombine.high %v14129_v4, %v14112_v18  ;;  %v4184_v42 = vrot.slane %v4176_v15, %v12729_v13  ;;  %v5381_v16 = vcombine.low %v14042_v30, %v14100_v9 }
 0x10a   : > { %v1429_v52 = vadd.f32 %v12058_v48, %v14072_v63  ;;  %4286 = vmatprep.mubr.bf16.mxu0 %v4191_v55  ;;  %v5384_v59 = vcombine.low %v14117_v23, %v5049_v0  ;;  %v5314_v38 = vcombine.low %v5298_v29, %v5312_v39  ;;  %v5281_v35 = vcombine.low %v14093_v1, %v14077_v53 }
 0x10b   : > { %v12060_v45 = vpop.f32.mrf.mxu0  ;;  %v5348_v33 = vcombine.high %v14138_v46, %v14126_v27  ;;  %v11834_v26 = vcombine.high %v14042_v30, %v14100_v9  ;;  %v5383_v37 = vcombine.low %v5001_v7, %v5034_v32  ;;  %v5305_v3 = vrot.slane %v5283_v17, %v12729_v13 }
 0x10c   : > { %v1480_v51 = vmax.f32 %v1429_v52, 0.0  ;;  %v12061_v54 = vadd.f32 %v12060_v45, %v12059_v25  ;;  %5533 = vmatmul.mubr.bf16.gmra.mxu1 %v5247_v11  ;;  %v5378_v53 = vrot.slane %v5350_v34, %v12729_v13  ;;  %v5026_v21 = vrot.slane %v5012_v60, %v12729_v13 }
 0x10d   : > { %v12062_v40 = vpop.f32.mrf.mxu0  ;;  %5540 = vmatprep.mubr.bf16.mxu1 %v5314_v38  ;;  %v5412_v41 = vrot.slane %v5384_v59, %v12729_v13  ;;  %v5291_v10 = vrot.slane %v5281_v35, %v12729_v13  ;;  %v5364_v7 = vrot.slane %v5348_v33, %v12729_v13  ;;  %v5391_v28 = vrot.slane %v5381_v16, %v12729_v13 }
 0x10e   : > { %v14143_v43 = vpack.c.bf16 %v1480_v51, %v1479_v22  ;;  %v11781_v24 = vpack.c.bf16 %v1480_v51, %v1480_v51  ;;  %v1434_v44 = vadd.f32 %v12061_v54, %v14072_v63  ;;  %v5398_v1 = vrot.slane %v11834_v26, %v12729_v13 }
 0x10f   : > { %v12063_v36 = vpop.f32.mrf.mxu0  ;;  %4287 = vmatmul.mubr.bf16.gmra.mxu0 %v4184_v42  ;;  %v5405_v8 = vrot.slane %v5383_v37, %v12729_v13  ;;  %v5050_v49 = vcombine.high %v14117_v23, %v14117_v23  ;;  %v5313_v57 = vcombine.low %v5291_v10, %v5305_v3  ;;  %v5380_v31 = vcombine.low %v5364_v7, %v5378_v53 }
 0x110   : > { %v14154_v47 = vrot.slane %v11781_v24, %v12729_v13  ;;  %v12064_v50 = vadd.f32 %v12063_v36, %v12062_v40  ;;  %v1481_v61 = vmax.f32 %v1434_v44, 0.0  ;;  %v5349_v9 = vcombine.low %v14129_v4, %v14112_v18 }
 0x111   : > { %v5416_v62 = vcombine.high %v5405_v8, %v5412_v41  ;;  %v5041_v6 = vrot.slane %v5026_v21, %v12729_v13  ;;  %v5347_v25 = vcombine.low %v14138_v46, %v14126_v27  ;;  %v5414_v55 = vcombine.high %v5391_v28, %v5398_v1 }
 0x112   : > { %v12065_v14 = vpop.f32.mrf.mxu0  ;;  %v1522_v19 = vcombine.high %v14154_v47, %v14154_v47  ;;  %v1437_v30 = vadd.f32 %v12064_v50, %v14072_v63  ;;  %v5371_v12 = vrot.slane %v5349_v9, %v12729_v13  ;;  %v5415_v16 = vcombine.low %v5405_v8, %v5412_v41 }
 0x113   : > { %v5447_v4 = vcombine.low %v5050_v49, %v5041_v6  ;;  %v5444_v27 = vrot.slane %v5416_v62, %v12729_v13  ;;  %v5357_v29 = vrot.slane %v5347_v25, %v12729_v13  ;;  %v5430_v40 = vrot.slane %v5414_v55, %v12729_v13 }
 0x114   : > { %v12066_v5 = vpop.f32.mrf.mxu0  ;;  %v14174_v15 = vrot.slane %v1522_v19, %v12729_v13  ;;  %v1482_v2 = vmax.f32 %v1437_v30, 0.0  ;;  %5541 = vmatmul.mubr.bf16.gmra.mxu1 %v5313_v57  ;;  %v5413_v50 = vcombine.low %v5391_v28, %v5398_v1  ;;  %v5437_v53 = vrot.slane %v5415_v16, %v12729_v13 }
 0x115   : > { %v12067_v32 = vadd.f32 %v12066_v5, %v12065_v14  ;;  %5548 = vmatprep.mubr.bf16.mxu1 %v5380_v31  ;;  %v5379_v24 = vcombine.low %v5357_v29, %v5371_v12  ;;  %v5446_v44 = vcombine.low %v5430_v40, %v5444_v27  ;;  %v5454_v36 = vrot.slane %v5447_v4, %v12729_v13 }
 0x116   : > { %v12068_v20 = vpop.f32.mrf.mxu0  ;;  %v1493_v56 = vpack.c.bf16 %v1482_v2, %v1481_v61  ;;  %v11782_v48 = vpack.c.bf16 %v1482_v2, %v1482_v2  ;;  %v1554_v52 = vcombine.high %v14174_v15, %v14174_v15  ;;  %v5423_v5 = vrot.slane %v5413_v50, %v12729_v13 }
 0x117   : > { %v1442_v60 = vadd.f32 %v12067_v32, %v14072_v63  ;;  %v5455_v21 = vcombine.high %v5454_v36, %v5454_v36  ;;  %v1513_v31 = vrot.slane %v14143_v43, %v12729_v13 }
 0x118   : > { %v12069_v58 = vpop.f32.mrf.mxu0  ;;  %v14187_v18 = vrot.slane %v1493_v56, %v12729_v13  ;;  %v14190_v23 = vrot.slane %v11782_v48, %v12729_v13  ;;  %v5445_v1 = vcombine.low %v5423_v5, %v5437_v53 }
 0x119   : > { %v12070_v22 = vadd.f32 %v12069_v58, %v12068_v20  ;;  %v1483_v39 = vmax.f32 %v1442_v60, 0.0  ;;  %v5469_v8 = vrot.slane %v5455_v21, %v12729_v13  ;;  %v1529_v29 = vrot.slane %v1513_v31, %v12729_v13 }
 0x11a   : > { %v12071_v0 = vpop.f32.mrf.mxu0  ;;  %v1571_v51 = vcombine.high %v14190_v23, %v14190_v23  ;;  %v14199_v54 = vrot.slane %v14187_v18, %v12729_v13 }
 0x11b   : > { %v1445_v45 = vadd.f32 %v12070_v22, %v14072_v63  ;;  %v1521_v22 = vcombine.high %v1513_v31, %v1513_v31 }
 0x11c   : > { %v12072_v11 = vpop.f32.mrf.mxu0  ;;  %v14206_v34 = vcombine.low %v1554_v52, %v14199_v54  ;;  %v14209_v59 = vrot.slane %v1571_v51, %v12729_v13  ;;  %5549 = vmatmul.mubr.bf16.gmra.mxu1 %v5379_v24 }
 0x11d   : > { %v14202_v17 = vmax.f32 %v1445_v45, 0.0  ;;  %v12073_v46 = vadd.f32 %v12072_v11, %v12071_v0  ;;  %5556 = vmatprep.mubr.bf16.mxu1 %v5446_v44 }
 0x11e   : > { %v12074_v42 = vpop.f32.mrf.mxu0  ;;  %v1603_v26 = vcombine.high %v14209_v59, %v14209_v59 }
 0x11f   : > { %v1494_v38 = vpack.c.bf16 %v14202_v17, %v1483_v39  ;;  %v1450_v35 = vadd.f32 %v12073_v46, %v14072_v63  ;;  %v5462_v39 = vrot.slane %v5454_v36, %v12729_v13  ;;  %v1543_v46 = vrot.slane %v1521_v22, %v12729_v13 }
 0x120   : > { %v12075_v33 = vpop.f32.mrf.mxu0  ;;  %v11783_v44 = vpack.c.bf16 %v14202_v17, %v14202_v17 }
 0x121   : > { %v14217_v37 = vrot.slane %v1494_v38, %v12729_v13  ;;  %v12076_v14 = vadd.f32 %v12075_v33, %v12074_v42  ;;  %v1485_v41 = vmax.f32 %v1450_v35, 0.0  ;;  %v1536_v38 = vrot.slane %v14154_v47, %v12729_v13 }
 0x122   : > { %v12077_v3 = vpop.f32.mrf.mxu0  ;;  %v1570_v47 = vcombine.high %v14187_v18, %v14187_v18 }
 0x123   : > { %v14222_v19 = vrot.slane %v14217_v37, %v12729_v13  ;;  %v1453_v61 = vadd.f32 %v12076_v14, %v14072_v63  ;;  %v5915_v14 = vcombine.low %v1529_v29, %v1543_v46 }
 0x124   : > { %v12078_v30 = vpop.f32.mrf.mxu0  ;;  %5557 = vmatmul.mubr.bf16.gmra.mxu1 %v5445_v1 }
 0x125   : > { %v14227_v10 = vcombine.low %v1603_v26, %v14222_v19  ;;  %v1486_v7 = vmax.f32 %v1453_v61, 0.0  ;;  %v12079_v28 = vadd.f32 %v12078_v30, %v12077_v3  ;;  %5564 = vmatprep.mubr.bf16.mxu1 %v5469_v8  ;;  %v11841_v3 = vcombine.high %v1529_v29, %v1543_v46 }
 0x126   : > { %v12080_v32 = vpop.f32.mrf.mxu0  ;;  %v1552_v61 = vcombine.high %v1536_v38, %v1536_v38  ;;  %v1618_v30 = vrot.slane %v11783_v44, %v12729_v13 }
 0x127   : > { %v1495_v2 = vpack.c.bf16 %v1486_v7, %v1485_v41  ;;  %v11784_v20 = vpack.c.bf16 %v1486_v7, %v1486_v7  ;;  %v1458_v49 = vadd.f32 %v12079_v28, %v14072_v63  ;;  %v1619_v28 = vcombine.high %v14217_v37, %v14217_v37 }
 0x128   : > { %v12081_v57 = vpop.f32.mrf.mxu0 }
 0x129   : > { %v12082_v9 = vadd.f32 %v12081_v57, %v12080_v32  ;;  %v14234_v62 = vrot.slane %v1495_v2, %v12729_v13  ;;  %v14237_v56 = vrot.slane %v11784_v20, %v12729_v13  ;;  %v1487_v60 = vmax.f32 %v1458_v49, 0.0 }
 0x12a   : > { %v12083_v48 = vpop.f32.mrf.mxu0  ;;  %v5923_v20 = vrot.slane %v5915_v14, %v12729_v13  ;;  %v5930_v49 = vrot.slane %v11841_v3, %v12729_v13  ;;  %v1592_v57 = vrot.slane %v1570_v47, %v12729_v13  ;;  %v14302_v22 = vrot.slane %v1619_v28, %v12729_v13 }
 0x12b   : > { %v1461_v58 = vadd.f32 %v12082_v9, %v14072_v63  ;;  %v1668_v6 = vcombine.high %v14234_v62, %v14234_v62  ;;  %v14244_v43 = vrot.slane %v14237_v56, %v12729_v13  ;;  %v5969_v47 = vrot.slane %v14206_v34, %v12729_v13 }
 0x12c   : > { %v12084_v25 = vpop.f32.mrf.mxu0  ;;  %5565 = vmatmul.mubr.bf16.gmra.mxu1 %v5462_v39 }
 0x12d   : > { %v1488_v55 = vmax.f32 %v1461_v58, 0.0  ;;  %v12085_v52 = vadd.f32 %v12084_v25, %v12083_v48  ;;  %v14247_v0 = vrot.slane %v1668_v6, %v12729_v13  ;;  %v5954_v48 = vcombine.low %v14174_v15, %v1552_v61 }
 0x12e   : > { %v12086_v12 = vpop.f32.mrf.mxu0  ;;  %v5937_v58 = vrot.slane %v1536_v38, %v12729_v13  ;;  %v5938_v6 = vcombine.low %v5923_v20, %v5930_v49  ;;  %v1620_v25 = vcombine.high %v1618_v30, %v1618_v30 }
 0x12f   : > { %v1496_v45 = vpack.c.bf16 %v1488_v55, %v1487_v60  ;;  %v11785_v4 = vpack.c.bf16 %v1488_v55, %v1488_v55  ;;  %v1700_v27 = vcombine.high %v14247_v0, %v14247_v0  ;;  %v1466_v51 = vadd.f32 %v12085_v52, %v14072_v63 }
 0x130   : > { %v12087_v11 = vpop.f32.mrf.mxu0  ;;  %v1585_v60 = vrot.slane %v14190_v23, %v12729_v13  ;;  %v1649_v55 = vcombine.high %v14222_v19, %v14222_v19  ;;  %v14309_v15 = vrot.slane %v5938_v6, %v12729_v13  ;;  %v14312_v23 = vrot.slane %v5937_v58, %v12729_v13 }
 0x131   : > { %v14256_v40 = vrot.slane %v1496_v45, %v12729_v13  ;;  %v12088_v42 = vadd.f32 %v12087_v11, %v12086_v12  ;;  %v14259_v24 = vcombine.low %v1700_v27, %v14244_v43  ;;  %v14266_v36 = vrot.slane %v11785_v4, %v12729_v13 }
 0x132   : > { %v12089_v16 = vpop.f32.mrf.mxu0  ;;  %v1489_v33 = vmax.f32 %v1466_v51, 0.0  ;;  %v11842_v4 = vcombine.high %v14199_v54, %v1592_v57  ;;  %v1669_v27 = vcombine.high %v14237_v56, %v14237_v56  ;;  %v14319_v19 = vrot.slane %v14234_v62, %v12729_v13 }
 0x133   : > { %v1717_v35 = vcombine.high %v14256_v40, %v14256_v40  ;;  %v1469_v50 = vadd.f32 %v12088_v42, %v14072_v63  ;;  %v14279_v5 = vrot.slane %v14266_v36, %v12729_v13  ;;  %v5994_v29 = vcombine.low %v1585_v60, %v14209_v59 }
 0x134   : > { %v12090_v26 = vpop.f32.mrf.mxu0  ;;  %v14332_v56 = vrot.slane %v1618_v30, %v12729_v13  ;;  %v14335_v62 = vrot.slane %v1620_v25, %v12729_v13  ;;  %v5962_v59 = vrot.slane %v5954_v48, %v12729_v13  ;;  %v1601_v44 = vcombine.high %v1585_v60, %v1585_v60 }
 0x135   : > { %v14272_v53 = vrot.slane %v1717_v35, %v12729_v13  ;;  %v1490_v21 = vmax.f32 %v1469_v50, 0.0  ;;  %v12091_v17 = vadd.f32 %v12090_v26, %v12089_v16  ;;  %v6033_v35 = vcombine.low %v14302_v22, %v1649_v55 }
 0x136   : > { %v12092_v41 = vpop.f32.mrf.mxu0  ;;  %v14344_v26 = vrot.slane %v1669_v27, %v12729_v13  ;;  %v1698_v14 = vcombine.high %v14319_v19, %v14319_v19  ;;  %v6001_v30 = vrot.slane %v11842_v4, %v12729_v13  ;;  %v11843_v34 = vcombine.high %v14332_v56, %v14335_v62 }
 0x137   : > { %v1749_v7 = vcombine.high %v14272_v53, %v14272_v53  ;;  %v14285_v32 = vpack.c.bf16 %v1490_v21, %v1489_v33  ;;  %v11786_v1 = vpack.c.bf16 %v1490_v21, %v1490_v21  ;;  %v1474_v18 = vadd.f32 %v12091_v17, %v14072_v63 }
 0x138   : > { %v12093_v8 = vpop.f32.mrf.mxu0  ;;  %v5976_v21 = vrot.slane %v1592_v57, %v12729_v13  ;;  %v6015_v57 = vrot.slane %v1601_v44, %v12729_v13  ;;  %v1718_v6 = vcombine.high %v14266_v36, %v14266_v36 }
 0x139   : > { %v14289_v2 = vcombine.low %v1749_v7, %v14279_v5  ;;  %v14295_v31 = vrot.slane %v11786_v1, %v12729_v13  ;;  %v1491_v9 = vmax.f32 %v1474_v18, 0.0  ;;  %v6071_v7 = vcombine.low %v14332_v56, %v14335_v62 }
 0x13a   : > { %v12169_v37 = vpop.f32.mrf.mxu0  ;;  %v5977_v1 = vcombine.low %v5962_v59, %v5969_v47  ;;  %v5991_v18 = vrot.slane %v5976_v21, %v12729_v13  ;;  %v6008_v8 = vrot.slane %v5994_v29, %v12729_v13  ;;  %v14381_v27 = vrot.slane %v14285_v32, %v12729_v13 }
 0x13b   : > { %v1767_v52 = vcombine.high %v14295_v31, %v14295_v31  ;;  %v1498_v39 = vpack.c.bf16 %v1491_v9, %v1491_v9  ;;  %v14363_v9 = vcombine.low %v14247_v0, %v1698_v14  ;;  %v6047_v59 = vrot.slane %v6033_v35, %v12729_v13 }
 0x13c   : > { %v12170_v12 = vpop.f32.mrf.mxu0  ;;  %v5984_v60 = vrot.slane %v5977_v1, %v12729_v13  ;;  %v6016_v58 = vcombine.low %v6001_v30, %v6008_v8  ;;  %v1781_v62 = vrot.slane %v14295_v31, %v12729_v13 }
 0x13d   : > { %v12171_v45 = vadd.f32 %v12170_v12, %v12169_v37  ;;  %v14322_v51 = vrot.slane %v1767_v52, %v12729_v13  ;;  %v14326_v46 = vrot.slane %v1498_v39, %v12729_v13  ;;  %v11844_v37 = vcombine.high %v14244_v43, %v14344_v26 }
 0x13e   : > { %v12172_v11 = vpop.f32.mrf.mxu0  ;;  %v6030_v52 = vrot.slane %v6015_v57, %v12729_v13  ;;  %v14373_v12 = vrot.slane %v14256_v40, %v12729_v13  ;;  %v6023_v4 = vrot.slane %v6016_v58, %v12729_v13  ;;  %v1651_v40 = vcombine.high %v14302_v22, %v14302_v22 }
 0x13f   : > { %v4241_v42 = vadd.f32 %v12171_v45, %v14072_v63  ;;  %v1799_v16 = vcombine.high %v14322_v51, %v14322_v51  ;;  %v1814_v33 = vrot.slane %v14326_v46, %v12729_v13  ;;  %v14376_v45 = vcombine.low %v5984_v60, %v5991_v18 }
 0x140   : > { %v12173_v38 = vpop.f32.mrf.mxu0  ;;  %v6054_v21 = vrot.slane %v1651_v40, %v12729_v13  ;;  %v1766_v60 = vcombine.high %v14381_v27, %v14381_v27  ;;  %v6150_v56 = vcombine.low %v14373_v12, %v14272_v53  ;;  %v1774_v53 = vrot.slane %v14381_v27, %v12729_v13 }
 0x141   : > { %v12174_v50 = vadd.f32 %v12173_v38, %v12172_v11  ;;  %v14351_v17 = vcombine.low %v1799_v16, %v1814_v33  ;;  %v4294_v41 = vmax.f32 %v4241_v42, 0.0  ;;  %v14385_v16 = vcombine.low %v6023_v4, %v6030_v52 }
 0x142   : > { %v12175_v3 = vpop.f32.mrf.mxu0  ;;  %v6040_v38 = vrot.slane %v14227_v10, %v12729_v13  ;;  %v6069_v8 = vrot.slane %v6054_v21, %v12729_v13  ;;  %v1788_v31 = vrot.slane %v1766_v60, %v12729_v13  ;;  %v1797_v60 = vcombine.high %v1781_v62, %v1781_v62 }
 0x143   : > { %v4244_v61 = vadd.f32 %v12174_v50, %v14072_v63  ;;  %v6118_v43 = vrot.slane %v14363_v9, %v12729_v13  ;;  %v6196_v9 = vrot.slane %v14289_v2, %v12729_v13 }
 0x144   : > { %v12176_v28 = vpop.f32.mrf.mxu0 }
 0x145   : > { %v4295_v20 = vmax.f32 %v4244_v61, 0.0  ;;  %v12177_v49 = vadd.f32 %v12176_v28, %v12175_v3 }
 0x146   : > { %v12178_v48 = vpop.f32.mrf.mxu0 }
 0x147   : > { %v4307_v25 = vpack.c.bf16 %v4295_v20, %v4294_v41  ;;  %v11824_v55 = vpack.c.bf16 %v4295_v20, %v4295_v20  ;;  %v4249_v0 = vadd.f32 %v12177_v49, %v14072_v63  ;;  %v6055_v41 = vcombine.low %v6040_v38, %v6047_v59 }
 0x148   : > { %v12179_v39 = vpop.f32.mrf.mxu0  ;;  %v14402_v20 = vrot.slane %v1718_v6, %v12729_v13 }
 0x149   : > { %v4328_v36 = vrot.slane %v4307_v25, %v12729_v13  ;;  %v4335_v11 = vrot.slane %v11824_v55, %v12729_v13  ;;  %v12180_v29 = vadd.f32 %v12179_v39, %v12178_v48  ;;  %v4296_v14 = vmax.f32 %v4249_v0, 0.0 }
 0x14a   : > { %v12181_v42 = vpop.f32.mrf.mxu0  ;;  %v6062_v18 = vrot.slane %v6055_v41, %v12729_v13 }
 0x14b   : > { %v4336_v44 = vcombine.high %v4328_v36, %v4328_v36  ;;  %v4337_v33 = vcombine.high %v4335_v11, %v4335_v11  ;;  %v4344_v32 = vrot.slane %v4328_v36, %v12729_v13  ;;  %v4351_v50 = vrot.slane %v4335_v11, %v12729_v13 }
 0x14c   : > { %v4252_v3 = vadd.f32 %v12180_v29, %v14072_v63  ;;  %v12182_v47 = vpop.f32.mrf.mxu0  ;;  %v14412_v40 = vcombine.low %v6062_v18, %v6069_v8 }
 0x14d   : > { %v4358_v22 = vrot.slane %v4336_v44, %v12729_v13  ;;  %v4365_v61 = vrot.slane %v4337_v33, %v12729_v13  ;;  %v4367_v10 = vcombine.high %v4351_v50, %v4351_v50  ;;  %v12183_v30 = vadd.f32 %v12182_v47, %v12181_v42 }
 0x14e   : > { %v4297_v35 = vmax.f32 %v4252_v3, 0.0  ;;  %v12184_v28 = vpop.f32.mrf.mxu0  ;;  %v6737_v1 = vrot.slane %v4351_v50, %v12729_v13 }
 0x14f   : > { %v6715_v49 = vcombine.low %v4344_v32, %v4358_v22  ;;  %v11851_v57 = vcombine.high %v4344_v32, %v4358_v22  ;;  %v4257_v48 = vadd.f32 %v12183_v30, %v14072_v63  ;;  %v6754_v52 = vcombine.low %v4365_v61, %v4367_v10 }
 0x150   : > { %v4308_v58 = vpack.c.bf16 %v4297_v35, %v4296_v14  ;;  %v11825_v25 = vpack.c.bf16 %v4297_v35, %v4297_v35  ;;  %v12185_v55 = vpop.f32.mrf.mxu0  ;;  %v4369_v0 = vcombine.high %v4365_v61, %v4365_v61  ;;  %v6752_v42 = vrot.slane %v6737_v1, %v12729_v13 }
 0x151   : > { %v12186_v39 = vadd.f32 %v12185_v55, %v12184_v28  ;;  %v6723_v4 = vrot.slane %v6715_v49, %v12729_v13  ;;  %v6730_v36 = vrot.slane %v11851_v57, %v12729_v13  ;;  %v4298_v38 = vmax.f32 %v4257_v48, 0.0 }
 0x152   : > { %v4377_v6 = vrot.slane %v4308_v58, %v12729_v13  ;;  %v4384_v11 = vrot.slane %v11825_v25, %v12729_v13  ;;  %v12187_v29 = vpop.f32.mrf.mxu0  ;;  %v6762_v44 = vrot.slane %v6754_v52, %v12729_v13  ;;  %v14423_v61 = vrot.slane %v6071_v7, %v12729_v13 }
 0x153   : > { %v4260_v59 = vadd.f32 %v12186_v39, %v14072_v63  ;;  %v6738_v33 = vcombine.low %v6723_v4, %v6730_v36 }
 0x154   : > { %v4385_v32 = vcombine.high %v4377_v6, %v4377_v6  ;;  %v4386_v50 = vcombine.high %v4384_v11, %v4384_v11  ;;  %v4393_v14 = vrot.slane %v4377_v6, %v12729_v13  ;;  %v4400_v3 = vrot.slane %v4384_v11, %v12729_v13  ;;  %v12188_v47 = vpop.f32.mrf.mxu0 }
 0x155   : > { %v4299_v21 = vmax.f32 %v4260_v59, 0.0  ;;  %v12189_v41 = vadd.f32 %v12188_v47, %v12187_v29  ;;  %v6745_v22 = vrot.slane %v6738_v33, %v12729_v13 }
 0x156   : > { %v4414_v10 = vrot.slane %v4386_v50, %v12729_v13  ;;  %v6755_v30 = vcombine.low %v4369_v0, %v4393_v14  ;;  %v12190_v35 = vpop.f32.mrf.mxu0  ;;  %v4407_v28 = vrot.slane %v4385_v32, %v12729_v13  ;;  %v4416_v1 = vcombine.high %v4400_v3, %v4400_v3 }
 0x157   : > { %v4309_v18 = vpack.c.bf16 %v4299_v21, %v4298_v38  ;;  %v11826_v8 = vpack.c.bf16 %v4299_v21, %v4299_v21  ;;  %v4265_v49 = vadd.f32 %v12189_v41, %v14072_v63  ;;  %v6753_v57 = vcombine.low %v6745_v22, %v6752_v42 }
 0x158   : > { %v6794_v48 = vcombine.low %v4400_v3, %v4414_v10  ;;  %v4418_v58 = vcombine.high %v4414_v10, %v4414_v10  ;;  %v12191_v25 = vpop.f32.mrf.mxu0  ;;  %v6769_v55 = vrot.slane %v6755_v30, %v12729_v13  ;;  %v6776_v7 = vrot.slane %v4407_v28, %v12729_v13 }
 0x159   : > { %v4426_v52 = vrot.slane %v4309_v18, %v12729_v13  ;;  %v4433_v0 = vrot.slane %v11826_v8, %v12729_v13  ;;  %v4300_v39 = vmax.f32 %v4265_v49, 0.0  ;;  %v12192_v4 = vadd.f32 %v12191_v25, %v12190_v35  ;;  %7105 = vrot.lane.b32.xlu1 %v6753_v57, %s12630_s19 }
 0x15a   : > { %v6777_v36 = vcombine.low %v6762_v44, %v6769_v55  ;;  %v6791_v6 = vrot.slane %v6776_v7, %v12729_v13  ;;  %v11852_v11 = vcombine.high %v4393_v14, %v4407_v28  ;;  %v6808_v29 = vrot.slane %v6794_v48, %v12729_v13 }
 0x15b   : > { %v4434_v42 = vcombine.high %v4426_v52, %v4426_v52  ;;  %v4435_v38 = vcombine.high %v4433_v0, %v4433_v0  ;;  %v4442_v59 = vrot.slane %v4426_v52, %v12729_v13  ;;  %v4449_v33 = vrot.slane %v4433_v0, %v12729_v13 }
 0x15c   : > { %v4268_v32 = vadd.f32 %v12192_v4, %v14072_v63  ;;  %v6784_v50 = vrot.slane %v6777_v36, %v12729_v13  ;;  %v6801_v3 = vrot.slane %v11852_v11, %v12729_v13  ;;  %v6815_v47 = vrot.slane %v4416_v1, %v12729_v13 }
 0x15d   : > { %v4456_v44 = vrot.slane %v4434_v42, %v12729_v13  ;;  %v4463_v14 = vrot.slane %v4435_v38, %v12729_v13  ;;  %v4464_v21 = vcombine.high %v4442_v59, %v4442_v59  ;;  %v6832_v41 = vcombine.low %v4418_v58, %v4442_v59 }
 0x15e   : > { %v4301_v22 = vmax.f32 %v4268_v32, 0.0  ;;  %v6792_v10 = vcombine.low %v6784_v50, %v6791_v6  ;;  %v6816_v30 = vcombine.low %v6801_v3, %v6808_v29  ;;  %v6830_v35 = vrot.slane %v6815_v47, %v12729_v13 }
 0x15f   : > { %v6871_v28 = vcombine.low %v4449_v33, %v4463_v14  ;;  %v11853_v18 = vcombine.high %v4449_v33, %v4463_v14  ;;  %v4466_v8 = vcombine.high %v4456_v44, %v4456_v44  ;;  %v6833_v49 = vcombine.low %v4456_v44, %v4464_v21 }
 0x160   : > { %v4310_v57 = vpack.c.bf16 %v4301_v22, %v4300_v39  ;;  %v11827_v48 = vpack.c.bf16 %v4301_v22, %v4301_v22  ;;  %7107 = vrot.lane.b32.xlu0 %v6792_v10, %s12630_s19  ;;  %v6823_v1 = vrot.slane %v6816_v30, %v12729_v13  ;;  %v6840_v25 = vrot.slane %v6832_v41, %v12729_v13 }
 0x161   : > { %v6879_v55 = vrot.slane %v6871_v28, %v12729_v13  ;;  %v6886_v58 = vrot.slane %v11853_v18, %v12729_v13  ;;  %v6847_v7 = vrot.slane %v6833_v49, %v12729_v13  ;;  %v6854_v52 = vrot.slane %v4466_v8, %v12729_v13 }
 0x162   : > { %v4475_v0 = vrot.slane %v4310_v57, %v12729_v13  ;;  %v14453_v4 = vrot.slane %v11827_v48, %v12729_v13  ;;  %v6831_v39 = vcombine.low %v6823_v1, %v6830_v35  ;;  %v6086_v36 = vrot.slane %v11843_v34, %v12729_v13 }
 0x163   : > { %v6894_v6 = vcombine.low %v6879_v55, %v6886_v58  ;;  %v6855_v11 = vcombine.low %v6840_v25, %v6847_v7  ;;  %v6869_v29 = vrot.slane %v6854_v52, %v12729_v13  ;;  %v6093_v42 = vrot.slane %v14319_v19, %v12729_v13 }
 0x164   : > { %v1747_v38 = vcombine.high %v14373_v12, %v14373_v12  ;;  %v1748_v59 = vcombine.high %v14279_v5, %v14279_v5  ;;  %v4483_v33 = vcombine.high %v4475_v0, %v4475_v0  ;;  %v14467_v32 = vrot.slane %v4475_v0, %v12729_v13  ;;  %7109 = vrot.lane.b32.xlu1 %v6831_v39, %s12630_s19 }
 0x165   : > { %v14476_v19 = vrot.slane %v14453_v4, %v12729_v13  ;;  %v6862_v34 = vrot.slane %v6855_v11, %v12729_v13  ;;  %v6901_v3 = vrot.slane %v6894_v6, %v12729_v13  ;;  %v6094_v47 = vcombine.low %v14423_v61, %v6086_v36 }
 0x166   : > { %v14480_v5 = vrot.slane %v4483_v33, %v12729_v13  ;;  %v6893_v50 = vrot.slane %v14467_v32, %v12729_v13  ;;  %v14493_v44 = vrot.slane %v6093_v42, %v12729_v13  ;;  %v6157_v61 = vrot.slane %v11844_v37, %v12729_v13 }
 0x167   : > { %v6870_v12 = vcombine.low %v6862_v34, %v6869_v29  ;;  %v14499_v41 = vrot.slane %v6094_v47, %v12729_v13  ;;  %v6189_v27 = vcombine.low %v14402_v20, %v1748_v59  ;;  %v6164_v22 = vrot.slane %v6150_v56, %v12729_v13 }
 0x168   : > { %v4515_v14 = vcombine.high %v14480_v5, %v14480_v5  ;;  %v6908_v21 = vrot.slane %v6893_v50, %v12729_v13  ;;  %v6171_v10 = vrot.slane %v1747_v38, %v12729_v13  ;;  %v6227_v37 = vcombine.low %v1774_v53, %v1788_v31 }
 0x169   : > { %7111 = vrot.lane.b32.xlu1 %v6870_v12, %s12630_s19  ;;  %v1807_v18 = vcombine.high %v14326_v46, %v14326_v46  ;;  %v6172_v8 = vcombine.low %v6157_v61, %v6164_v22  ;;  %v6125_v57 = vrot.slane %v14259_v24, %v12729_v13  ;;  %v6132_v48 = vrot.slane %v14344_v26, %v12729_v13 }
 0x16a   : > { %v14510_v30 = vcombine.low %v4515_v14, %v14476_v19  ;;  %v6909_v35 = vcombine.low %v6901_v3, %v6908_v21  ;;  %v6186_v49 = vrot.slane %v6171_v10, %v12729_v13  ;;  %v1750_v1 = vcombine.high %v14402_v20, %v14402_v20 }
 0x16b   : > { %v11845_v25 = vcombine.high %v1774_v53, %v1788_v31  ;;  %v6266_v46 = vcombine.low %v14322_v51, %v1797_v60  ;;  %v6179_v55 = vrot.slane %v6172_v8, %v12729_v13  ;;  %v6133_v58 = vcombine.low %v6118_v43, %v6125_v57  ;;  %v12193_v57 = vpop.f32.mrf.mxu0 }
 0x16c   : > { %7113 = vrot.lane.b32.xlu0 %v6909_v35, %s12630_s19  ;;  %v6147_v7 = vrot.slane %v6132_v48, %v12729_v13  ;;  %v6203_v52 = vrot.slane %v6189_v27, %v12729_v13  ;;  %v1821_v24 = vrot.slane %v1807_v18, %v12729_v13  ;;  %v6281_v26 = vrot.slane %v14351_v17, %v12729_v13 }
 0x16d   : > { %v6210_v20 = vrot.slane %v1750_v1, %v12729_v13  ;;  %v14536_v0 = vcombine.low %v6179_v55, %v6186_v49  ;;  %v6140_v2 = vrot.slane %v6133_v58, %v12729_v13  ;;  %v6235_v51 = vrot.slane %v6227_v37, %v12729_v13 }
 0x16e   : > { %v6211_v39 = vcombine.low %v6196_v9, %v6203_v52  ;;  %v6242_v6 = vrot.slane %v11845_v25, %v12729_v13  ;;  %v6249_v42 = vrot.slane %v1781_v62, %v12729_v13  ;;  %v6274_v17 = vrot.slane %v6266_v46, %v12729_v13  ;;  %v12111_v47 = vpop.f32.mrf.mxu1 }
 0x16f   : > { %v6225_v36 = vrot.slane %v6210_v20, %v12729_v13  ;;  %v14542_v11 = vcombine.low %v6140_v2, %v6147_v7  ;;  %v6288_v59 = vrot.slane %v1821_v24, %v12729_v13  ;;  %v4484_v10 = vcombine.high %v14453_v4, %v14453_v4  ;;  %v12194_v24 = vpop.f32.mrf.mxu0 }
 0x170   : > { %v6218_v29 = vrot.slane %v6211_v39, %v12729_v13  ;;  %v6250_v38 = vcombine.low %v6235_v51, %v6242_v6  ;;  %v14551_v56 = vrot.slane %v6249_v42, %v12729_v13  ;;  %v6289_v34 = vcombine.low %v6274_v17, %v6281_v26  ;;  %v12112_v31 = vpop.f32.mrf.mxu1 }
 0x171   : > { %v6303_v3 = vrot.slane %v6288_v59, %v12729_v13  ;;  %v12113_v14 = vadd.f32 %v12112_v31, %v12111_v47  ;;  %v4513_v35 = vcombine.high %v14467_v32, %v14467_v32  ;;  %v14569_v48 = vrot.slane %v4484_v10, %v12729_v13 }
 0x172   : > { %v14548_v33 = vcombine.low %v6218_v29, %v6225_v36  ;;  %v14554_v50 = vrot.slane %v6250_v38, %v12729_v13  ;;  %v6296_v53 = vrot.slane %v6289_v34, %v12729_v13  ;;  %v12114_v21 = vpop.f32.mrf.mxu1  ;;  %v6925_v9 = vrot.slane %v14510_v30, %v12729_v13  ;;  %v12196_v38 = vpop.f32.mrf.mxu0 }
 0x173   : > { %v2970_v27 = vadd.f32 %v12113_v14, %v14072_v63  ;;  %v6910_v1 = vcombine.low %v14480_v5, %v4513_v35  ;;  %v6932_v58 = vrot.slane %v14569_v48, %v12729_v13 }
 0x174   : > { %v14560_v12 = vcombine.low %v6296_v53, %v6303_v3  ;;  %v12115_v61 = vpop.f32.mrf.mxu1  ;;  %v12197_v10 = vpop.f32.mrf.mxu0 }
 0x175   : > { %v12116_v60 = vadd.f32 %v12115_v61, %v12114_v21  ;;  %v3023_v43 = vmax.f32 %v2970_v27, 0.0  ;;  %v6918_v55 = vrot.slane %v6910_v1, %v12729_v13  ;;  %v6947_v5 = vrot.slane %v6932_v58, %v12729_v13 }
 0x177   : > { %v2973_v22 = vadd.f32 %v12116_v60, %v14072_v63  ;;  %v6933_v26 = vcombine.low %v6918_v55, %v6925_v9 }
 0x179   : > { %v3024_v37 = vmax.f32 %v2973_v22, 0.0  ;;  %v6940_v6 = vrot.slane %v6933_v26, %v12729_v13 }
 0x17a   : > { %v12117_v49 = vpop.f32.mrf.mxu1 }
 0x17b   : > { %v3036_v18 = vpack.c.bf16 %v3024_v37, %v3023_v43  ;;  %v11792_v8 = vpack.c.bf16 %v3024_v37, %v3024_v37  ;;  %v14586_v34 = vcombine.low %v6940_v6, %v6947_v5  ;;  %v14601_v5 = vld [vmem:[%s16197_s2] ss:$0 sm:$0xff] }
 0x17c   : > { %v12118_v46 = vpop.f32.mrf.mxu1 }
 0x17d   : > { %v3057_v25 = vrot.slane %v3036_v18, %v12729_v13  ;;  %v3064_v4 = vrot.slane %v11792_v8, %v12729_v13  ;;  %v12119_v32 = vadd.f32 %v12118_v46, %v12117_v49  ;;  %v12195_v49 = vadd.f32 %v12194_v24, %v12193_v57 }
 0x17e   : > { %v12120_v52 = vpop.f32.mrf.mxu1 }
 0x17f   : > { %v3065_v7 = vcombine.high %v3057_v25, %v3057_v25  ;;  %v3073_v20 = vrot.slane %v3057_v25, %v12729_v13  ;;  %v3080_v30 = vrot.slane %v3064_v4, %v12729_v13  ;;  %v2978_v51 = vadd.f32 %v12119_v32, %v14072_v63 }
 0x180   : > { %v12121_v39 = vpop.f32.mrf.mxu1  ;;  %v3066_v29 = vcombine.high %v3064_v4, %v3064_v4  ;;  %v12198_v25 = vadd.f32 %v12197_v10, %v12196_v38 }
 0x181   : > { %v3087_v2 = vrot.slane %v3065_v7, %v12729_v13  ;;  %v12122_v36 = vadd.f32 %v12121_v39, %v12120_v52  ;;  %v6327_v31 = vrot.slane %v3080_v30, %v12729_v13  ;;  %v3025_v14 = vmax.f32 %v2978_v51, 0.0 }
 0x182   : > { %v3094_v61 = vrot.slane %v3066_v29, %v12729_v13  ;;  %v3096_v27 = vcombine.high %v3080_v30, %v3080_v30  ;;  %v4276_v51 = vadd.f32 %v14601_v5, %v12198_v25 }
 0x183   : > { %v6305_v42 = vcombine.low %v3073_v20, %v3087_v2  ;;  %v11846_v17 = vcombine.high %v3073_v20, %v3087_v2  ;;  %v2981_v59 = vadd.f32 %v12122_v36, %v14072_v63  ;;  %v6342_v8 = vrot.slane %v6327_v31, %v12729_v13 }
 0x184   : > { %v12123_v3 = vpop.f32.mrf.mxu1  ;;  %v3098_v4 = vcombine.high %v3094_v61, %v3094_v61  ;;  %v6344_v55 = vcombine.low %v3094_v61, %v3096_v27  ;;  %v4273_v20 = vadd.f32 %v14601_v5, %v12195_v49  ;;  %v4303_v61 = vmax.f32 %v4276_v51, 0.0 }
 0x185   : > { %v6313_v47 = vrot.slane %v6305_v42, %v12729_v13  ;;  %v6320_v53 = vrot.slane %v11846_v17, %v12729_v13  ;;  %v3026_v21 = vmax.f32 %v2981_v59, 0.0 }
 0x186   : > { %v12124_v60 = vpop.f32.mrf.mxu1  ;;  %v6352_v42 = vrot.slane %v6344_v55, %v12729_v13 }
 0x187   : > { %v6328_v22 = vcombine.low %v6313_v47, %v6320_v53  ;;  %v3037_v35 = vpack.c.bf16 %v3026_v21, %v3025_v14  ;;  %v11793_v43 = vpack.c.bf16 %v3026_v21, %v3026_v21  ;;  %v12125_v63 = vadd.f32 %v12124_v60, %v12123_v3 }
 0x188   : > { %v12126_v37 = vpop.f32.mrf.mxu1  ;;  %v4302_v21 = vmax.f32 %v4273_v20, 0.0 }
 0x189   : > { %v6335_v18 = vrot.slane %v6328_v22, %v12729_v13  ;;  %v3106_v1 = vrot.slane %v3037_v35, %v12729_v13  ;;  %v3113_v9 = vrot.slane %v11793_v43, %v12729_v13  ;;  %v2986_v57 = vadd.f32 %v14601_v5, %v12125_v63 }
 0x18a   : > { %v12127_v46 = vpop.f32.mrf.mxu1 }
 0x18b   : > { %v6343_v32 = vcombine.low %v6335_v18, %v6342_v8  ;;  %v3114_v58 = vcombine.high %v3106_v1, %v3106_v1  ;;  %v3115_v7 = vcombine.high %v3113_v9, %v3113_v9  ;;  %v3122_v52 = vrot.slane %v3106_v1, %v12729_v13 }
 0x18c   : > { %v3129_v26 = vrot.slane %v3113_v9, %v12729_v13  ;;  %v12128_v24 = vadd.f32 %v12127_v46, %v12126_v37  ;;  %v3027_v59 = vmax.f32 %v2986_v57, 0.0 }
 0x18d   : > { %6695 = vrot.lane.b32.xlu0 %v6343_v32, %s12631_s13  ;;  %v3143_v30 = vrot.slane %v3115_v7, %v12729_v13  ;;  %v6345_v2 = vcombine.low %v3098_v4, %v3122_v52  ;;  %v3136_v39 = vrot.slane %v3114_v58, %v12729_v13  ;;  %v4311_v4 = vpack.c.bf16 %v4303_v61, %v4302_v21 }
 0x18e   : > { %v2989_v36 = vadd.f32 %v14601_v5, %v12128_v24  ;;  %v3145_v6 = vcombine.high %v3129_v26, %v3129_v26 }
 0x18f   : > { %v6384_v29 = vcombine.low %v3129_v26, %v3143_v30  ;;  %v6359_v17 = vrot.slane %v6345_v2, %v12729_v13  ;;  %v6366_v38 = vrot.slane %v3136_v39, %v12729_v13  ;;  %v11847_v53 = vcombine.high %v3122_v52, %v3136_v39 }
 0x190   : > { %v3028_v3 = vmax.f32 %v2989_v36, 0.0  ;;  %v6405_v35 = vrot.slane %v3145_v6, %v12729_v13  ;;  %v3147_v9 = vcombine.high %v3143_v30, %v3143_v30  ;;  %v4524_v6 = vrot.slane %v4311_v4, %v12729_v13  ;;  %v12541_v4 = vld [vmem:[%s16198_s3 + $0x30] sm:$0xff]  }
 0x191   : > { %v6367_v31 = vcombine.low %v6352_v42, %v6359_v17  ;;  %v6398_v14 = vrot.slane %v6384_v29, %v12729_v13  ;;  %v6391_v10 = vrot.slane %v11847_v53, %v12729_v13  ;;  %v6381_v37 = vrot.slane %v6366_v38, %v12729_v13 }
 0x192   : > { %v3038_v27 = vpack.c.bf16 %v3028_v3, %v3027_v59  ;;  %v11794_v60 = vpack.c.bf16 %v3028_v3, %v3028_v3  ;;  %v6420_v58 = vrot.slane %v6405_v35, %v12729_v13 }
 0x193   : > { %v6374_v63 = vrot.slane %v6367_v31, %v12729_v13  ;;  %v6406_v1 = vcombine.low %v6391_v10, %v6398_v14 }
 0x194   : > { %v3155_v18 = vrot.slane %v3038_v27, %v12729_v13  ;;  %v3162_v8 = vrot.slane %v11794_v60, %v12729_v13  ;;  %v12536_v27 = vld [vmem:[%s16198_s3 + $0x78] sm:$0xff]  }
 0x195   : > { %v6382_v25 = vcombine.low %v6374_v63, %v6381_v37  ;;  %v6413_v57 = vrot.slane %v6406_v1, %v12729_v13  ;;  %v12537_v60 = vld [vmem:[%s16198_s3 + $0x38] sm:$0xff]   ;;  %v12540_v37 = vld [vmem:[%s16198_s3 + $0x70] sm:$0xff]   ;;  %12269 = vmatprep.subr.bf16.mxu0 %v12536_v27 }
 0x196   : > { %v12129_v47 = vpop.f32.mrf.mxu1  ;;  %v3163_v46 = vcombine.high %v3155_v18, %v3155_v18  ;;  %v3164_v32 = vcombine.high %v3162_v8, %v3162_v8  ;;  %v3171_v55 = vrot.slane %v3155_v18, %v12729_v13  ;;  %v3178_v52 = vrot.slane %v3162_v8, %v12729_v13  ;;  %v12539_v63 = vld [vmem:[%s16198_s3 + $0xb8] sm:$0xff]   ;;  %12270 = vmatpush3.bf16.msra.mxu0 %v12537_v60 }
 0x197   : > { %6697 = vrot.lane.b32.xlu0 %v6382_v25, %s12631_s13  ;;  %v6421_v51 = vcombine.low %v6413_v57, %v6420_v58  ;;  %12271 = vmatprep.subr.bf16.mxu0 %v12540_v37  ;;  %v12543_v58 = vld [vmem:[%s16198_s3 + $0xb0] sm:$0xff]   ;;  %v4540_v57 = vrot.slane %v4524_v6, %v12729_v13 }
 0x198   : > { %v12130_v22 = vpop.f32.mrf.mxu1  ;;  %v3185_v20 = vrot.slane %v3163_v46, %v12729_v13  ;;  %v3192_v30 = vrot.slane %v3164_v32, %v12729_v13  ;;  %v3193_v2 = vcombine.high %v3171_v55, %v3171_v55  ;;  %v6422_v39 = vcombine.low %v3147_v9, %v3171_v55 }
 0x199   : > { %v12131_v43 = vadd.f32 %v12130_v22, %v12129_v47  ;;  %6699 = vrot.lane.b32.xlu1 %v6421_v51, %s12631_s13  ;;  %v11828_v47 = vpack.c.bf16 %v4303_v61, %v4303_v61  ;;  %v12538_v22 = vld [vmem:[%s16198_s3 + $0xf8] sm:$0xff]  }
 0x19a   : > { %v12132_v49 = vpop.f32.mrf.mxu1  ;;  %v6461_v29 = vcombine.low %v3178_v52, %v3192_v30  ;;  %v11848_v42 = vcombine.high %v3178_v52, %v3192_v30  ;;  %v3195_v17 = vcombine.high %v3185_v20, %v3185_v20  ;;  %v6423_v38 = vcombine.low %v3185_v20, %v3193_v2  ;;  %12321 = vmatprep.subr.bf16.mxu1 %v12538_v22 }
 0x19b   : > { %v2994_v26 = vadd.f32 %v14601_v5, %v12131_v43  ;;  %v6430_v53 = vrot.slane %v6422_v39, %v12729_v13  ;;  %v4532_v43 = vcombine.high %v4524_v6, %v4524_v6  ;;  %v4531_v8 = vrot.slane %v11828_v47, %v12729_v13  ;;  %12322 = vmatpush3.bf16.msra.mxu1 %v12539_v63 }
 0x19c   : > { %v12133_v7 = vpop.f32.mrf.mxu1  ;;  %v6437_v31 = vrot.slane %v6423_v38, %v12729_v13  ;;  %v6444_v14 = vrot.slane %v3195_v17, %v12729_v13  ;;  %v6469_v10 = vrot.slane %v6461_v29, %v12729_v13  ;;  %v6476_v35 = vrot.slane %v11848_v42, %v12729_v13  ;;  %12272 = vmatpush3.bf16.msra.mxu0 %v12541_v4 }
 0x19d   : > { %v12134_v24 = vadd.f32 %v12133_v7, %v12132_v49  ;;  %v3029_v59 = vmax.f32 %v2994_v26, 0.0  ;;  %v12542_v49 = vld [vmem:[%s16198_s3 + $0xf0] sm:$0xff]   ;;  %v4533_v30 = vcombine.high %v4531_v8, %v4531_v8 }
 0x19e   : > { %v6445_v61 = vcombine.low %v6430_v53, %v6437_v31  ;;  %v6459_v25 = vrot.slane %v6444_v14, %v12729_v13  ;;  %v6484_v26 = vcombine.low %v6469_v10, %v6476_v35  ;;  %12323 = vmatprep.subr.bf16.mxu1 %v12542_v49 }
 0x19f   : > { %v2997_v36 = vadd.f32 %v14601_v5, %v12134_v24  ;;  %v4554_v24 = vrot.slane %v4532_v43, %v12729_v13  ;;  %12324 = vmatpush3.bf16.msra.mxu1 %v12543_v58  ;;  %v4561_v53 = vrot.slane %v4533_v30, %v12729_v13 }
 0x1a0   : > { %v6452_v9 = vrot.slane %v6445_v61, %v12729_v13  ;;  %v6491_v6 = vrot.slane %v6484_v26, %v12729_v13 }
 0x1a1   : > { %v3030_v3 = vmax.f32 %v2997_v36, 0.0  ;;  %v4547_v36 = vrot.slane %v4531_v8, %v12729_v13  ;;  %v6950_v38 = vcombine.low %v4540_v57, %v4554_v24  ;;  %v4564_v60 = vcombine.high %v4554_v24, %v4554_v24 }
 0x1a2   : > { %v6460_v52 = vcombine.low %v6452_v9, %v6459_v25 }
 0x1a3   : > { %v3039_v21 = vpack.c.bf16 %v3030_v3, %v3029_v59  ;;  %v11795_v46 = vpack.c.bf16 %v3030_v3, %v3030_v3  ;;  %v11854_v59 = vcombine.high %v14476_v19, %v14569_v48  ;;  %v4563_v27 = vcombine.high %v4547_v36, %v4547_v36 }
 0x1a4   : > { %v12135_v1 = vpop.f32.mrf.mxu1  ;;  %6701 = vrot.lane.b32.xlu1 %v6460_v52, %s12631_s13  ;;  %v4562_v19 = vcombine.high %v4540_v57, %v4540_v57  ;;  %v6964_v43 = vrot.slane %v6950_v38, %v12729_v13  ;;  %v4565_v57 = vcombine.high %v4561_v53, %v4561_v53 }
 0x1a5   : > { %v3204_v18 = vrot.slane %v3039_v21, %v12729_v13  ;;  %v3211_v29 = vrot.slane %v11795_v46, %v12729_v13  ;;  %v6957_v48 = vrot.slane %v11854_v59, %v12729_v13  ;;  %v6989_v9 = vcombine.low %v4561_v53, %v4563_v27 }
 0x1a6   : > { %v12136_v7 = vpop.f32.mrf.mxu1 }
 0x1a7   : > { %v3212_v32 = vcombine.high %v3204_v18, %v3204_v18  ;;  %v3220_v55 = vrot.slane %v3204_v18, %v12729_v13  ;;  %v12137_v2 = vadd.f32 %v12136_v7, %v12135_v1  ;;  %v14679_v22 = vrot.slane %v3211_v29, %v12729_v13 }
 0x1a8   : > { %v12138_v39 = vpop.f32.mrf.mxu1  ;;  %v6988_v1 = vcombine.low %v4564_v60, %v4547_v36  ;;  %v3213_v25 = vcombine.high %v3211_v29, %v3211_v29  ;;  %v6972_v58 = vcombine.low %v6957_v48, %v6964_v43 }
 0x1a9   : > { %v3234_v20 = vrot.slane %v3212_v32, %v12729_v13  ;;  %v6483_v51 = vrot.slane %v3220_v55, %v12729_v13  ;;  %v3002_v31 = vadd.f32 %v14601_v5, %v12137_v2  ;;  %v3242_v61 = vcombine.high %v3220_v55, %v3220_v55 }
 0x1aa   : > { %v12139_v42 = vpop.f32.mrf.mxu1  ;;  %v6971_v55 = vrot.slane %v4562_v19, %v12729_v13  ;;  %v6996_v2 = vrot.slane %v6988_v1, %v12729_v13 }
 0x1ab   : > { %v6498_v17 = vrot.slane %v6483_v51, %v12729_v13  ;;  %v3244_v3 = vcombine.high %v3234_v20, %v3234_v20  ;;  %v12140_v47 = vadd.f32 %v12139_v42, %v12138_v39  ;;  %v3031_v8 = vmax.f32 %v3002_v31, 0.0 }
 0x1ac   : > { %v12141_v14 = vpop.f32.mrf.mxu1  ;;  %v6500_v4 = vcombine.low %v3234_v20, %v3242_v61  ;;  %v7003_v39 = vrot.slane %v6989_v9, %v12729_v13  ;;  %v3241_v51 = vrot.slane %v3213_v25, %v12729_v13 }
 0x1ad   : > { %v6499_v21 = vcombine.low %v6491_v6, %v6498_v17  ;;  %v3005_v10 = vadd.f32 %v14601_v5, %v12140_v47  ;;  %v6501_v63 = vcombine.low %v3244_v3, %v14679_v22  ;;  %v6979_v6 = vrot.slane %v6972_v58, %v12729_v13 }
 0x1ae   : > { %v12142_v35 = vpop.f32.mrf.mxu1  ;;  %v6508_v20 = vrot.slane %v6500_v4, %v12729_v13  ;;  %v6986_v17 = vrot.slane %v6971_v55, %v12729_v13  ;;  %v14699_v47 = vrot.slane %v4565_v57, %v12729_v13  ;;  %v11849_v27 = vcombine.high %v14679_v22, %v3241_v51 }
 0x1af   : > { %6703 = vrot.lane.b32.xlu0 %v6499_v21, %s12631_s13  ;;  %v3032_v37 = vmax.f32 %v3005_v10, 0.0  ;;  %v12143_v18 = vadd.f32 %v12142_v35, %v12141_v14  ;;  %v6515_v26 = vrot.slane %v6501_v63, %v12729_v13  ;;  %v14701_v21 = vcombine.low %v6996_v2, %v7003_v39 }
 0x1b0   : > { %v12144_v49 = vpop.f32.mrf.mxu1  ;;  %v6522_v61 = vrot.slane %v3241_v51, %v12729_v13  ;;  %v14706_v43 = vcombine.low %v6979_v6, %v6986_v17 }
 0x1b1   : > { %v3040_v46 = vpack.c.bf16 %v3032_v37, %v3031_v8  ;;  %v11796_v7 = vpack.c.bf16 %v3032_v37, %v3032_v37  ;;  %v3010_v24 = vadd.f32 %v14601_v5, %v12143_v18  ;;  %v6523_v3 = vcombine.low %v6508_v20, %v6515_v26 }
 0x1b2   : > { %v12145_v32 = vpop.f32.mrf.mxu1  ;;  %v7025_v8 = vrot.slane %v14699_v47, %v12729_v13  ;;  %v6537_v55 = vrot.slane %v6522_v61, %v12729_v13 }
 0x1b3   : > { %v12146_v52 = vadd.f32 %v12145_v32, %v12144_v49  ;;  %v3253_v36 = vrot.slane %v3040_v46, %v12729_v13  ;;  %v3260_v38 = vrot.slane %v11796_v7, %v12729_v13  ;;  %v3033_v53 = vmax.f32 %v3010_v24, 0.0 }
 0x1b4   : > { %v12147_v30 = vpop.f32.mrf.mxu1  ;;  %v6530_v18 = vrot.slane %v6523_v3, %v12729_v13  ;;  %v14718_v32 = vrot.slane %v11849_v27, %v12729_v13 }
 0x1b5   : > { %v3013_v29 = vadd.f32 %v14601_v5, %v12146_v52  ;;  %v3261_v10 = vcombine.high %v3253_v36, %v3253_v36  ;;  %v3262_v63 = vcombine.high %v3260_v38, %v3260_v38  ;;  %v3276_v49 = vrot.slane %v3260_v38, %v12729_v13 }
 0x1b6   : > { %v12148_v42 = vpop.f32.mrf.mxu1  ;;  %v3269_v4 = vrot.slane %v3253_v36, %v12729_v13  ;;  %v14725_v39 = vcombine.low %v6530_v18, %v6537_v55 }
 0x1b7   : > { %v12149_v59 = vadd.f32 %v12148_v42, %v12147_v30  ;;  %v3034_v31 = vmax.f32 %v3013_v29, 0.0  ;;  %v3283_v58 = vrot.slane %v3261_v10, %v12729_v13  ;;  %v3290_v24 = vrot.slane %v3262_v63, %v12729_v13 }
 0x1b8   : > { %v12150_v14 = vpop.f32.mrf.mxu1  ;;  %v3292_v51 = vcombine.high %v3276_v49, %v3276_v49 }
 0x1b9   : > { %v3018_v60 = vadd.f32 %v14601_v5, %v12149_v59  ;;  %v3041_v35 = vpack.c.bf16 %v3034_v31, %v3033_v53  ;;  %v11797_v19 = vpack.c.bf16 %v3034_v31, %v3034_v31  ;;  %v3291_v59 = vcombine.high %v3269_v4, %v3269_v4 }
 0x1ba   : > { %v12151_v48 = vpop.f32.mrf.mxu1  ;;  %v6540_v3 = vcombine.low %v3269_v4, %v3283_v58 }
 0x1bb   : > { %v3035_v37 = vmax.f32 %v3018_v60, 0.0  ;;  %v3302_v22 = vrot.slane %v3041_v35, %v12729_v13  ;;  %v3309_v1 = vrot.slane %v11797_v19, %v12729_v13  ;;  %v3293_v60 = vcombine.high %v3283_v58, %v3283_v58 }
 0x1bc   : > { %v12227_v9 = vpop.f32.mrf.mxu1  ;;  %v6554_v58 = vrot.slane %v6540_v3, %v12729_v13 }
 0x1bd   : > { %v3042_v46 = vpack.c.bf16 %v3035_v37, %v3035_v37  ;;  %v3310_v7 = vcombine.high %v3302_v22, %v3302_v22  ;;  %v3311_v52 = vcombine.high %v3309_v1, %v3309_v1  ;;  %v3325_v26 = vrot.slane %v3309_v1, %v12729_v13 }
 0x1be   : > { %v12228_v57 = vpop.f32.mrf.mxu1  ;;  %v3318_v20 = vrot.slane %v3302_v22, %v12729_v13  ;;  %v14738_v1 = vrot.slane %v3291_v59, %v12729_v13 }
 0x1bf   : > { %v3350_v30 = vrot.slane %v3042_v46, %v12729_v13  ;;  %v12229_v2 = vadd.f32 %v12228_v57, %v12227_v9  ;;  %v3332_v36 = vrot.slane %v3310_v7, %v12729_v13  ;;  %v3339_v29 = vrot.slane %v3311_v52, %v12729_v13 }
 0x1c0   : > { %v12230_v42 = vpop.f32.mrf.mxu1  ;;  %v3341_v6 = vcombine.high %v3325_v26, %v3325_v26  ;;  %v6639_v35 = vrot.slane %v3325_v26, %v12729_v13  ;;  %v3294_v9 = vcombine.high %v3290_v24, %v3290_v24  ;;  %v6579_v7 = vcombine.low %v3290_v24, %v3292_v51 }
 0x1c1   : > { %v3351_v17 = vcombine.high %v3350_v30, %v3350_v30  ;;  %v3358_v38 = vrot.slane %v3350_v30, %v12729_v13  ;;  %v6617_v53 = vcombine.low %v3318_v20, %v3332_v36  ;;  %v11850_v31 = vcombine.high %v3318_v20, %v3332_v36 }
 0x1c2   : > { %v3343_v14 = vcombine.high %v3339_v29, %v3339_v29  ;;  %v12231_v27 = vpop.f32.mrf.mxu1  ;;  %v5519_v61 = vadd.f32 %v14601_v5, %v12229_v2  ;;  %v6656_v4 = vcombine.low %v3339_v29, %v3341_v6  ;;  %v6578_v57 = vcombine.low %v3293_v60, %v3276_v49 }
 0x1c3   : > { %v12232_v10 = vadd.f32 %v12231_v27, %v12230_v42  ;;  %v3365_v19 = vrot.slane %v3351_v17, %v12729_v13  ;;  %v6625_v37 = vrot.slane %v6617_v53, %v12729_v13  ;;  %v6632_v18 = vrot.slane %v11850_v31, %v12729_v13 }
 0x1c4   : > { %v6657_v48 = vcombine.low %v3343_v14, %v3358_v38  ;;  %v12233_v63 = vpop.f32.mrf.mxu1  ;;  %v5572_v30 = vmax.f32 %v5519_v61, 0.0  ;;  %v14743_v20 = vrot.slane %v6639_v35, %v12729_v13  ;;  %v6664_v29 = vrot.slane %v6656_v4, %v12729_v13 }
 0x1c5   : > { %v5522_v22 = vadd.f32 %v14601_v5, %v12232_v10  ;;  %v6640_v52 = vcombine.low %v6625_v37, %v6632_v18  ;;  %v6678_v6 = vrot.slane %v3365_v19, %v12729_v13  ;;  %v14751_v49 = vrot.slane %v3294_v9, %v12729_v13 }
 0x1c6   : > { %v12234_v46 = vpop.f32.mrf.mxu1  ;;  %v6671_v26 = vrot.slane %v6657_v48, %v12729_v13  ;;  %v6562_v31 = vcombine.low %v14718_v32, %v6554_v58  ;;  %v6576_v14 = vrot.slane %v14738_v1, %v12729_v13  ;;  %v6593_v19 = vrot.slane %v6579_v7, %v12729_v13 }
 0x1c7   : > { %v12199_v55 = vpop.f32.mrf.mxu0  ;;  %v5573_v2 = vmax.f32 %v5522_v22, 0.0  ;;  %v12235_v36 = vadd.f32 %v12234_v46, %v12233_v63  ;;  %v14746_v38 = vrot.slane %v6640_v52, %v12729_v13  ;;  %v6693_v22 = vrot.slane %v6678_v6, %v12729_v13 }
 0x1c8   : > { %v12236_v42 = vpop.f32.mrf.mxu1  ;;  %v6679_v60 = vcombine.low %v6664_v29, %v6671_v26  ;;  %v6586_v4 = vrot.slane %v6578_v57, %v12729_v13  ;;  %v6615_v46 = vrot.slane %v14751_v49, %v12729_v13  ;;  %v6569_v26 = vrot.slane %v6562_v31, %v12729_v13 }
 0x1c9   : > { %v12200_v17 = vpop.f32.mrf.mxu0  ;;  %v5585_v24 = vpack.c.bf16 %v5573_v2, %v5572_v30  ;;  %v11835_v51 = vpack.c.bf16 %v5573_v2, %v5573_v2  ;;  %v5527_v48 = vadd.f32 %v14601_v5, %v12235_v36 }
 0x1ca   : > { %v12201_v59 = vadd.f32 %v12200_v17, %v12199_v55  ;;  %v12237_v3 = vpop.f32.mrf.mxu1  ;;  %v6686_v18 = vrot.slane %v6679_v60, %v12729_v13  ;;  %v6601_v60 = vcombine.low %v6586_v4, %v6593_v19 }
 0x1cb   : > { %v12202_v53 = vpop.f32.mrf.mxu0  ;;  %v5606_v61 = vrot.slane %v5585_v24, %v12729_v13  ;;  %v5613_v10 = vrot.slane %v11835_v51, %v12729_v13  ;;  %v12238_v35 = vadd.f32 %v12237_v3, %v12236_v42  ;;  %v5574_v57 = vmax.f32 %v5527_v48, 0.0 }
 0x1cc   : > { %v12239_v63 = vpop.f32.mrf.mxu1  ;;  %v4281_v37 = vadd.f32 %v14601_v5, %v12201_v59  ;;  %v14775_v30 = vcombine.low %v6686_v18, %v6693_v22 }
 0x1cd   : > { %v12203_v32 = vpop.f32.mrf.mxu0  ;;  %v5614_v1 = vcombine.high %v5606_v61, %v5606_v61  ;;  %v14766_v9 = vrot.slane %v5613_v10, %v12729_v13  ;;  %v5530_v55 = vadd.f32 %v14601_v5, %v12238_v35  ;;  %v5615_v2 = vcombine.high %v5613_v10, %v5613_v10 }
 0x1ce   : > { %v12240_v58 = vpop.f32.mrf.mxu1  ;;  %v12204_v7 = vadd.f32 %v12203_v32, %v12202_v53  ;;  %v5622_v36 = vrot.slane %v5606_v61, %v12729_v13  ;;  %v4304_v24 = vmax.f32 %v4281_v37, 0.0 }
 0x1cf   : > { %v14772_v52 = vpop.f32.mrf.mxu0  ;;  %v5636_v42 = vrot.slane %v5614_v1, %v12729_v13  ;;  %v12241_v17 = vadd.f32 %v12240_v58, %v12239_v63  ;;  %v5575_v29 = vmax.f32 %v5530_v55, 0.0  ;;  %v7147_v31 = vrot.slane %v14766_v9, %v12729_v13 }
 0x1d0   : > { %v12242_v6 = vpop.f32.mrf.mxu1  ;;  %v4284_v51 = vadd.f32 %v14601_v5, %v12204_v7  ;;  %v5643_v18 = vrot.slane %v5615_v2, %v12729_v13  ;;  %v6608_v2 = vrot.slane %v6601_v60, %v12729_v13 }
 0x1d1   : > { %v14780_v59 = vpop.f32.mrf.mxu0  ;;  %v7125_v3 = vcombine.low %v5622_v36, %v5636_v42  ;;  %v11856_v53 = vcombine.high %v5622_v36, %v5636_v42  ;;  %v5586_v10 = vpack.c.bf16 %v5575_v29, %v5574_v57  ;;  %v11836_v35 = vpack.c.bf16 %v5575_v29, %v5575_v29 }
 0x1d2   : > { %v5535_v61 = vadd.f32 %v14601_v5, %v12241_v17  ;;  %v12243_v32 = vpop.f32.mrf.mxu1  ;;  %v4305_v63 = vmax.f32 %v4284_v51, 0.0  ;;  %v14791_v57 = vcombine.low %v6569_v26, %v6576_v14  ;;  %v5645_v29 = vcombine.high %v14766_v9, %v14766_v9  ;;  %v12544_v14 = vld [vmem:[%s16198_s3 + $0x68] sm:$0xff]  }
 0x1d3   : > { %v12208_v48 = vpop.f32.mrf.mxu0  ;;  %v12244_v37 = vadd.f32 %v12243_v32, %v12242_v6  ;;  %v7133_v22 = vrot.slane %v7125_v3, %v12729_v13  ;;  %v7140_v1 = vrot.slane %v11856_v53, %v12729_v13  ;;  %v5655_v55 = vrot.slane %v5586_v10, %v12729_v13  ;;  %v12545_v26 = vld [vmem:[%s16198_s3 + $0x28] sm:$0xff]   ;;  %12273 = vmatprep.subr.bf16.mxu0 %v12544_v14 }
 0x1d4   : > { %v5662_v58 = vrot.slane %v11836_v35, %v12729_v13  ;;  %v12245_v7 = vpop.f32.mrf.mxu1  ;;  %v4312_v19 = vpack.c.bf16 %v4305_v63, %v4304_v24  ;;  %v11829_v4 = vpack.c.bf16 %v4305_v63, %v4305_v63  ;;  %v5576_v51 = vmax.f32 %v5535_v61, 0.0  ;;  %v12546_v9 = vld [vmem:[%s16198_s3 + $0xe8] sm:$0xff]   ;;  %12274 = vmatpush3.bf16.msra.mxu0 %v12545_v26 }
 0x1d5   : > { %v12209_v36 = vpop.f32.mrf.mxu0  ;;  %v5538_v42 = vadd.f32 %v14601_v5, %v12244_v37  ;;  %v7148_v17 = vcombine.low %v7133_v22, %v7140_v1  ;;  %v7162_v53 = vrot.slane %v7147_v31, %v12729_v13  ;;  %v5647_v60 = vcombine.high %v5643_v18, %v5643_v18  ;;  %v12547_v37 = vld [vmem:[%s16198_s3 + $0xa8] sm:$0xff]   ;;  %12325 = vmatprep.subr.bf16.mxu1 %v12546_v9 }
 0x1d6   : > { %v5664_v6 = vcombine.high %v5662_v58, %v5662_v58  ;;  %v12246_v3 = vpop.f32.mrf.mxu1  ;;  %v4573_v32 = vrot.slane %v4312_v19, %v12729_v13  ;;  %v5663_v31 = vcombine.high %v5655_v55, %v5655_v55  ;;  %v14809_v61 = vrot.slane %v5655_v55, %v12729_v13  ;;  %12326 = vmatpush3.bf16.msra.mxu1 %v12547_v37 }
 0x1d7   : > { %v5577_v10 = vmax.f32 %v5538_v42, 0.0  ;;  %v12247_v35 = vadd.f32 %v12246_v3, %v12245_v7  ;;  %v7155_v24 = vrot.slane %v7148_v17, %v12729_v13  ;;  %v4580_v48 = vrot.slane %v11829_v4, %v12729_v13 }
 0x1d8   : > { %v12248_v63 = vpop.f32.mrf.mxu1  ;;  %v14816_v22 = vrot.slane %v5664_v6, %v12729_v13  ;;  %v5678_v36 = vrot.slane %v5662_v58, %v12729_v13  ;;  %v4581_v17 = vcombine.high %v4573_v32, %v4573_v32  ;;  %v7165_v6 = vcombine.low %v5647_v60, %v14809_v61 }
 0x1d9   : > { %v5587_v1 = vpack.c.bf16 %v5577_v10, %v5576_v51  ;;  %v11837_v7 = vpack.c.bf16 %v5577_v10, %v5577_v10  ;;  %v7163_v19 = vcombine.low %v7155_v24, %v7162_v53  ;;  %v5543_v42 = vadd.f32 %v14601_v5, %v12247_v35 }
 0x1da   : > { %v12249_v55 = vpop.f32.mrf.mxu1  ;;  %v4582_v3 = vcombine.high %v4580_v48, %v4580_v48  ;;  %v7164_v53 = vcombine.low %v5643_v18, %v5645_v29  ;;  %v12207_v58 = vadd.f32 %v14780_v59, %v14772_v52  ;;  %v14829_v10 = vcombine.low %v6608_v2, %v6615_v46 }
 0x1db   : > { %v5704_v4 = vrot.slane %v5587_v1, %v12729_v13  ;;  %v5711_v62 = vrot.slane %v11837_v7, %v12729_v13  ;;  %v12250_v28 = vadd.f32 %v12249_v55, %v12248_v63  ;;  %7515 = vrot.lane.b32.xlu0 %v7163_v19, %s12632_s16  ;;  %v7204_v35 = vcombine.low %v5678_v36, %v14816_v22 }
 0x1dc   : > { %v12251_v51 = vpop.f32.mrf.mxu1  ;;  %v5696_v24 = vcombine.high %v14816_v22, %v14816_v22  ;;  %v14835_v14 = vrot.slane %v4580_v48, %v12729_v13  ;;  %v5685_v26 = vrot.slane %v5663_v31, %v12729_v13  ;;  %v5578_v18 = vmax.f32 %v5543_v42, 0.0 }
 0x1dd   : > { %v5546_v29 = vadd.f32 %v14601_v5, %v12250_v28  ;;  %v14840_v52 = vrot.slane %v4573_v32, %v12729_v13  ;;  %v14843_v49 = vrot.slane %v4581_v17, %v12729_v13  ;;  %v5712_v59 = vcombine.high %v5704_v4, %v5704_v4 }
 0x1de   : > { %v12252_v46 = vpop.f32.mrf.mxu1  ;;  %v5713_v2 = vcombine.high %v5711_v62, %v5711_v62  ;;  %v5720_v9 = vrot.slane %v5704_v4, %v12729_v13  ;;  %v14847_v60 = vrot.slane %v4582_v3, %v12729_v13  ;;  %v7172_v37 = vrot.slane %v7164_v53, %v12729_v13 }
 0x1df   : > { %v5579_v63 = vmax.f32 %v5546_v29, 0.0  ;;  %v12253_v48 = vadd.f32 %v12252_v46, %v12251_v51  ;;  %v7179_v28 = vrot.slane %v7165_v6, %v12729_v13  ;;  %v14852_v32 = vrot.slane %v5711_v62, %v12729_v13 }
 0x1e0   : > { %v12254_v31 = vpop.f32.mrf.mxu1  ;;  %v7186_v1 = vrot.slane %v5685_v26, %v12729_v13  ;;  %v5694_v7 = vcombine.high %v5678_v36, %v5678_v36  ;;  %v7027_v42 = vcombine.low %v14840_v52, %v14843_v49  ;;  %v11855_v55 = vcombine.high %v14840_v52, %v14843_v49  ;;  %v12556_v49 = vld [vmem:[%s16198_s3 + $0x50] sm:$0xff]  }
 0x1e1   : > { %v5588_v19 = vpack.c.bf16 %v5579_v63, %v5578_v18  ;;  %v7187_v17 = vcombine.low %v7172_v37, %v7179_v28  ;;  %v5551_v4 = vadd.f32 %v14601_v5, %v12253_v48  ;;  %v11857_v62 = vcombine.high %v14809_v61, %v5685_v26 }
 0x1e2   : > { %v12255_v3 = vpop.f32.mrf.mxu1  ;;  %v7218_v51 = vrot.slane %v7204_v35, %v12729_v13  ;;  %v11838_v53 = vpack.c.bf16 %v5579_v63, %v5579_v63  ;;  %v7201_v18 = vrot.slane %v7186_v1, %v12729_v13  ;;  %v7225_v28 = vrot.slane %v5694_v7, %v12729_v13 }
 0x1e3   : > { %v12256_v6 = vadd.f32 %v12255_v3, %v12254_v31  ;;  %v5753_v29 = vrot.slane %v5588_v19, %v12729_v13  ;;  %v7194_v36 = vrot.slane %v7187_v17, %v12729_v13  ;;  %v7211_v37 = vrot.slane %v11857_v62, %v12729_v13 }
 0x1e4   : > { %v12257_v46 = vpop.f32.mrf.mxu1  ;;  %v4289_v48 = vadd.f32 %v14601_v5, %v12207_v58  ;;  %v5734_v61 = vrot.slane %v5712_v59, %v12729_v13  ;;  %v5741_v35 = vrot.slane %v5713_v2, %v12729_v13  ;;  %v5742_v26 = vcombine.high %v5720_v9, %v5720_v9 }
 0x1e5   : > { %v5554_v54 = vadd.f32 %v14601_v5, %v12256_v6  ;;  %v5761_v63 = vcombine.high %v5753_v29, %v5753_v29  ;;  %v5580_v19 = vmax.f32 %v5551_v4, 0.0  ;;  %v7202_v17 = vcombine.low %v7194_v36, %v7201_v18 }
 0x1e6   : > { %v12258_v31 = vpop.f32.mrf.mxu1  ;;  %v7226_v1 = vcombine.low %v7211_v37, %v7218_v51  ;;  %v14874_v27 = vrot.slane %v11838_v53, %v12729_v13  ;;  %v7240_v7 = vrot.slane %v7225_v28, %v12729_v13  ;;  %v4306_v58 = vmax.f32 %v4289_v48, 0.0 }
 0x1e7   : > { %v5581_v3 = vmax.f32 %v5554_v54, 0.0  ;;  %v14877_v6 = vrot.slane %v5761_v63, %v12729_v13  ;;  %7517 = vrot.lane.b32.xlu0 %v7202_v17, %s12632_s16  ;;  %v12259_v4 = vadd.f32 %v12258_v31, %v12257_v46  ;;  %v7242_v36 = vcombine.low %v5696_v24, %v5720_v9 }
 0x1e8   : > { %v12260_v62 = vpop.f32.mrf.mxu1  ;;  %v7233_v22 = vrot.slane %v7226_v1, %v12729_v13  ;;  %v5769_v54 = vrot.slane %v5753_v29, %v12729_v13  ;;  %v4313_v53 = vpack.c.bf16 %v4306_v58, %v4306_v58  ;;  %v7243_v63 = vcombine.low %v5734_v61, %v5742_v26 }
 0x1e9   : > { %v5589_v59 = vpack.c.bf16 %v5581_v3, %v5580_v19  ;;  %v11839_v2 = vpack.c.bf16 %v5581_v3, %v5581_v3  ;;  %v5793_v51 = vcombine.high %v14877_v6, %v14877_v6  ;;  %v7281_v19 = vcombine.low %v14852_v32, %v5741_v35 }
 0x1ea   : > { %v12261_v18 = vpop.f32.mrf.mxu1  ;;  %v7241_v48 = vcombine.low %v7233_v22, %v7240_v7  ;;  %v5559_v17 = vadd.f32 %v14601_v5, %v12259_v4  ;;  %v5744_v46 = vcombine.high %v5734_v61, %v5734_v61  ;;  %v11858_v9 = vcombine.high %v14852_v32, %v5741_v35 }
 0x1eb   : > { %v5802_v37 = vrot.slane %v5589_v59, %v12729_v13  ;;  %v5809_v28 = vrot.slane %v11839_v2, %v12729_v13  ;;  %v12262_v3 = vadd.f32 %v12261_v18, %v12260_v62  ;;  %v5762_v29 = vcombine.high %v14874_v27, %v14874_v27  ;;  %6707 = vrot.lane.b32.xlu0 %v14791_v57, %s12631_s13 }
 0x1ec   : > { %v12263_v24 = vpop.f32.mrf.mxu1  ;;  %v14894_v31 = vrot.slane %v14874_v27, %v12729_v13  ;;  %7519 = vrot.lane.b32.xlu1 %v7241_v48, %s12632_s16  ;;  %v14898_v22 = vrot.slane %v4313_v53, %v12729_v13  ;;  %v5791_v26 = vcombine.high %v5769_v54, %v5769_v54  ;;  %v4614_v32 = vcombine.high %v14847_v60, %v14847_v60 }
 0x1ed   : > { %v5810_v1 = vcombine.high %v5802_v37, %v5802_v37  ;;  %v5562_v61 = vadd.f32 %v14601_v5, %v12262_v3  ;;  %v5811_v27 = vcombine.high %v5809_v28, %v5809_v28  ;;  %v7250_v58 = vrot.slane %v7242_v36, %v12729_v13 }
 0x1ee   : > { %v12264_v35 = vpop.f32.mrf.mxu1  ;;  %v7321_v7 = vcombine.low %v5793_v51, %v14894_v31  ;;  %v7257_v62 = vrot.slane %v7243_v63, %v12729_v13  ;;  %v14909_v59 = vrot.slane %v5802_v37, %v12729_v13  ;;  %v5582_v2 = vmax.f32 %v5559_v17, 0.0 }
 0x1ef   : > { %v5583_v4 = vmax.f32 %v5562_v61, 0.0  ;;  %v7264_v57 = vrot.slane %v5744_v46, %v12729_v13  ;;  %v14913_v18 = vrot.slane %v5809_v28, %v12729_v13  ;;  %v4629_v48 = vrot.slane %v14898_v22, %v12729_v13 }
 0x1f0   : > { %v12266_v53 = vpop.f32.mrf.mxu1  ;;  %6705 = vrot.lane.b32.xlu1 %v14725_v39, %s12631_s13  ;;  %v7265_v36 = vcombine.low %v7250_v58, %v7257_v62  ;;  %v7289_v51 = vrot.slane %v7281_v19, %v12729_v13  ;;  %v5832_v37 = vrot.slane %v5810_v1, %v12729_v13  ;;  %v7296_v3 = vrot.slane %v11858_v9, %v12729_v13  ;;  %v12548_v39 = vld [vmem:[%s16198_s3 + $0x60] sm:$0xff]  }
 0x1f1   : > { %v5590_v63 = vpack.c.bf16 %v5583_v4, %v5582_v2  ;;  %v11840_v17 = vpack.c.bf16 %v5583_v4, %v5583_v4  ;;  %v7279_v28 = vrot.slane %v7264_v57, %v12729_v13  ;;  %v7303_v53 = vrot.slane %v5769_v54, %v12729_v13  ;;  %v12549_v19 = vld [vmem:[%s16198_s3 + $0x20] sm:$0xff]   ;;  %12275 = vmatprep.subr.bf16.mxu0 %v12548_v39 }
 0x1f2   : > { %v12267_v46 = vpop.f32.mrf.mxu1  ;;  %v7272_v61 = vrot.slane %v7265_v36, %v12729_v13  ;;  %v12265_v25 = vadd.f32 %v12264_v35, %v12263_v24  ;;  %v12550_v9 = vld [vmem:[%s16198_s3 + $0xe0] sm:$0xff]   ;;  %v7304_v62 = vcombine.low %v7289_v51, %v7296_v3  ;;  %v5790_v54 = vrot.slane %v5762_v29, %v12729_v13  ;;  %v12552_v36 = vld [vmem:[%s16198_s3 + $0x58] sm:$0xff]   ;;  %12276 = vmatpush3.bf16.msra.mxu0 %v12549_v19 }
 0x1f3   : > { %v5851_v1 = vrot.slane %v5590_v63, %v12729_v13  ;;  %v5858_v58 = vrot.slane %v11840_v17, %v12729_v13  ;;  %v12551_v24 = vld [vmem:[%s16198_s3 + $0xa0] sm:$0xff]   ;;  %v7318_v2 = vrot.slane %v7303_v53, %v12729_v13  ;;  %v7320_v57 = vcombine.low %v14877_v6, %v5791_v26  ;;  %12327 = vmatprep.subr.bf16.mxu1 %v12550_v9  ;;  %v12553_v6 = vld [vmem:[%s16198_s3 + $0x18] sm:$0xff]  }
 0x1f4   : > { %v7280_v35 = vcombine.low %v7272_v61, %v7279_v28  ;;  %v5567_v4 = vadd.f32 %v14601_v5, %v12265_v25  ;;  %v5839_v51 = vrot.slane %v5811_v27, %v12729_v13  ;;  %v5842_v63 = vcombine.high %v5832_v37, %v5832_v37  ;;  %12328 = vmatpush3.bf16.msra.mxu1 %v12551_v24  ;;  %v12554_v53 = vld [vmem:[%s16198_s3 + $0xd8] sm:$0xff]  }
 0x1f5   : > { %v5859_v29 = vcombine.high %v5851_v1, %v5851_v1  ;;  %v5860_v17 = vcombine.high %v5858_v58, %v5858_v58  ;;  %v7311_v3 = vrot.slane %v7304_v62, %v12729_v13  ;;  %v7328_v5 = vrot.slane %v7320_v57, %v12729_v13  ;;  %12277 = vmatprep.subr.bf16.mxu0 %v12552_v36 }
 0x1f6   : > { %7521 = vrot.lane.b32.xlu1 %v7280_v35, %s12632_s16  ;;  %v5584_v46 = vmax.f32 %v5567_v4, 0.0  ;;  %v7335_v25 = vrot.slane %v7321_v7, %v12729_v13  ;;  %v5841_v26 = vcombine.high %v14913_v18, %v14913_v18  ;;  %v7360_v27 = vcombine.low %v14909_v59, %v5832_v37  ;;  %12278 = vmatpush3.bf16.msra.mxu0 %v12553_v6 }
 0x1f7   : > { %v5888_v61 = vrot.slane %v5860_v17, %v12729_v13  ;;  %v7342_v28 = vrot.slane %v5790_v54, %v12729_v13  ;;  %v7319_v7 = vcombine.low %v7311_v3, %v7318_v2  ;;  %v5840_v9 = vcombine.high %v14909_v59, %v14909_v59  ;;  %12329 = vmatprep.subr.bf16.mxu1 %v12554_v53 }
 0x1f8   : > { %v5591_v39 = vpack.c.bf16 %v5584_v46, %v5584_v46  ;;  %v7343_v19 = vcombine.low %v7328_v5, %v7335_v25  ;;  %v7398_v62 = vcombine.low %v5842_v63, %v14913_v18  ;;  %v14966_v37 = vrot.slane %v5858_v58, %v12729_v13  ;;  %12279 = vmatprep.subr.bf16.mxu0 %v12556_v49 }
 0x1f9   : > { %v5881_v35 = vrot.slane %v5859_v29, %v12729_v13  ;;  %v7357_v24 = vrot.slane %v7342_v28, %v12729_v13  ;;  %7523 = vrot.lane.b32.xlu0 %v7319_v7, %s12632_s16  ;;  %v11859_v4 = vcombine.high %v14894_v31, %v5790_v54  ;;  %v5867_v18 = vrot.slane %v5851_v1, %v12729_v13 }
 0x1fa   : > { %v5899_v2 = vrot.slane %v5591_v39, %v12729_v13  ;;  %7115 = vrot.lane.b32.xlu1 %v14586_v34, %s12630_s19  ;;  %v7350_v59 = vrot.slane %v7343_v19, %v12729_v13  ;;  %v5892_v58 = vcombine.high %v5888_v61, %v5888_v61  ;;  %v7374_v57 = vrot.slane %v7360_v27, %v12729_v13  ;;  %v12555_v39 = vld [vmem:[%s16198_s3 + $0x98] sm:$0xff]  }
 0x1fb   : > { %v7399_v36 = vcombine.low %v5839_v51, %v5841_v26  ;;  %v7367_v17 = vrot.slane %v11859_v4, %v12729_v13  ;;  %v7381_v3 = vrot.slane %v5840_v9, %v12729_v13  ;;  %v7437_v46 = vcombine.low %v5867_v18, %v5881_v35  ;;  %12330 = vmatpush3.bf16.msra.mxu1 %v12555_v39 }
 0x1fc   : > { %v5907_v63 = vrot.slane %v5899_v2, %v12729_v13  ;;  %v7358_v29 = vcombine.low %v7350_v59, %v7357_v24  ;;  %v11860_v34 = vcombine.high %v5867_v18, %v5881_v35  ;;  %v5843_v5 = vcombine.high %v5839_v51, %v5839_v51 }
 0x1fd   : > { %v7406_v25 = vrot.slane %v7398_v62, %v12729_v13  ;;  %v5890_v31 = vcombine.high %v14966_v37, %v14966_v37  ;;  %7117 = vrot.lane.b32.xlu0 %v14706_v43, %s12630_s19  ;;  %v7382_v1 = vcombine.low %v7367_v17, %v7374_v57  ;;  %v7413_v54 = vrot.slane %v7399_v36, %v12729_v13 }
 0x1fe   : > { %7525 = vrot.lane.b32.xlu1 %v7358_v29, %s12632_s16  ;;  %v4622_v6 = vcombine.high %v14898_v22, %v14898_v22  ;;  %v5900_v26 = vcombine.high %v5899_v2, %v5899_v2  ;;  %v7035_v51 = vrot.slane %v7027_v42, %v12729_v13  ;;  %v7042_v27 = vrot.slane %v11855_v55, %v12729_v13  ;;  %v12557_v2 = vld [vmem:[%s16198_s3 + $0x10] sm:$0xff]  }
 0x1ff   : > { %v7477_v43 = vcombine.low %v5892_v58, %v5907_v63  ;;  %v7389_v28 = vrot.slane %v7382_v1, %v12729_v13  ;;  %v7396_v53 = vrot.slane %v7381_v3, %v12729_v13  ;;  %v7421_v7 = vcombine.low %v7406_v25, %v7413_v54  ;;  %v12562_v63 = vld [vmem:[%s16198_s3 + $0xc8] sm:$0xff]   ;;  %12280 = vmatpush3.bf16.msra.mxu0 %v12557_v2 }
 0x200   : > { %v7420_v19 = vrot.slane %v5843_v5, %v12729_v13  ;;  %v7049_v42 = vrot.slane %v14835_v14, %v12729_v13  ;;  %v7445_v9 = vrot.slane %v7437_v46, %v12729_v13  ;;  %v7452_v52 = vrot.slane %v11860_v34, %v12729_v13 }
 0x201   : > { %v7067_v55 = vcombine.low %v4614_v32, %v4629_v48  ;;  %v7397_v62 = vcombine.low %v7389_v28, %v7396_v53  ;;  %v7050_v35 = vcombine.low %v7035_v51, %v7042_v27  ;;  %v7476_v24 = vcombine.low %v5888_v61, %v5890_v31  ;;  %v12558_v32 = vld [vmem:[%s16198_s3 + $0xd0] sm:$0xff]   ;;  %v12566_v27 = vld [vmem:[%s16198_s3] sm:$0xff]  }
 0x202   : > { %6709 = vrot.lane.b32.xlu1 %v14829_v10, %s12631_s13  ;;  %v16326_v22 = vrot.slane %v14701_v21, %v12729_v13  ;;  %v12560_v10 = vld [vmem:[%s16198_s3 + $0x48] sm:$0xff]   ;;  %v4636_v48 = vrot.slane %v4622_v6, %v12729_v13  ;;  %v5914_v61 = vrot.slane %v5900_v26, %v12729_v13  ;;  %v7428_v47 = vrot.slane %v7421_v7, %v12729_v13  ;;  %v12565_v26 = vld [vmem:[%s16198_s3 + $0xc0] sm:$0xff]  }
 0x203   : > { %7527 = vrot.lane.b32.xlu0 %v7397_v62, %s12632_s16  ;;  %v7491_v21 = vrot.slane %v7477_v43, %v12729_v13  ;;  %v7435_v4 = vrot.slane %v7420_v19, %v12729_v13  ;;  %v7064_v18 = vrot.slane %v7049_v42, %v12729_v13  ;;  %v7460_v58 = vcombine.low %v7445_v9, %v7452_v52  ;;  %v12567_v28 = vld [vmem:[%s16198_s3 + $0x80] sm:$0xff]   ;;  %v7108_v52 = vpop.permute.xlu0 %7107 }
 0x204   : > { %v7026_v59 = vcombine.low %v16326_v22, %v7025_v8  ;;  %v12559_v8 = vld [vmem:[%s16198_s3 + $0x90] sm:$0xff]   ;;  %v16327_v57 = vcombine.high %v14835_v14, %v14835_v14  ;;  %v7057_v29 = vrot.slane %v7050_v35, %v12729_v13  ;;  %v7484_v17 = vrot.slane %v7476_v24, %v12729_v13  ;;  %v12561_v14 = vld [vmem:[%s16198_s3 + $0x8] sm:$0xff]   ;;  %12331 = vmatprep.subr.bf16.mxu1 %v12558_v32 }
 0x205   : > { %v7081_v3 = vrot.slane %v7067_v55, %v12729_v13  ;;  %12281 = vmatprep.subr.bf16.mxu0 %v12560_v10  ;;  %v16328_v34 = vcombine.low %v14746_v38, %v14743_v20  ;;  %v7436_v5 = vcombine.low %v7428_v47, %v7435_v4  ;;  %12332 = vmatpush3.bf16.msra.mxu1 %v12559_v8  ;;  %v12563_v20 = vld [vmem:[%s16198_s3 + $0x88] sm:$0xff]   ;;  %v12564_v38 = vld [vmem:[%s16198_s3 + $0x40] sm:$0xff]  }
 0x206   : > { %v7066_v36 = vcombine.low %v14847_v60, %v16327_v57  ;;  %7119 = vrot.lane.b32.xlu1 %v7026_v59, %s12630_s19  ;;  %v7459_v60 = vrot.slane %v14966_v37, %v12729_v13  ;;  %v7499_v25 = vcombine.low %v7484_v17, %v7491_v21  ;;  %v7467_v31 = vrot.slane %v7460_v58, %v12729_v13 }
 0x207   : > { %6711 = vrot.lane.b32.xlu0 %v16328_v34, %s12631_s13  ;;  %v7498_v1 = vrot.slane %v5914_v61, %v12729_v13  ;;  %12333 = vmatprep.subr.bf16.mxu1 %v12562_v63  ;;  %v7065_v37 = vcombine.low %v7057_v29, %v7064_v18  ;;  %v7088_v54 = vrot.slane %v4636_v48, %v12729_v13  ;;  %v7114_v49 = vpop.permute.xlu0 %7113 }
 0x208   : > { %v7074_v46 = vrot.slane %v7066_v36, %v12729_v13  ;;  %12282 = vmatpush3.bf16.msra.mxu0 %v12561_v14  ;;  %v7474_v51 = vrot.slane %v7459_v60, %v12729_v13  ;;  %v7506_v43 = vrot.slane %v7499_v25, %v12729_v13  ;;  %v16329_v2 = vcombine.low %v14309_v15, %v14312_v23 }
 0x209   : > { %12334 = vmatpush3.bf16.msra.mxu1 %v12563_v20  ;;  %12283 = vmatprep.subr.bf16.mxu0 %v12564_v38  ;;  %v7513_v7 = vrot.slane %v7498_v1, %v12729_v13  ;;  %v7103_v19 = vrot.slane %v7088_v54, %v12729_v13 }
 0x20a   : > { %7529 = vrot.lane.b32.xlu1 %v7436_v5, %s12632_s16  ;;  %v7089_v6 = vcombine.low %v7074_v46, %v7081_v3  ;;  %v7475_v53 = vcombine.low %v7467_v31, %v7474_v51  ;;  %12335 = vmatprep.subr.bf16.mxu1 %v12565_v26 }
 0x20b   : > { %7121 = vrot.lane.b32.xlu0 %v7065_v37, %s12630_s19  ;;  %v7514_v42 = vcombine.low %v7506_v43, %v7513_v7  ;;  %v6696_v55 = vpop.permute.xlu0 %6695 }
 0x20c   : > { %v7096_v39 = vrot.slane %v7089_v6, %v12729_v13  ;;  %12284 = vmatpush3.bf16.msra.mxu0 %v12566_v27  ;;  %v7538_v22 = vsel %vm7535_vm1, %v16329_v2, %v6696_v55  ;;  %v16330_v27 = vcombine.low %v14499_v41, %v14493_v44 }
 0x20d   : > { %12336 = vmatpush3.bf16.msra.mxu1 %v12567_v28 }
 0x20e   : > { %6713 = vrot.lane.b32.xlu1 %v14775_v30, %s12631_s13  ;;  %v7104_v9 = vcombine.low %v7096_v39, %v7103_v19  ;;  %v7106_v30 = vpop.permute.xlu1 %7105 }
 0x20f   : > { %7531 = vrot.lane.b32.xlu0 %v7475_v53, %s12632_s16  ;;  %v6698_v62 = vpop.permute.xlu0 %6697  ;;  %v7567_v32 = vsel %vm382_vm0, %v7538_v22, %v7106_v30 }
 0x210   : > { %v7541_v21 = vsel %vm7535_vm1, %v14376_v45, %v6698_v62 }
 0x211   : > { %v7569_v58 = vsel %vm382_vm0, %v7541_v21, %v7108_v52 }
 0x212   : > { %7533 = vrot.lane.b32.xlu1 %v7514_v42, %s12632_s16  ;;  %v7110_v24 = vpop.permute.xlu1 %7109 }
 0x213   : > { %7123 = vrot.lane.b32.xlu0 %v7104_v9, %s12630_s19 }
 0x216   : > { %v7112_v10 = vpop.permute.xlu1 %7111 }
 0x21a   : > { %v6700_v47 = vpop.permute.xlu1 %6699 }
 0x21b   : > { %v7544_v23 = vsel %vm7535_vm1, %v14385_v16, %v6700_v47 }
 0x21c   : > { %v7571_v3 = vsel %vm382_vm0, %v7544_v23, %v7110_v24 }
 0x21e   : > { %v6702_v18 = vpop.permute.xlu1 %6701 }
 0x21f   : > { %v7547_v51 = vsel %vm7535_vm1, %v14412_v40, %v6702_v18 }
 0x220   : > { %v7573_v52 = vsel %vm382_vm0, %v7547_v51, %v7112_v10 }
 0x221   : > { %v6704_v35 = vpop.permute.xlu0 %6703 }
 0x222   : > { %v7550_v43 = vsel %vm7535_vm1, %v16330_v27, %v6704_v35 }
 0x223   : > { %v7575_v35 = vsel %vm382_vm0, %v7550_v43, %v7114_v49 }
 0x24d   : > { %v7516_v59 = vpop.permute.xlu0 %7515 }
 0x24e   : > { %v7588_v48 = vsel %vm7586_vm2, %v7567_v32, %v7516_v59 }
 0x24f   : > { %v7609_v61 = vshll.u32 %v7588_v48, 16  ;;  %v7607_v4 = vshrl.u32 %v7588_v48, 16 }
 0x251   : > { %v7611_v8 = vrot.slane %v7609_v61, 1 }
 0x253   : > { %v7612_v57 = vor.u32 %v7611_v8, %v7607_v4 }
 0x255   : > { %v7677_v60 = vcombine.low %v7588_v48, %v7612_v57  ;;  %v7678_v46 = vcombine.high %v7588_v48, %v7612_v57 }
 0x257   : > { %v7687_v54 = vrot.slane %v7677_v60, %v12729_v13  ;;  %v7694_v6 = vrot.slane %v7678_v46, %v12729_v13 }
 0x259   : > { %v7518_v15 = vpop.permute.xlu0 %7517 }
 0x25a   : > { %v7590_v36 = vsel %vm7586_vm2, %v7569_v58, %v7518_v15 }
 0x25b   : > { %v7615_v63 = vshll.u32 %v7590_v36, 16  ;;  %v7613_v29 = vshrl.u32 %v7590_v36, 16 }
 0x25d   : > { %v7617_v17 = vrot.slane %v7615_v63, 1  ;;  %v6708_v19 = vpop.permute.xlu0 %6707 }
 0x25e   : > { %v7520_v14 = vpop.permute.xlu1 %7519  ;;  %v7556_v41 = vsel %vm7535_vm1, %v14536_v0, %v6708_v19 }
 0x25f   : > { %v7592_v45 = vsel %vm7586_vm2, %v7571_v3, %v7520_v14  ;;  %v7618_v34 = vor.u32 %v7617_v17, %v7613_v29 }
 0x260   : > { %v7621_v5 = vshll.u32 %v7592_v45, 16  ;;  %v7619_v1 = vshrl.u32 %v7592_v45, 16 }
 0x261   : > { %v7679_v25 = vcombine.low %v7590_v36, %v7618_v34  ;;  %v7680_v31 = vcombine.high %v7590_v36, %v7618_v34 }
 0x262   : > { %v7623_v37 = vrot.slane %v7621_v5, 1  ;;  %v6706_v16 = vpop.permute.xlu1 %6705 }
 0x263   : > { %v7701_v20 = vrot.slane %v7679_v25, %v12729_v13  ;;  %v7708_v38 = vrot.slane %v7680_v31, %v12729_v13  ;;  %v7553_v22 = vsel %vm7535_vm1, %v14542_v11, %v6706_v16 }
 0x264   : > { %v7624_v26 = vor.u32 %v7623_v37, %v7619_v1 }
 0x265   : > { %v7709_v28 = vcombine.low %v7687_v54, %v7701_v20  ;;  %v7710_v53 = vcombine.high %v7687_v54, %v7701_v20  ;;  %v7711_v7 = vcombine.low %v7694_v6, %v7708_v38 }
 0x266   : > { %v7735_v39 = vcombine.low %v7592_v45, %v7624_v26  ;;  %v7736_v42 = vcombine.high %v7592_v45, %v7624_v26 }
 0x267   : > { %v15124_v30 = vrot.slane %v7709_v28, %v12729_v13  ;;  %v15127_v40 = vrot.slane %v7710_v53, %v12729_v13  ;;  %v7725_v32 = vrot.slane %v7711_v7, %v12729_v13 }
 0x268   : > { %v15120_v9 = vrot.slane %v7735_v39, %v12729_v13  ;;  %v7522_v55 = vpop.permute.xlu1 %7521  ;;  %v7750_v44 = vrot.slane %v7736_v42, %v12729_v13 }
 0x269   : > { %v7594_v62 = vsel %vm7586_vm2, %v7573_v52, %v7522_v55  ;;  %v8264_v48 = vcombine.low %v15124_v30, %v15127_v40  ;;  %v11882_v0 = vcombine.high %v15124_v30, %v15127_v40 }
 0x26a   : > { %v7751_v24 = vcombine.low %v7701_v20, %v15120_v9  ;;  %v7752_v2 = vcombine.high %v7701_v20, %v15120_v9  ;;  %v7627_v59 = vshll.u32 %v7594_v62, 16  ;;  %v7753_v10 = vcombine.low %v7708_v38, %v7750_v44 }
 0x26b   : > { %v7625_v47 = vshrl.u32 %v7594_v62, 16  ;;  %v7524_v8 = vpop.permute.xlu0 %7523  ;;  %v15149_v15 = vrot.slane %v8264_v48, %v12729_v13 }
 0x26c   : > { %v7760_v61 = vrot.slane %v7751_v24, %v12729_v13  ;;  %v7774_v49 = vrot.slane %v7752_v2, %v12729_v13  ;;  %v7629_v21 = vrot.slane %v7627_v59, 1  ;;  %v7116_v4 = vpop.permute.xlu1 %7115  ;;  %v7767_v11 = vrot.slane %v7753_v10, %v12729_v13 }
 0x26d   : > { %v7596_v18 = vsel %vm7586_vm2, %v7575_v35, %v7524_v8  ;;  %v7577_v58 = vsel %vm382_vm0, %v7553_v22, %v7116_v4  ;;  %v8281_v24 = vrot.slane %v11882_v0, %v12729_v13 }
 0x26e   : > { %v7776_v23 = vcombine.high %v7774_v49, %v7774_v49  ;;  %v7630_v57 = vor.u32 %v7629_v21, %v7625_v47  ;;  %v7631_v36 = vshrl.u32 %v7596_v18, 16  ;;  %v7633_v63 = vshll.u32 %v7596_v18, 16 }
 0x26f   : > { %v7775_v29 = vcombine.high %v7760_v61, %v7760_v61  ;;  %v8081_v17 = vunpack.i.h.s16 %v7760_v61  ;;  %v8083_v3 = vunpack.i.h.s16 %v7774_v49  ;;  %v11862_v14 = vpack.i.b16 %v7760_v61, %v7725_v32  ;;  %v7118_v5 = vpop.permute.xlu0 %7117 }
 0x270   : > { %v8087_v60 = vunpack.i.h.s16 %v7776_v23  ;;  %v7777_v45 = vcombine.low %v7594_v62, %v7630_v57  ;;  %v7778_v46 = vcombine.high %v7594_v62, %v7630_v57  ;;  %v7635_v34 = vrot.slane %v7633_v63, 1  ;;  %v7526_v25 = vpop.permute.xlu1 %7525 }
 0x271   : > { %v7579_v31 = vsel %vm382_vm0, %v7556_v41, %v7118_v5  ;;  %v7598_v1 = vsel %vm7586_vm2, %v7577_v58, %v7526_v25  ;;  %v8085_v37 = vunpack.i.h.s16 %v7775_v29  ;;  %v11863_v16 = vpack.i.b16 %v7774_v49, %v8081_v17 }
 0x272   : > { %v15153_v54 = vpack.i.b16 %v7767_v11, %v8087_v60  ;;  %v15156_v6 = vrot.slane %v7777_v45, %v12729_v13  ;;  %v7792_v20 = vrot.slane %v7778_v46, %v12729_v13  ;;  %v7636_v38 = vor.u32 %v7635_v34, %v7631_v36 }
 0x273   : > { %v7637_v26 = vshrl.u32 %v7598_v1, 16  ;;  %v7639_v51 = vshll.u32 %v7598_v1, 16  ;;  %v11864_v27 = vpack.i.b16 %v7775_v29, %v8083_v3  ;;  %v11865_v43 = vpack.i.b16 %v7776_v23, %v8085_v37 }
 0x274   : > { %v7793_v28 = vcombine.low %v15120_v9, %v15156_v6  ;;  %v7794_v53 = vcombine.high %v15120_v9, %v15156_v6  ;;  %v7795_v7 = vcombine.low %v7750_v44, %v7792_v20  ;;  %v7819_v39 = vcombine.low %v7596_v18, %v7636_v38  ;;  %v6710_v19 = vpop.permute.xlu1 %6709 }
 0x275   : > { %v7820_v42 = vcombine.high %v7596_v18, %v7636_v38  ;;  %v7641_v52 = vrot.slane %v7639_v51, 1  ;;  %v7559_v55 = vsel %vm7535_vm1, %v14548_v33, %v6710_v19  ;;  %v8266_v30 = vcombine.low %v11862_v14, %v11863_v16  ;;  %v7528_v62 = vpop.permute.xlu0 %7527 }
 0x276   : > { %v15166_v40 = vrot.slane %v7795_v7, %v12729_v13  ;;  %v15169_v41 = vrot.slane %v7819_v39, %v12729_v13  ;;  %v8267_v35 = vcombine.low %v11864_v27, %v11865_v43  ;;  %v7600_v22 = vsel %vm7586_vm2, %v7579_v31, %v7528_v62 }
 0x277   : > { %v7834_v44 = vrot.slane %v7820_v42, %v12729_v13  ;;  %v7642_v2 = vor.u32 %v7641_v52, %v7637_v26  ;;  %v8288_v59 = vrot.slane %v8266_v30, %v12729_v13  ;;  %v7643_v10 = vshrl.u32 %v7600_v22, 16 }
 0x278   : > { %v7835_v33 = vcombine.low %v15156_v6, %v15169_v41  ;;  %v7836_v32 = vcombine.high %v15156_v6, %v15169_v41  ;;  %v7645_v48 = vshll.u32 %v7600_v22, 16  ;;  %v7120_v61 = vpop.permute.xlu1 %7119  ;;  %v8295_v58 = vrot.slane %v8267_v35, %v12729_v13 }
 0x279   : > { %v7837_v49 = vcombine.low %v7792_v20, %v7834_v44  ;;  %v7861_v47 = vcombine.low %v7598_v1, %v7642_v2  ;;  %v7862_v21 = vcombine.high %v7598_v1, %v7642_v2  ;;  %v7581_v0 = vsel %vm382_vm0, %v7559_v55, %v7120_v61  ;;  %v6712_v18 = vpop.permute.xlu0 %6711 }
 0x27a   : > { %v15181_v8 = vrot.slane %v7835_v33, %v12729_v13  ;;  %v15184_v4 = vrot.slane %v7836_v32, %v12729_v13  ;;  %v7647_v11 = vrot.slane %v7645_v48, 1  ;;  %v16331_v63 = vcombine.low %v14554_v50, %v14551_v56 }
 0x27b   : > { %v7851_v23 = vrot.slane %v7837_v49, %v12729_v13  ;;  %v15189_v57 = vrot.slane %v7861_v47, %v12729_v13  ;;  %v7876_v36 = vrot.slane %v7862_v21, %v12729_v13  ;;  %v8296_v60 = vcombine.low %v15149_v15, %v8281_v24 }
 0x27c   : > { %v7562_v29 = vsel %vm7535_vm1, %v16331_v63, %v6712_v18  ;;  %v15198_v17 = vcombine.high %v15184_v4, %v15184_v4  ;;  %v7648_v3 = vor.u32 %v7647_v11, %v7643_v10  ;;  %v7530_v14 = vpop.permute.xlu1 %7529  ;;  %v8297_v45 = vcombine.high %v15149_v15, %v8281_v24 }
 0x27d   : > { %v7877_v46 = vcombine.low %v15169_v41, %v15189_v57  ;;  %v7878_v34 = vcombine.high %v15169_v41, %v15189_v57  ;;  %v7879_v5 = vcombine.low %v7834_v44, %v7876_v36  ;;  %v7602_v56 = vsel %vm7586_vm2, %v7581_v0, %v7530_v14  ;;  %v7122_v37 = vpop.permute.xlu0 %7121 }
 0x27e   : > { %v8105_v50 = vunpack.i.h.s16 %v15198_v17  ;;  %v7903_v25 = vcombine.low %v7600_v22, %v7648_v3  ;;  %v7904_v31 = vcombine.high %v7600_v22, %v7648_v3  ;;  %v7649_v1 = vshrl.u32 %v7602_v56, 16 }
 0x27f   : > { %v15209_v16 = vrot.slane %v7879_v5, %v12729_v13  ;;  %v7651_v20 = vshll.u32 %v7602_v56, 16  ;;  %v7583_v15 = vsel %vm382_vm0, %v7562_v29, %v7122_v37  ;;  %v8298_v38 = vcombine.low %v8288_v59, %v8295_v58 }
 0x280   : > { %v15212_v26 = vpack.i.b16 %v7851_v23, %v8105_v50  ;;  %v15215_v51 = vrot.slane %v7903_v25, %v12729_v13  ;;  %v7918_v27 = vrot.slane %v7904_v31, %v12729_v13  ;;  %v8299_v43 = vcombine.high %v8288_v59, %v8295_v58  ;;  %v6714_v7 = vpop.permute.xlu1 %6713 }
 0x281   : > { %v7653_v39 = vrot.slane %v7651_v20, 1  ;;  %v8313_v19 = vrot.slane %v8297_v45, %v12729_v13  ;;  %v8306_v42 = vrot.slane %v8296_v60, %v12729_v13  ;;  %v8320_v52 = vrot.slane %v8298_v38, %v12729_v13  ;;  %v7532_v24 = vpop.permute.xlu0 %7531 }
 0x282   : > { %v7919_v55 = vcombine.low %v15189_v57, %v15215_v51  ;;  %v7920_v30 = vcombine.high %v15189_v57, %v15215_v51  ;;  %v7921_v62 = vcombine.low %v7876_v36, %v7918_v27  ;;  %v8327_v35 = vrot.slane %v8299_v43, %v12729_v13 }
 0x283   : > { %v7654_v44 = vor.u32 %v7653_v39, %v7649_v1  ;;  %v8328_v2 = vcombine.low %v8306_v42, %v8320_v52  ;;  %v8329_v22 = vcombine.high %v8306_v42, %v8320_v52  ;;  %v7565_v59 = vsel %vm7535_vm1, %v14560_v12, %v6714_v7 }
 0x284   : > { %v15229_v33 = vrot.slane %v7919_v55, %v12729_v13  ;;  %v7935_v32 = vrot.slane %v7921_v62, %v12729_v13  ;;  %v15233_v10 = vrot.slane %v7920_v30, %v12729_v13  ;;  %v8330_v48 = vcombine.low %v8313_v19, %v8327_v35  ;;  %v7534_v63 = vpop.permute.xlu1 %7533 }
 0x285   : > { %v7945_v61 = vcombine.low %v7602_v56, %v7654_v44  ;;  %v7946_v49 = vcombine.high %v7602_v56, %v7654_v44  ;;  %v8331_v47 = vcombine.high %v8313_v19, %v8327_v35  ;;  %v7604_v21 = vsel %vm7586_vm2, %v7583_v15, %v7532_v24  ;;  %v7124_v18 = vpop.permute.xlu0 %7123 }
 0x286   : > { %v15238_v0 = vcombine.high %v15233_v10, %v15233_v10  ;;  %8876 = vmatprep.mubr.bf16.mxu0 %v8330_v48  ;;  %v7655_v12 = vshrl.u32 %v7604_v21, 16  ;;  %v7657_v11 = vshll.u32 %v7604_v21, 16  ;;  %v7802_v58 = vrot.slane %v7793_v28, %v12729_v13 }
 0x287   : > { %v15245_v23 = vrot.slane %v7945_v61, %v12729_v13  ;;  %v7960_v36 = vrot.slane %v7946_v49, %v12729_v13  ;;  %8956 = vmatprep.mubr.bf16.mxu1 %v8331_v47  ;;  %8877 = vmatmul.mubr.bf16.vlgmr.msra.gmra.mxu0 %v8328_v2  ;;  %v7585_v29 = vsel %vm382_vm0, %v7565_v59, %v7124_v18  ;;  %v8099_v3 = vunpack.i.h.s16 %v15181_v8 }
 0x288   : > { %v8123_v14 = vunpack.i.h.s16 %v15238_v0  ;;  %8957 = vmatmul.mubr.bf16.vlgmr.msra.gmra.mxu1 %v8329_v22  ;;  %v7659_v60 = vrot.slane %v7657_v11, 1  ;;  %v7606_v45 = vsel %vm7586_vm2, %v7585_v29, %v7534_v63  ;;  %v7816_v28 = vrot.slane %v7794_v53, %v12729_v13 }
 0x289   : > { %v7961_v5 = vcombine.low %v15215_v51, %v15245_v23  ;;  %v7962_v56 = vcombine.high %v15215_v51, %v15245_v23  ;;  %v7963_v50 = vcombine.low %v7918_v27, %v7960_v36  ;;  %v7661_v25 = vshrl.u32 %v7606_v45, 16 }
 0x28a   : > { %v15260_v31 = vpack.i.b16 %v7935_v32, %v8123_v14  ;;  %v7660_v1 = vor.u32 %v7659_v60, %v7655_v12  ;;  %v7663_v37 = vshll.u32 %v7606_v45, 16  ;;  %v7817_v20 = vcombine.high %v7802_v58, %v7802_v58 }
 0x28b   : > { %v15263_v15 = vrot.slane %v7963_v50, %v12729_v13  ;;  %v7818_v38 = vcombine.high %v7816_v28, %v7816_v28  ;;  %v7859_v9 = vcombine.high %v15181_v8, %v15181_v8  ;;  %v8101_v6 = vunpack.i.h.s16 %v15184_v4 }
 0x28c   : > { %v7987_v53 = vcombine.low %v7604_v21, %v7660_v1  ;;  %v7988_v43 = vcombine.high %v7604_v21, %v7660_v1  ;;  %v7665_v7 = vrot.slane %v7663_v37, 1  ;;  %v11867_v27 = vpack.i.b16 %v15181_v8, %v15166_v40 }
 0x28d   : > { %v11868_v39 = vpack.i.b16 %v15184_v4, %v8099_v3  ;;  %v11869_v19 = vpack.i.b16 %v7859_v9, %v8101_v6  ;;  %v8332_v42 = vcombine.low %v15153_v54, %v7802_v58  ;;  %v8333_v52 = vcombine.low %v7816_v28, %v7817_v20 }
 0x28e   : > { %v15273_v55 = vrot.slane %v7987_v53, %v12729_v13  ;;  %v15276_v30 = vrot.slane %v7988_v43, %v12729_v13  ;;  %v7666_v62 = vor.u32 %v7665_v7, %v7661_v25  ;;  %v8334_v35 = vcombine.low %v7818_v38, %v11867_v27 }
 0x28f   : > { %v8335_v24 = vcombine.low %v11868_v39, %v11869_v19  ;;  %v8342_v44 = vrot.slane %v8332_v42, %v12729_v13  ;;  %v8349_v2 = vrot.slane %v8333_v52, %v12729_v13  ;;  %v7886_v40 = vrot.slane %v7877_v46, %v12729_v13 }
 0x290   : > { %v8003_v54 = vcombine.low %v15245_v23, %v15273_v55  ;;  %v8004_v8 = vcombine.high %v15245_v23, %v15273_v55  ;;  %v8005_v4 = vcombine.low %v7960_v36, %v15276_v30  ;;  %v8029_v22 = vcombine.low %v7606_v45, %v7666_v62 }
 0x291   : > { %v8030_v59 = vcombine.high %v7606_v45, %v7666_v62  ;;  %v8356_v32 = vrot.slane %v8334_v35, %v12729_v13  ;;  %v8363_v48 = vrot.slane %v8335_v24, %v12729_v13  ;;  %v8365_v61 = vcombine.high %v8342_v44, %v8349_v2 }
 0x292   : > { %v15292_v49 = vrot.slane %v8003_v54, %v12729_v13  ;;  %v8019_v46 = vrot.slane %v8005_v4, %v12729_v13  ;;  %v15296_v47 = vrot.slane %v8004_v8, %v12729_v13  ;;  %v15299_v21 = vrot.slane %v8029_v22, %v12729_v13 }
 0x293   : > { %v15302_v12 = vrot.slane %v8030_v59, %v12729_v13  ;;  %v8367_v11 = vcombine.high %v8356_v32, %v8363_v48  ;;  %v8381_v18 = vrot.slane %v8365_v61, %v12729_v13  ;;  %v8364_v58 = vcombine.low %v8342_v44, %v8349_v2 }
 0x294   : > { %v15307_v36 = vcombine.high %v15296_v47, %v15296_v47  ;;  %v8045_v63 = vcombine.low %v15273_v55, %v15299_v21  ;;  %v8046_v29 = vcombine.high %v15273_v55, %v15299_v21  ;;  %v8366_v3 = vcombine.low %v8356_v32, %v8363_v48 }
 0x295   : > { %v8047_v14 = vcombine.low %v15276_v30, %v15302_v12  ;;  %v8395_v60 = vrot.slane %v8367_v11, %v12729_v13  ;;  %v8374_v45 = vrot.slane %v8364_v58, %v12729_v13  ;;  %v7900_v28 = vrot.slane %v7878_v34, %v12729_v13 }
 0x296   : > { %v8141_v50 = vunpack.i.h.s16 %v15307_v36  ;;  %v8388_v25 = vrot.slane %v8366_v3, %v12729_v13  ;;  %v8103_v1 = vunpack.i.h.s16 %v7859_v9  ;;  %v8117_v37 = vunpack.i.h.s16 %v15229_v33 }
 0x297   : > { %v8398_v20 = vcombine.low %v8381_v18, %v8395_v60  ;;  %v8399_v38 = vcombine.high %v8381_v18, %v8395_v60  ;;  %v11872_v6 = vpack.i.b16 %v15229_v33, %v15209_v16  ;;  %v8401_v53 = vcombine.low %v7886_v40, %v7900_v28 }
 0x298   : > { %v15326_v43 = vpack.i.b16 %v8019_v46, %v8141_v50  ;;  %v8396_v7 = vcombine.low %v8374_v45, %v8388_v25  ;;  %v8397_v27 = vcombine.high %v8374_v45, %v8388_v25  ;;  %v11870_v41 = vpack.i.b16 %v15198_v17, %v8103_v1 }
 0x299   : > { %8884 = vmatprep.mubr.bf16.mxu0 %v8398_v20  ;;  %8964 = vmatprep.mubr.bf16.mxu1 %v8399_v38  ;;  %v11873_v57 = vpack.i.b16 %v15233_v10, %v8117_v37  ;;  %v11883_v34 = vcombine.high %v7886_v40, %v7900_v28  ;;  %v8417_v9 = vrot.slane %v8401_v53, %v12729_v13  ;;  %v8119_v39 = vunpack.i.h.s16 %v15233_v10 }
 0x29a   : > { %8885 = vmatmul.mubr.bf16.gmra.mxu0 %v8396_v7  ;;  %8965 = vmatmul.mubr.bf16.gmra.mxu1 %v8397_v27  ;;  %v8400_v16 = vcombine.low %v11870_v41, %v15212_v26  ;;  %v7943_v19 = vcombine.high %v15229_v33, %v15229_v33  ;;  %v7970_v17 = vrot.slane %v7961_v5, %v12729_v13  ;;  %v8135_v42 = vunpack.i.h.s16 %v15292_v49 }
 0x29b   : > { %v8403_v52 = vcombine.low %v11872_v6, %v11873_v57  ;;  %v8424_v55 = vrot.slane %v11883_v34, %v12729_v13  ;;  %v7984_v10 = vrot.slane %v7962_v56, %v12729_v13  ;;  %v11877_v26 = vpack.i.b16 %v15292_v49, %v15263_v15 }
 0x29c   : > { %v8410_v33 = vrot.slane %v8400_v16, %v12729_v13  ;;  %v7985_v62 = vcombine.high %v7970_v17, %v7970_v17  ;;  %v8121_v35 = vunpack.i.h.s16 %v7943_v19  ;;  %v11874_v24 = vpack.i.b16 %v7943_v19, %v8119_v39 }
 0x29d   : > { %v8431_v5 = vrot.slane %v8403_v52, %v12729_v13  ;;  %v7986_v44 = vcombine.high %v7984_v10, %v7984_v10  ;;  %v8469_v2 = vcombine.low %v15260_v31, %v7970_v17  ;;  %v8027_v40 = vcombine.high %v15292_v49, %v15292_v49 }
 0x29e   : > { %v8433_v54 = vcombine.high %v8410_v33, %v8417_v9  ;;  %v8432_v8 = vcombine.low %v8410_v33, %v8417_v9  ;;  %v11875_v51 = vpack.i.b16 %v15238_v0, %v8121_v35  ;;  %v8470_v23 = vcombine.low %v7984_v10, %v7985_v62 }
 0x29f   : > { %v8435_v56 = vcombine.high %v8424_v55, %v8431_v5  ;;  %v8434_v15 = vcombine.low %v8424_v55, %v8431_v5  ;;  %v8471_v4 = vcombine.low %v7986_v44, %v11877_v26  ;;  %v8485_v22 = vrot.slane %v8469_v2, %v12729_v13 }
 0x2a0   : > { %v8449_v59 = vrot.slane %v8433_v54, %v12729_v13  ;;  %v8442_v32 = vrot.slane %v8432_v8, %v12729_v13  ;;  %v8468_v48 = vcombine.low %v11874_v24, %v11875_v51  ;;  %v8492_v31 = vrot.slane %v8470_v23, %v12729_v13 }
 0x2a1   : > { %v8463_v61 = vrot.slane %v8435_v56, %v12729_v13  ;;  %v8456_v49 = vrot.slane %v8434_v15, %v12729_v13  ;;  %v8499_v46 = vrot.slane %v8471_v4, %v12729_v13  ;;  %v8054_v0 = vrot.slane %v8045_v63, %v12729_v13  ;;  %v15389_v4 = vld [vmem:[%s16199_s4] ss:$0 sm:$0xff] }
 0x2a2   : > { %v8478_v21 = vrot.slane %v8468_v48, %v12729_v13  ;;  %v8068_v11 = vrot.slane %v8046_v29, %v12729_v13  ;;  %v8137_v18 = vunpack.i.h.s16 %v15296_v47  ;;  %v8139_v58 = vunpack.i.h.s16 %v8027_v40 }
 0x2a3   : > { %v8466_v3 = vcombine.low %v8449_v59, %v8463_v61  ;;  %v8467_v60 = vcombine.high %v8449_v59, %v8463_v61  ;;  %v8464_v45 = vcombine.low %v8442_v32, %v8456_v49  ;;  %v8465_v28 = vcombine.high %v8442_v32, %v8456_v49 }
 0x2a4   : > { %v8501_v50 = vcombine.high %v8478_v21, %v8485_v22  ;;  %v8503_v25 = vcombine.high %v8492_v31, %v8499_v46  ;;  %v8500_v1 = vcombine.low %v8478_v21, %v8485_v22  ;;  %v8502_v37 = vcombine.low %v8492_v31, %v8499_v46 }
 0x2a5   : > { %8892 = vmatprep.mubr.bf16.mxu0 %v8466_v3  ;;  %8972 = vmatprep.mubr.bf16.mxu1 %v8467_v60  ;;  %v11878_v20 = vpack.i.b16 %v15296_v47, %v8135_v42  ;;  %v11879_v63 = vpack.i.b16 %v8027_v40, %v8137_v18  ;;  %v11880_v38 = vpack.i.b16 %v15307_v36, %v8139_v58 }
 0x2a6   : > { %8893 = vmatmul.mubr.bf16.gmra.mxu0 %v8464_v45  ;;  %8973 = vmatmul.mubr.bf16.gmra.mxu1 %v8465_v28  ;;  %v8517_v29 = vrot.slane %v8501_v50, %v12729_v13  ;;  %v8531_v6 = vrot.slane %v8503_v25, %v12729_v13  ;;  %v8510_v53 = vrot.slane %v8500_v1, %v12729_v13 }
 0x2a7   : > { %v8524_v7 = vrot.slane %v8502_v37, %v12729_v13  ;;  %v8536_v27 = vcombine.low %v11878_v20, %v11879_v63  ;;  %v8537_v41 = vcombine.low %v11880_v38, %v15326_v43  ;;  %v8538_v57 = vcombine.low %v8054_v0, %v8068_v11 }
 0x2a8   : > { %v8534_v34 = vcombine.low %v8517_v29, %v8531_v6  ;;  %v8535_v9 = vcombine.high %v8517_v29, %v8531_v6  ;;  %v11884_v47 = vcombine.high %v8054_v0, %v8068_v11  ;;  %v8061_v36 = vrot.slane %v8047_v14, %v12729_v13 }
 0x2a9   : > { %v8532_v39 = vcombine.low %v8510_v53, %v8524_v7  ;;  %v8533_v16 = vcombine.high %v8510_v53, %v8524_v7  ;;  %v8546_v19 = vrot.slane %v8536_v27, %v12729_v13  ;;  %v8553_v17 = vrot.slane %v8537_v41, %v12729_v13 }
 0x2aa   : > { %8900 = vmatprep.mubr.bf16.mxu0 %v8534_v34  ;;  %8980 = vmatprep.mubr.bf16.mxu1 %v8535_v9  ;;  %v8560_v42 = vrot.slane %v8538_v57, %v12729_v13  ;;  %v8567_v43 = vrot.slane %v11884_v47, %v12729_v13  ;;  %v8151_v52 = vunpack.i.l.s16 %v8061_v36 }
 0x2ab   : > { %v8569_v55 = vcombine.high %v8546_v19, %v8553_v17  ;;  %v8568_v10 = vcombine.low %v8546_v19, %v8553_v17 }
 0x2ac   : > { %v8571_v26 = vcombine.high %v8560_v42, %v8567_v43  ;;  %v8570_v33 = vcombine.low %v8560_v42, %v8567_v43  ;;  %v8610_v30 = vrot.slane %v8151_v52, %v12729_v13 }
 0x2ad   : > { %v8585_v12 = vrot.slane %v8569_v55, %v12729_v13  ;;  %v8578_v14 = vrot.slane %v8568_v10, %v12729_v13 }
 0x2ae   : > { %8901 = vmatmul.mubr.bf16.gmra.mxu0 %v8532_v39  ;;  %8981 = vmatmul.mubr.bf16.gmra.mxu1 %v8533_v16  ;;  %v8599_v62 = vrot.slane %v8571_v26, %v12729_v13  ;;  %v8592_v35 = vrot.slane %v8570_v33, %v12729_v13  ;;  %v8611_v24 = vcombine.high %v8610_v30, %v8610_v30 }
 0x2af   : > { %v8618_v51 = vrot.slane %v8610_v30, %v12729_v13 }
 0x2b0   : > { %v8602_v5 = vcombine.low %v8585_v12, %v8599_v62  ;;  %v8603_v44 = vcombine.high %v8585_v12, %v8599_v62  ;;  %v8600_v2 = vcombine.low %v8578_v14, %v8592_v35  ;;  %v8601_v40 = vcombine.high %v8578_v14, %v8592_v35 }
 0x2b1   : > { %v8625_v54 = vrot.slane %v8611_v24, %v12729_v13  ;;  %v8626_v23 = vcombine.high %v8618_v51, %v8618_v51 }
 0x2b2   : > { %8908 = vmatprep.mubr.bf16.mxu0 %v8602_v5  ;;  %8988 = vmatprep.mubr.bf16.mxu1 %v8603_v44 }
 0x2b3   : > { %v8627_v8 = vcombine.high %v8625_v54, %v8625_v54 }
 0x2b6   : > { %8909 = vmatmul.mubr.bf16.gmra.mxu0 %v8600_v2  ;;  %8989 = vmatmul.mubr.bf16.gmra.mxu1 %v8601_v40 }
 0x2b7   : > { %8916 = vmatprep.mubr.bf16.mxu0 %v8625_v54  ;;  %8996 = vmatprep.mubr.bf16.mxu1 %v8627_v8 }
 0x2be   : > { %8917 = vmatmul.mubr.bf16.gmra.mxu0 %v8618_v51  ;;  %8997 = vmatmul.mubr.bf16.gmra.mxu1 %v8626_v23 }
 0x347   : > { %v12285_v56 = vpop.f32.mrf.mxu0 }
 0x348   : > { %v12337_v15 = vpop.f32.mrf.mxu1 }
 0x349   : > { %v12286_v22 = vpop.f32.mrf.mxu0 }
 0x34a   : > { %v12287_v59 = vadd.f32 %v12286_v22, %v12285_v56  ;;  %v12338_v32 = vpop.f32.mrf.mxu1 }
 0x34b   : > { %v12288_v48 = vpop.f32.mrf.mxu0  ;;  %v12339_v46 = vadd.f32 %v12338_v32, %v12337_v15 }
 0x34c   : > { %v8879_v31 = vadd.f32 %v12287_v59, %v15389_v4  ;;  %v12340_v61 = vpop.f32.mrf.mxu1 }
 0x34d   : > { %v12289_v49 = vpop.f32.mrf.mxu0 }
 0x34e   : > { %v12290_v0 = vadd.f32 %v12289_v49, %v12288_v48  ;;  %v12341_v21 = vpop.f32.mrf.mxu1  ;;  %v8959_v11 = vadd.f32 %v12339_v46, %v8879_v31 }
 0x34f   : > { %v12342_v58 = vadd.f32 %v12341_v21, %v12340_v61 }
 0x350   : > { %v8882_v18 = vadd.f32 %v12290_v0, %v15389_v4  ;;  %v9004_v60 = vmax.f32 %v8959_v11, 0.0 }
 0x352   : > { %v8962_v3 = vadd.f32 %v12342_v58, %v8882_v18 }
 0x354   : > { %v9005_v45 = vmax.f32 %v8962_v3, 0.0 }
 0x356   : > { %v9015_v28 = vpack.c.bf16 %v9005_v45, %v9004_v60  ;;  %v11917_v50 = vpack.c.bf16 %v9005_v45, %v9005_v45 }
 0x358   : > { %v9034_v25 = vrot.slane %v9015_v28, %v12729_v13  ;;  %v9041_v1 = vrot.slane %v11917_v50, %v12729_v13 }
 0x35a   : > { %v9042_v37 = vcombine.high %v9034_v25, %v9034_v25  ;;  %v9043_v20 = vcombine.high %v9041_v1, %v9041_v1  ;;  %v15396_v63 = vrot.slane %v9034_v25, %v12729_v13  ;;  %v9057_v38 = vrot.slane %v9041_v1, %v12729_v13  ;;  %v12291_v29 = vpop.f32.mrf.mxu0  ;;  %v12343_v6 = vpop.f32.mrf.mxu1 }
 0x35c   : > { %v15400_v53 = vrot.slane %v9042_v37, %v12729_v13  ;;  %v15403_v7 = vrot.slane %v9043_v20, %v12729_v13  ;;  %v15407_v27 = vcombine.high %v15396_v63, %v15396_v63  ;;  %v15409_v41 = vcombine.high %v9057_v38, %v9057_v38  ;;  %v12292_v57 = vpop.f32.mrf.mxu0  ;;  %v12344_v34 = vpop.f32.mrf.mxu1 }
 0x35d   : > { %v9287_v9 = vunpack.i.h.s16 %v15396_v63  ;;  %v12293_v47 = vadd.f32 %v12292_v57, %v12291_v29  ;;  %v9295_v36 = vunpack.i.h.s16 %v9057_v38  ;;  %v12345_v35 = vadd.f32 %v12344_v34, %v12343_v6 }
 0x35e   : > { %v12294_v39 = vpop.f32.mrf.mxu0  ;;  %v12346_v16 = vpop.f32.mrf.mxu1  ;;  %v9074_v19 = vcombine.high %v15400_v53, %v15400_v53  ;;  %v9289_v17 = vunpack.i.h.s16 %v15400_v53  ;;  %v9291_v42 = vunpack.i.h.s16 %v15407_v27  ;;  %v15420_v55 = vcombine.high %v15403_v7, %v15403_v7 }
 0x35f   : > { %v8887_v43 = vadd.f32 %v12293_v47, %v15389_v4  ;;  %v11932_v52 = vpack.i.b16 %v15400_v53, %v9287_v9  ;;  %v9297_v10 = vunpack.i.h.s16 %v15403_v7  ;;  %v9299_v62 = vunpack.i.h.s16 %v15409_v41 }
 0x360   : > { %v12295_v26 = vpop.f32.mrf.mxu0  ;;  %v12347_v33 = vpop.f32.mrf.mxu1  ;;  %v9293_v30 = vunpack.i.h.s16 %v9074_v19  ;;  %v11933_v12 = vpack.i.b16 %v15407_v27, %v9289_v17  ;;  %v11934_v14 = vpack.i.b16 %v9074_v19, %v9291_v42  ;;  %v9301_v5 = vunpack.i.h.s16 %v15420_v55 }
 0x361   : > { %v12296_v24 = vadd.f32 %v12295_v26, %v12294_v39  ;;  %v11922_v40 = vpack.i.b16 %v15403_v7, %v9295_v36  ;;  %v15428_v54 = vpack.i.b16 %v15409_v41, %v9297_v10  ;;  %v8967_v8 = vadd.f32 %v12345_v35, %v8887_v43  ;;  %v12569_v10 = vld [vmem:[%s16200_s5 + $0xf8] sm:$0xff]  }
 0x362   : > { %v9591_v44 = vcombine.low %v11932_v52, %v11933_v12  ;;  %v9592_v2 = vcombine.low %v11934_v14, %v9293_v30  ;;  %v12348_v23 = vadd.f32 %v12347_v33, %v12346_v16  ;;  %v15432_v56 = vpack.i.b16 %v15420_v55, %v9299_v62  ;;  %v12568_v52 = vld [vmem:[%s16200_s5 + $0x78] sm:$0xff]   ;;  %12413 = vmatprep.subr.bf16.mxu1 %v12569_v10 }
 0x363   : > { %v8890_v51 = vadd.f32 %v12296_v24, %v15389_v4  ;;  %v9419_v59 = vcombine.low %v11922_v40, %v15428_v54  ;;  %v9395_v32 = vcombine.low %v15396_v63, %v15400_v53  ;;  %v9294_v61 = vunpack.i.l.s16 %v9057_v38  ;;  %v12570_v26 = vld [vmem:[%s16200_s5 + $0x38] sm:$0xff]   ;;  %12373 = vmatprep.subr.bf16.mxu0 %v12568_v52 }
 0x364   : > { %v9599_v15 = vrot.slane %v9591_v44, %v12729_v13  ;;  %v9606_v22 = vrot.slane %v9592_v2, %v12729_v13  ;;  %v9420_v31 = vcombine.low %v15432_v56, %v9301_v5  ;;  %v9292_v11 = vunpack.i.l.s16 %v9074_v19  ;;  %v12571_v14 = vld [vmem:[%s16200_s5 + $0xb8] sm:$0xff]   ;;  %12374 = vmatpush3.bf16.msra.mxu0 %v12570_v26 }
 0x365   : > { %v8970_v48 = vadd.f32 %v12348_v23, %v8890_v51  ;;  %v9427_v21 = vrot.slane %v9419_v59, %v12729_v13  ;;  %v9006_v18 = vmax.f32 %v8967_v8, 0.0  ;;  %v9787_v60 = vcombine.low %v15400_v53, %v15407_v27  ;;  %12414 = vmatpush3.bf16.msra.mxu1 %v12571_v14 }
 0x366   : > { %v12297_v49 = vpop.f32.mrf.mxu0  ;;  %v12349_v46 = vpop.f32.mrf.mxu1  ;;  %v9607_v0 = vcombine.low %v9599_v15, %v9606_v22  ;;  %v9434_v3 = vrot.slane %v9420_v31, %v12729_v13  ;;  %v9615_v25 = vcombine.low %v15403_v7, %v15409_v41  ;;  %v9396_v1 = vcombine.low %v15407_v27, %v9292_v11 }
 0x367   : > { %v9007_v58 = vmax.f32 %v8970_v48, 0.0  ;;  %v9788_v37 = vcombine.low %v9074_v19, %v9294_v61  ;;  %v9403_v29 = vrot.slane %v9395_v32, %v12729_v13  ;;  %v9795_v9 = vrot.slane %v9787_v60, %v12729_v13  ;;  %v12572_v48 = vld [vmem:[%s16200_s5 + $0x70] sm:$0xff]  }
 0x368   : > { %v12298_v45 = vpop.f32.mrf.mxu0  ;;  %v12350_v28 = vpop.f32.mrf.mxu1  ;;  %v9614_v50 = vrot.slane %v9607_v0, %v12729_v13  ;;  %v9435_v53 = vcombine.low %v9427_v21, %v9434_v3  ;;  %v9410_v34 = vrot.slane %v9396_v1, %v12729_v13  ;;  %v9811_v36 = vcombine.low %v15428_v54, %v15432_v56  ;;  %12375 = vmatprep.subr.bf16.mxu0 %v12572_v48 }
 0x369   : > { %v9016_v20 = vpack.c.bf16 %v9007_v58, %v9006_v18  ;;  %v11918_v63 = vpack.c.bf16 %v9007_v58, %v9007_v58  ;;  %v12299_v38 = vadd.f32 %v12298_v45, %v12297_v49  ;;  %v9802_v47 = vrot.slane %v9788_v37, %v12729_v13 }
 0x36a   : > { %v12300_v6 = vpop.f32.mrf.mxu0  ;;  %v12352_v57 = vpop.f32.mrf.mxu1  ;;  %9759 = vrot.lane.b32.xlu0 %v9614_v50, %s12630_s19  ;;  %v12351_v39 = vadd.f32 %v12350_v28, %v12349_v46  ;;  %v15461_v17 = vrot.slane %v9435_v53, %v12729_v13  ;;  %v15463_v42 = vcombine.low %v9403_v29, %v9410_v34  ;;  %v9623_v2 = vrot.slane %v9615_v25, %v12729_v13 }
 0x36b   : > { %v9083_v7 = vrot.slane %v9016_v20, %v12729_v13  ;;  %v9090_v27 = vrot.slane %v11918_v63, %v12729_v13  ;;  %v8895_v41 = vadd.f32 %v12299_v38, %v15389_v4  ;;  %v15465_v43 = vcombine.low %v9795_v9, %v9802_v47 }
 0x36c   : > { %v12301_v16 = vpop.f32.mrf.mxu0  ;;  %v12353_v19 = vpop.f32.mrf.mxu1  ;;  %v9819_v59 = vrot.slane %v9811_v36, %v12729_v13 }
 0x36d   : > { %v9091_v33 = vcombine.high %v9083_v7, %v9083_v7  ;;  %v9092_v30 = vcombine.high %v9090_v27, %v9090_v27  ;;  %v9099_v12 = vrot.slane %v9083_v7, %v12729_v13  ;;  %v8975_v62 = vadd.f32 %v12351_v39, %v8895_v41 }
 0x36e   : > { %v12302_v35 = vadd.f32 %v12301_v16, %v12300_v6  ;;  %v12303_v24 = vpop.f32.mrf.mxu0  ;;  %v12355_v44 = vpop.f32.mrf.mxu1  ;;  %9983 = vrot.lane.b32.xlu0 %v15461_v17, %s12630_s19  ;;  %v12354_v56 = vadd.f32 %v12353_v19, %v12352_v57  ;;  %v15500_v31 = vrot.slane %v9090_v27, %v12729_v13 }
 0x36f   : > { %v15484_v40 = vrot.slane %v9091_v33, %v12729_v13  ;;  %v15487_v54 = vrot.slane %v9092_v30, %v12729_v13  ;;  %v9303_v8 = vunpack.i.h.s16 %v9099_v12  ;;  %v11945_v51 = vpack.i.b16 %v9099_v12, %v9301_v5  ;;  %v12573_v5 = vld [vmem:[%s16200_s5 + $0xf0] sm:$0xff]  }
 0x370   : > { %v8898_v23 = vadd.f32 %v12302_v35, %v15389_v4  ;;  %v12304_v15 = vpop.f32.mrf.mxu0  ;;  %v12356_v22 = vpop.f32.mrf.mxu1  ;;  %v9302_v32 = vunpack.i.l.s16 %v9099_v12  ;;  %v9008_v0 = vmax.f32 %v8975_v62, 0.0  ;;  %v15507_v28 = vcombine.high %v9099_v12, %v9099_v12  ;;  %12415 = vmatprep.subr.bf16.mxu1 %v12573_v5 }
 0x371   : > { %v12305_v61 = vadd.f32 %v12304_v15, %v12303_v24  ;;  %v9812_v49 = vcombine.low %v11945_v51, %v9303_v8  ;;  %v9312_v46 = vunpack.i.l.s16 %v15487_v54  ;;  %v11948_v3 = vcombine.high %v9099_v12, %v15484_v40 }
 0x372   : > { %v8978_v21 = vadd.f32 %v12354_v56, %v8898_v23  ;;  %v12306_v11 = vpop.f32.mrf.mxu0  ;;  %v12358_v18 = vpop.f32.mrf.mxu1  ;;  %v9616_v58 = vcombine.low %v15420_v55, %v9302_v32  ;;  %v15511_v50 = vcombine.high %v15484_v40, %v15484_v40  ;;  %v12357_v37 = vadd.f32 %v12356_v22, %v12355_v44 }
 0x373   : > { %v9826_v60 = vrot.slane %v9812_v49, %v12729_v13  ;;  %v9836_v45 = vcombine.low %v15500_v31, %v9312_v46  ;;  %v8903_v1 = vadd.f32 %v12305_v61, %v15389_v4  ;;  %v9843_v6 = vrot.slane %v11948_v3, %v12729_v13 }
 0x374   : > { %v9009_v25 = vmax.f32 %v8978_v21, 0.0  ;;  %v12307_v20 = vpop.f32.mrf.mxu0  ;;  %v12359_v55 = vpop.f32.mrf.mxu1  ;;  %v9630_v63 = vrot.slane %v9616_v58, %v12729_v13  ;;  %v9310_v57 = vunpack.i.l.s16 %v15500_v31  ;;  %v9443_v33 = vcombine.low %v15484_v40, %v15507_v28 }
 0x375   : > { %v12308_v38 = vadd.f32 %v12307_v20, %v12306_v11  ;;  %v9827_v29 = vcombine.low %v9819_v59, %v9826_v60  ;;  %v9850_v27 = vrot.slane %v9836_v45, %v12729_v13  ;;  %v12360_v36 = vadd.f32 %v12359_v55, %v12358_v18 }
 0x376   : > { %v9017_v53 = vpack.c.bf16 %v9009_v25, %v9008_v0  ;;  %v11919_v34 = vpack.c.bf16 %v9009_v25, %v9009_v25  ;;  %v12309_v9 = vpop.f32.mrf.mxu0  ;;  %v12361_v47 = vpop.f32.mrf.mxu1  ;;  %v9631_v7 = vcombine.low %v9623_v2, %v9630_v63  ;;  %v9444_v16 = vcombine.low %v15511_v50, %v9310_v57 }
 0x377   : > { %v8906_v41 = vadd.f32 %v12308_v38, %v15389_v4  ;;  %v15520_v39 = vrot.slane %v9827_v29, %v12729_v13  ;;  %v9851_v26 = vcombine.low %v9843_v6, %v9850_v27  ;;  %v8983_v14 = vadd.f32 %v12357_v37, %v8903_v1 }
 0x378   : > { %v12310_v19 = vpop.f32.mrf.mxu0  ;;  %v12362_v52 = vpop.f32.mrf.mxu1  ;;  %v15524_v10 = vrot.slane %v9631_v7, %v12729_v13  ;;  %v9132_v30 = vrot.slane %v9017_v53, %v12729_v13  ;;  %v9139_v12 = vrot.slane %v11919_v34, %v12729_v13  ;;  %v9458_v8 = vrot.slane %v9444_v16, %v12729_v13 }
 0x379   : > { %v8986_v62 = vadd.f32 %v12360_v36, %v8906_v41  ;;  %10051 = vrot.lane.b32.xlu1 %v15520_v39, %s12630_s19  ;;  %v12311_v44 = vadd.f32 %v12310_v19, %v12309_v9  ;;  %v15535_v2 = vrot.slane %v9851_v26, %v12729_v13  ;;  %v9451_v15 = vrot.slane %v9443_v33, %v12729_v13 }
 0x37a   : > { %9761 = vrot.lane.b32.xlu0 %v15524_v10, %s12630_s19  ;;  %v12312_v35 = vpop.f32.mrf.mxu0  ;;  %v12364_v24 = vpop.f32.mrf.mxu1  ;;  %v9140_v22 = vcombine.high %v9132_v30, %v9132_v30  ;;  %v9141_v59 = vcombine.high %v9139_v12, %v9139_v12  ;;  %v9010_v32 = vmax.f32 %v8983_v14, 0.0  ;;  %v9305_v61 = vunpack.i.h.s16 %v15484_v40 }
 0x37b   : > { %v9011_v51 = vmax.f32 %v8986_v62, 0.0  ;;  %v9459_v5 = vcombine.low %v9451_v15, %v9458_v8  ;;  %v9307_v49 = vunpack.i.h.s16 %v15507_v28  ;;  %v8911_v21 = vadd.f32 %v12311_v44, %v15389_v4 }
 0x37c   : > { %v12313_v23 = vpop.f32.mrf.mxu0  ;;  %v12365_v56 = vpop.f32.mrf.mxu1  ;;  %v12363_v11 = vadd.f32 %v12362_v52, %v12361_v47  ;;  %v9309_v18 = vunpack.i.h.s16 %v15511_v50  ;;  %v15550_v40 = vrot.slane %v9132_v30, %v12729_v13  ;;  %v15553_v37 = vrot.slane %v9139_v12, %v12729_v13 }
 0x37d   : > { %10053 = vrot.lane.b32.xlu1 %v15535_v2, %s12630_s19  ;;  %v12314_v48 = vadd.f32 %v12313_v23, %v12312_v35  ;;  %v9018_v58 = vpack.c.bf16 %v9011_v51, %v9010_v32  ;;  %v12366_v60 = vadd.f32 %v12365_v56, %v12364_v24  ;;  %v15547_v45 = vrot.slane %v9459_v5, %v12729_v13  ;;  %v12575_v5 = vld [vmem:[%s16200_s5 + $0xb0] sm:$0xff]  }
 0x37e   : > { %v12315_v46 = vpop.f32.mrf.mxu0  ;;  %v12367_v0 = vpop.f32.mrf.mxu1  ;;  %v15556_v20 = vrot.slane %v9140_v22, %v12729_v13  ;;  %v15559_v55 = vrot.slane %v9141_v59, %v12729_v13  ;;  %v11920_v63 = vpack.c.bf16 %v9011_v51, %v9011_v51  ;;  %v11935_v29 = vpack.i.b16 %v15507_v28, %v9305_v61  ;;  %v12576_v61 = vld [vmem:[%s16200_s5 + $0x68] sm:$0xff]   ;;  %12416 = vmatpush3.bf16.msra.mxu1 %v12575_v5 }
 0x37f   : > { %v8914_v3 = vadd.f32 %v12314_v48, %v15389_v4  ;;  %9985 = vrot.lane.b32.xlu0 %v15547_v45, %s12630_s19  ;;  %v11936_v6 = vpack.i.b16 %v15511_v50, %v9307_v49  ;;  %v8991_v34 = vadd.f32 %v12363_v11, %v8911_v21  ;;  %v9311_v9 = vunpack.i.h.s16 %v15500_v31  ;;  %v12574_v48 = vld [vmem:[%s16200_s5 + $0x30] sm:$0xff]   ;;  %v12577_v11 = vld [vmem:[%s16200_s5 + $0xe8] sm:$0xff]  }
 0x380   : > { %v12316_v25 = vpop.f32.mrf.mxu0  ;;  %v12368_v1 = vpop.f32.mrf.mxu1  ;;  %v11937_v47 = vpack.i.b16 %v15500_v31, %v9309_v18  ;;  %v15568_v27 = vrot.slane %v9018_v58, %v12729_v13  ;;  %v9122_v50 = vcombine.high %v15500_v31, %v15500_v31  ;;  %v9124_v33 = vcombine.high %v15487_v54, %v15487_v54  ;;  %12376 = vmatpush3.bf16.msra.mxu0 %v12574_v48 }
 0x381   : > { %v8994_v38 = vadd.f32 %v12366_v60, %v8914_v3  ;;  %v12317_v7 = vadd.f32 %v12316_v25, %v12315_v46  ;;  %v9639_v36 = vcombine.low %v11935_v29, %v11936_v6  ;;  %v12369_v16 = vadd.f32 %v12368_v1, %v12367_v0  ;;  %v12578_v25 = vld [vmem:[%s16200_s5 + $0x28] sm:$0xff]   ;;  %12377 = vmatprep.subr.bf16.mxu0 %v12576_v61 }
 0x382   : > { %v12318_v57 = vpop.f32.mrf.mxu0  ;;  %v12370_v53 = vpop.f32.mrf.mxu1  ;;  %v9640_v26 = vcombine.low %v11937_v47, %v9311_v9  ;;  %v15576_v30 = vrot.slane %v11920_v63, %v12729_v13  ;;  %v9313_v62 = vunpack.i.h.s16 %v15487_v54  ;;  %v9315_v44 = vunpack.i.h.s16 %v9122_v50  ;;  %v12579_v29 = vld [vmem:[%s16200_s5 + $0xa8] sm:$0xff]   ;;  %12417 = vmatprep.subr.bf16.mxu1 %v12577_v11 }
 0x383   : > { %v9013_v41 = vmax.f32 %v8994_v38, 0.0  ;;  %v8919_v28 = vadd.f32 %v12317_v7, %v15389_v4  ;;  %v9647_v14 = vrot.slane %v9639_v36, %v12729_v13  ;;  %v9317_v8 = vunpack.i.h.s16 %v9124_v33  ;;  %12418 = vmatpush3.bf16.msra.mxu1 %v12579_v29 }
 0x384   : > { %v12319_v19 = vpop.f32.mrf.mxu0  ;;  %v12371_v52 = vpop.f32.mrf.mxu1  ;;  %v9654_v35 = vrot.slane %v9640_v26, %v12729_v13  ;;  %v9012_v4 = vmax.f32 %v8991_v34, 0.0  ;;  %v9319_v23 = vunpack.i.h.s16 %v15550_v40  ;;  %v11925_v56 = vpack.i.b16 %v9122_v50, %v9313_v62  ;;  %12378 = vmatpush3.bf16.msra.mxu0 %v12578_v25 }
 0x385   : > { %v11921_v12 = vpack.c.bf16 %v9013_v41, %v9013_v41  ;;  %v8999_v24 = vadd.f32 %v12369_v16, %v8919_v28  ;;  %v11926_v59 = vpack.i.b16 %v9124_v33, %v9315_v44  ;;  %v11927_v32 = vpack.i.b16 %v15550_v40, %v9317_v8 }
 0x386   : > { %v9655_v15 = vcombine.low %v9647_v14, %v9654_v35  ;;  %v9189_v49 = vcombine.high %v15568_v27, %v15568_v27  ;;  %v15597_v46 = vrot.slane %v15568_v27, %v12729_v13  ;;  %v15611_v1 = vpack.c.bf16 %v9013_v41, %v9012_v4 }
 0x387   : > { %v9237_v51 = vrot.slane %v11921_v12, %v12729_v13  ;;  %v9014_v22 = vmax.f32 %v8999_v24, 0.0  ;;  %v9467_v3 = vcombine.low %v11925_v56, %v11926_v59  ;;  %v9468_v60 = vcombine.low %v11927_v32, %v9319_v23 }
 0x388   : > { %v15606_v18 = vrot.slane %v9655_v15, %v12729_v13  ;;  %v9321_v34 = vunpack.i.h.s16 %v15556_v20  ;;  %v11946_v7 = vpack.i.b16 %v15556_v20, %v9319_v23  ;;  %v9859_v41 = vcombine.low %v11926_v59, %v11927_v32 }
 0x389   : > { %v9239_v0 = vcombine.high %v9237_v51, %v9237_v51  ;;  %v15600_v21 = vrot.slane %v9237_v51, %v12729_v13  ;;  %v9020_v58 = vpack.c.bf16 %v9014_v22, %v9014_v22  ;;  %v9475_v57 = vrot.slane %v9467_v3, %v12729_v13 }
 0x38a   : > { %9763 = vrot.lane.b32.xlu1 %v15606_v18, %s12630_s19  ;;  %v9482_v53 = vrot.slane %v9468_v60, %v12729_v13  ;;  %v9320_v19 = vunpack.i.l.s16 %v15556_v20  ;;  %v11944_v52 = vcombine.high %v15500_v31, %v15487_v54  ;;  %v9860_v28 = vcombine.low %v11946_v7, %v9321_v34 }
 0x38b   : > { %v15614_v63 = vrot.slane %v9239_v0, %v12729_v13  ;;  %v15618_v38 = vcombine.high %v15600_v21, %v15600_v21  ;;  %v9278_v6 = vrot.slane %v9020_v58, %v12729_v13  ;;  %v9867_v50 = vrot.slane %v9859_v41, %v12729_v13 }
 0x38c   : > { %v9483_v16 = vcombine.low %v9475_v57, %v9482_v53  ;;  %v9328_v33 = vunpack.i.l.s16 %v15559_v55  ;;  %v9664_v62 = vcombine.low %v15550_v40, %v9320_v19  ;;  %v9671_v35 = vrot.slane %v11944_v52, %v12729_v13 }
 0x38d   : > { %v15631_v9 = vcombine.high %v15614_v63, %v15614_v63  ;;  %v10127_v47 = vcombine.low %v15614_v63, %v15618_v38  ;;  %v9285_v36 = vrot.slane %v9278_v6, %v12729_v13  ;;  %v9874_v24 = vrot.slane %v9860_v28, %v12729_v13 }
 0x38e   : > { %v15644_v14 = vrot.slane %v9483_v16, %v12729_v13  ;;  %v11931_v54 = vcombine.high %v15550_v40, %v15556_v20  ;;  %v9492_v31 = vcombine.low %v15553_v37, %v9328_v33  ;;  %v15654_v44 = vcombine.high %v15553_v37, %v15553_v37  ;;  %v12583_v33 = vld [vmem:[%s16200_s5 + $0xa0] sm:$0xff]  }
 0x38f   : > { %v10135_v26 = vrot.slane %v10127_v47, %v12729_v13  ;;  %v9366_v12 = vunpack.i.l.s16 %v9285_v36  ;;  %v9678_v4 = vrot.slane %v9664_v62, %v12729_v13  ;;  %v9172_v51 = vcombine.high %v15556_v20, %v15556_v20 }
 0x390   : > { %9987 = vrot.lane.b32.xlu1 %v15644_v14, %s12630_s19  ;;  %v9170_v23 = vcombine.high %v15550_v40, %v15550_v40  ;;  %v9875_v56 = vcombine.low %v9867_v50, %v9874_v24  ;;  %v9499_v15 = vrot.slane %v11931_v54, %v12729_v13  ;;  %v9506_v22 = vrot.slane %v9492_v31, %v12729_v13 }
 0x391   : > { %v10128_v8 = vcombine.low %v15631_v9, %v9366_v12  ;;  %v9330_v59 = vunpack.i.l.s16 %v15654_v44  ;;  %v9679_v48 = vcombine.low %v9671_v35, %v9678_v4  ;;  %v9883_v5 = vcombine.low %v9172_v51, %v15553_v37 }
 0x392   : > { %v9323_v61 = vunpack.i.h.s16 %v9170_v23  ;;  %v15670_v0 = vrot.slane %v9875_v56, %v12729_v13  ;;  %v9507_v20 = vcombine.low %v9499_v15, %v9506_v22  ;;  %v9325_v40 = vunpack.i.h.s16 %v9172_v51 }
 0x393   : > { %v10142_v32 = vrot.slane %v10128_v8, %v12729_v13  ;;  %v9884_v11 = vcombine.low %v15559_v55, %v9330_v59  ;;  %v15676_v3 = vrot.slane %v9679_v48, %v12729_v13  ;;  %v9891_v60 = vrot.slane %v9883_v5, %v12729_v13 }
 0x394   : > { %v9327_v25 = vunpack.i.h.s16 %v15553_v37  ;;  %v9190_v29 = vcombine.high %v15576_v30, %v15576_v30  ;;  %10055 = vrot.lane.b32.xlu0 %v15670_v0, %s12630_s19  ;;  %v9329_v57 = vunpack.i.h.s16 %v15559_v55  ;;  %v9211_v53 = vrot.slane %v9189_v49, %v12729_v13 }
 0x395   : > { %v15673_v58 = vcombine.low %v10135_v26, %v10142_v32  ;;  %v9898_v6 = vrot.slane %v9884_v11, %v12729_v13  ;;  %9765 = vrot.lane.b32.xlu1 %v15676_v3, %s12630_s19  ;;  %v11938_v34 = vpack.i.b16 %v9172_v51, %v9323_v61  ;;  %v11939_v47 = vpack.i.b16 %v15553_v37, %v9325_v40  ;;  %v12580_v37 = vld [vmem:[%s16200_s5 + $0x60] sm:$0xff]  }
 0x396   : > { %v11940_v7 = vpack.i.b16 %v15559_v55, %v9327_v25  ;;  %v9230_v41 = vrot.slane %v15611_v1, %v12729_v13  ;;  %v15697_v36 = vrot.slane %v9507_v20, %v12729_v13  ;;  %v9173_v19 = vcombine.high %v15559_v55, %v15559_v55  ;;  %v12581_v1 = vld [vmem:[%s16200_s5 + $0xe0] sm:$0xff]   ;;  %12379 = vmatprep.subr.bf16.mxu0 %v12580_v37 }
 0x397   : > { %v9899_v16 = vcombine.low %v9891_v60, %v9898_v6  ;;  %v9687_v27 = vcombine.low %v11938_v34, %v11939_v47  ;;  %v9219_v52 = vcombine.high %v15597_v46, %v15597_v46  ;;  %v12582_v26 = vld [vmem:[%s16200_s5 + $0x20] sm:$0xff]   ;;  %v9335_v24 = vunpack.i.h.s16 %v15597_v46  ;;  %12419 = vmatprep.subr.bf16.mxu1 %v12581_v1 }
 0x398   : > { %v9688_v49 = vcombine.low %v11940_v7, %v9329_v57  ;;  %9989 = vrot.lane.b32.xlu0 %v15697_v36, %s12630_s19  ;;  %v9711_v28 = vcombine.low %v9173_v19, %v15597_v46  ;;  %v9333_v50 = vunpack.i.h.s16 %v9173_v19  ;;  %v9204_v54 = vrot.slane %v15576_v30, %v12729_v13  ;;  %12380 = vmatpush3.bf16.msra.mxu0 %v12582_v26 }
 0x399   : > { %v15715_v55 = vrot.slane %v9899_v16, %v12729_v13  ;;  %v9695_v12 = vrot.slane %v9687_v27, %v12729_v13  ;;  %v9338_v35 = vunpack.i.l.s16 %v9219_v52  ;;  %v9218_v31 = vrot.slane %v9190_v29, %v12729_v13  ;;  %12420 = vmatpush3.bf16.msra.mxu1 %v12583_v33  ;;  %v12585_v16 = vld [vmem:[%s16200_s5 + $0xd8] sm:$0xff]  }
 0x39a   : > { %v9702_v62 = vrot.slane %v9688_v49, %v12729_v13  ;;  %v9238_v8 = vcombine.high %v9230_v41, %v9230_v41  ;;  %v9337_v4 = vunpack.i.h.s16 %v9211_v53  ;;  %v11929_v56 = vpack.i.b16 %v15597_v46, %v9333_v50  ;;  %12421 = vmatprep.subr.bf16.mxu1 %v12585_v16 }
 0x39b   : > { %10057 = vrot.lane.b32.xlu1 %v15715_v55, %s12630_s19  ;;  %v9712_v23 = vcombine.low %v9211_v53, %v9338_v35  ;;  %v11930_v15 = vpack.i.b16 %v9211_v53, %v9335_v24  ;;  %v9719_v22 = vrot.slane %v9711_v28, %v12729_v13  ;;  %v9339_v59 = vunpack.i.h.s16 %v9219_v52 }
 0x39c   : > { %v9703_v51 = vcombine.low %v9695_v12, %v9702_v62  ;;  %v11947_v32 = vpack.i.b16 %v9219_v52, %v9337_v4  ;;  %v9331_v30 = vunpack.i.h.s16 %v15654_v44  ;;  %v15737_v11 = vrot.slane %v9230_v41, %v12729_v13  ;;  %v12584_v41 = vld [vmem:[%s16200_s5 + $0x58] sm:$0xff]  }
 0x39d   : > { %v9726_v5 = vrot.slane %v9712_v23, %v12729_v13  ;;  %v9907_v61 = vcombine.low %v11929_v56, %v11930_v15  ;;  %v9516_v20 = vcombine.low %v11930_v15, %v9337_v4  ;;  %v9220_v60 = vcombine.high %v9204_v54, %v9204_v54  ;;  %12381 = vmatprep.subr.bf16.mxu0 %v12584_v41 }
 0x39e   : > { %v15733_v48 = vrot.slane %v9703_v51, %v12729_v13  ;;  %v9908_v40 = vcombine.low %v11947_v32, %v9339_v59  ;;  %v11928_v46 = vpack.i.b16 %v9173_v19, %v9331_v30  ;;  %v15743_v6 = vcombine.high %v9218_v31, %v9218_v31 }
 0x39f   : > { %v9727_v25 = vcombine.low %v9719_v22, %v9726_v5  ;;  %v9915_v29 = vrot.slane %v9907_v61, %v12729_v13  ;;  %v9530_v44 = vrot.slane %v9516_v20, %v12729_v13  ;;  %v9931_v47 = vcombine.low %v9204_v54, %v9218_v31 }
 0x3a0   : > { %9767 = vrot.lane.b32.xlu0 %v15733_v48, %s12630_s19  ;;  %v9922_v57 = vrot.slane %v9908_v40, %v12729_v13  ;;  %v9515_v34 = vcombine.low %v11928_v46, %v11929_v56  ;;  %v9221_v7 = vcombine.high %v9211_v53, %v9211_v53  ;;  %v9348_v27 = vunpack.i.l.s16 %v15743_v6 }
 0x3a1   : > { %v15753_v19 = vrot.slane %v9727_v25, %v12729_v13  ;;  %v9346_v49 = vunpack.i.l.s16 %v9220_v60  ;;  %v9343_v52 = vunpack.i.h.s16 %v9204_v54  ;;  %v9260_v37 = vrot.slane %v9238_v8, %v12729_v13 }
 0x3a2   : > { %v9923_v1 = vcombine.low %v9915_v29, %v9922_v57  ;;  %v9523_v53 = vrot.slane %v9515_v34, %v12729_v13  ;;  %v9539_v26 = vcombine.low %v9221_v7, %v9204_v54  ;;  %v9932_v28 = vcombine.low %v9220_v60, %v9348_v27  ;;  %v12587_v29 = vld [vmem:[%s16200_s5 + $0x98] sm:$0xff]  }
 0x3a3   : > { %9769 = vrot.lane.b32.xlu1 %v15753_v19, %s12630_s19  ;;  %v9540_v50 = vcombine.low %v9218_v31, %v9346_v49  ;;  %v9341_v33 = vunpack.i.h.s16 %v9221_v7  ;;  %v9345_v12 = vunpack.i.h.s16 %v9218_v31  ;;  %v9939_v24 = vrot.slane %v9931_v47, %v12729_v13  ;;  %v12589_v47 = vld [vmem:[%s16200_s5 + $0xd0] sm:$0xff]   ;;  %12422 = vmatpush3.bf16.msra.mxu1 %v12587_v29 }
 0x3a4   : > { %v15761_v62 = vrot.slane %v9923_v1, %v12729_v13  ;;  %v9531_v35 = vcombine.low %v9523_v53, %v9530_v44  ;;  %v9547_v8 = vrot.slane %v9539_v26, %v12729_v13  ;;  %v9946_v4 = vrot.slane %v9932_v28, %v12729_v13  ;;  %v12588_v44 = vld [vmem:[%s16200_s5 + $0x50] sm:$0xff]   ;;  %12423 = vmatprep.subr.bf16.mxu1 %v12589_v47 }
 0x3a5   : > { %v9554_v51 = vrot.slane %v9540_v50, %v12729_v13  ;;  %v11941_v23 = vpack.i.b16 %v9204_v54, %v9341_v33  ;;  %v11942_v56 = vpack.i.b16 %v9218_v31, %v9343_v52  ;;  %v9347_v22 = vunpack.i.h.s16 %v9220_v60  ;;  %v12590_v49 = vld [vmem:[%s16200_s5 + $0x10] sm:$0xff]  }
 0x3a6   : > { %10059 = vrot.lane.b32.xlu0 %v15761_v62, %s12630_s19  ;;  %v15770_v15 = vrot.slane %v9531_v35, %v12729_v13  ;;  %v11943_v59 = vpack.i.b16 %v9220_v60, %v9345_v12  ;;  %v9947_v32 = vcombine.low %v9939_v24, %v9946_v4  ;;  %v9270_v61 = vcombine.high %v9260_v37, %v9260_v37  ;;  %v12586_v60 = vld [vmem:[%s16200_s5 + $0x18] sm:$0xff]   ;;  %v12592_v35 = vld [vmem:[%s16200_s5 + $0x48] sm:$0xff]  }
 0x3a7   : > { %v9555_v30 = vcombine.low %v9547_v8, %v9554_v51  ;;  %v9735_v5 = vcombine.low %v11941_v23, %v11942_v56  ;;  %v9268_v54 = vcombine.high %v15737_v11, %v15737_v11  ;;  %v10001_v25 = vcombine.low %v15737_v11, %v9260_v37  ;;  %12382 = vmatpush3.bf16.msra.mxu0 %v12586_v60  ;;  %v12593_v23 = vld [vmem:[%s16200_s5 + $0xc8] sm:$0xff]  }
 0x3a8   : > { %9991 = vrot.lane.b32.xlu1 %v15770_v15, %s12630_s19  ;;  %v9736_v20 = vcombine.low %v11943_v59, %v9347_v22  ;;  %v15777_v31 = vrot.slane %v9947_v32, %v12729_v13  ;;  %v9356_v46 = vunpack.i.l.s16 %v9270_v61  ;;  %v9349_v41 = vunpack.i.h.s16 %v15743_v6  ;;  %v12591_v6 = vld [vmem:[%s16200_s5 + $0x90] sm:$0xff]   ;;  %12383 = vmatprep.subr.bf16.mxu0 %v12588_v44  ;;  %v12594_v22 = vld [vmem:[%s16200_s5 + $0x8] sm:$0xff]  }
 0x3a9   : > { %v9743_v40 = vrot.slane %v9735_v5, %v12729_v13  ;;  %v15791_v57 = vrot.slane %v9555_v30, %v12729_v13  ;;  %v9351_v16 = vunpack.i.h.s16 %v15737_v11  ;;  %v9353_v27 = vunpack.i.h.s16 %v9260_v37  ;;  %12424 = vmatpush3.bf16.msra.mxu1 %v12591_v6  ;;  %v12595_v5 = vld [vmem:[%s16200_s5 + $0x88] sm:$0xff]  }
 0x3aa   : > { %v9750_v34 = vrot.slane %v9736_v20, %v12729_v13  ;;  %10061 = vrot.lane.b32.xlu0 %v15777_v31, %s12630_s19  ;;  %v10002_v7 = vcombine.low %v9268_v54, %v9356_v46  ;;  %v9359_v52 = vunpack.i.h.s16 %v15600_v21  ;;  %v9355_v53 = vunpack.i.h.s16 %v9268_v54  ;;  %12425 = vmatprep.subr.bf16.mxu1 %v12593_v23 }
 0x3ab   : > { %v9357_v26 = vunpack.i.h.s16 %v9270_v61  ;;  %v10009_v28 = vrot.slane %v10001_v25, %v12729_v13  ;;  %v11949_v33 = vpack.i.b16 %v15737_v11, %v9349_v41  ;;  %v11950_v12 = vpack.i.b16 %v9260_v37, %v9351_v16  ;;  %12384 = vmatpush3.bf16.msra.mxu0 %v12590_v49  ;;  %v12596_v49 = vld [vmem:[%s16200_s5 + $0x40] sm:$0xff]  }
 0x3ac   : > { %9993 = vrot.lane.b32.xlu1 %v15791_v57, %s12630_s19  ;;  %v9751_v1 = vcombine.low %v9743_v40, %v9750_v34  ;;  %v10016_v50 = vrot.slane %v10002_v7, %v12729_v13  ;;  %v11951_v8 = vpack.i.b16 %v9268_v54, %v9353_v27  ;;  %v11952_v4 = vpack.i.b16 %v9270_v61, %v9355_v53 }
 0x3ad   : > { %v9361_v51 = vunpack.i.h.s16 %v15614_v63  ;;  %v9959_v11 = vcombine.low %v11949_v33, %v11950_v12  ;;  %v9363_v37 = vunpack.i.h.s16 %v15618_v38  ;;  %v9365_v54 = vunpack.i.h.s16 %v15631_v9  ;;  %12385 = vmatprep.subr.bf16.mxu0 %v12592_v35  ;;  %12426 = vmatpush3.bf16.msra.mxu1 %v12595_v5  ;;  %v15881_v35 = vld [vmem:[%s16200_s5 + $0x118] sm:$0xff]  }
 0x3ae   : > { %v15817_v24 = vrot.slane %v9751_v1, %v12729_v13  ;;  %v10017_v56 = vcombine.low %v10009_v28, %v10016_v50  ;;  %v9960_v59 = vcombine.low %v11951_v8, %v9355_v53  ;;  %v10027_v32 = vcombine.low %v11950_v12, %v11951_v8 }
 0x3af   : > { %v10028_v30 = vcombine.low %v11952_v4, %v9357_v26  ;;  %v9967_v20 = vrot.slane %v9959_v11, %v12729_v13  ;;  %v11953_v40 = vpack.i.b16 %v15614_v63, %v9359_v52  ;;  %v11954_v29 = vpack.i.b16 %v15618_v38, %v9361_v51  ;;  %12386 = vmatpush3.bf16.msra.mxu0 %v12594_v22  ;;  %v12597_v52 = vld [vmem:[%s16200_s5 + $0xc0] sm:$0xff]  }
 0x3b0   : > { %9771 = vrot.lane.b32.xlu0 %v15817_v24, %s12630_s19  ;;  %v15833_v61 = vrot.slane %v10017_v56, %v12729_v13  ;;  %v9974_v46 = vrot.slane %v9960_v59, %v12729_v13  ;;  %v10035_v25 = vrot.slane %v10027_v32, %v12729_v13  ;;  %v11955_v44 = vpack.i.b16 %v15631_v9, %v9363_v37  ;;  %v12599_v26 = vld [vmem:[%s16200_s5 + $0x80] sm:$0xff]  }
 0x3b1   : > { %v10042_v60 = vrot.slane %v10028_v30, %v12729_v13  ;;  %v9364_v34 = vunpack.i.l.s16 %v15631_v9  ;;  %v10097_v41 = vcombine.low %v11953_v40, %v11954_v29  ;;  %v10069_v16 = vcombine.low %v15600_v21, %v15614_v63  ;;  %v12598_v9 = vld [vmem:[%s16200_s5] sm:$0xff]   ;;  %12387 = vmatprep.subr.bf16.mxu0 %v12596_v49  ;;  %12427 = vmatprep.subr.bf16.mxu1 %v12597_v52 }
 0x3b2   : > { %10121 = vrot.lane.b32.xlu1 %v15833_v61, %s12630_s19  ;;  %v9975_v47 = vcombine.low %v9967_v20, %v9974_v46  ;;  %v10098_v27 = vcombine.low %v11955_v44, %v9365_v54  ;;  %12428 = vmatpush3.bf16.msra.mxu1 %v12599_v26  ;;  %v9418_v4 = vrot.slane %v15463_v42, %v12729_v13 }
 0x3b3   : > { %v10043_v7 = vcombine.low %v10035_v25, %v10042_v60  ;;  %v10070_v1 = vcombine.low %v15618_v38, %v9364_v34  ;;  %v10105_v63 = vrot.slane %v10097_v41, %v12729_v13  ;;  %v10077_v28 = vrot.slane %v10069_v16, %v12729_v13  ;;  %12388 = vmatpush3.bf16.msra.mxu0 %v12598_v9 }
 0x3b4   : > { %v15859_v53 = vrot.slane %v9975_v47, %v12729_v13  ;;  %v10112_v6 = vrot.slane %v10098_v27, %v12729_v13  ;;  %12461 = vmatprep.subr.bf16.mxu0 %v15881_v35  ;;  %12477 = vmatprep.subr.bf16.mxu1 %v15881_v35  ;;  %v9810_v51 = vrot.slane %v15465_v43, %v12729_v13 }
 0x3b5   : > { %v15862_v21 = vrot.slane %v10043_v7, %v12729_v13  ;;  %v10084_v38 = vrot.slane %v10070_v1, %v12729_v13  ;;  %v10265_v25 = vrot.slane %v15535_v2, %v12729_v13 }
 0x3b6   : > { %9995 = vrot.lane.b32.xlu0 %v15859_v53, %s12630_s19  ;;  %v10113_v50 = vcombine.low %v10105_v63, %v10112_v6 }
 0x3b7   : > { %10063 = vrot.lane.b32.xlu1 %v15862_v21, %s12630_s19  ;;  %v15875_v33 = vcombine.low %v10077_v28, %v10084_v38  ;;  %v10268_v16 = vcombine.high %v10265_v25, %v10265_v25 }
 0x3b8   : > { %v10120_v12 = vrot.slane %v10113_v50, %v12729_v13 }
 0x3ba   : > { %10123 = vrot.lane.b32.xlu0 %v10120_v12, %s12630_s19 }
 0x3dc   : > { %v9760_v8 = vpop.permute.xlu0 %9759 }
 0x3dd   : > { %v10153_v56 = vsel %vm382_vm0, %v9418_v4, %v9760_v8  ;;  %v15925_v8 = vrot.slane %v10265_v25, %v12729_v13 }
 0x3e0   : > { %v9984_v23 = vpop.permute.xlu0 %9983 }
 0x3e1   : > { %v10174_v11 = vsel %vm382_vm0, %v9810_v51, %v9984_v23 }
 0x3e2   : > { %v10243_v37 = vcombine.low %v10153_v56, %v10174_v11 }
 0x3eb   : > { %v10052_v22 = vpop.permute.xlu1 %10051 }
 0x3ec   : > { %v9762_v32 = vpop.permute.xlu0 %9761  ;;  %v10195_v20 = vsel %vm382_vm0, %v15524_v10, %v10052_v22  ;;  %v10251_v10 = vrot.slane %v10243_v37, %v12729_v13 }
 0x3ed   : > { %v10156_v60 = vsel %vm382_vm0, %v15461_v17, %v9762_v32  ;;  %v10439_v32 = vrot.slane %v15761_v62, %v12729_v13 }
 0x3ef   : > { %v10054_v59 = vpop.permute.xlu1 %10053 }
 0x3f0   : > { %v10198_v47 = vsel %vm382_vm0, %v15606_v18, %v10054_v59  ;;  %v10381_v59 = vrot.slane %v15715_v55, %v12729_v13 }
 0x3f1   : > { %v9986_v42 = vpop.permute.xlu0 %9985 }
 0x3f2   : > { %v10177_v43 = vsel %vm382_vm0, %v15520_v39, %v9986_v42 }
 0x3f3   : > { %v10301_v44 = vcombine.low %v10156_v60, %v10177_v43 }
 0x3f5   : > { %v10309_v17 = vrot.slane %v10301_v44, %v12729_v13 }
 0x3fc   : > { %v9764_v30 = vpop.permute.xlu1 %9763 }
 0x3fd   : > { %v10159_v5 = vsel %vm382_vm0, %v15547_v45, %v9764_v30  ;;  %v10323_v45 = vrot.slane %v15670_v0, %v12729_v13 }
 0x3fe   : > { %v10244_v54 = vcombine.low %v10195_v20, %v10159_v5 }
 0x3ff   : > { %v10326_v27 = vcombine.high %v10323_v45, %v10323_v45  ;;  %v10347_v6 = vrot.slane %v10323_v45, %v12729_v13 }
 0x400   : > { %v10258_v46 = vrot.slane %v10244_v54, %v12729_v13 }
 0x401   : > { %v10354_v28 = vrot.slane %v10326_v27, %v12729_v13 }
 0x402   : > { %v9988_v40 = vpop.permute.xlu1 %9987  ;;  %v10267_v7 = vcombine.high %v10251_v10, %v10258_v46  ;;  %v10266_v9 = vcombine.low %v10251_v10, %v10258_v46 }
 0x403   : > { %v10180_v63 = vsel %vm382_vm0, %v15535_v2, %v9988_v40  ;;  %v10150_v2 = vrot.slane %v15673_v58, %v12729_v13  ;;  %v10497_v40 = vrot.slane %v15777_v31, %v12729_v13 }
 0x404   : > { %v15913_v1 = vrot.slane %v10267_v7, %v12729_v13  ;;  %v10275_v4 = vrot.slane %v10266_v9, %v12729_v13  ;;  %v10359_v51 = vcombine.low %v10159_v5, %v10180_v63  ;;  %v10384_v7 = vcombine.high %v10381_v59, %v10381_v59 }
 0x406   : > { %v10056_v29 = vpop.permute.xlu0 %10055  ;;  %v10298_v43 = vcombine.high %v10275_v4, %v15925_v8  ;;  %v10367_v46 = vrot.slane %v10359_v51, %v12729_v13  ;;  %v11969_v27 = vcombine.low %v10275_v4, %v15913_v1  ;;  %v15987_v51 = vrot.slane %v10497_v40, %v12729_v13 }
 0x407   : > { %v9766_v34 = vpop.permute.xlu1 %9765  ;;  %v10201_v5 = vsel %vm382_vm0, %v15676_v3, %v10056_v29 }
 0x408   : > { %v10162_v39 = vsel %vm382_vm0, %v15644_v14, %v9766_v34  ;;  %v15918_v14 = vrot.slane %v10268_v16, %v12729_v13  ;;  %v10442_v16 = vcombine.high %v10439_v32, %v10439_v32 }
 0x409   : > { %v10302_v41 = vcombine.low %v10198_v47, %v10162_v39  ;;  %v15964_v47 = vrot.slane %v10150_v2, %v12729_v13 }
 0x40a   : > { %v9990_v52 = vpop.permute.xlu0 %9989  ;;  %v10300_v23 = vcombine.high %v15913_v1, %v15918_v14  ;;  %v15982_v1 = vrot.slane %v10384_v7, %v12729_v13  ;;  %v10470_v4 = vrot.slane %v10442_v16, %v12729_v13 }
 0x40b   : > { %v10316_v49 = vrot.slane %v10302_v41, %v12729_v13  ;;  %v10183_v30 = vsel %vm382_vm0, %v15670_v0, %v9990_v52  ;;  %v10500_v52 = vcombine.high %v10497_v40, %v10497_v40 }
 0x40d   : > { %v10324_v18 = vcombine.low %v10309_v17, %v10316_v49  ;;  %v10325_v26 = vcombine.high %v10309_v17, %v10316_v49  ;;  %v10058_v12 = vpop.permute.xlu1 %10057 }
 0x40e   : > { %v10204_v3 = vsel %vm382_vm0, %v15733_v48, %v10058_v12  ;;  %v15968_v48 = vrot.slane %v10381_v59, %v12729_v13 }
 0x40f   : > { %v10333_v38 = vrot.slane %v10324_v18, %v12729_v13  ;;  %v10340_v50 = vrot.slane %v10325_v26, %v12729_v13 }
 0x411   : > { %v10355_v56 = vcombine.low %v10333_v38, %v10347_v6  ;;  %v10356_v11 = vcombine.high %v10333_v38, %v10347_v6  ;;  %v10357_v37 = vcombine.low %v10340_v50, %v10354_v28  ;;  %v10358_v41 = vcombine.high %v10340_v50, %v10354_v28 }
 0x412   : > { %v9768_v22 = vpop.permute.xlu0 %9767  ;;  %v10463_v50 = vrot.slane %v10439_v32, %v12729_v13 }
 0x413   : > { %v15940_v58 = vsel %vm382_vm0, %v15697_v36, %v9768_v22  ;;  %v10657_v20 = vunpack.i.h.s16 %v10355_v56  ;;  %v10659_v42 = vunpack.i.h.s16 %v10357_v37  ;;  %v15944_v54 = vpack.i.b16 %v10355_v56, %v10300_v23 }
 0x414   : > { %v10360_v0 = vcombine.low %v10201_v5, %v15940_v58  ;;  %v10661_v25 = vunpack.i.h.s16 %v10356_v11  ;;  %v10417_v36 = vcombine.low %v10162_v39, %v10183_v30  ;;  %v10816_v56 = vrot.slane %v11969_v27, %v12729_v13 }
 0x415   : > { %v15951_v60 = vpack.i.b16 %v10357_v37, %v10657_v20  ;;  %v9770_v29 = vpop.permute.xlu1 %9769  ;;  %v15955_v45 = vpack.i.b16 %v10356_v11, %v10659_v42  ;;  %v10804_v34 = vcombine.low %v10298_v43, %v15944_v54  ;;  %v15993_v11 = vrot.slane %v10500_v52, %v12729_v13 }
 0x416   : > { %v10374_v10 = vrot.slane %v10360_v0, %v12729_v13  ;;  %v15960_v44 = vsel %vm382_vm0, %v15770_v15, %v9770_v29  ;;  %v15971_v15 = vpack.i.b16 %v10358_v41, %v10661_v25  ;;  %v10425_v9 = vrot.slane %v10417_v36, %v12729_v13 }
 0x417   : > { %v10418_v39 = vcombine.low %v10204_v3, %v15960_v44  ;;  %v10806_v28 = vcombine.low %v15951_v60, %v15955_v45  ;;  %v10830_v38 = vrot.slane %v10804_v34, %v12729_v13  ;;  %v16001_v30 = vrot.slane %v15862_v21, %v12729_v13 }
 0x418   : > { %v10382_v17 = vcombine.low %v10367_v46, %v10374_v10  ;;  %v10060_v49 = vpop.permute.xlu0 %10059  ;;  %v10383_v18 = vcombine.high %v10367_v46, %v10374_v10 }
 0x419   : > { %v10432_v63 = vrot.slane %v10418_v39, %v12729_v13  ;;  %v10844_v20 = vrot.slane %v10806_v28, %v12729_v13  ;;  %v10867_v42 = vcombine.high %v10816_v56, %v10830_v38  ;;  %v10207_v36 = vsel %vm382_vm0, %v15753_v19, %v10060_v49 }
 0x41a   : > { %v15976_v26 = vrot.slane %v10382_v17, %v12729_v13  ;;  %v9992_v6 = vpop.permute.xlu1 %9991  ;;  %v16004_v5 = vrot.slane %v10383_v18, %v12729_v13  ;;  %v10866_v3 = vcombine.low %v10816_v56, %v10830_v38 }
 0x41b   : > { %v10440_v12 = vcombine.low %v10425_v9, %v10432_v63  ;;  %v10441_v2 = vcombine.high %v10425_v9, %v10432_v63  ;;  %v10186_v23 = vsel %vm382_vm0, %v15715_v55, %v9992_v6  ;;  %v10892_v52 = vrot.slane %v10867_v42, %v12729_v13 }
 0x41c   : > { %v10062_v59 = vpop.permute.xlu0 %10061  ;;  %v11972_v32 = vcombine.low %v15971_v15, %v15976_v26  ;;  %v10475_v0 = vcombine.low %v15940_v58, %v10186_v23  ;;  %v10414_v25 = vcombine.high %v15976_v26, %v15968_v48  ;;  %v10416_v41 = vcombine.high %v16004_v5, %v15982_v1 }
 0x41d   : > { %v10449_v37 = vrot.slane %v10440_v12, %v12729_v13  ;;  %v10456_v22 = vrot.slane %v10441_v2, %v12729_v13  ;;  %v10210_v58 = vsel %vm382_vm0, %v15817_v24, %v10062_v59 }
 0x41e   : > { %v9994_v55 = vpop.permute.xlu1 %9993  ;;  %v10858_v21 = vrot.slane %v11972_v32, %v12729_v13  ;;  %v10483_v19 = vrot.slane %v10475_v0, %v12729_v13  ;;  %v11973_v42 = vcombine.low %v16004_v5, %v10414_v25  ;;  %v16060_v25 = vrot.slane %v15964_v47, %v12729_v13 }
 0x41f   : > { %v10471_v40 = vcombine.low %v10449_v37, %v10463_v50  ;;  %v10472_v43 = vcombine.high %v10449_v37, %v10463_v50  ;;  %v10473_v46 = vcombine.low %v10456_v22, %v10470_v4  ;;  %v10189_v7 = vsel %vm382_vm0, %v15761_v62, %v9994_v55  ;;  %v12601_v55 = vld [vmem:[%s16200_s5 + $0x110] sm:$0xff]  }
 0x420   : > { %v10869_v16 = vcombine.low %v10844_v20, %v10858_v21  ;;  %v10870_v27 = vcombine.high %v10844_v20, %v10858_v21  ;;  %v10474_v17 = vcombine.high %v10456_v22, %v10470_v4  ;;  %v10533_v62 = vcombine.low %v15960_v44, %v10189_v7 }
 0x421   : > { %v10671_v29 = vunpack.i.h.s16 %v10471_v40  ;;  %v10673_v10 = vunpack.i.h.s16 %v10473_v46  ;;  %v10675_v34 = vunpack.i.h.s16 %v10472_v43  ;;  %v10558_v4 = vcombine.high %v16001_v30, %v16001_v30 }
 0x422   : > { %v9772_v39 = vpop.permute.xlu0 %9771  ;;  %v10913_v63 = vrot.slane %v10870_v27, %v12729_v13  ;;  %v10899_v24 = vrot.slane %v10869_v16, %v12729_v13  ;;  %v16041_v23 = vpack.i.b16 %v10471_v40, %v10416_v41 }
 0x423   : > { %v16022_v49 = vsel %vm382_vm0, %v15791_v57, %v9772_v39  ;;  %v16029_v18 = vpack.i.b16 %v10473_v46, %v10671_v29  ;;  %v16031_v6 = vpack.i.b16 %v10472_v43, %v10673_v10  ;;  %v16033_v28 = vpack.i.b16 %v10474_v17, %v10675_v34  ;;  %v12602_v39 = vld [vmem:[%s16200_s5 + $0x108] sm:$0xff]  }
 0x424   : > { %v10476_v9 = vcombine.low %v10207_v36, %v16022_v49  ;;  %v10122_v38 = vpop.permute.xlu1 %10121  ;;  %v10878_v57 = vrot.slane %v10866_v3, %v12729_v13  ;;  %v10917_v12 = vcombine.low %v10892_v52, %v10913_v63  ;;  %v10918_v2 = vcombine.high %v10892_v52, %v10913_v63 }
 0x425   : > { %v10216_v44 = vsel %vm382_vm0, %v15859_v53, %v10122_v38  ;;  %v10541_v53 = vrot.slane %v10533_v62, %v12729_v13  ;;  %v10921_v40 = vcombine.low %v16041_v23, %v16029_v18  ;;  %v10923_v36 = vcombine.low %v16031_v6, %v16033_v28 }
 0x426   : > { %v10490_v50 = vrot.slane %v10476_v9, %v12729_v13  ;;  %v10534_v56 = vcombine.low %v10210_v58, %v10216_v44  ;;  %v10914_v37 = vcombine.low %v10878_v57, %v10899_v24  ;;  %11468 = vmatprep.mubr.bf16.mxu0 %v10917_v12  ;;  %11532 = vmatprep.mubr.bf16.mxu1 %v10918_v2  ;;  %v12603_v44 = vld [vmem:[%s16200_s5 + $0x100] sm:$0xff]  }
 0x427   : > { %v10915_v32 = vcombine.high %v10878_v57, %v10899_v24  ;;  %v10616_v10 = vcombine.high %v15964_v47, %v15964_v47  ;;  %v10579_v34 = vrot.slane %v16001_v30, %v12729_v13  ;;  %v10092_v58 = vrot.slane %v15875_v33, %v12729_v13 }
 0x428   : > { %v10498_v22 = vcombine.low %v10483_v19, %v10490_v50  ;;  %v10499_v59 = vcombine.high %v10483_v19, %v10490_v50  ;;  %v10548_v20 = vrot.slane %v10534_v56, %v12729_v13  ;;  %11469 = vmatmul.mubr.bf16.vlgmr.msra.gmra.mxu0 %v10914_v37  ;;  %v9996_v0 = vpop.permute.xlu0 %9995  ;;  %v10947_v30 = vrot.slane %v10921_v40, %v12729_v13 }
 0x429   : > { %11533 = vmatmul.mubr.bf16.vlgmr.msra.gmra.mxu1 %v10915_v32  ;;  %12462 = vmatpush3.bf16.msra.mxu0 %v15881_v35  ;;  %v10064_v29 = vpop.permute.xlu1 %10063  ;;  %v10192_v41 = vsel %vm382_vm0, %v15777_v31, %v9996_v0  ;;  %v10933_v17 = vrot.slane %v11973_v42, %v12729_v13  ;;  %v10961_v33 = vrot.slane %v10923_v36, %v12729_v13 }
 0x42a   : > { %v16052_v43 = vrot.slane %v10498_v22, %v12729_v13  ;;  %v10514_v46 = vrot.slane %v10499_v59, %v12729_v13  ;;  %v10556_v21 = vcombine.low %v10541_v53, %v10548_v20  ;;  %v10557_v3 = vcombine.high %v10541_v53, %v10548_v20  ;;  %12481 = vmatpush3.bf16.msra.mxu1 %v15881_v35 }
 0x42b   : > { %12463 = vmatprep.subr.bf16.mxu0 %v12601_v55  ;;  %v10586_v35 = vrot.slane %v10558_v4, %v12729_v13  ;;  %12478 = vmatprep.subr.bf16.mxu1 %v12601_v55  ;;  %v10213_v31 = vsel %vm382_vm0, %v15833_v61, %v10064_v29  ;;  %v10591_v63 = vcombine.low %v16022_v49, %v10192_v41 }
 0x42c   : > { %v11975_v7 = vcombine.low %v16052_v43, %v10514_v46  ;;  %v10565_v16 = vrot.slane %v10556_v21, %v12729_v13  ;;  %v10572_v27 = vrot.slane %v10557_v3, %v12729_v13  ;;  %v10124_v24 = vpop.permute.xlu0 %10123  ;;  %v10532_v38 = vcombine.high %v10514_v46, %v15993_v11 }
 0x42d   : > { %12464 = vmatpush3.bf16.msra.mxu0 %v12601_v55  ;;  %v10219_v57 = vsel %vm382_vm0, %v10092_v58, %v10124_v24  ;;  %v10984_v50 = vcombine.high %v10933_v17, %v10947_v30  ;;  %v10983_v56 = vcombine.low %v10933_v17, %v10947_v30  ;;  %v10599_v20 = vrot.slane %v10591_v63, %v12729_v13 }
 0x42e   : > { %v10975_v19 = vrot.slane %v11975_v7, %v12729_v13  ;;  %v10587_v52 = vcombine.low %v10565_v16, %v10579_v34  ;;  %v10588_v62 = vcombine.high %v10565_v16, %v10579_v34  ;;  %v10589_v9 = vcombine.low %v10572_v27, %v10586_v35  ;;  %12482 = vmatpush3.bf16.msra.mxu1 %v12601_v55 }
 0x42f   : > { %12465 = vmatprep.subr.bf16.mxu0 %v12602_v39  ;;  %12479 = vmatprep.subr.bf16.mxu1 %v12602_v39  ;;  %v10592_v37 = vcombine.low %v10213_v31, %v10219_v57  ;;  %v11009_v49 = vrot.slane %v10984_v50, %v12729_v13  ;;  %v10590_v42 = vcombine.high %v10572_v27, %v10586_v35 }
 0x430   : > { %v10987_v61 = vcombine.high %v10961_v33, %v10975_v19  ;;  %v10685_v12 = vunpack.i.h.s16 %v10587_v52  ;;  %v10687_v2 = vunpack.i.h.s16 %v10589_v9  ;;  %v10689_v4 = vunpack.i.h.s16 %v10588_v62 }
 0x431   : > { %v10986_v59 = vcombine.low %v10961_v33, %v10975_v19  ;;  %12466 = vmatpush3.bf16.msra.mxu0 %v12602_v39  ;;  %v11965_v32 = vpack.i.b16 %v10587_v52, %v10532_v38  ;;  %v10606_v40 = vrot.slane %v10592_v37, %v12729_v13  ;;  %v10530_v36 = vcombine.high %v16052_v43, %v15987_v51 }
 0x432   : > { %v11030_v22 = vrot.slane %v10987_v61, %v12729_v13  ;;  %v11966_v55 = vpack.i.b16 %v10589_v9, %v10685_v12  ;;  %v11967_v53 = vpack.i.b16 %v10588_v62, %v10687_v2  ;;  %12483 = vmatpush3.bf16.msra.mxu1 %v12602_v39  ;;  %12467 = vmatprep.subr.bf16.mxu0 %v12603_v44 }
 0x433   : > { %v10995_v21 = vrot.slane %v10983_v56, %v12729_v13  ;;  %v11016_v3 = vrot.slane %v10986_v59, %v12729_v13  ;;  %12480 = vmatprep.subr.bf16.mxu1 %v12603_v44  ;;  %v11968_v34 = vpack.i.b16 %v10590_v42, %v10689_v4  ;;  %v10614_v7 = vcombine.low %v10599_v20, %v10606_v40 }
 0x434   : > { %v11034_v46 = vcombine.low %v11009_v49, %v11030_v22  ;;  %v11035_v0 = vcombine.high %v11009_v49, %v11030_v22  ;;  %v11038_v29 = vcombine.low %v11966_v55, %v11967_v53  ;;  %v10615_v41 = vcombine.high %v10599_v20, %v10606_v40 }
 0x435   : > { %v11039_v58 = vcombine.high %v11966_v55, %v11967_v53  ;;  %v11031_v39 = vcombine.low %v10995_v21, %v11016_v3  ;;  %v11032_v35 = vcombine.high %v10995_v21, %v11016_v3  ;;  %v11036_v16 = vcombine.low %v10530_v36, %v11965_v32  ;;  %12468 = vmatpush3.bf16.msra.mxu0 %v12603_v44 }
 0x436   : > { %11476 = vmatprep.mubr.bf16.mxu0 %v11034_v46  ;;  %11540 = vmatprep.mubr.bf16.mxu1 %v11035_v0  ;;  %v10413_v27 = vcombine.low %v15976_v26, %v15968_v48  ;;  %v10623_v43 = vrot.slane %v10614_v7, %v12729_v13  ;;  %v10630_v30 = vrot.slane %v10615_v41, %v12729_v13 }
 0x437   : > { %v10644_v31 = vrot.slane %v10616_v10, %v12729_v13  ;;  %12484 = vmatpush3.bf16.msra.mxu1 %v12603_v44  ;;  %v11977_v17 = vcombine.high %v15987_v51, %v11965_v32  ;;  %11477 = vmatmul.mubr.bf16.gmra.mxu0 %v11031_v39  ;;  %v11064_v33 = vrot.slane %v11038_v29, %v12729_v13 }
 0x438   : > { %11541 = vmatmul.mubr.bf16.gmra.mxu1 %v11032_v35  ;;  %v10645_v19 = vcombine.low %v10623_v43, %v16060_v25  ;;  %v10646_v26 = vcombine.high %v10623_v43, %v16060_v25  ;;  %v11978_v52 = vcombine.low %v11968_v34, %v10623_v43  ;;  %v11971_v9 = vcombine.high %v15925_v8, %v15944_v54 }
 0x439   : > { %v10647_v62 = vcombine.low %v10630_v30, %v10644_v31  ;;  %v11050_v63 = vrot.slane %v11036_v16, %v12729_v13  ;;  %v10648_v47 = vcombine.high %v10630_v30, %v10644_v31  ;;  %v11071_v10 = vrot.slane %v11039_v58, %v12729_v13 }
 0x43a   : > { %v10809_v24 = vcombine.high %v15971_v15, %v10413_v27  ;;  %v11041_v38 = vcombine.high %v11968_v34, %v10645_v19  ;;  %v11979_v57 = vcombine.low %v10630_v30, %v10646_v26  ;;  %v11057_v2 = vrot.slane %v11977_v17, %v12729_v13 }
 0x43b   : > { %v11980_v50 = vcombine.high %v10647_v62, %v16060_v25  ;;  %v11101_v61 = vcombine.high %v11050_v63, %v11064_v33  ;;  %v11100_v44 = vcombine.low %v11050_v63, %v11064_v33  ;;  %v10697_v12 = vunpack.i.l.s16 %v10648_v47 }
 0x43c   : > { %v11078_v4 = vrot.slane %v11978_v52, %v12729_v13  ;;  %v11092_v54 = vrot.slane %v11979_v57, %v12729_v13  ;;  %v11085_v56 = vrot.slane %v11041_v38, %v12729_v13  ;;  %v10807_v15 = vcombine.high %v15951_v60, %v15955_v45 }
 0x43d   : > { %v11099_v37 = vrot.slane %v11980_v50, %v12729_v13  ;;  %v11160_v49 = vrot.slane %v10697_v12, %v12729_v13  ;;  %v11102_v22 = vcombine.low %v11057_v2, %v11071_v10  ;;  %v11970_v25 = vcombine.low %v15925_v8, %v15918_v14 }
 0x43e   : > { %v11104_v59 = vcombine.high %v11078_v4, %v11092_v54  ;;  %v11103_v32 = vcombine.low %v11078_v4, %v11092_v54  ;;  %v11126_v53 = vrot.slane %v11101_v61, %v12729_v13  ;;  %v10837_v42 = vrot.slane %v11971_v9, %v12729_v13 }
 0x43f   : > { %v11105_v55 = vcombine.low %v11085_v56, %v11099_v37  ;;  %v11168_v20 = vcombine.high %v11160_v49, %v11160_v49  ;;  %v10865_v40 = vrot.slane %v10809_v24, %v12729_v13  ;;  %v11112_v60 = vrot.slane %v11100_v44, %v12729_v13 }
 0x440   : > { %v11147_v46 = vrot.slane %v11104_v59, %v12729_v13  ;;  %v11133_v45 = vrot.slane %v11103_v32, %v12729_v13  ;;  %v10415_v14 = vcombine.low %v16004_v5, %v15982_v1  ;;  %v10851_v36 = vrot.slane %v10807_v15, %v12729_v13 }
 0x441   : > { %v11140_v0 = vrot.slane %v11105_v55, %v12729_v13  ;;  %v11189_v8 = vrot.slane %v11168_v20, %v12729_v13  ;;  %v11119_v21 = vrot.slane %v11102_v22, %v12729_v13  ;;  %v10922_v41 = vcombine.high %v16041_v23, %v16029_v18 }
 0x442   : > { %v11151_v3 = vcombine.low %v11126_v53, %v11147_v46  ;;  %v11152_v29 = vcombine.high %v11126_v53, %v11147_v46  ;;  %v11148_v34 = vcombine.low %v11112_v60, %v11133_v45  ;;  %v11149_v7 = vcombine.high %v11112_v60, %v11133_v45  ;;  %v11956_v45 = vld [vmem:[%s16201_s6] ss:$0 sm:$0xff] }
 0x443   : > { %v10924_v58 = vcombine.high %v16031_v6, %v16033_v28  ;;  %v11150_v39 = vcombine.low %v11119_v21, %v11140_v0  ;;  %v11191_v1 = vcombine.high %v11189_v8, %v11189_v8  ;;  %v10823_v5 = vrot.slane %v11970_v25, %v12729_v13 }
 0x444   : > { %11484 = vmatprep.mubr.bf16.mxu0 %v11151_v3  ;;  %11548 = vmatprep.mubr.bf16.mxu1 %v11152_v29  ;;  %v10871_v35 = vcombine.low %v10851_v36, %v10865_v40  ;;  %v11976_v16 = vcombine.low %v15987_v51, %v15993_v11  ;;  %v11974_v27 = vcombine.high %v10415_v14, %v15968_v48 }
 0x445   : > { %11485 = vmatmul.mubr.bf16.gmra.mxu0 %v11148_v34  ;;  %11549 = vmatmul.mubr.bf16.gmra.mxu1 %v11149_v7  ;;  %v10868_v18 = vcombine.low %v10823_v5, %v10837_v42  ;;  %v10954_v23 = vrot.slane %v10922_v41, %v12729_v13  ;;  %v10968_v6 = vrot.slane %v10924_v58, %v12729_v13 }
 0x446   : > { %11492 = vmatprep.mubr.bf16.mxu0 %v11189_v8  ;;  %11556 = vmatprep.mubr.bf16.mxu1 %v11191_v1  ;;  %v11175_v28 = vrot.slane %v11160_v49, %v12729_v13  ;;  %v10906_v43 = vrot.slane %v10871_v35, %v12729_v13  ;;  %v10982_v30 = vrot.slane %v11976_v16, %v12729_v13 }
 0x447   : > { %v10940_v31 = vrot.slane %v11974_v27, %v12729_v13  ;;  %v10885_v51 = vrot.slane %v10868_v18, %v12729_v13  ;;  %v11153_v17 = vcombine.high %v10697_v12, %v10697_v12 }
 0x448   : > { %v10988_v11 = vcombine.low %v10968_v6, %v10982_v30  ;;  %v11190_v33 = vcombine.high %v11175_v28, %v11175_v28 }
 0x449   : > { %v10985_v48 = vcombine.low %v10940_v31, %v10954_v23  ;;  %v10916_v19 = vcombine.low %v10885_v51, %v10906_v43  ;;  %v11167_v26 = vrot.slane %v11153_v17, %v12729_v13 }
 0x44a   : > { %v11023_v62 = vrot.slane %v10988_v11, %v12729_v13 }
 0x44b   : > { %v11002_v52 = vrot.slane %v10985_v48, %v12729_v13  ;;  %v11182_v9 = vrot.slane %v11167_v26, %v12729_v13 }
 0x44d   : > { %11493 = vmatmul.mubr.bf16.gmra.mxu0 %v11175_v28  ;;  %11557 = vmatmul.mubr.bf16.gmra.mxu1 %v11190_v33  ;;  %v11033_v63 = vcombine.low %v11002_v52, %v11023_v62 }
 0x44e   : > { %12469 = vmatprep.mubr.msk.bf16.mxu0 %vm382_vm0, %v10916_v19  ;;  %12473 = vmatprep.mubr.msk.bf16.mxu1 %vm382_vm0, %v11150_v39 }
 0x455   : > { %12470 = vmatmul.mubr.msk.bf16.vlgmr.msra.gmra.mxu0 %vm382_vm0, %v11033_v63  ;;  %12474 = vmatmul.mubr.msk.bf16.vlgmr.msra.gmra.mxu1 %vm382_vm0, %v11182_v9 }
 0x4e8   : > { %v12389_v47 = vpop.f32.mrf.mxu0 }
 0x4e9   : > { %v12429_v10 = vpop.f32.mrf.mxu1 }
 0x4ea   : > { %v12390_v24 = vpop.f32.mrf.mxu0 }
 0x4eb   : > { %v12430_v38 = vpop.f32.mrf.mxu1  ;;  %v12391_v40 = vadd.f32 %v12390_v24, %v12389_v47 }
 0x4ec   : > { %v12392_v57 = vpop.f32.mrf.mxu0  ;;  %v12431_v18 = vadd.f32 %v12430_v38, %v12429_v10 }
 0x4ed   : > { %v12432_v50 = vpop.f32.mrf.mxu1  ;;  %v11471_v3 = vadd.f32 %v12391_v40, %v11956_v45 }
 0x4ee   : > { %v12393_v61 = vpop.f32.mrf.mxu0 }
 0x4ef   : > { %v12433_v44 = vpop.f32.mrf.mxu1  ;;  %v12394_v29 = vadd.f32 %v12393_v61, %v12392_v57  ;;  %v11535_v17 = vadd.f32 %v12431_v18, %v11471_v3  ;;  %v11674_v61 = vld [vmem:[%s16168_s23 + $0x18] sm:$0x1] }
 0x4f0   : > { %v12434_v19 = vadd.f32 %v12433_v44, %v12432_v50 }
 0x4f1   : > { %v11474_v43 = vadd.f32 %v12394_v29, %v11956_v45 }
 0x4f7   : > { %v12395_v12 = vpop.f32.mrf.mxu0 }
 0x4f8   : > { %v12435_v2 = vpop.f32.mrf.mxu1 }
 0x4f9   : > { %v12396_v4 = vpop.f32.mrf.mxu0 }
 0x4fa   : > { %v12436_v54 = vpop.f32.mrf.mxu1  ;;  %v12397_v42 = vadd.f32 %v12396_v4, %v12395_v12 }
 0x4fb   : > { %v12398_v56 = vpop.f32.mrf.mxu0  ;;  %v12437_v58 = vadd.f32 %v12436_v54, %v12435_v2  ;;  %v11538_v2 = vadd.f32 %v12434_v19, %v11474_v43 }
 0x4fc   : > { %v12438_v37 = vpop.f32.mrf.mxu1  ;;  %v11479_v36 = vadd.f32 %v12397_v42, %v11956_v45 }
 0x4fd   : > { %v12399_v13 = vpop.f32.mrf.mxu0 }
 0x4fe   : > { %v12439_v15 = vpop.f32.mrf.mxu1  ;;  %v12400_v34 = vadd.f32 %v12399_v13, %v12398_v56  ;;  %v11543_v6 = vadd.f32 %v12437_v58, %v11479_v36 }
 0x4ff   : > { %v12440_v26 = vadd.f32 %v12439_v15, %v12438_v37 }
 0x500   : > { %v11482_v30 = vadd.f32 %v12400_v34, %v11956_v45 }
 0x502   : > { %v11546_v12 = vadd.f32 %v12440_v26, %v11482_v30 }
 0x505   : > { %v12401_v49 = vpop.f32.mrf.mxu0  ;;  %v12441_v22 = vpop.f32.mrf.mxu1 }
 0x507   : > { %v12402_v25 = vpop.f32.mrf.mxu0  ;;  %v12442_v59 = vpop.f32.mrf.mxu1 }
 0x508   : > { %v12403_v0 = vadd.f32 %v12402_v25, %v12401_v49  ;;  %v12443_v23 = vadd.f32 %v12442_v59, %v12441_v22 }
 0x509   : > { %v12404_v32 = vpop.f32.mrf.mxu0  ;;  %v12444_v55 = vpop.f32.mrf.mxu1 }
 0x50a   : > { %v11487_v39 = vadd.f32 %v12403_v0, %v11956_v45 }
 0x50b   : > { %v12405_v53 = vpop.f32.mrf.mxu0  ;;  %v12445_v20 = vpop.f32.mrf.mxu1 }
 0x50c   : > { %v12406_v35 = vadd.f32 %v12405_v53, %v12404_v32  ;;  %v11551_v33 = vadd.f32 %v12443_v23, %v11487_v39  ;;  %v12446_v38 = vadd.f32 %v12445_v20, %v12444_v55 }
 0x50d   : > { %v12407_v46 = vpop.f32.mrf.mxu0  ;;  %v12447_v60 = vpop.f32.mrf.mxu1 }
 0x50e   : > { %v11490_v52 = vadd.f32 %v12406_v35, %v11956_v45 }
 0x50f   : > { %v12408_v14 = vpop.f32.mrf.mxu0  ;;  %v12448_v8 = vpop.f32.mrf.mxu1 }
 0x510   : > { %v12409_v21 = vadd.f32 %v12408_v14, %v12407_v46  ;;  %v12449_v5 = vadd.f32 %v12448_v8, %v12447_v60  ;;  %v11554_v49 = vadd.f32 %v12446_v38, %v11490_v52 }
 0x511   : > { %v12410_v7 = vpop.f32.mrf.mxu0  ;;  %v12450_v41 = vpop.f32.mrf.mxu1 }
 0x512   : > { %v11495_v1 = vadd.f32 %v12409_v21, %v11956_v45 }
 0x513   : > { %v12411_v16 = vpop.f32.mrf.mxu0  ;;  %v12451_v27 = vpop.f32.mrf.mxu1 }
 0x514   : > { %v11559_v28 = vadd.f32 %v12449_v5, %v11495_v1 }
 0x515   : > { %v12471_v31 = vpop.f32.mrf.mxu0  ;;  %v12475_v51 = vpop.f32.mrf.mxu1 }
 0x516   : > { %v11607_v48 = vadd.f32 %v12471_v31, %v11543_v6  ;;  %v11623_v11 = vadd.f32 %v12475_v51, %v11559_v28 }
 0x517   : > { %v11598_v62 = vpop.f32.mrf.mxu0  ;;  %v11614_v9 = vpop.f32.mrf.mxu1 }
 0x518   : > { %v11630_v63 = vmax.f32 %v11607_v48, 0.0  ;;  %v11634_v47 = vmax.f32 %v11623_v11, 0.0  ;;  %v11599_v10 = vadd.f32 %v11598_v62, %v11535_v17  ;;  %v11615_v24 = vadd.f32 %v11614_v9, %v11551_v33 }
 0x519   : > { %v12472_v50 = vpop.f32.mrf.mxu0  ;;  %v12476_v44 = vpop.f32.mrf.mxu1 }
 0x51a   : > { %v12032_v4 = vpack.c.bf16 %v11630_v63, %v11630_v63  ;;  %v12036_v54 = vpack.c.bf16 %v11634_v47, %v11634_v47  ;;  %v11628_v56 = vmax.f32 %v11599_v10, 0.0  ;;  %v11632_v37 = vmax.f32 %v11615_v24, 0.0 }
 0x51b   : > { %v11610_v13 = vadd.f32 %v12472_v50, %v11546_v12  ;;  %v11601_v15 = vpop.f32.mrf.mxu0  ;;  %v11617_v22 = vpop.f32.mrf.mxu1 }
 0x51c   : > { %11667 = vst.msk [vmem:[%s16168_s23 + $0x8] sm:$0xf] %vm11664_vm5, %v12032_v4  ;;  %v11675_v25 = vsel %vm16172_vm6, %v12036_v54, %v11674_v61  ;;  %v12030_v59 = vpack.c.bf16 %v11628_v56, %v11628_v56  ;;  %v12034_v32 = vpack.c.bf16 %v11632_v37, %v11632_v37  ;;  %v11602_v55 = vadd.f32 %v11601_v15, %v11538_v2 }
 0x51d   : > { %11676 = vst [vmem:[%s16168_s23 + $0x18] sm:$0x1] %v11675_v25  ;;  %v11631_v53 = vmax.f32 %v11610_v13, 0.0  ;;  %v11618_v20 = vadd.f32 %v11617_v22, %v11554_v49 }
 0x51e   : > { %11665 = vst.msk [vmem:[%s16168_s23] sm:$0xf] %vm11664_vm5, %v12030_v59  ;;  %11669 = vst.msk [vmem:[%s16168_s23 + $0x10] sm:$0xf] %vm11664_vm5, %v12034_v32  ;;  %v11629_v42 = vmax.f32 %v11602_v55, 0.0 }
 0x51f   : > { %v12033_v40 = vpack.c.bf16 %v11631_v53, %v11631_v53  ;;  %v11633_v46 = vmax.f32 %v11618_v20, 0.0 }
 0x520   : > { %v12031_v60 = vpack.c.bf16 %v11629_v42, %v11629_v42 }
 0x521   : > { %11668 = vst.msk [vmem:[%s16168_s23 + $0xc] sm:$0xf] %vm11664_vm5, %v12033_v40  ;;  %v12035_v45 = vpack.c.bf16 %v11633_v46, %v11633_v46 }
 0x522   : > { %11666 = vst.msk [vmem:[%s16168_s23 + $0x4] sm:$0xf] %vm11664_vm5, %v12031_v60 }
 0x523   : > { %11670 = vst.msk [vmem:[%s16168_s23 + $0x14] sm:$0xf] %vm11664_vm5, %v12035_v45 }
 0x524 PF: > { %s17_s24 = sadd.s32 1, %s12627_s24  }
 0x525   : > { %p14_p4 = scmp.ge.s32.totalorder %s17_s24, 4  }
 0x527   :  { %16 = sbr.rel (!%p14_p4) target bundleno = 1 (0x1), region = 78 }

</bundles_post_ra>
